<compile_context>
chip_gen: v6e
topology: v6e:2x2x1
jax: 0.10.0
libtpu: 0.0.40
codegen_flags: <defaults>
</compile_context>

<pallas_src>
import functools

import jax
import jax.numpy as jnp
from jax.experimental import pallas as pl
from jax.experimental.pallas import tpu as pltpu

CP = 128  # channel padding: full lane width -> lane-dense loads/stores, full-K MXU


def _round_up(x, m):
    return ((x + m - 1) // m) * m


# ------------------------------- Pallas kernel -------------------------------

def _resblock_kernel(*refs, P, Wp, EXT, has_proj):
    """Fused pre-activation residual block for one image of the batch.

    Activations live as [P, CP] row-major slabs (P = padded_H * padded_W). A
    3x3 conv is the sum over its 9 taps of `shifted_slab @ w_tap`, where each
    shift is a static row offset into a zero-haloed VMEM scratch.
    """
    if has_proj:
        (x_ref, m_ref, w1_ref, s1_ref, b1_ref, w2_ref, s2_ref, b2_ref,
         wsc_ref, o_ref, ext_ref, acc_ref) = refs
    else:
        (x_ref, m_ref, w1_ref, s1_ref, b1_ref, w2_ref, s2_ref, b2_ref,
         o_ref, ext_ref, acc_ref) = refs
        wsc_ref = None

    offsets = [(u - 1) * Wp + (v - 1) for u in range(3) for v in range(3)]
    mask = m_ref[...]          # [P, 1]: 1.0 on real pixels, 0.0 on the zero ring

    # Zero only the halo rows; the P interior rows are fully overwritten with
    # a1 / a2 before each conv, so they never need clearing.
    ext_ref[pl.ds(0, EXT), :] = jnp.zeros((EXT, CP), jnp.float32)
    ext_ref[pl.ds(EXT + P, EXT), :] = jnp.zeros((EXT, CP), jnp.float32)

    def conv3x3(w_ref):
        for t, off in enumerate(offsets):
            slab = ext_ref[pl.ds(EXT + off, P), :].astype(jnp.bfloat16)
            part = jnp.dot(slab, w_ref[t], preferred_element_type=jnp.float32)
            if t == 0:
                acc_ref[...] = part          # direct store: no zero-init RMW
            else:
                acc_ref[...] += part

    # --- BN1 -> ReLU1 (pre-activation), zero the padding ring, conv1 ---------
    a1 = jnp.maximum(x_ref[0] * s1_ref[...] + b1_ref[...], 0.0) * mask
    ext_ref[pl.ds(EXT, P), :] = a1
    conv3x3(w1_ref)

    # --- BN2 -> ReLU2, zero padding ring, conv2 -------------------------------
    a2 = jnp.maximum(acc_ref[...] * s2_ref[...] + b2_ref[...], 0.0) * mask
    ext_ref[pl.ds(EXT, P), :] = a2
    conv3x3(w2_ref)

    # --- shortcut (1x1 projection or identity) + residual add (no final ReLU)
    if has_proj:
        ident = jnp.dot(x_ref[0].astype(jnp.bfloat16), wsc_ref[...],
                        preferred_element_type=jnp.float32)
    else:
        ident = x_ref[0]
    o_ref[0] = acc_ref[...] + ident


# ------------------------------ wrapper / params -----------------------------

def _fold_bn(bn, eps=1e-5):
    scale = bn["gamma"] / jnp.sqrt(bn["var"] + eps)
    bias = bn["beta"] - bn["mean"] * scale
    return scale, bias


def _pad_lane(v):
    """[c] -> [1, CP] float32, zero-padded."""
    return jnp.pad(v.astype(jnp.float32), (0, CP - v.shape[0])).reshape(1, CP)


def _pad_w3x3(w):
    """[3, 3, cin, cout] -> [9, CP, CP] bfloat16, zero-padded."""
    _, _, cin, cout = w.shape
    w = w.reshape(9, cin, cout)
    w = jnp.pad(w, ((0, 0), (0, CP - cin), (0, CP - cout)))
    return w.astype(jnp.bfloat16)


def resnet_block_forward(params, x_nchw):
    """Fused Pallas forward of the pre-activation ResNetBlock. Input is NCHW."""
    N, cin, H, W = x_nchw.shape
    cout = params["conv2_w"].shape[-1]
    stride = params["stride"]
    # TODO(synk): strided conv1 / strided shortcut path not implemented in-kernel.
    assert stride == 1, "stride != 1 not supported by the fused kernel"
    assert cin <= CP and cout <= CP

    Hp = H + 2
    Wp = _round_up(W + 2, 8)      # extra right zero-pad keeps all slabs 8-aligned
    P = Hp * Wp
    EXT = _round_up(Wp + 1, 8)    # zero halo rows around the flattened slab

    # NCHW -> NHWC, spatial zero pad (1 top/left, rest to reach Hp/Wp), channel
    # zero pad to the 128-lane width, flatten spatial dims.
    x = jnp.transpose(x_nchw, (0, 2, 3, 1)).astype(jnp.float32)
    xp = jnp.pad(x, ((0, 0), (1, 1), (1, Wp - W - 1), (0, CP - cin)))
    xflat = xp.reshape(N, P, CP)

    # Interior mask: 1.0 on real pixels, 0.0 on the zero-padding ring (keeps the
    # conv's zero padding exact after the folded-BN bias is added).
    ii = jnp.arange(Hp)
    jj = jnp.arange(Wp)
    interior = ((ii >= 1) & (ii <= H))[:, None] & ((jj >= 1) & (jj <= W))[None, :]
    mask = interior.astype(jnp.float32).reshape(P, 1)

    s1, b1 = _fold_bn(params["bn1"])
    s2, b2 = _fold_bn(params["bn2"])
    w1 = _pad_w3x3(params["conv1_w"])
    w2 = _pad_w3x3(params["conv2_w"])
    has_proj = params["shortcut_w"] is not None

    def full(shape):
        return pl.BlockSpec(shape, lambda n, _s=len(shape): (0,) * _s)

    in_specs = [
        pl.BlockSpec((1, P, CP), lambda n: (n, 0, 0)),    # x (one image / step)
        full((P, 1)),                                     # interior mask
        full((9, CP, CP)), full((1, CP)), full((1, CP)),  # w1, s1, b1
        full((9, CP, CP)), full((1, CP)), full((1, CP)),  # w2, s2, b2
    ]
    args = [xflat, mask,
            w1, _pad_lane(s1), _pad_lane(b1),
            w2, _pad_lane(s2), _pad_lane(b2)]
    if has_proj:
        wsc = params["shortcut_w"].reshape(cin, cout)
        wsc = jnp.pad(wsc, ((0, CP - cin), (0, CP - cout))).astype(jnp.bfloat16)
        in_specs.append(full((CP, CP)))
        args.append(wsc)

    kernel = functools.partial(_resblock_kernel, P=P, Wp=Wp, EXT=EXT,
                               has_proj=has_proj)
    out = pl.pallas_call(
        kernel,
        out_shape=jax.ShapeDtypeStruct((N, P, CP), jnp.float32),
        grid_spec=pltpu.PrefetchScalarGridSpec(
            num_scalar_prefetch=0,
            grid=(N,),
            in_specs=in_specs,
            out_specs=pl.BlockSpec((1, P, CP), lambda n: (n, 0, 0)),
            scratch_shapes=[pltpu.VMEM((P + 2 * EXT, CP), jnp.float32),
                            pltpu.VMEM((P, CP), jnp.float32)]),
        compiler_params=pltpu.CompilerParams(
            dimension_semantics=("parallel",)),
    )(*args)

    out = out.reshape(N, Hp, Wp, CP)[:, 1:H + 1, 1:W + 1, :cout]
    return jnp.transpose(out, (0, 3, 1, 2))   # back to NCHW like PyTorch


def init_resnet_block_params(key, cin, cout, stride=1):
    ks = jax.random.split(key, 5)

    def bn(k, c):
        k1, k2, k3, k4 = jax.random.split(k, 4)
        return {"gamma": 1.0 + 0.1 * jax.random.normal(k1, (c,), jnp.float32),
                "beta": 0.1 * jax.random.normal(k2, (c,), jnp.float32),
                "mean": 0.05 * jax.random.normal(k3, (c,), jnp.float32),
                "var": 1.0 + 0.1 * jax.random.uniform(k4, (c,), jnp.float32)}

    def conv(k, kh, kw, ci, co):
        return (jax.random.normal(k, (kh, kw, ci, co), jnp.float32)
                / jnp.sqrt(kh * kw * ci))

    needs_proj = stride != 1 or cin != cout
    return {
        "stride": stride,
        "bn1": bn(ks[0], cin),
        "conv1_w": conv(ks[1], 3, 3, cin, cout),
        "bn2": bn(ks[2], cout),
        "conv2_w": conv(ks[3], 3, 3, cout, cout),
        "shortcut_w": conv(ks[4], 1, 1, cin, cout) if needs_proj else None,
    }


# ------------------------- pure-JAX reference (check) ------------------------

def _conv_nhwc(x, w, stride, padding):
    return jax.lax.conv_general_dilated(
        x, w, window_strides=(stride, stride), padding=padding,
        dimension_numbers=("NHWC", "HWIO", "NHWC"))


def resnet_block_reference(params, x_nchw):
    """Pure-JAX reference (weights rounded to bf16 to mirror the kernel)."""
    x = jnp.transpose(x_nchw, (0, 2, 3, 1)).astype(jnp.float32)
    s1, b1 = _fold_bn(params["bn1"])
    s2, b2 = _fold_bn(params["bn2"])
    bf = lambda w: w.astype(jnp.bfloat16).astype(jnp.float32)
    out = jnp.maximum(x * s1 + b1, 0.0)
    out = _conv_nhwc(out, bf(params["conv1_w"]), params["stride"], "SAME")
    out = jnp.maximum(out * s2 + b2, 0.0)
    out = _conv_nhwc(out, bf(params["conv2_w"]), 1, "SAME")
    if params["shortcut_w"] is not None:
        ident = _conv_nhwc(x, bf(params["shortcut_w"]), params["stride"], "VALID")
    else:
        ident = x
    return jnp.transpose(out + ident, (0, 3, 1, 2))


# ------------------------------------ main -----------------------------------

if __name__ == "__main__":
    key = jax.random.PRNGKey(0)
    kpa, kpb, kx = jax.random.split(key, 3)

    # Small shapes consistent with the module: p4m regular fields flattened to
    # channels (multiples of 8), 16x16 spatial, batch 2.
    N, Cin, H, W = 2, 8, 16, 16
    Cout = 16
    x = jax.random.normal(kx, (N, Cin, H, W), jnp.float32)

    # Block A: channel expansion -> exercises the 1x1 projection shortcut.
    params_a = init_resnet_block_params(kpa, Cin, Cout, stride=1)
    y_a = jax.block_until_ready(resnet_block_forward(params_a, x))
    assert y_a.shape == (N, Cout, H, W), y_a.shape
    ref_a = resnet_block_reference(params_a, x)
    assert bool(jnp.allclose(y_a, ref_a, rtol=5e-2, atol=5e-2)), \
        float(jnp.max(jnp.abs(y_a - ref_a)))

    # Block B: cin == cout, stride 1 -> exercises the identity shortcut.
    params_b = init_resnet_block_params(kpb, Cout, Cout, stride=1)
    y_b = jax.block_until_ready(resnet_block_forward(params_b, y_a))
    assert y_b.shape == (N, Cout, H, W), y_b.shape
    ref_b = resnet_block_reference(params_b, y_a)
    assert bool(jnp.allclose(y_b, ref_b, rtol=5e-2, atol=5e-2)), \
        float(jnp.max(jnp.abs(y_b - ref_b)))

    assert bool(jnp.all(jnp.isfinite(y_b)))
    print("KERNEL_OK")
</pallas_src>

<mosaic_0001>
module attributes {stable_mosaic.version = 11 : i64} {
  func.func @_resblock_kernel(%arg0: i32, %arg1: memref<1x432x128xf32, #tpu.memory_space<vmem>>, %arg2: memref<432x1xf32, #tpu.memory_space<vmem>>, %arg3: memref<9x128x128xbf16, #tpu.memory_space<vmem>>, %arg4: memref<1x128xf32, #tpu.memory_space<vmem>>, %arg5: memref<1x128xf32, #tpu.memory_space<vmem>>, %arg6: memref<9x128x128xbf16, #tpu.memory_space<vmem>>, %arg7: memref<1x128xf32, #tpu.memory_space<vmem>>, %arg8: memref<1x128xf32, #tpu.memory_space<vmem>>, %arg9: memref<128x128xbf16, #tpu.memory_space<vmem>>, %arg10: memref<1x432x128xf32, #tpu.memory_space<vmem>>, %arg11: memref<496x128xf32, #tpu.memory_space<vmem>>, %arg12: memref<432x128xf32, #tpu.memory_space<vmem>>) attributes {dimension_semantics = [#tpu.dimension_semantics<parallel>], iteration_bounds = array<i64: 2>, scalar_prefetch = 0 : i64, scratch_operands = 2 : i64, tpu.core_type = #tpu.core_type<tc>, window_params = [{transform_indices = @transform_0, window_bounds = array<i64: 1, 432, 128>}, {pipeline_mode = #tpu.pipeline_mode<synchronous>, transform_indices = @transform_1, window_bounds = array<i64: 432, 1>}, {pipeline_mode = #tpu.pipeline_mode<synchronous>, transform_indices = @transform_2, window_bounds = array<i64: 9, 128, 128>}, {pipeline_mode = #tpu.pipeline_mode<synchronous>, transform_indices = @transform_3, window_bounds = array<i64: 1, 128>}, {pipeline_mode = #tpu.pipeline_mode<synchronous>, transform_indices = @transform_4, window_bounds = array<i64: 1, 128>}, {pipeline_mode = #tpu.pipeline_mode<synchronous>, transform_indices = @transform_5, window_bounds = array<i64: 9, 128, 128>}, {pipeline_mode = #tpu.pipeline_mode<synchronous>, transform_indices = @transform_6, window_bounds = array<i64: 1, 128>}, {pipeline_mode = #tpu.pipeline_mode<synchronous>, transform_indices = @transform_7, window_bounds = array<i64: 1, 128>}, {pipeline_mode = #tpu.pipeline_mode<synchronous>, transform_indices = @transform_8, window_bounds = array<i64: 128, 128>}, {transform_indices = @transform_9, window_bounds = array<i64: 1, 432, 128>}]} {
    %c0 = arith.constant 0 : index
    %c0_0 = arith.constant 0 : index
    %0 = vector.load %arg2[%c0, %c0_0] : memref<432x1xf32, #tpu.memory_space<vmem>>, vector<432x1xf32>
    %cst = arith.constant 0.000000e+00 : f32
    %1 = vector.broadcast %cst : f32 to vector<32x128xf32>
    %c0_1 = arith.constant 0 : index
    %c0_2 = arith.constant 0 : index
    %2 = vector.load %arg11[%c0_1, %c0_2] : memref<496x128xf32, #tpu.memory_space<vmem>>, vector<32x128xf32>
    tpu.vector_store %arg11[%c0_1, %c0_2], %1 {strides = array<i32>} : memref<496x128xf32, #tpu.memory_space<vmem>>, vector<32x128xf32>,
    %cst_3 = arith.constant 0.000000e+00 : f32
    %3 = vector.broadcast %cst_3 : f32 to vector<32x128xf32>
    %c464 = arith.constant 464 : index
    %c0_4 = arith.constant 0 : index
    %4 = vector.load %arg11[%c464, %c0_4] : memref<496x128xf32, #tpu.memory_space<vmem>>, vector<32x128xf32>
    tpu.vector_store %arg11[%c464, %c0_4], %3 {strides = array<i32>} : memref<496x128xf32, #tpu.memory_space<vmem>>, vector<32x128xf32>,
    %c0_5 = arith.constant 0 : index
    %c0_6 = arith.constant 0 : index
    %c0_7 = arith.constant 0 : index
    %5 = vector.load %arg1[%c0_5, %c0_6, %c0_7] : memref<1x432x128xf32, #tpu.memory_space<vmem>>, vector<1x432x128xf32>
    %6 = vector.shape_cast %5 : vector<1x432x128xf32> to vector<432x128xf32>
    %c0_8 = arith.constant 0 : index
    %c0_9 = arith.constant 0 : index
    %7 = vector.load %arg4[%c0_8, %c0_9] : memref<1x128xf32, #tpu.memory_space<vmem>>, vector<1x128xf32>
    %8 = vector.broadcast %7 : vector<1x128xf32> to vector<432x128xf32>
    %9 = arith.mulf %6, %8 : vector<432x128xf32>
    %c0_10 = arith.constant 0 : index
    %c0_11 = arith.constant 0 : index
    %10 = vector.load %arg5[%c0_10, %c0_11] : memref<1x128xf32, #tpu.memory_space<vmem>>, vector<1x128xf32>
    %11 = vector.broadcast %10 : vector<1x128xf32> to vector<432x128xf32>
    %12 = arith.addf %9, %11 : vector<432x128xf32>
    %cst_12 = arith.constant 0.000000e+00 : f32
    %13 = vector.broadcast %cst_12 : f32 to vector<432x128xf32>
    %14 = arith.maximumf %12, %13 : vector<432x128xf32>
    %15 = vector.broadcast %0 : vector<432x1xf32> to vector<432x128xf32>
    %16 = arith.mulf %14, %15 : vector<432x128xf32>
    %c32 = arith.constant 32 : index
    %c0_13 = arith.constant 0 : index
    %17 = vector.load %arg11[%c32, %c0_13] : memref<496x128xf32, #tpu.memory_space<vmem>>, vector<432x128xf32>
    tpu.vector_store %arg11[%c32, %c0_13], %16 {strides = array<i32>} : memref<496x128xf32, #tpu.memory_space<vmem>>, vector<432x128xf32>,
    %c7 = arith.constant 7 : index
    %c0_14 = arith.constant 0 : index
    %18 = vector.load %arg11[%c7, %c0_14] : memref<496x128xf32, #tpu.memory_space<vmem>>, vector<432x128xf32>
    %19 = arith.truncf %18 : vector<432x128xf32> to vector<432x128xbf16>
    %c0_15 = arith.constant 0 : index
    %c0_16 = arith.constant 0 : index
    %c0_17 = arith.constant 0 : index
    %20 = vector.load %arg3[%c0_15, %c0_16, %c0_17] : memref<9x128x128xbf16, #tpu.memory_space<vmem>>, vector<1x128x128xbf16>
    %21 = vector.shape_cast %20 : vector<1x128x128xbf16> to vector<128x128xbf16>
    %cst_18 = arith.constant dense<0.000000e+00> : vector<432x128xf32>
    %22 = tpu.matmul %19, %21, %cst_18 {dimension_numbers = #tpu.dot_dimension_numbers<[1], [0], [0], [1], [0, 0, 1, 1], [], []>} : vector<432x128xbf16>, vector<128x128xbf16>, vector<432x128xf32> -> vector<432x128xf32>
    %c0_19 = arith.constant 0 : index
    %c0_20 = arith.constant 0 : index
    %23 = vector.load %arg12[%c0_19, %c0_20] : memref<432x128xf32, #tpu.memory_space<vmem>>, vector<432x128xf32>
    tpu.vector_store %arg12[%c0_19, %c0_20], %22 {strides = array<i32>} : memref<432x128xf32, #tpu.memory_space<vmem>>, vector<432x128xf32>,
    %c8 = arith.constant 8 : index
    %c0_21 = arith.constant 0 : index
    %24 = vector.load %arg11[%c8, %c0_21] : memref<496x128xf32, #tpu.memory_space<vmem>>, vector<432x128xf32>
    %25 = arith.truncf %24 : vector<432x128xf32> to vector<432x128xbf16>
    %c1 = arith.constant 1 : index
    %c0_22 = arith.constant 0 : index
    %c0_23 = arith.constant 0 : index
    %26 = vector.load %arg3[%c1, %c0_22, %c0_23] : memref<9x128x128xbf16, #tpu.memory_space<vmem>>, vector<1x128x128xbf16>
    %27 = vector.shape_cast %26 : vector<1x128x128xbf16> to vector<128x128xbf16>
    %cst_24 = arith.constant dense<0.000000e+00> : vector<432x128xf32>
    %28 = tpu.matmul %25, %27, %cst_24 {dimension_numbers = #tpu.dot_dimension_numbers<[1], [0], [0], [1], [0, 0, 1, 1], [], []>} : vector<432x128xbf16>, vector<128x128xbf16>, vector<432x128xf32> -> vector<432x128xf32>
    %c0_25 = arith.constant 0 : index
    %c0_26 = arith.constant 0 : index
    %29 = vector.load %arg12[%c0_25, %c0_26] : memref<432x128xf32, #tpu.memory_space<vmem>>, vector<432x128xf32>
    %30 = arith.addf %29, %28 : vector<432x128xf32>
    %c0_27 = arith.constant 0 : index
    %c0_28 = arith.constant 0 : index
    %31 = vector.load %arg12[%c0_27, %c0_28] : memref<432x128xf32, #tpu.memory_space<vmem>>, vector<432x128xf32>
    tpu.vector_store %arg12[%c0_27, %c0_28], %30 {strides = array<i32>} : memref<432x128xf32, #tpu.memory_space<vmem>>, vector<432x128xf32>,
    %c9 = arith.constant 9 : index
    %c0_29 = arith.constant 0 : index
    %32 = vector.load %arg11[%c9, %c0_29] : memref<496x128xf32, #tpu.memory_space<vmem>>, vector<432x128xf32>
    %33 = arith.truncf %32 : vector<432x128xf32> to vector<432x128xbf16>
    %c2 = arith.constant 2 : index
    %c0_30 = arith.constant 0 : index
    %c0_31 = arith.constant 0 : index
    %34 = vector.load %arg3[%c2, %c0_30, %c0_31] : memref<9x128x128xbf16, #tpu.memory_space<vmem>>, vector<1x128x128xbf16>
    %35 = vector.shape_cast %34 : vector<1x128x128xbf16> to vector<128x128xbf16>
    %cst_32 = arith.constant dense<0.000000e+00> : vector<432x128xf32>
    %36 = tpu.matmul %33, %35, %cst_32 {dimension_numbers = #tpu.dot_dimension_numbers<[1], [0], [0], [1], [0, 0, 1, 1], [], []>} : vector<432x128xbf16>, vector<128x128xbf16>, vector<432x128xf32> -> vector<432x128xf32>
    %c0_33 = arith.constant 0 : index
    %c0_34 = arith.constant 0 : index
    %37 = vector.load %arg12[%c0_33, %c0_34] : memref<432x128xf32, #tpu.memory_space<vmem>>, vector<432x128xf32>
    %38 = arith.addf %37, %36 : vector<432x128xf32>
    %c0_35 = arith.constant 0 : index
    %c0_36 = arith.constant 0 : index
    %39 = vector.load %arg12[%c0_35, %c0_36] : memref<432x128xf32, #tpu.memory_space<vmem>>, vector<432x128xf32>
    tpu.vector_store %arg12[%c0_35, %c0_36], %38 {strides = array<i32>} : memref<432x128xf32, #tpu.memory_space<vmem>>, vector<432x128xf32>,
    %c31 = arith.constant 31 : index
    %c0_37 = arith.constant 0 : index
    %40 = vector.load %arg11[%c31, %c0_37] : memref<496x128xf32, #tpu.memory_space<vmem>>, vector<432x128xf32>
    %41 = arith.truncf %40 : vector<432x128xf32> to vector<432x128xbf16>
    %c3 = arith.constant 3 : index
    %c0_38 = arith.constant 0 : index
    %c0_39 = arith.constant 0 : index
    %42 = vector.load %arg3[%c3, %c0_38, %c0_39] : memref<9x128x128xbf16, #tpu.memory_space<vmem>>, vector<1x128x128xbf16>
    %43 = vector.shape_cast %42 : vector<1x128x128xbf16> to vector<128x128xbf16>
    %cst_40 = arith.constant dense<0.000000e+00> : vector<432x128xf32>
    %44 = tpu.matmul %41, %43, %cst_40 {dimension_numbers = #tpu.dot_dimension_numbers<[1], [0], [0], [1], [0, 0, 1, 1], [], []>} : vector<432x128xbf16>, vector<128x128xbf16>, vector<432x128xf32> -> vector<432x128xf32>
    %c0_41 = arith.constant 0 : index
    %c0_42 = arith.constant 0 : index
    %45 = vector.load %arg12[%c0_41, %c0_42] : memref<432x128xf32, #tpu.memory_space<vmem>>, vector<432x128xf32>
    %46 = arith.addf %45, %44 : vector<432x128xf32>
    %c0_43 = arith.constant 0 : index
    %c0_44 = arith.constant 0 : index
    %47 = vector.load %arg12[%c0_43, %c0_44] : memref<432x128xf32, #tpu.memory_space<vmem>>, vector<432x128xf32>
    tpu.vector_store %arg12[%c0_43, %c0_44], %46 {strides = array<i32>} : memref<432x128xf32, #tpu.memory_space<vmem>>, vector<432x128xf32>,
    %c32_45 = arith.constant 32 : index
    %c0_46 = arith.constant 0 : index
    %48 = vector.load %arg11[%c32_45, %c0_46] : memref<496x128xf32, #tpu.memory_space<vmem>>, vector<432x128xf32>
    %49 = arith.truncf %48 : vector<432x128xf32> to vector<432x128xbf16>
    %c4 = arith.constant 4 : index
    %c0_47 = arith.constant 0 : index
    %c0_48 = arith.constant 0 : index
    %50 = vector.load %arg3[%c4, %c0_47, %c0_48] : memref<9x128x128xbf16, #tpu.memory_space<vmem>>, vector<1x128x128xbf16>
    %51 = vector.shape_cast %50 : vector<1x128x128xbf16> to vector<128x128xbf16>
    %cst_49 = arith.constant dense<0.000000e+00> : vector<432x128xf32>
    %52 = tpu.matmul %49, %51, %cst_49 {dimension_numbers = #tpu.dot_dimension_numbers<[1], [0], [0], [1], [0, 0, 1, 1], [], []>} : vector<432x128xbf16>, vector<128x128xbf16>, vector<432x128xf32> -> vector<432x128xf32>
    %c0_50 = arith.constant 0 : index
    %c0_51 = arith.constant 0 : index
    %53 = vector.load %arg12[%c0_50, %c0_51] : memref<432x128xf32, #tpu.memory_space<vmem>>, vector<432x128xf32>
    %54 = arith.addf %53, %52 : vector<432x128xf32>
    %c0_52 = arith.constant 0 : index
    %c0_53 = arith.constant 0 : index
    %55 = vector.load %arg12[%c0_52, %c0_53] : memref<432x128xf32, #tpu.memory_space<vmem>>, vector<432x128xf32>
    tpu.vector_store %arg12[%c0_52, %c0_53], %54 {strides = array<i32>} : memref<432x128xf32, #tpu.memory_space<vmem>>, vector<432x128xf32>,
    %c33 = arith.constant 33 : index
    %c0_54 = arith.constant 0 : index
    %56 = vector.load %arg11[%c33, %c0_54] : memref<496x128xf32, #tpu.memory_space<vmem>>, vector<432x128xf32>
    %57 = arith.truncf %56 : vector<432x128xf32> to vector<432x128xbf16>
    %c5 = arith.constant 5 : index
    %c0_55 = arith.constant 0 : index
    %c0_56 = arith.constant 0 : index
    %58 = vector.load %arg3[%c5, %c0_55, %c0_56] : memref<9x128x128xbf16, #tpu.memory_space<vmem>>, vector<1x128x128xbf16>
    %59 = vector.shape_cast %58 : vector<1x128x128xbf16> to vector<128x128xbf16>
    %cst_57 = arith.constant dense<0.000000e+00> : vector<432x128xf32>
    %60 = tpu.matmul %57, %59, %cst_57 {dimension_numbers = #tpu.dot_dimension_numbers<[1], [0], [0], [1], [0, 0, 1, 1], [], []>} : vector<432x128xbf16>, vector<128x128xbf16>, vector<432x128xf32> -> vector<432x128xf32>
    %c0_58 = arith.constant 0 : index
    %c0_59 = arith.constant 0 : index
    %61 = vector.load %arg12[%c0_58, %c0_59] : memref<432x128xf32, #tpu.memory_space<vmem>>, vector<432x128xf32>
    %62 = arith.addf %61, %60 : vector<432x128xf32>
    %c0_60 = arith.constant 0 : index
    %c0_61 = arith.constant 0 : index
    %63 = vector.load %arg12[%c0_60, %c0_61] : memref<432x128xf32, #tpu.memory_space<vmem>>, vector<432x128xf32>
    tpu.vector_store %arg12[%c0_60, %c0_61], %62 {strides = array<i32>} : memref<432x128xf32, #tpu.memory_space<vmem>>, vector<432x128xf32>,
    %c55 = arith.constant 55 : index
    %c0_62 = arith.constant 0 : index
    %64 = vector.load %arg11[%c55, %c0_62] : memref<496x128xf32, #tpu.memory_space<vmem>>, vector<432x128xf32>
    %65 = arith.truncf %64 : vector<432x128xf32> to vector<432x128xbf16>
    %c6 = arith.constant 6 : index
    %c0_63 = arith.constant 0 : index
    %c0_64 = arith.constant 0 : index
    %66 = vector.load %arg3[%c6, %c0_63, %c0_64] : memref<9x128x128xbf16, #tpu.memory_space<vmem>>, vector<1x128x128xbf16>
    %67 = vector.shape_cast %66 : vector<1x128x128xbf16> to vector<128x128xbf16>
    %cst_65 = arith.constant dense<0.000000e+00> : vector<432x128xf32>
    %68 = tpu.matmul %65, %67, %cst_65 {dimension_numbers = #tpu.dot_dimension_numbers<[1], [0], [0], [1], [0, 0, 1, 1], [], []>} : vector<432x128xbf16>, vector<128x128xbf16>, vector<432x128xf32> -> vector<432x128xf32>
    %c0_66 = arith.constant 0 : index
    %c0_67 = arith.constant 0 : index
    %69 = vector.load %arg12[%c0_66, %c0_67] : memref<432x128xf32, #tpu.memory_space<vmem>>, vector<432x128xf32>
    %70 = arith.addf %69, %68 : vector<432x128xf32>
    %c0_68 = arith.constant 0 : index
    %c0_69 = arith.constant 0 : index
    %71 = vector.load %arg12[%c0_68, %c0_69] : memref<432x128xf32, #tpu.memory_space<vmem>>, vector<432x128xf32>
    tpu.vector_store %arg12[%c0_68, %c0_69], %70 {strides = array<i32>} : memref<432x128xf32, #tpu.memory_space<vmem>>, vector<432x128xf32>,
    %c56 = arith.constant 56 : index
    %c0_70 = arith.constant 0 : index
    %72 = vector.load %arg11[%c56, %c0_70] : memref<496x128xf32, #tpu.memory_space<vmem>>, vector<432x128xf32>
    %73 = arith.truncf %72 : vector<432x128xf32> to vector<432x128xbf16>
    %c7_71 = arith.constant 7 : index
    %c0_72 = arith.constant 0 : index
    %c0_73 = arith.constant 0 : index
    %74 = vector.load %arg3[%c7_71, %c0_72, %c0_73] : memref<9x128x128xbf16, #tpu.memory_space<vmem>>, vector<1x128x128xbf16>
    %75 = vector.shape_cast %74 : vector<1x128x128xbf16> to vector<128x128xbf16>
    %cst_74 = arith.constant dense<0.000000e+00> : vector<432x128xf32>
    %76 = tpu.matmul %73, %75, %cst_74 {dimension_numbers = #tpu.dot_dimension_numbers<[1], [0], [0], [1], [0, 0, 1, 1], [], []>} : vector<432x128xbf16>, vector<128x128xbf16>, vector<432x128xf32> -> vector<432x128xf32>
    %c0_75 = arith.constant 0 : index
    %c0_76 = arith.constant 0 : index
    %77 = vector.load %arg12[%c0_75, %c0_76] : memref<432x128xf32, #tpu.memory_space<vmem>>, vector<432x128xf32>
    %78 = arith.addf %77, %76 : vector<432x128xf32>
    %c0_77 = arith.constant 0 : index
    %c0_78 = arith.constant 0 : index
    %79 = vector.load %arg12[%c0_77, %c0_78] : memref<432x128xf32, #tpu.memory_space<vmem>>, vector<432x128xf32>
    tpu.vector_store %arg12[%c0_77, %c0_78], %78 {strides = array<i32>} : memref<432x128xf32, #tpu.memory_space<vmem>>, vector<432x128xf32>,
    %c57 = arith.constant 57 : index
    %c0_79 = arith.constant 0 : index
    %80 = vector.load %arg11[%c57, %c0_79] : memref<496x128xf32, #tpu.memory_space<vmem>>, vector<432x128xf32>
    %81 = arith.truncf %80 : vector<432x128xf32> to vector<432x128xbf16>
    %c8_80 = arith.constant 8 : index
    %c0_81 = arith.constant 0 : index
    %c0_82 = arith.constant 0 : index
    %82 = vector.load %arg3[%c8_80, %c0_81, %c0_82] : memref<9x128x128xbf16, #tpu.memory_space<vmem>>, vector<1x128x128xbf16>
    %83 = vector.shape_cast %82 : vector<1x128x128xbf16> to vector<128x128xbf16>
    %cst_83 = arith.constant dense<0.000000e+00> : vector<432x128xf32>
    %84 = tpu.matmul %81, %83, %cst_83 {dimension_numbers = #tpu.dot_dimension_numbers<[1], [0], [0], [1], [0, 0, 1, 1], [], []>} : vector<432x128xbf16>, vector<128x128xbf16>, vector<432x128xf32> -> vector<432x128xf32>
    %c0_84 = arith.constant 0 : index
    %c0_85 = arith.constant 0 : index
    %85 = vector.load %arg12[%c0_84, %c0_85] : memref<432x128xf32, #tpu.memory_space<vmem>>, vector<432x128xf32>
    %86 = arith.addf %85, %84 : vector<432x128xf32>
    %c0_86 = arith.constant 0 : index
    %c0_87 = arith.constant 0 : index
    %87 = vector.load %arg12[%c0_86, %c0_87] : memref<432x128xf32, #tpu.memory_space<vmem>>, vector<432x128xf32>
    tpu.vector_store %arg12[%c0_86, %c0_87], %86 {strides = array<i32>} : memref<432x128xf32, #tpu.memory_space<vmem>>, vector<432x128xf32>,
    %c0_88 = arith.constant 0 : index
    %c0_89 = arith.constant 0 : index
    %88 = vector.load %arg12[%c0_88, %c0_89] : memref<432x128xf32, #tpu.memory_space<vmem>>, vector<432x128xf32>
    %c0_90 = arith.constant 0 : index
    %c0_91 = arith.constant 0 : index
    %89 = vector.load %arg7[%c0_90, %c0_91] : memref<1x128xf32, #tpu.memory_space<vmem>>, vector<1x128xf32>
    %90 = vector.broadcast %89 : vector<1x128xf32> to vector<432x128xf32>
    %91 = arith.mulf %88, %90 : vector<432x128xf32>
    %c0_92 = arith.constant 0 : index
    %c0_93 = arith.constant 0 : index
    %92 = vector.load %arg8[%c0_92, %c0_93] : memref<1x128xf32, #tpu.memory_space<vmem>>, vector<1x128xf32>
    %93 = vector.broadcast %92 : vector<1x128xf32> to vector<432x128xf32>
    %94 = arith.addf %91, %93 : vector<432x128xf32>
    %cst_94 = arith.constant 0.000000e+00 : f32
    %95 = vector.broadcast %cst_94 : f32 to vector<432x128xf32>
    %96 = arith.maximumf %94, %95 : vector<432x128xf32>
    %97 = vector.broadcast %0 : vector<432x1xf32> to vector<432x128xf32>
    %98 = arith.mulf %96, %97 : vector<432x128xf32>
    %c32_95 = arith.constant 32 : index
    %c0_96 = arith.constant 0 : index
    %99 = vector.load %arg11[%c32_95, %c0_96] : memref<496x128xf32, #tpu.memory_space<vmem>>, vector<432x128xf32>
    tpu.vector_store %arg11[%c32_95, %c0_96], %98 {strides = array<i32>} : memref<496x128xf32, #tpu.memory_space<vmem>>, vector<432x128xf32>,
    %c7_97 = arith.constant 7 : index
    %c0_98 = arith.constant 0 : index
    %100 = vector.load %arg11[%c7_97, %c0_98] : memref<496x128xf32, #tpu.memory_space<vmem>>, vector<432x128xf32>
    %101 = arith.truncf %100 : vector<432x128xf32> to vector<432x128xbf16>
    %c0_99 = arith.constant 0 : index
    %c0_100 = arith.constant 0 : index
    %c0_101 = arith.constant 0 : index
    %102 = vector.load %arg6[%c0_99, %c0_100, %c0_101] : memref<9x128x128xbf16, #tpu.memory_space<vmem>>, vector<1x128x128xbf16>
    %103 = vector.shape_cast %102 : vector<1x128x128xbf16> to vector<128x128xbf16>
    %cst_102 = arith.constant dense<0.000000e+00> : vector<432x128xf32>
    %104 = tpu.matmul %101, %103, %cst_102 {dimension_numbers = #tpu.dot_dimension_numbers<[1], [0], [0], [1], [0, 0, 1, 1], [], []>} : vector<432x128xbf16>, vector<128x128xbf16>, vector<432x128xf32> -> vector<432x128xf32>
    %c0_103 = arith.constant 0 : index
    %c0_104 = arith.constant 0 : index
    %105 = vector.load %arg12[%c0_103, %c0_104] : memref<432x128xf32, #tpu.memory_space<vmem>>, vector<432x128xf32>
    tpu.vector_store %arg12[%c0_103, %c0_104], %104 {strides = array<i32>} : memref<432x128xf32, #tpu.memory_space<vmem>>, vector<432x128xf32>,
    %c8_105 = arith.constant 8 : index
    %c0_106 = arith.constant 0 : index
    %106 = vector.load %arg11[%c8_105, %c0_106] : memref<496x128xf32, #tpu.memory_space<vmem>>, vector<432x128xf32>
    %107 = arith.truncf %106 : vector<432x128xf32> to vector<432x128xbf16>
    %c1_107 = arith.constant 1 : index
    %c0_108 = arith.constant 0 : index
    %c0_109 = arith.constant 0 : index
    %108 = vector.load %arg6[%c1_107, %c0_108, %c0_109] : memref<9x128x128xbf16, #tpu.memory_space<vmem>>, vector<1x128x128xbf16>
    %109 = vector.shape_cast %108 : vector<1x128x128xbf16> to vector<128x128xbf16>
    %cst_110 = arith.constant dense<0.000000e+00> : vector<432x128xf32>
    %110 = tpu.matmul %107, %109, %cst_110 {dimension_numbers = #tpu.dot_dimension_numbers<[1], [0], [0], [1], [0, 0, 1, 1], [], []>} : vector<432x128xbf16>, vector<128x128xbf16>, vector<432x128xf32> -> vector<432x128xf32>
    %c0_111 = arith.constant 0 : index
    %c0_112 = arith.constant 0 : index
    %111 = vector.load %arg12[%c0_111, %c0_112] : memref<432x128xf32, #tpu.memory_space<vmem>>, vector<432x128xf32>
    %112 = arith.addf %111, %110 : vector<432x128xf32>
    %c0_113 = arith.constant 0 : index
    %c0_114 = arith.constant 0 : index
    %113 = vector.load %arg12[%c0_113, %c0_114] : memref<432x128xf32, #tpu.memory_space<vmem>>, vector<432x128xf32>
    tpu.vector_store %arg12[%c0_113, %c0_114], %112 {strides = array<i32>} : memref<432x128xf32, #tpu.memory_space<vmem>>, vector<432x128xf32>,
    %c9_115 = arith.constant 9 : index
    %c0_116 = arith.constant 0 : index
    %114 = vector.load %arg11[%c9_115, %c0_116] : memref<496x128xf32, #tpu.memory_space<vmem>>, vector<432x128xf32>
    %115 = arith.truncf %114 : vector<432x128xf32> to vector<432x128xbf16>
    %c2_117 = arith.constant 2 : index
    %c0_118 = arith.constant 0 : index
    %c0_119 = arith.constant 0 : index
    %116 = vector.load %arg6[%c2_117, %c0_118, %c0_119] : memref<9x128x128xbf16, #tpu.memory_space<vmem>>, vector<1x128x128xbf16>
    %117 = vector.shape_cast %116 : vector<1x128x128xbf16> to vector<128x128xbf16>
    %cst_120 = arith.constant dense<0.000000e+00> : vector<432x128xf32>
    %118 = tpu.matmul %115, %117, %cst_120 {dimension_numbers = #tpu.dot_dimension_numbers<[1], [0], [0], [1], [0, 0, 1, 1], [], []>} : vector<432x128xbf16>, vector<128x128xbf16>, vector<432x128xf32> -> vector<432x128xf32>
    %c0_121 = arith.constant 0 : index
    %c0_122 = arith.constant 0 : index
    %119 = vector.load %arg12[%c0_121, %c0_122] : memref<432x128xf32, #tpu.memory_space<vmem>>, vector<432x128xf32>
    %120 = arith.addf %119, %118 : vector<432x128xf32>
    %c0_123 = arith.constant 0 : index
    %c0_124 = arith.constant 0 : index
    %121 = vector.load %arg12[%c0_123, %c0_124] : memref<432x128xf32, #tpu.memory_space<vmem>>, vector<432x128xf32>
    tpu.vector_store %arg12[%c0_123, %c0_124], %120 {strides = array<i32>} : memref<432x128xf32, #tpu.memory_space<vmem>>, vector<432x128xf32>,
    %c31_125 = arith.constant 31 : index
    %c0_126 = arith.constant 0 : index
    %122 = vector.load %arg11[%c31_125, %c0_126] : memref<496x128xf32, #tpu.memory_space<vmem>>, vector<432x128xf32>
    %123 = arith.truncf %122 : vector<432x128xf32> to vector<432x128xbf16>
    %c3_127 = arith.constant 3 : index
    %c0_128 = arith.constant 0 : index
    %c0_129 = arith.constant 0 : index
    %124 = vector.load %arg6[%c3_127, %c0_128, %c0_129] : memref<9x128x128xbf16, #tpu.memory_space<vmem>>, vector<1x128x128xbf16>
    %125 = vector.shape_cast %124 : vector<1x128x128xbf16> to vector<128x128xbf16>
    %cst_130 = arith.constant dense<0.000000e+00> : vector<432x128xf32>
    %126 = tpu.matmul %123, %125, %cst_130 {dimension_numbers = #tpu.dot_dimension_numbers<[1], [0], [0], [1], [0, 0, 1, 1], [], []>} : vector<432x128xbf16>, vector<128x128xbf16>, vector<432x128xf32> -> vector<432x128xf32>
    %c0_131 = arith.constant 0 : index
    %c0_132 = arith.constant 0 : index
    %127 = vector.load %arg12[%c0_131, %c0_132] : memref<432x128xf32, #tpu.memory_space<vmem>>, vector<432x128xf32>
    %128 = arith.addf %127, %126 : vector<432x128xf32>
    %c0_133 = arith.constant 0 : index
    %c0_134 = arith.constant 0 : index
    %129 = vector.load %arg12[%c0_133, %c0_134] : memref<432x128xf32, #tpu.memory_space<vmem>>, vector<432x128xf32>
    tpu.vector_store %arg12[%c0_133, %c0_134], %128 {strides = array<i32>} : memref<432x128xf32, #tpu.memory_space<vmem>>, vector<432x128xf32>,
    %c32_135 = arith.constant 32 : index
    %c0_136 = arith.constant 0 : index
    %130 = vector.load %arg11[%c32_135, %c0_136] : memref<496x128xf32, #tpu.memory_space<vmem>>, vector<432x128xf32>
    %131 = arith.truncf %130 : vector<432x128xf32> to vector<432x128xbf16>
    %c4_137 = arith.constant 4 : index
    %c0_138 = arith.constant 0 : index
    %c0_139 = arith.constant 0 : index
    %132 = vector.load %arg6[%c4_137, %c0_138, %c0_139] : memref<9x128x128xbf16, #tpu.memory_space<vmem>>, vector<1x128x128xbf16>
    %133 = vector.shape_cast %132 : vector<1x128x128xbf16> to vector<128x128xbf16>
    %cst_140 = arith.constant dense<0.000000e+00> : vector<432x128xf32>
    %134 = tpu.matmul %131, %133, %cst_140 {dimension_numbers = #tpu.dot_dimension_numbers<[1], [0], [0], [1], [0, 0, 1, 1], [], []>} : vector<432x128xbf16>, vector<128x128xbf16>, vector<432x128xf32> -> vector<432x128xf32>
    %c0_141 = arith.constant 0 : index
    %c0_142 = arith.constant 0 : index
    %135 = vector.load %arg12[%c0_141, %c0_142] : memref<432x128xf32, #tpu.memory_space<vmem>>, vector<432x128xf32>
    %136 = arith.addf %135, %134 : vector<432x128xf32>
    %c0_143 = arith.constant 0 : index
    %c0_144 = arith.constant 0 : index
    %137 = vector.load %arg12[%c0_143, %c0_144] : memref<432x128xf32, #tpu.memory_space<vmem>>, vector<432x128xf32>
    tpu.vector_store %arg12[%c0_143, %c0_144], %136 {strides = array<i32>} : memref<432x128xf32, #tpu.memory_space<vmem>>, vector<432x128xf32>,
    %c33_145 = arith.constant 33 : index
    %c0_146 = arith.constant 0 : index
    %138 = vector.load %arg11[%c33_145, %c0_146] : memref<496x128xf32, #tpu.memory_space<vmem>>, vector<432x128xf32>
    %139 = arith.truncf %138 : vector<432x128xf32> to vector<432x128xbf16>
    %c5_147 = arith.constant 5 : index
    %c0_148 = arith.constant 0 : index
    %c0_149 = arith.constant 0 : index
    %140 = vector.load %arg6[%c5_147, %c0_148, %c0_149] : memref<9x128x128xbf16, #tpu.memory_space<vmem>>, vector<1x128x128xbf16>
    %141 = vector.shape_cast %140 : vector<1x128x128xbf16> to vector<128x128xbf16>
    %cst_150 = arith.constant dense<0.000000e+00> : vector<432x128xf32>
    %142 = tpu.matmul %139, %141, %cst_150 {dimension_numbers = #tpu.dot_dimension_numbers<[1], [0], [0], [1], [0, 0, 1, 1], [], []>} : vector<432x128xbf16>, vector<128x128xbf16>, vector<432x128xf32> -> vector<432x128xf32>
    %c0_151 = arith.constant 0 : index
    %c0_152 = arith.constant 0 : index
    %143 = vector.load %arg12[%c0_151, %c0_152] : memref<432x128xf32, #tpu.memory_space<vmem>>, vector<432x128xf32>
    %144 = arith.addf %143, %142 : vector<432x128xf32>
    %c0_153 = arith.constant 0 : index
    %c0_154 = arith.constant 0 : index
    %145 = vector.load %arg12[%c0_153, %c0_154] : memref<432x128xf32, #tpu.memory_space<vmem>>, vector<432x128xf32>
    tpu.vector_store %arg12[%c0_153, %c0_154], %144 {strides = array<i32>} : memref<432x128xf32, #tpu.memory_space<vmem>>, vector<432x128xf32>,
    %c55_155 = arith.constant 55 : index
    %c0_156 = arith.constant 0 : index
    %146 = vector.load %arg11[%c55_155, %c0_156] : memref<496x128xf32, #tpu.memory_space<vmem>>, vector<432x128xf32>
    %147 = arith.truncf %146 : vector<432x128xf32> to vector<432x128xbf16>
    %c6_157 = arith.constant 6 : index
    %c0_158 = arith.constant 0 : index
    %c0_159 = arith.constant 0 : index
    %148 = vector.load %arg6[%c6_157, %c0_158, %c0_159] : memref<9x128x128xbf16, #tpu.memory_space<vmem>>, vector<1x128x128xbf16>
    %149 = vector.shape_cast %148 : vector<1x128x128xbf16> to vector<128x128xbf16>
    %cst_160 = arith.constant dense<0.000000e+00> : vector<432x128xf32>
    %150 = tpu.matmul %147, %149, %cst_160 {dimension_numbers = #tpu.dot_dimension_numbers<[1], [0], [0], [1], [0, 0, 1, 1], [], []>} : vector<432x128xbf16>, vector<128x128xbf16>, vector<432x128xf32> -> vector<432x128xf32>
    %c0_161 = arith.constant 0 : index
    %c0_162 = arith.constant 0 : index
    %151 = vector.load %arg12[%c0_161, %c0_162] : memref<432x128xf32, #tpu.memory_space<vmem>>, vector<432x128xf32>
    %152 = arith.addf %151, %150 : vector<432x128xf32>
    %c0_163 = arith.constant 0 : index
    %c0_164 = arith.constant 0 : index
    %153 = vector.load %arg12[%c0_163, %c0_164] : memref<432x128xf32, #tpu.memory_space<vmem>>, vector<432x128xf32>
    tpu.vector_store %arg12[%c0_163, %c0_164], %152 {strides = array<i32>} : memref<432x128xf32, #tpu.memory_space<vmem>>, vector<432x128xf32>,
    %c56_165 = arith.constant 56 : index
    %c0_166 = arith.constant 0 : index
    %154 = vector.load %arg11[%c56_165, %c0_166] : memref<496x128xf32, #tpu.memory_space<vmem>>, vector<432x128xf32>
    %155 = arith.truncf %154 : vector<432x128xf32> to vector<432x128xbf16>
    %c7_167 = arith.constant 7 : index
    %c0_168 = arith.constant 0 : index
    %c0_169 = arith.constant 0 : index
    %156 = vector.load %arg6[%c7_167, %c0_168, %c0_169] : memref<9x128x128xbf16, #tpu.memory_space<vmem>>, vector<1x128x128xbf16>
    %157 = vector.shape_cast %156 : vector<1x128x128xbf16> to vector<128x128xbf16>
    %cst_170 = arith.constant dense<0.000000e+00> : vector<432x128xf32>
    %158 = tpu.matmul %155, %157, %cst_170 {dimension_numbers = #tpu.dot_dimension_numbers<[1], [0], [0], [1], [0, 0, 1, 1], [], []>} : vector<432x128xbf16>, vector<128x128xbf16>, vector<432x128xf32> -> vector<432x128xf32>
    %c0_171 = arith.constant 0 : index
    %c0_172 = arith.constant 0 : index
    %159 = vector.load %arg12[%c0_171, %c0_172] : memref<432x128xf32, #tpu.memory_space<vmem>>, vector<432x128xf32>
    %160 = arith.addf %159, %158 : vector<432x128xf32>
    %c0_173 = arith.constant 0 : index
    %c0_174 = arith.constant 0 : index
    %161 = vector.load %arg12[%c0_173, %c0_174] : memref<432x128xf32, #tpu.memory_space<vmem>>, vector<432x128xf32>
    tpu.vector_store %arg12[%c0_173, %c0_174], %160 {strides = array<i32>} : memref<432x128xf32, #tpu.memory_space<vmem>>, vector<432x128xf32>,
    %c57_175 = arith.constant 57 : index
    %c0_176 = arith.constant 0 : index
    %162 = vector.load %arg11[%c57_175, %c0_176] : memref<496x128xf32, #tpu.memory_space<vmem>>, vector<432x128xf32>
    %163 = arith.truncf %162 : vector<432x128xf32> to vector<432x128xbf16>
    %c8_177 = arith.constant 8 : index
    %c0_178 = arith.constant 0 : index
    %c0_179 = arith.constant 0 : index
    %164 = vector.load %arg6[%c8_177, %c0_178, %c0_179] : memref<9x128x128xbf16, #tpu.memory_space<vmem>>, vector<1x128x128xbf16>
    %165 = vector.shape_cast %164 : vector<1x128x128xbf16> to vector<128x128xbf16>
    %cst_180 = arith.constant dense<0.000000e+00> : vector<432x128xf32>
    %166 = tpu.matmul %163, %165, %cst_180 {dimension_numbers = #tpu.dot_dimension_numbers<[1], [0], [0], [1], [0, 0, 1, 1], [], []>} : vector<432x128xbf16>, vector<128x128xbf16>, vector<432x128xf32> -> vector<432x128xf32>
    %c0_181 = arith.constant 0 : index
    %c0_182 = arith.constant 0 : index
    %167 = vector.load %arg12[%c0_181, %c0_182] : memref<432x128xf32, #tpu.memory_space<vmem>>, vector<432x128xf32>
    %168 = arith.addf %167, %166 : vector<432x128xf32>
    %c0_183 = arith.constant 0 : index
    %c0_184 = arith.constant 0 : index
    %169 = vector.load %arg12[%c0_183, %c0_184] : memref<432x128xf32, #tpu.memory_space<vmem>>, vector<432x128xf32>
    tpu.vector_store %arg12[%c0_183, %c0_184], %168 {strides = array<i32>} : memref<432x128xf32, #tpu.memory_space<vmem>>, vector<432x128xf32>,
    %c0_185 = arith.constant 0 : index
    %c0_186 = arith.constant 0 : index
    %c0_187 = arith.constant 0 : index
    %170 = vector.load %arg1[%c0_185, %c0_186, %c0_187] : memref<1x432x128xf32, #tpu.memory_space<vmem>>, vector<1x432x128xf32>
    %171 = vector.shape_cast %170 : vector<1x432x128xf32> to vector<432x128xf32>
    %172 = arith.truncf %171 : vector<432x128xf32> to vector<432x128xbf16>
    %c0_188 = arith.constant 0 : index
    %c0_189 = arith.constant 0 : index
    %173 = vector.load %arg9[%c0_188, %c0_189] : memref<128x128xbf16, #tpu.memory_space<vmem>>, vector<128x128xbf16>
    %cst_190 = arith.constant dense<0.000000e+00> : vector<432x128xf32>
    %174 = tpu.matmul %172, %173, %cst_190 {dimension_numbers = #tpu.dot_dimension_numbers<[1], [0], [0], [1], [0, 0, 1, 1], [], []>} : vector<432x128xbf16>, vector<128x128xbf16>, vector<432x128xf32> -> vector<432x128xf32>
    %c0_191 = arith.constant 0 : index
    %c0_192 = arith.constant 0 : index
    %175 = vector.load %arg12[%c0_191, %c0_192] : memref<432x128xf32, #tpu.memory_space<vmem>>, vector<432x128xf32>
    %176 = arith.addf %175, %174 : vector<432x128xf32>
    %c0_193 = arith.constant 0 : index
    %c0_194 = arith.constant 0 : index
    %c0_195 = arith.constant 0 : index
    %177 = vector.load %arg10[%c0_193, %c0_194, %c0_195] : memref<1x432x128xf32, #tpu.memory_space<vmem>>, vector<1x432x128xf32>
    %178 = vector.shape_cast %177 : vector<1x432x128xf32> to vector<432x128xf32>
    %179 = vector.shape_cast %176 : vector<432x128xf32> to vector<1x432x128xf32>
    tpu.vector_store %arg10[%c0_193, %c0_194, %c0_195], %179 {strides = array<i32>} : memref<1x432x128xf32, #tpu.memory_space<vmem>>, vector<1x432x128xf32>,
    return
  }
  func.func @transform_0(%arg0: i32) -> (i32, i32, i32) {
    %c0_i32 = arith.constant 0 : i32
    %c0_i32_0 = arith.constant 0 : i32
    %c0_i32_1 = arith.constant 0 : i32
    return %arg0, %c0_i32, %c0_i32_0 : i32, i32, i32
  }
  func.func @transform_1(%arg0: i32) -> (i32, i32) {
    %c0_i32 = arith.constant 0 : i32
    %c0_i32_0 = arith.constant 0 : i32
    %c0_i32_1 = arith.constant 0 : i32
    return %c0_i32, %c0_i32_0 : i32, i32
  }
  func.func @transform_2(%arg0: i32) -> (i32, i32, i32) {
    %c0_i32 = arith.constant 0 : i32
    %c0_i32_0 = arith.constant 0 : i32
    %c0_i32_1 = arith.constant 0 : i32
    %c0_i32_2 = arith.constant 0 : i32
    return %c0_i32, %c0_i32_0, %c0_i32_1 : i32, i32, i32
  }
  func.func @transform_3(%arg0: i32) -> (i32, i32) {
    %c0_i32 = arith.constant 0 : i32
    %c0_i32_0 = arith.constant 0 : i32
    %c0_i32_1 = arith.constant 0 : i32
    return %c0_i32, %c0_i32_0 : i32, i32
  }
  func.func @transform_4(%arg0: i32) -> (i32, i32) {
    %c0_i32 = arith.constant 0 : i32
    %c0_i32_0 = arith.constant 0 : i32
    %c0_i32_1 = arith.constant 0 : i32
    return %c0_i32, %c0_i32_0 : i32, i32
  }
  func.func @transform_5(%arg0: i32) -> (i32, i32, i32) {
    %c0_i32 = arith.constant 0 : i32
    %c0_i32_0 = arith.constant 0 : i32
    %c0_i32_1 = arith.constant 0 : i32
    %c0_i32_2 = arith.constant 0 : i32
    return %c0_i32, %c0_i32_0, %c0_i32_1 : i32, i32, i32
  }
  func.func @transform_6(%arg0: i32) -> (i32, i32) {
    %c0_i32 = arith.constant 0 : i32
    %c0_i32_0 = arith.constant 0 : i32
    %c0_i32_1 = arith.constant 0 : i32
    return %c0_i32, %c0_i32_0 : i32, i32
  }
  func.func @transform_7(%arg0: i32) -> (i32, i32) {
    %c0_i32 = arith.constant 0 : i32
    %c0_i32_0 = arith.constant 0 : i32
    %c0_i32_1 = arith.constant 0 : i32
    return %c0_i32, %c0_i32_0 : i32, i32
  }
  func.func @transform_8(%arg0: i32) -> (i32, i32) {
    %c0_i32 = arith.constant 0 : i32
    %c0_i32_0 = arith.constant 0 : i32
    %c0_i32_1 = arith.constant 0 : i32
    return %c0_i32, %c0_i32_0 : i32, i32
  }
  func.func @transform_9(%arg0: i32) -> (i32, i32, i32) {
    %c0_i32 = arith.constant 0 : i32
    %c0_i32_0 = arith.constant 0 : i32
    %c0_i32_1 = arith.constant 0 : i32
    return %arg0, %c0_i32, %c0_i32_0 : i32, i32, i32
  }
}

</mosaic_0001>

<bundles_post_ra>
// kernel: tpu_custom_call.1
= control target key start
LH: loop header
LB: loop body
LE: loop exit
PB: predicated region body
PF: predicated region fallthrough
CT: control target
= control target key end

     0   :  { %s19460_s0 = inlined_call_operand.hbm [shape: f32[2,432,128], index: 0, kind: input, shape index: {}]   ;;  %s19461_s1 = inlined_call_operand.vmem [shape: f32[432,1], index: 1, kind: input, shape index: {}]   ;;  %s19462_s2 = inlined_call_operand.hbm [shape: bf16[9,128,128], index: 2, kind: input, shape index: {}]   ;;  %s19463_s3 = inlined_call_operand.vmem [shape: f32[1,128], index: 3, kind: input, shape index: {}]   ;;  %s19464_s4 = inlined_call_operand.vmem [shape: f32[1,128], index: 4, kind: input, shape index: {}]   ;;  %s19465_s5 = inlined_call_operand.hbm [shape: bf16[9,128,128], index: 5, kind: input, shape index: {}]   ;;  %s19466_s6 = inlined_call_operand.vmem [shape: f32[1,128], index: 6, kind: input, shape index: {}]   ;;  %s19467_s7 = inlined_call_operand.vmem [shape: f32[1,128], index: 7, kind: input, shape index: {}]   ;;  %s19468_s8 = inlined_call_operand.vmem [shape: bf16[128,128], index: 8, kind: input, shape index: {}]   ;;  %s19469_s9 = inlined_call_operand.hbm [shape: f32[2,432,128], index: 9, kind: output, shape index: {}]  }
   0x1   :  { %19528 = sst [smem:[#allocation84_spill]] %s19462_s2 }
   0x2   :  { %19529 = sst [smem:[#allocation85_spill]] %s19465_s5 }
   0x3   :  { %14 = vsyncpa [#allocation5], 0 }
   0x4   :  { %16 = vsyncpa [#allocation5 + $0x1], 0 }
   0x5   :  { %17 = vsyncpa [#allocation8], 0 }
   0x6   :  { %18 = vsyncpa [#allocation6], 0 }
   0x7   :  { %20 = vsyncpa [#allocation6 + $0x1], 0  ;;  %s15527_s30 = smov 0   ;;  %s15529_s10 = smov 0  }
   0x8   :  { %s15531_s11 = smov 0   ;;  %s15533_s12 = smov 0  }
   0x9 LB: > { %s15548_s13 = sadd.s32 4294967295, %s15462_s12   ;;  %s11859_s14 = sadd.s32 4294967294, %s15462_s12   ;;  %s15462_s12 = sphi %s15533_s12, %s19825_s12   ;;  %s15458_s11 = sphi %s15531_s11, %s19824_s11   ;;  %s15454_s10 = sphi %s15529_s10, %s19823_s10   ;;  %s15450_s30 = sphi %s15527_s30, %s19822_s30  }
   0xa   : > { %p46_p0 = scmp.ne.s32.totalorder %s15454_s10, %s15450_s30  ;;  %p19470_p1 = scmp.eq.s32.totalorder %s15548_s13, 0 }
   0xb   : > { %p244_p3 = scmp.eq.s32.totalorder %s11859_s14, 1  ;;  %p11860_p5 = scmp.ge.s32.totalorder %s15462_s12, 1 }
   0xc   : > { %p15557_p4 = por %p19470_p1, %p46_p0  ;;  %p251_p7 = scmp.lt.s32.totalorder %s15462_s12, 3 }
   0xd   : > { %p15562_p6 = por %p244_p3, %p46_p0  ;;  %s15464_s18 = smov [#allocation7]  }
   0xe   : > { %s19530_s15 = scalar_select %p15557_p4, 1, 0 }
   0xf   : > { %s19531_s16 = scalar_select %p15562_p6, 1, 0 }
  0x10   : > { %p15567_p8 = pnand %p11860_p5, %p251_p7  ;;  %s266_s19 = sshll.u32 %s15464_s18, 4  ;;  %s267_s19 = int_to_ptr.vmem [resolvable:$true] %s266_s19 }
  0x11   : > { %s15465_s21 = smov [#allocation9]   ;;  %s15325_s23 = scalar_lea.vmem %s267_s19, 9216 }
  0x12   : > { %s19532_s17 = scalar_select %p15567_p8, 1, 0 }
  0x13   : > { %p15080_p9 = pneg %p15567_p8  ;;  %s285_s22 = sshll.u32 %s15465_s21, 4  ;;  %s286_s22 = int_to_ptr.vmem [resolvable:$true] %s285_s22 }
  0x14   : > { %p15326_p13 = scmp.ne.s32.totalorder %s267_s19, %s15325_s23  ;;  %p15333_p5 = scmp.lt.s32.totalorder %s267_s19, %s267_s19 }
  0x15   : > { %p15576_p11 = pnand %p15080_p9, %p19470_p1  ;;  %p15334_p7 = scmp.lt.s32.totalorder %s15325_s23, %s15325_s23 }
  0x17   : > { %p15316_p12 = pneg %p15576_p11  ;;  %p15335_p10 = por %p15334_p7, %p15333_p5 }
  0x19   : > { %p15328_p0 = pnand %p15326_p13, %p15316_p12 }
  0x1b   : > { %p15329_p3 = pneg %p15328_p0 }
  0x1d   : > { %p15336_p9 = pnand %p15335_p10, %p15329_p3 }
  0x1f   : > { %15339 = shalt.err (!%p15336_p9)
}
  0x20   : > { %s15466_s24 = smov 64   ;;  %s15467_s25 = smov 4  }
  0x21   : > { %s19534_s2 = sld [smem:[#allocation84_spill]]  ;;  %s15351_s28 = scalar_lea.vmem %s286_s22, 9216 }
  0x22   : > { %p15352_p1 = scmp.ne.s32.totalorder %s286_s22, %s15351_s28  ;;  %p15359_p2 = scmp.lt.s32.totalorder %s286_s22, %s286_s22 }
  0x23   : > { %p15360_p6 = scmp.lt.s32.totalorder %s15351_s28, %s15351_s28 }
  0x24   : > { %p15354_p13 = pnand %p15352_p1, %p15316_p12 }
  0x25   : > { %p15361_p5 = por %p15360_p6, %p15359_p2 }
  0x26   : > { %p15355_p0 = pneg %p15354_p13 }
  0x27   : > { %15083 = dma.hbm_to_vmem [thread:$0]  (!%p15576_p11), %s19534_s2, 9216, %s267_s19, [#allocation8], %s15466_s24, %s15466_s24, %s15467_s25  }
  0x28   : > { %p15362_p10 = pnand %p15361_p5, %p15355_p0 }
  0x2a   : > { %15365 = shalt.err (!%p15362_p10)
}
  0x2b   : > { %s19535_s5 = sld [smem:[#allocation85_spill]]  ;;  %s15599_s18 = sadd.s32 1, %s15462_s12  }
  0x2c   : > { %s33_s19 = sadd.s32 1, %s15458_s11  ;;  %s30_s20 = ssub.s32 %s15462_s12, %s15599_s18 }
  0x2d   : > { %p40_p1 = scmp.ne.s32.totalorder %s15458_s11, %s15454_s10  ;;  %p31_p2 = scmp.eq.s32.totalorder %s30_s20, 0 }
  0x2e   : > { %p41_p6 = scmp.eq.s32.totalorder %s15462_s12, 0  ;;  %p19536_p12 = scmp.eq.s32.totalorder %s15548_s13, 1 }
  0x2f   : > { %p15097_p7 = scmp.lt.s32.totalorder %s15462_s12, 2  ;;  %s308_s26 = sand.u32 1, %s15458_s11  }
  0x30   : > { %p15609_p3 = por %p19536_p12, %p40_p1  ;;  %p42_p9 = por %p41_p6, %p40_p1 }
  0x31   : > { %15086 = dma.hbm_to_vmem [thread:$0]  (!%p15576_p11), %s19535_s5, 9216, %s286_s22, [#allocation8], %s15466_s24, %s15466_s24, %s15467_s25  }
  0x32   : > { %s19537_s21 = scalar_select %p15609_p3, 1, 0 }
  0x33   : > { %s15615_s23 = scalar_select %p31_p2, %s15458_s11, %s33_s19  }
  0x34   : > { %s15064_s27 = smul.u32 432, %s308_s26  ;;  %p15619_p11 = pnand %p15097_p7, %p42_p9 }
  0x35   : > { %19538 = sst [smem:[#allocation14_spill]] %s15615_s23  ;;  %s15065_s22 = smul.u32 6912, %s15462_s12 }
  0x36   : > { %s312_s14 = scalar_lea.vmem [#allocation4], %s15064_s27  ;;  %s15630_s20 = scalar_lea.sflag [#allocation5], %s308_s26 }
  0x37   : > { %s15626_s29 = scalar_lea.hbm %s19460_s0, %s15065_s22  ;;  %s319_s19 = sshll.u32 %s312_s14, 4  ;;  %s15628_s19 = int_to_ptr.vmem [resolvable:$true] %s319_s19 }
  0x38   : > { %s15366_s2 = scalar_lea.hbm %s15626_s29, 6912  ;;  %p15368_p0 = pneg %p15619_p11 }
  0x39   : > { %p15367_p13 = scmp.ne.s32.totalorder %s15626_s29, %s15366_s2  ;;  %s15371_s22 = scalar_lea.hbm %s19460_s0, 13824 }
  0x3a   : > { %p15372_p1 = scmp.lt.s32.totalorder %s15626_s29, %s19460_s0  ;;  %p15373_p2 = scmp.lt.s32.totalorder %s15371_s22, %s15366_s2 }
  0x3b   : > { %p15369_p5 = pnand %p15368_p0, %p15367_p13 }
  0x3c   : > { %p15374_p6 = por %p15373_p2, %p15372_p1 }
  0x3d   : > { %p15370_p10 = pneg %p15369_p5 }
  0x3f   : > { %p15375_p12 = pnand %p15374_p6, %p15370_p10 }
  0x41   : > { %15378 = shalt.err (!%p15375_p12)
}
  0x42   : > { %s15379_s26 = scalar_lea.vmem %s15628_s19, 6912  ;;  %s15468_s27 = smov [#allocation4]  }
  0x43   : > { %p15380_p7 = scmp.ne.s32.totalorder %s15628_s19, %s15379_s26  ;;  %s15384_s14 = sshll.u32 %s15468_s27, 4  ;;  %s15385_s14 = int_to_ptr.vmem [resolvable:$false] %s15384_s14 }
  0x44   : > { %s15386_s5 = scalar_lea.vmem %s15385_s14, 13824  ;;  %p15387_p5 = scmp.lt.s32.totalorder %s15628_s19, %s15385_s14 }
  0x45   : > { %p15382_p9 = pnand %p15380_p7, %p15368_p0  ;;  %p15388_p3 = scmp.lt.s32.totalorder %s15386_s5, %s15379_s26 }
  0x47   : > { %p15383_p13 = pneg %p15382_p9  ;;  %p15389_p4 = por %p15388_p3, %p15387_p5 }
  0x49   : > { %p15390_p8 = pnand %p15389_p4, %p15383_p13 }
  0x4b   : > { %15393 = shalt.err (!%p15390_p8)
}
  0x4c   : > { %s15469_s2 = smov 128   ;;  %s15470_s23 = smov 8  }
  0x4d   : > { %15090 = dma.hbm_to_vmem [thread:$0]  (!%p15619_p11), %s15626_s29, 6912, %s15628_s19, %s15630_s20, %s15469_s2, %s15469_s2, %s15470_s23  }
  0x4e   : > { %p19540_p0 = scmp.ne.s32.totalorder %s19532_s17, 0 }
  0x50   : > { %331 = sbr.rel (%p19540_p0) target bundleno = 2492 (0x9bc), region = 56 }
  0x55   : > { %s15654_s25 = sand.u32 1, %s15454_s10   ;;  %p19541_p4 = scmp.ne.s32.totalorder %s19530_s15, 0 }
  0x56   : > { %s15066_s22 = smul.u32 432, %s15654_s25  ;;  %s334_s28 = scalar_lea.sflag [#allocation5], %s15654_s25 }
  0x58   : > { %s15660_s26 = scalar_lea.vmem [#allocation4], %s15066_s22 }
  0x59   : > { %15437 = dma.done.wait (%p19541_p4), %s334_s28, 6912  }
  0x5a   : > { %15439 = vsyncadd (%p19541_p4), %s334_s28, 4294960384  ;;  %p19542_p8 = scmp.eq.s32.totalorder %s15548_s13, 0 }
  0x5c   : > { %15441 = dma.done.wait (%p19542_p8), [#allocation8], 18432   ;;  %p19543_p3 = pmov %p19542_p8 }
  0x5d   : > { %v15471_v0 = vmov 0   ;;  %v15472_v1 = vmov 0.0   ;;  %v407_v2 = vld [vmem:[%s19461_s1 + $0xd0] sm:$0xff]  ;;  %v405_v3 = vld [vmem:[%s19461_s1 + $0xc0] sm:$0xff]  ;;  %vm15473_vm0 = vmmov 0   ;;  %v406_v4 = vld [vmem:[%s19461_s1 + $0xc8] sm:$0xff] }
  0x5e   : > { %15443 = vsyncadd (%p19543_p3), [#allocation8], 4294948864  ;;  %15145 = vset.pattern.permute.xlu1 %v15471_v0  ;;  %15144 = vset.pattern.permute.xlu0 %v15471_v0  ;;  %435 = vst [vmem:[#allocation2] sm:$0xff] %v15472_v1  ;;  %v381_v5 = vld [vmem:[%s19461_s1] sm:$0xff]  ;;  %v408_v6 = vld [vmem:[%s19461_s1 + $0xd8] sm:$0xff]  ;;  %s19295_s5 = scalar_lea.vmem [#allocation10], %s15066_s22 }
  0x5f   : > { %436 = vst [vmem:[#allocation2 + $0x8] sm:$0xff] %v15472_v1  ;;  %437 = vst [vmem:[#allocation2 + $0x10] sm:$0xff] %v15472_v1  ;;  %12692 = vmatprep.subr.bf16.mxu0 %v15472_v1  ;;  %15048 = vmatprep.subr.bf16.mxu1 %v15472_v1  ;;  %v409_v7 = vld [vmem:[%s19461_s1 + $0xe0] sm:$0xff]  ;;  %v382_v8 = vld [vmem:[%s19461_s1 + $0x8] sm:$0xff]  ;;  %s15067_s22 = smul.u32 6912, %s15548_s13  ;;  %s11754_s13 = scalar_lea.sflag [#allocation6], %s15654_s25 }
  0x60   : > { %438 = vst [vmem:[#allocation2 + $0x18] sm:$0xff] %v15472_v1  ;;  %439 = vst [vmem:[#allocation2 + $0x1d0] sm:$0xff] %v15472_v1  ;;  %12708 = vmatprep.mubr.msk.bf16.mxu0 %vm15473_vm0, %v15472_v1  ;;  %12764 = vmatprep.mubr.msk.bf16.mxu1 %vm15473_vm0, %v15472_v1  ;;  %v383_v9 = vld [vmem:[%s19461_s1 + $0x10] sm:$0xff]  ;;  %v410_v10 = vld [vmem:[%s19461_s1 + $0xe8] sm:$0xff]  ;;  %p19818_p10 = scmp.ne.s32.totalorder %s19537_s21, 0  ;;  %s15474_s17 = smov [#allocation10]  }
  0x61   : > { %440 = vst [vmem:[#allocation2 + $0x1d8] sm:$0xff] %v15472_v1  ;;  %441 = vst [vmem:[#allocation2 + $0x1e0] sm:$0xff] %v15472_v1  ;;  %805 = vperm.xlu1 %15145, %v407_v2   ;;  %795 = vperm.xlu0 %15144, %v405_v3   ;;  %v411_v11 = vld [vmem:[%s19461_s1 + $0xf0] sm:$0xff]  ;;  %v384_v12 = vld [vmem:[%s19461_s1 + $0x18] sm:$0xff]  ;;  %s19414_s28 = scalar_lea.hbm %s19469_s9, %s15067_s22  ;;  %s15398_s24 = sshll.u32 %s15474_s17, 4  ;;  %s15399_s24 = int_to_ptr.vmem [resolvable:$false] %s15398_s24 }
  0x62   : > { %442 = vst [vmem:[#allocation2 + $0x1e8] sm:$0xff] %v15472_v1  ;;  %v15146_v13 = vld [vmem:[#allocation7 + $0x38] sm:$0xff]   ;;  %v385_v14 = vld [vmem:[%s19461_s1 + $0x20] sm:$0xff]  ;;  %v412_v16 = vld [vmem:[%s19461_s1 + $0xf8] sm:$0xff]  ;;  %s15400_s29 = scalar_lea.vmem %s15399_s24, 13824 }
  0x63   : > { %12693 = vmatpush3.bf16.msra.mxu0 %v15146_v13  ;;  %v15147_v15 = vld [vmem:[#allocation7 + $0x30] sm:$0xff]   ;;  %15056 = vmatpush3.bf16.msra.mxu1 %v15146_v13  ;;  %v15148_v18 = vld [vmem:[#allocation7 + $0x28] sm:$0xff]   ;;  %v386_v19 = vld [vmem:[%s19461_s1 + $0x28] sm:$0xff] }
  0x64   : > { %12694 = vmatprep.subr.bf16.mxu0 %v15472_v1  ;;  %15049 = vmatprep.subr.bf16.mxu1 %v15472_v1  ;;  %v413_v17 = vld [vmem:[%s19461_s1 + $0x100] sm:$0xff]  ;;  %v387_v20 = vld [vmem:[%s19461_s1 + $0x30] sm:$0xff]  ;;  %v414_v22 = vld [vmem:[%s19461_s1 + $0x108] sm:$0xff] }
  0x65   : > { %800 = vperm.xlu0 %15144, %v406_v4   ;;  %675 = vperm.xlu1 %15145, %v381_v5   ;;  %v15149_v21 = vld [vmem:[#allocation7 + $0x20] sm:$0xff]   ;;  %v15150_v24 = vld [vmem:[#allocation7 + $0x18] sm:$0xff]   ;;  %v388_v25 = vld [vmem:[%s19461_s1 + $0x38] sm:$0xff] }
  0x66   : > { %v415_v23 = vld [vmem:[%s19461_s1 + $0x110] sm:$0xff]  ;;  %v389_v26 = vld [vmem:[%s19461_s1 + $0x40] sm:$0xff]  ;;  %v416_v28 = vld [vmem:[%s19461_s1 + $0x118] sm:$0xff] }
  0x67   : > { %12695 = vmatpush3.bf16.msra.mxu0 %v15147_v15  ;;  %15057 = vmatpush3.bf16.msra.mxu1 %v15147_v15  ;;  %v15151_v27 = vld [vmem:[#allocation7 + $0x10] sm:$0xff]   ;;  %v15152_v30 = vld [vmem:[#allocation7 + $0x8] sm:$0xff]   ;;  %v390_v31 = vld [vmem:[%s19461_s1 + $0x48] sm:$0xff] }
  0x68   : > { %12696 = vmatprep.subr.bf16.mxu0 %v15472_v1  ;;  %15050 = vmatprep.subr.bf16.mxu1 %v15472_v1  ;;  %v417_v29 = vld [vmem:[%s19461_s1 + $0x120] sm:$0xff]  ;;  %v391_v32 = vld [vmem:[%s19461_s1 + $0x50] sm:$0xff]  ;;  %v418_v36 = vld [vmem:[%s19461_s1 + $0x128] sm:$0xff] }
  0x69   : > { %810 = vperm.xlu0 %15144, %v408_v6   ;;  %815 = vperm.xlu1 %15145, %v409_v7   ;;  %v15153_v33 = vld [vmem:[#allocation7] sm:$0xff]   ;;  %v1051_v34 = vld [vmem:[#allocation2 + $0x7] sm:$0xff]  ;;  %v392_v40 = vld [vmem:[%s19461_s1 + $0x58] sm:$0xff] }
  0x6a   : > { %v1052_v35 = vld [vmem:[#allocation2 + $0xf] sm:$0xff]  ;;  %v393_v41 = vld [vmem:[%s19461_s1 + $0x60] sm:$0xff]  ;;  %v420_v43 = vld [vmem:[%s19461_s1 + $0x138] sm:$0xff] }
  0x6b   : > { %12697 = vmatpush3.bf16.msra.mxu0 %v15148_v18  ;;  %15058 = vmatpush3.bf16.msra.mxu1 %v15148_v18  ;;  %v419_v37 = vld [vmem:[%s19461_s1 + $0x130] sm:$0xff]  ;;  %v1105_v38 = vpack.c.bf16 %v1052_v35, %v1051_v34  ;;  %v15154_v39 = vld [vmem:[#allocation7 + $0xb8] sm:$0xff]   ;;  %v15156_v42 = vld [vmem:[#allocation7 + $0xb0] sm:$0xff]  }
  0x6c   : > { %12698 = vmatprep.subr.bf16.mxu0 %v15472_v1  ;;  %15051 = vmatprep.subr.bf16.mxu1 %v15472_v1  ;;  %v421_v44 = vld [vmem:[%s19461_s1 + $0x140] sm:$0xff]  ;;  %v15158_v45 = vld [vmem:[#allocation7 + $0xa8] sm:$0xff]   ;;  %v394_v46 = vld [vmem:[%s19461_s1 + $0x68] sm:$0xff] }
  0x6d   : > { %680 = vperm.xlu0 %15144, %v382_v8   ;;  %685 = vperm.xlu1 %15145, %v383_v9   ;;  %v395_v47 = vld [vmem:[%s19461_s1 + $0x70] sm:$0xff]  ;;  %v422_v49 = vld [vmem:[%s19461_s1 + $0x148] sm:$0xff]  ;;  %v396_v52 = vld [vmem:[%s19461_s1 + $0x78] sm:$0xff] }
  0x6e   : > { %v15160_v48 = vld [vmem:[#allocation7 + $0xa0] sm:$0xff]   ;;  %v15162_v51 = vld [vmem:[#allocation7 + $0x98] sm:$0xff]   ;;  %v397_v53 = vld [vmem:[%s19461_s1 + $0x80] sm:$0xff] }
  0x6f   : > { %12699 = vmatpush3.bf16.msra.mxu0 %v15149_v21  ;;  %15059 = vmatpush3.bf16.msra.mxu1 %v15149_v21  ;;  %v423_v50 = vld [vmem:[%s19461_s1 + $0x150] sm:$0xff]  ;;  %v424_v54 = vld [vmem:[%s19461_s1 + $0x158] sm:$0xff]  ;;  %v425_v55 = vld [vmem:[%s19461_s1 + $0x160] sm:$0xff] }
  0x70   : > { %12700 = vmatprep.subr.bf16.mxu0 %v15472_v1  ;;  %15052 = vmatprep.subr.bf16.mxu1 %v15472_v1  ;;  %v398_v56 = vld [vmem:[%s19461_s1 + $0x88] sm:$0xff]  ;;  %v399_v57 = vld [vmem:[%s19461_s1 + $0x90] sm:$0xff]  ;;  %v15164_v60 = vld [vmem:[#allocation7 + $0x90] sm:$0xff]  }
  0x71   : > { %820 = vperm.xlu0 %15144, %v410_v10   ;;  %825 = vperm.xlu1 %15145, %v411_v11   ;;  %v426_v58 = vld [vmem:[%s19461_s1 + $0x168] sm:$0xff]  ;;  %v427_v59 = vld [vmem:[%s19461_s1 + $0x170] sm:$0xff]  ;;  %v400_v61 = vld [vmem:[%s19461_s1 + $0x98] sm:$0xff] }
  0x72   : > { %v401_v62 = vld [vmem:[%s19461_s1 + $0xa0] sm:$0xff]  ;;  %v428_v63 = vld [vmem:[%s19461_s1 + $0x178] sm:$0xff]  ;;  %v402_v2 = vld [vmem:[%s19461_s1 + $0xa8] sm:$0xff] }
  0x73   : > { %12701 = vmatpush3.bf16.msra.mxu0 %v15150_v24  ;;  %15060 = vmatpush3.bf16.msra.mxu1 %v15150_v24  ;;  %v429_v0 = vld [vmem:[%s19461_s1 + $0x180] sm:$0xff]  ;;  %v403_v3 = vld [vmem:[%s19461_s1 + $0xb0] sm:$0xff]  ;;  %v15167_v7 = vld [vmem:[#allocation7 + $0x88] sm:$0xff]  }
  0x74   : > { %12702 = vmatprep.subr.bf16.mxu0 %v15472_v1  ;;  %15053 = vmatprep.subr.bf16.mxu1 %v15472_v1  ;;  %v469_v4 = vld [vmem:[%s15660_s26 + $0xd0] sm:$0xff]  ;;  %v467_v6 = vld [vmem:[%s15660_s26 + $0xc0] sm:$0xff]  ;;  %v430_v8 = vld [vmem:[%s19461_s1 + $0x188] sm:$0xff] }
  0x75   : > { %690 = vperm.xlu0 %15144, %v384_v12   ;;  %695 = vperm.xlu1 %15145, %v385_v14   ;;  %v15856_v5 = vld [vmem:[%s19463_s3] ss:$0 sm:$0xff]  ;;  %v431_v9 = vld [vmem:[%s19461_s1 + $0x190] sm:$0xff]  ;;  %v404_v13 = vld [vmem:[%s19461_s1 + $0xb8] sm:$0xff] }
  0x76   : > { %v530_v10 = vmul.f32 %v15856_v5, %v469_v4  ;;  %v15869_v11 = vld [vmem:[%s19464_s4] ss:$0 sm:$0xff]  ;;  %v528_v12 = vmul.f32 %v15856_v5, %v467_v6  ;;  %v432_v14 = vld [vmem:[%s19461_s1 + $0x198] sm:$0xff]  ;;  %v434_v18 = vld [vmem:[%s19461_s1 + $0x1a8] sm:$0xff] }
  0x77   : > { %12703 = vmatpush3.bf16.msra.mxu0 %v15151_v27  ;;  %15061 = vmatpush3.bf16.msra.mxu1 %v15151_v27  ;;  %v470_v24 = vld [vmem:[%s15660_s26 + $0xd8] sm:$0xff]  ;;  %v445_v27 = vld [vmem:[%s15660_s26 + $0x10] sm:$0xff] }
  0x78   : > { %12704 = vmatprep.subr.bf16.mxu0 %v15472_v1  ;;  %15054 = vmatprep.subr.bf16.mxu1 %v15472_v1  ;;  %v591_v15 = vadd.f32 %v15869_v11, %v530_v10  ;;  %v506_v35 = vmul.f32 %v15856_v5, %v445_v27  ;;  %v1053_v6 = vld [vmem:[#allocation2 + $0x17] sm:$0xff] }
  0x79   : > { %830 = vperm.xlu0 %15144, %v412_v16   ;;  %835 = vperm.xlu1 %15145, %v413_v17   ;;  %v589_v16 = vadd.f32 %v15869_v11, %v528_v12  ;;  %v433_v17 = vld [vmem:[%s19461_s1 + $0x1a0] sm:$0xff]  ;;  %v448_v10 = vld [vmem:[%s15660_s26 + $0x28] sm:$0xff] }
  0x7a   : > { %v449_v12 = vld [vmem:[%s15660_s26 + $0x30] sm:$0xff] }
  0x7b   : > { %12705 = vmatpush3.bf16.msra.mxu0 %v15152_v30  ;;  %15062 = vmatpush3.bf16.msra.mxu1 %v15152_v30  ;;  %v643_v21 = vmax.f32 %v589_v16, 0.0  ;;  %v531_v30 = vmul.f32 %v15856_v5, %v470_v24 }
  0x7c   : > { %12706 = vmatprep.subr.bf16.mxu0 %v15472_v1  ;;  %15055 = vmatprep.subr.bf16.mxu1 %v15472_v1 }
  0x7d   : > { %700 = vperm.xlu0 %15144, %v386_v19   ;;  %705 = vperm.xlu1 %15145, %v387_v20   ;;  %v468_v19 = vld [vmem:[%s15660_s26 + $0xc8] sm:$0xff]  ;;  %v645_v20 = vmax.f32 %v591_v15, 0.0 }
  0x7e   : > { %v15155_v15 = vld [vmem:[#allocation7 + $0x78] sm:$0xff]  }
  0x7f   : > { %12707 = vmatpush3.bf16.msra.mxu0 %v15153_v33  ;;  %15063 = vmatpush3.bf16.msra.mxu1 %v15153_v33 }
  0x80   : > { %12940 = vmatprep.subr.bf16.mxu0 %v15472_v1  ;;  %12816 = vmatprep.subr.bf16.mxu1 %v15472_v1 }
  0x81   : > { %840 = vperm.xlu0 %15144, %v414_v22   ;;  %845 = vperm.xlu1 %15145, %v415_v23   ;;  %v443_v22 = vld [vmem:[%s15660_s26] sm:$0xff] }
  0x82   : > { %12709 = vmatmul.mubr.bf16.vlgmr.msra.gmra.mxu0 %v1105_v38  ;;  %v15169_v23 = vld [vmem:[#allocation7 + $0x80] sm:$0xff]  }
  0x83   : > { %12941 = vmatpush3.bf16.msra.mxu0 %v15154_v39  ;;  %12712 = vmatprep.mubr.msk.bf16.mxu0 %vm15473_vm0, %v15472_v1 }
  0x84   : > { %12942 = vmatprep.subr.bf16.mxu0 %v15472_v1 }
  0x85   : > { %710 = vperm.xlu0 %15144, %v388_v25   ;;  %715 = vperm.xlu1 %15145, %v389_v26   ;;  %v471_v25 = vld [vmem:[%s15660_s26 + $0xe0] sm:$0xff]  ;;  %v444_v26 = vld [vmem:[%s15660_s26 + $0x8] sm:$0xff] }
  0x86   : > { %v505_v34 = vmul.f32 %v15856_v5, %v444_v26 }
  0x87   : > { %12943 = vmatpush3.bf16.msra.mxu0 %v15156_v42 }
  0x88   : > { %12944 = vmatprep.subr.bf16.mxu0 %v15472_v1  ;;  %v566_v39 = vadd.f32 %v15869_v11, %v505_v34 }
  0x89   : > { %850 = vperm.xlu0 %15144, %v416_v28   ;;  %855 = vperm.xlu1 %15145, %v417_v29   ;;  %v529_v28 = vmul.f32 %v15856_v5, %v468_v19  ;;  %v504_v29 = vmul.f32 %v15856_v5, %v443_v22 }
  0x8b   : > { %12945 = vmatpush3.bf16.msra.mxu0 %v15158_v45  ;;  %v565_v33 = vadd.f32 %v15869_v11, %v504_v29  ;;  %v472_v45 = vld [vmem:[%s15660_s26 + $0xe8] sm:$0xff] }
  0x8c   : > { %12946 = vmatprep.subr.bf16.mxu0 %v15472_v1 }
  0x8d   : > { %720 = vperm.xlu0 %15144, %v390_v31   ;;  %725 = vperm.xlu1 %15145, %v391_v32   ;;  %v532_v31 = vmul.f32 %v15856_v5, %v471_v25  ;;  %v590_v32 = vadd.f32 %v15869_v11, %v529_v28 }
  0x8f   : > { %12947 = vmatpush3.bf16.msra.mxu0 %v15160_v48  ;;  %v644_v38 = vmax.f32 %v590_v32, 0.0  ;;  %v510_v32 = vmul.f32 %v15856_v5, %v449_v12 }
  0x90   : > { %12948 = vmatprep.subr.bf16.mxu0 %v15472_v1 }
  0x91   : > { %860 = vperm.xlu0 %15144, %v418_v36   ;;  %865 = vperm.xlu1 %15145, %v419_v37   ;;  %v592_v36 = vadd.f32 %v15869_v11, %v531_v30  ;;  %v593_v37 = vadd.f32 %v15869_v11, %v532_v31  ;;  %v509_v31 = vmul.f32 %v15856_v5, %v448_v10 }
  0x93   : > { %12949 = vmatpush3.bf16.msra.mxu0 %v15162_v51  ;;  %v647_v42 = vmax.f32 %v593_v37, 0.0  ;;  %v533_v51 = vmul.f32 %v15856_v5, %v472_v45  ;;  %v476_v37 = vld [vmem:[%s15660_s26 + $0x108] sm:$0xff]  ;;  %v570_v45 = vadd.f32 %v15869_v11, %v509_v31 }
  0x94   : > { %12950 = vmatprep.subr.bf16.mxu0 %v15472_v1 }
  0x95   : > { %730 = vperm.xlu0 %15144, %v392_v40   ;;  %735 = vperm.xlu1 %15145, %v393_v41   ;;  %v567_v40 = vadd.f32 %v15869_v11, %v506_v35  ;;  %v646_v41 = vmax.f32 %v592_v36, 0.0 }
  0x97   : > { %12951 = vmatpush3.bf16.msra.mxu0 %v15164_v60 }
  0x98   : > { %12952 = vmatprep.subr.bf16.mxu0 %v15472_v1 }
  0x99   : > { %870 = vperm.xlu0 %15144, %v420_v43   ;;  %875 = vperm.xlu1 %15145, %v421_v44   ;;  %v620_v43 = vmax.f32 %v566_v39, 0.0  ;;  %v621_v44 = vmax.f32 %v567_v40, 0.0  ;;  %v477_v39 = vld [vmem:[%s15660_s26 + $0x110] sm:$0xff] }
  0x9b   : > { %12953 = vmatpush3.bf16.msra.mxu0 %v15167_v7  ;;  %v475_v7 = vld [vmem:[%s15660_s26 + $0x100] sm:$0xff] }
  0x9c   : > { %12954 = vmatprep.subr.bf16.mxu0 %v15472_v1 }
  0x9d   : > { %740 = vperm.xlu0 %15144, %v394_v46   ;;  %745 = vperm.xlu1 %15145, %v395_v47   ;;  %v473_v46 = vld [vmem:[%s15660_s26 + $0xf0] sm:$0xff] }
  0x9f   : > { %12955 = vmatpush3.bf16.msra.mxu0 %v15169_v23 }
  0xa0   : > { %13188 = vmatprep.subr.bf16.mxu0 %v15472_v1  ;;  %v619_v1 = vmax.f32 %v565_v33, 0.0 }
  0xa1   : > { %880 = vperm.xlu0 %15144, %v422_v49   ;;  %885 = vperm.xlu1 %15145, %v423_v50  }
  0xa5   : > { %750 = vperm.xlu0 %15144, %v396_v52   ;;  %755 = vperm.xlu1 %15145, %v397_v53   ;;  %v534_v52 = vmul.f32 %v15856_v5, %v473_v46  ;;  %v446_v53 = vld [vmem:[%s15660_s26 + $0x18] sm:$0xff]  ;;  %v571_v46 = vadd.f32 %v15869_v11, %v510_v32 }
  0xa7   : > { %v595_v60 = vadd.f32 %v15869_v11, %v534_v52  ;;  %v625_v12 = vmax.f32 %v571_v46, 0.0 }
  0xa9   : > { %890 = vperm.xlu0 %15144, %v424_v54   ;;  %895 = vperm.xlu1 %15145, %v425_v55  }
  0xad   : > { %760 = vperm.xlu0 %15144, %v398_v56   ;;  %765 = vperm.xlu1 %15145, %v399_v57   ;;  %v447_v56 = vld [vmem:[%s15660_s26 + $0x20] sm:$0xff] }
  0xae   : > { %v508_v4 = vmul.f32 %v15856_v5, %v447_v56  ;;  %v450_v56 = vld [vmem:[%s15660_s26 + $0x38] sm:$0xff] }
  0xb1   : > { %900 = vperm.xlu0 %15144, %v426_v58   ;;  %905 = vperm.xlu1 %15145, %v427_v59   ;;  %v594_v59 = vadd.f32 %v15869_v11, %v533_v51 }
  0xb5   : > { %770 = vperm.xlu0 %15144, %v400_v61   ;;  %775 = vperm.xlu1 %15145, %v401_v62   ;;  %v474_v61 = vld [vmem:[%s15660_s26 + $0xf8] sm:$0xff] }
  0xb9   : > { %910 = vperm.xlu0 %15144, %v428_v63   ;;  %915 = vperm.xlu1 %15145, %v429_v0   ;;  %v507_v0 = vmul.f32 %v15856_v5, %v446_v53  ;;  %v538_v53 = vmul.f32 %v15856_v5, %v477_v39  ;;  %v15163_v39 = vld [vmem:[#allocation7 + $0x58] sm:$0xff]  }
  0xbb   : > { %v568_v16 = vadd.f32 %v15869_v11, %v507_v0  ;;  %v15159_v0 = vld [vmem:[#allocation7 + $0x68] sm:$0xff]  }
  0xbd   : > { %780 = vperm.xlu0 %15144, %v402_v2   ;;  %785 = vperm.xlu1 %15145, %v403_v3   ;;  %v622_v29 = vmax.f32 %v568_v16, 0.0  ;;  %v478_v16 = vld [vmem:[%s15660_s26 + $0x118] sm:$0xff] }
  0xc1   : > { %920 = vperm.xlu0 %15144, %v430_v8   ;;  %925 = vperm.xlu1 %15145, %v431_v9   ;;  %v648_v8 = vmax.f32 %v594_v59, 0.0  ;;  %v649_v9 = vmax.f32 %v595_v60, 0.0 }
  0xc5   : > { %790 = vperm.xlu0 %15144, %v404_v13   ;;  %930 = vperm.xlu1 %15145, %v432_v14  }
  0xc9   : > { %935 = vperm.xlu0 %15144, %v433_v17   ;;  %940 = vperm.xlu1 %15145, %v434_v18   ;;  %v535_v17 = vmul.f32 %v15856_v5, %v474_v61 }
  0xcb   : > { %v596_v30 = vadd.f32 %v15869_v11, %v535_v17  ;;  %v479_v17 = vld [vmem:[%s15660_s26 + $0x120] sm:$0xff] }
  0xcc   : > { %v540_v32 = vmul.f32 %v15856_v5, %v479_v17  ;;  %v454_v17 = vld [vmem:[%s15660_s26 + $0x58] sm:$0xff] }
  0xdc   : > { %v15908_v47 = vpop.permute.xlu1 %805  ;;  %v15910_v48 = vpop.permute.xlu0 %795 }
  0xdd   : > { %19544 = vst [vmem:[#allocation15_spill] sm:$0xff] %v15908_v47  ;;  %19545 = vst [vmem:[#allocation16_spill] sm:$0xff] %v15910_v48  ;;  %v969_v49 = vmul.f32 %v15908_v47, %v645_v20  ;;  %v967_v50 = vmul.f32 %v15910_v48, %v643_v21  ;;  %v569_v20 = vadd.f32 %v15869_v11, %v508_v4  ;;  %v624_v4 = vmax.f32 %v570_v45, 0.0 }
  0xde   : > { %v536_v21 = vmul.f32 %v15856_v5, %v475_v7  ;;  %v511_v7 = vmul.f32 %v15856_v5, %v450_v56  ;;  %v601_v56 = vadd.f32 %v15869_v11, %v540_v32 }
  0xdf   : > { %1023 = vst [vmem:[#allocation2 + $0xf0] sm:$0xff] %v969_v49  ;;  %1021 = vst [vmem:[#allocation2 + $0xe0] sm:$0xff] %v967_v50  ;;  %v623_v35 = vmax.f32 %v569_v20, 0.0  ;;  %v537_v49 = vmul.f32 %v15856_v5, %v476_v37 }
  0xe0   : > { %v15917_v54 = vpop.permute.xlu0 %800  ;;  %v15919_v55 = vpop.permute.xlu1 %675  ;;  %v597_v36 = vadd.f32 %v15869_v11, %v536_v21 }
  0xe1   : > { %19546 = vst [vmem:[#allocation17_spill] sm:$0xff] %v15917_v54  ;;  %19547 = vst [vmem:[#allocation18_spill] sm:$0xff] %v15919_v55  ;;  %v968_v57 = vmul.f32 %v15917_v54, %v644_v38  ;;  %v943_v58 = vmul.f32 %v15919_v55, %v619_v1  ;;  %v15959_v38 = vld [vmem:[#allocation2] sm:$0xff] }
  0xe2   : > { %v15157_v1 = vld [vmem:[#allocation7 + $0x70] sm:$0xff]   ;;  %v651_v52 = vmax.f32 %v597_v36, 0.0 }
  0xe3   : > { %1022 = vst [vmem:[#allocation2 + $0xe8] sm:$0xff] %v968_v57  ;;  %997 = vst [vmem:[#allocation2 + $0x20] sm:$0xff] %v943_v58  ;;  %v451_v57 = vld [vmem:[%s15660_s26 + $0x40] sm:$0xff] }
  0xe4   : > { %v15927_v62 = vpop.permute.xlu0 %810  ;;  %v15929_v63 = vpop.permute.xlu1 %815 }
  0xe5   : > { %19548 = vst [vmem:[#allocation19_spill] sm:$0xff] %v15927_v62  ;;  %19549 = vst [vmem:[#allocation20_spill] sm:$0xff] %v15929_v63  ;;  %v970_v2 = vmul.f32 %v15927_v62, %v646_v41  ;;  %v971_v3 = vmul.f32 %v15929_v63, %v647_v42  ;;  %v650_v42 = vmax.f32 %v596_v30, 0.0 }
  0xe7   : > { %1024 = vst [vmem:[#allocation2 + $0xf8] sm:$0xff] %v970_v2  ;;  %1025 = vst [vmem:[#allocation2 + $0x100] sm:$0xff] %v971_v3 }
  0xe8   : > { %v15938_v13 = vpop.permute.xlu0 %680  ;;  %v15940_v14 = vpop.permute.xlu1 %685 }
  0xe9   : > { %19550 = vst [vmem:[#allocation21_spill] sm:$0xff] %v15938_v13  ;;  %19551 = vst [vmem:[#allocation22_spill] sm:$0xff] %v15940_v14  ;;  %v944_v18 = vmul.f32 %v15938_v13, %v620_v43  ;;  %v945_v19 = vmul.f32 %v15940_v14, %v621_v44 }
  0xea   : > { %v1054_v22 = vld [vmem:[#allocation2 + $0x1f] sm:$0xff]  ;;  %v1079_v23 = vld [vmem:[#allocation2 + $0xe7] sm:$0xff]  ;;  %v1080_v24 = vld [vmem:[#allocation2 + $0xef] sm:$0xff] }
  0xeb   : > { %998 = vst [vmem:[#allocation2 + $0x28] sm:$0xff] %v944_v18  ;;  %999 = vst [vmem:[#allocation2 + $0x30] sm:$0xff] %v945_v19  ;;  %v1106_v25 = vpack.c.bf16 %v1054_v22, %v1053_v6  ;;  %v1119_v26 = vpack.c.bf16 %v1080_v24, %v1079_v23  ;;  %v598_v6 = vadd.f32 %v15869_v11, %v537_v49  ;;  %v15161_v18 = vld [vmem:[#allocation7 + $0x60] sm:$0xff]  }
  0xec   : > { %v15948_v27 = vpop.permute.xlu0 %820  ;;  %v15950_v28 = vpop.permute.xlu1 %825  ;;  %v572_v24 = vadd.f32 %v15869_v11, %v511_v7 }
  0xed   : > { %19552 = vst [vmem:[#allocation23_spill] sm:$0xff] %v15948_v27  ;;  %19553 = vst [vmem:[#allocation24_spill] sm:$0xff] %v15950_v28  ;;  %v972_v33 = vmul.f32 %v15948_v27, %v648_v8  ;;  %v973_v34 = vmul.f32 %v15950_v28, %v649_v9  ;;  %12713 = vmatmul.mubr.bf16.gmra.mxu0 %v1106_v25  ;;  %12765 = vmatmul.mubr.bf16.vlgmr.msra.gmra.mxu1 %v1119_v26  ;;  %v652_v21 = vmax.f32 %v598_v6, 0.0  ;;  %v494_v27 = vld [vmem:[%s15660_s26 + $0x198] sm:$0xff] }
  0xee   : > { %12817 = vmatpush3.bf16.msra.mxu1 %v15155_v15  ;;  %12768 = vmatprep.mubr.msk.bf16.mxu1 %vm15473_vm0, %v15959_v38  ;;  %v1081_v43 = vld [vmem:[#allocation2 + $0xf7] sm:$0xff]  ;;  %v1082_v44 = vld [vmem:[#allocation2 + $0xff] sm:$0xff]  ;;  %v512_v8 = vmul.f32 %v15856_v5, %v451_v57  ;;  %v599_v15 = vadd.f32 %v15869_v11, %v538_v53  ;;  %v539_v26 = vmul.f32 %v15856_v5, %v478_v16  ;;  %v626_v45 = vmax.f32 %v572_v24, 0.0 }
  0xef   : > { %1026 = vst [vmem:[#allocation2 + $0x108] sm:$0xff] %v972_v33  ;;  %1027 = vst [vmem:[#allocation2 + $0x110] sm:$0xff] %v973_v34  ;;  %12716 = vmatprep.mubr.msk.bf16.mxu0 %vm15473_vm0, %v15959_v38  ;;  %12818 = vmatprep.subr.bf16.mxu1 %v15959_v38  ;;  %v1120_v61 = vpack.c.bf16 %v1082_v44, %v1081_v43  ;;  %v452_v33 = vld [vmem:[%s15660_s26 + $0x48] sm:$0xff]  ;;  %v453_v34 = vld [vmem:[%s15660_s26 + $0x50] sm:$0xff] }
  0xf0   : > { %v15967_v40 = vpop.permute.xlu0 %690  ;;  %v15969_v41 = vpop.permute.xlu1 %695  ;;  %v573_v25 = vadd.f32 %v15869_v11, %v512_v8  ;;  %v653_v31 = vmax.f32 %v599_v15, 0.0  ;;  %v600_v46 = vadd.f32 %v15869_v11, %v539_v26  ;;  %v513_v49 = vmul.f32 %v15856_v5, %v452_v33  ;;  %v480_v57 = vld [vmem:[%s15660_s26 + $0x128] sm:$0xff] }
  0xf1   : > { %19554 = vst [vmem:[#allocation25_spill] sm:$0xff] %v15967_v40  ;;  %19555 = vst [vmem:[#allocation26_spill] sm:$0xff] %v15969_v41  ;;  %v946_v50 = vmul.f32 %v15967_v40, %v622_v29  ;;  %v947_v51 = vmul.f32 %v15969_v41, %v623_v35  ;;  %v655_v15 = vmax.f32 %v601_v56, 0.0 }
  0xf2   : > { %v1055_v58 = vld [vmem:[#allocation2 + $0x27] sm:$0xff]  ;;  %v1056_v59 = vld [vmem:[#allocation2 + $0x2f] sm:$0xff]  ;;  %12819 = vmatpush3.bf16.msra.mxu1 %v15157_v1  ;;  %v627_v53 = vmax.f32 %v573_v25, 0.0  ;;  %v574_v7 = vadd.f32 %v15869_v11, %v513_v49  ;;  %v15166_v25 = vld [vmem:[#allocation7 + $0x48] sm:$0xff]  }
  0xf3   : > { %1000 = vst [vmem:[#allocation2 + $0x38] sm:$0xff] %v946_v50  ;;  %1001 = vst [vmem:[#allocation2 + $0x40] sm:$0xff] %v947_v51  ;;  %v1107_v60 = vpack.c.bf16 %v1056_v59, %v1055_v58  ;;  %12820 = vmatprep.subr.bf16.mxu1 %v15959_v38  ;;  %v514_v50 = vmul.f32 %v15856_v5, %v453_v34  ;;  %v481_v58 = vld [vmem:[%s15660_s26 + $0x130] sm:$0xff]  ;;  %v483_v49 = vld [vmem:[%s15660_s26 + $0x140] sm:$0xff] }
  0xf4   : > { %v15980_v2 = vpop.permute.xlu0 %830  ;;  %v15982_v3 = vpop.permute.xlu1 %835  ;;  %v15165_v59 = vld [vmem:[#allocation7 + $0x50] sm:$0xff]   ;;  %v542_v16 = vmul.f32 %v15856_v5, %v481_v58  ;;  %v628_v33 = vmax.f32 %v574_v7, 0.0 }
  0xf5   : > { %19556 = vst [vmem:[#allocation27_spill] sm:$0xff] %v15980_v2  ;;  %19557 = vst [vmem:[#allocation28_spill] sm:$0xff] %v15982_v3  ;;  %v974_v9 = vmul.f32 %v15980_v2, %v650_v42  ;;  %v975_v10 = vmul.f32 %v15982_v3, %v651_v52  ;;  %12717 = vmatmul.mubr.bf16.gmra.mxu0 %v1107_v60  ;;  %12769 = vmatmul.mubr.bf16.gmra.mxu1 %v1120_v61  ;;  %v461_v42 = vld [vmem:[%s15660_s26 + $0x90] sm:$0xff] }
  0xf6   : > { %12720 = vmatprep.mubr.msk.bf16.mxu0 %vm15473_vm0, %v15959_v38  ;;  %12772 = vmatprep.mubr.msk.bf16.mxu1 %vm15473_vm0, %v15959_v38  ;;  %v1083_v22 = vld [vmem:[#allocation2 + $0x107] sm:$0xff]  ;;  %v1084_v23 = vld [vmem:[#allocation2 + $0x10f] sm:$0xff]  ;;  %v575_v8 = vadd.f32 %v15869_v11, %v514_v50 }
  0xf7   : > { %1028 = vst [vmem:[#allocation2 + $0x118] sm:$0xff] %v974_v9  ;;  %1029 = vst [vmem:[#allocation2 + $0x120] sm:$0xff] %v975_v10  ;;  %12821 = vmatpush3.bf16.msra.mxu1 %v15159_v0  ;;  %v1121_v1 = vpack.c.bf16 %v1084_v23, %v1083_v22  ;;  %v654_v0 = vmax.f32 %v600_v46, 0.0  ;;  %v541_v9 = vmul.f32 %v15856_v5, %v480_v57  ;;  %v482_v46 = vld [vmem:[%s15660_s26 + $0x138] sm:$0xff]  ;;  %v15168_v50 = vld [vmem:[#allocation7 + $0x40] sm:$0xff]  }
  0xf8   : > { %v15996_v19 = vpop.permute.xlu0 %700  ;;  %v15998_v20 = vpop.permute.xlu1 %705  ;;  %12822 = vmatprep.subr.bf16.mxu1 %v15959_v38 }
  0xf9   : > { %19558 = vst [vmem:[#allocation29_spill] sm:$0xff] %v15996_v19  ;;  %19559 = vst [vmem:[#allocation30_spill] sm:$0xff] %v15998_v20  ;;  %v16005_v29 = vmul.f32 %v15996_v19, %v624_v4  ;;  %v16008_v30 = vmul.f32 %v15998_v20, %v625_v12  ;;  %v602_v34 = vadd.f32 %v15869_v11, %v541_v9  ;;  %v456_v9 = vld [vmem:[%s15660_s26 + $0x68] sm:$0xff] }
  0xfa   : > { %v1057_v35 = vld [vmem:[#allocation2 + $0x37] sm:$0xff]  ;;  %v1058_v36 = vld [vmem:[#allocation2 + $0x3f] sm:$0xff] }
  0xfb   : > { %1002 = vst [vmem:[#allocation2 + $0x48] sm:$0xff] %v16005_v29  ;;  %1003 = vst [vmem:[#allocation2 + $0x50] sm:$0xff] %v16008_v30  ;;  %v1108_v37 = vpack.c.bf16 %v1058_v36, %v1057_v35  ;;  %12823 = vmatpush3.bf16.msra.mxu1 %v15161_v18  ;;  %v455_v18 = vld [vmem:[%s15660_s26 + $0x60] sm:$0xff]  ;;  %v515_v35 = vmul.f32 %v15856_v5, %v454_v17  ;;  %v457_v17 = vld [vmem:[%s15660_s26 + $0x70] sm:$0xff] }
  0xfc   : > { %v16017_v43 = vpop.permute.xlu0 %840  ;;  %v16019_v44 = vpop.permute.xlu1 %845  ;;  %12824 = vmatprep.subr.bf16.mxu1 %v15959_v38  ;;  %v516_v36 = vmul.f32 %v15856_v5, %v455_v18 }
  0xfd   : > { %19560 = vst [vmem:[#allocation31_spill] sm:$0xff] %v16017_v43  ;;  %19561 = vst [vmem:[#allocation32_spill] sm:$0xff] %v16019_v44  ;;  %v976_v51 = vmul.f32 %v16017_v43, %v652_v21  ;;  %v977_v52 = vmul.f32 %v16019_v44, %v653_v31  ;;  %12721 = vmatmul.mubr.bf16.gmra.mxu0 %v1108_v37  ;;  %12773 = vmatmul.mubr.bf16.gmra.mxu1 %v1121_v1  ;;  %v465_v43 = vld [vmem:[%s15660_s26 + $0xb0] sm:$0xff] }
  0xfe   : > { %12724 = vmatprep.mubr.msk.bf16.mxu0 %vm15473_vm0, %v15959_v38  ;;  %12776 = vmatprep.mubr.msk.bf16.mxu1 %vm15473_vm0, %v15959_v38  ;;  %v1085_v4 = vld [vmem:[#allocation2 + $0x117] sm:$0xff]  ;;  %v1086_v6 = vld [vmem:[#allocation2 + $0x11f] sm:$0xff]  ;;  %v576_v58 = vadd.f32 %v15869_v11, %v515_v35  ;;  %v517_v35 = vmul.f32 %v15856_v5, %v456_v9 }
  0xff   : > { %1030 = vst [vmem:[#allocation2 + $0x128] sm:$0xff] %v976_v51  ;;  %1031 = vst [vmem:[#allocation2 + $0x130] sm:$0xff] %v977_v52  ;;  %12825 = vmatpush3.bf16.msra.mxu1 %v15163_v39  ;;  %v1122_v24 = vpack.c.bf16 %v1086_v6, %v1085_v4  ;;  %v629_v39 = vmax.f32 %v575_v8, 0.0  ;;  %v577_v8 = vadd.f32 %v15869_v11, %v516_v36  ;;  %v1533_v48 = vld [vmem:[#allocation2 + $0x118] sm:$0xff] }
 0x100   : > { %v16034_v60 = vpop.permute.xlu0 %710  ;;  %v16036_v61 = vpop.permute.xlu1 %715  ;;  %12826 = vmatprep.subr.bf16.mxu1 %v15959_v38 }
 0x101   : > { %19562 = vst [vmem:[#allocation33_spill] sm:$0xff] %v16034_v60  ;;  %19563 = vst [vmem:[#allocation34_spill] sm:$0xff] %v16036_v61  ;;  %v16043_v10 = vmul.f32 %v16034_v60, %v626_v45  ;;  %v16046_v12 = vmul.f32 %v16036_v61, %v627_v53  ;;  %v603_v45 = vadd.f32 %v15869_v11, %v542_v16  ;;  %v656_v53 = vmax.f32 %v602_v34, 0.0 }
 0x102   : > { %v1059_v21 = vld [vmem:[#allocation2 + $0x47] sm:$0xff]  ;;  %v1060_v22 = vld [vmem:[#allocation2 + $0x4f] sm:$0xff] }
 0x103   : > { %1004 = vst [vmem:[#allocation2 + $0x58] sm:$0xff] %v16043_v10  ;;  %1005 = vst [vmem:[#allocation2 + $0x60] sm:$0xff] %v16046_v12  ;;  %v1109_v23 = vpack.c.bf16 %v1060_v22, %v1059_v21  ;;  %12827 = vmatpush3.bf16.msra.mxu1 %v15165_v59  ;;  %v543_v59 = vmul.f32 %v15856_v5, %v482_v46  ;;  %v657_v7 = vmax.f32 %v603_v45, 0.0  ;;  %v484_v45 = vld [vmem:[%s15660_s26 + $0x148] sm:$0xff]  ;;  %v485_v46 = vld [vmem:[%s15660_s26 + $0x150] sm:$0xff] }
 0x104   : > { %v16055_v31 = vpop.permute.xlu0 %850  ;;  %v16057_v32 = vpop.permute.xlu1 %855  ;;  %12828 = vmatprep.subr.bf16.mxu1 %v15959_v38  ;;  %v460_v22 = vld [vmem:[%s15660_s26 + $0x88] sm:$0xff] }
 0x105   : > { %19564 = vst [vmem:[#allocation35_spill] sm:$0xff] %v16055_v31  ;;  %19565 = vst [vmem:[#allocation36_spill] sm:$0xff] %v16057_v32  ;;  %v978_v37 = vmul.f32 %v16055_v31, %v654_v0  ;;  %v979_v1 = vmul.f32 %v16057_v32, %v655_v15  ;;  %12725 = vmatmul.mubr.bf16.gmra.mxu0 %v1109_v23  ;;  %12777 = vmatmul.mubr.bf16.gmra.mxu1 %v1122_v24  ;;  %v16211_v32 = vld [vmem:[%s19463_s3] ss:$0 sm:$0xff] }
 0x106   : > { %12728 = vmatprep.mubr.msk.bf16.mxu0 %vm15473_vm0, %v15959_v38  ;;  %12780 = vmatprep.mubr.msk.bf16.mxu1 %vm15473_vm0, %v15959_v38  ;;  %v1087_v56 = vld [vmem:[#allocation2 + $0x127] sm:$0xff]  ;;  %v1088_v57 = vld [vmem:[#allocation2 + $0x12f] sm:$0xff]  ;;  %v544_v0 = vmul.f32 %v15856_v5, %v483_v49 }
 0x107   : > { %1032 = vst [vmem:[#allocation2 + $0x138] sm:$0xff] %v978_v37  ;;  %1033 = vst [vmem:[#allocation2 + $0x140] sm:$0xff] %v979_v1  ;;  %12829 = vmatpush3.bf16.msra.mxu1 %v15166_v25  ;;  %v1123_v21 = vpack.c.bf16 %v1088_v57, %v1087_v56  ;;  %v630_v25 = vmax.f32 %v576_v58, 0.0  ;;  %v631_v1 = vmax.f32 %v577_v8, 0.0  ;;  %v578_v58 = vadd.f32 %v15869_v11, %v517_v35 }
 0x108   : > { %v16072_v51 = vpop.permute.xlu0 %720  ;;  %v16074_v52 = vpop.permute.xlu1 %725  ;;  %12830 = vmatprep.subr.bf16.mxu1 %v15959_v38  ;;  %v605_v34 = vadd.f32 %v15869_v11, %v544_v0  ;;  %v546_v0 = vmul.f32 %v15856_v5, %v485_v46 }
 0x109   : > { %19566 = vst [vmem:[#allocation37_spill] sm:$0xff] %v16072_v51  ;;  %19567 = vst [vmem:[#allocation38_spill] sm:$0xff] %v16074_v52  ;;  %v16081_v4 = vmul.f32 %v16072_v51, %v628_v33  ;;  %v16084_v6 = vmul.f32 %v16074_v52, %v629_v39  ;;  %v604_v33 = vadd.f32 %v15869_v11, %v543_v59 }
 0x10a   : > { %v1061_v15 = vld [vmem:[#allocation2 + $0x57] sm:$0xff]  ;;  %v1062_v16 = vld [vmem:[#allocation2 + $0x5f] sm:$0xff]  ;;  %v518_v39 = vmul.f32 %v15856_v5, %v457_v17  ;;  %v545_v59 = vmul.f32 %v15856_v5, %v484_v45  ;;  %v659_v9 = vmax.f32 %v605_v34, 0.0 }
 0x10b   : > { %1006 = vst [vmem:[#allocation2 + $0x68] sm:$0xff] %v16081_v4  ;;  %1007 = vst [vmem:[#allocation2 + $0x70] sm:$0xff] %v16084_v6  ;;  %v1110_v18 = vpack.c.bf16 %v1062_v16, %v1061_v15  ;;  %12831 = vmatpush3.bf16.msra.mxu1 %v15168_v50  ;;  %v458_v16 = vld [vmem:[%s15660_s26 + $0x78] sm:$0xff] }
 0x10c   : > { %v16093_v23 = vpop.permute.xlu0 %860  ;;  %v16095_v24 = vpop.permute.xlu1 %865  ;;  %13064 = vmatprep.subr.bf16.mxu1 %v15959_v38  ;;  %v579_v15 = vadd.f32 %v15869_v11, %v518_v39  ;;  %v607_v39 = vadd.f32 %v15869_v11, %v546_v0  ;;  %v519_v45 = vmul.f32 %v15856_v5, %v458_v16 }
 0x10d   : > { %19568 = vst [vmem:[#allocation39_spill] sm:$0xff] %v16093_v23  ;;  %19569 = vst [vmem:[#allocation40_spill] sm:$0xff] %v16095_v24  ;;  %v980_v36 = vmul.f32 %v16093_v23, %v656_v53  ;;  %v981_v37 = vmul.f32 %v16095_v24, %v657_v7  ;;  %12729 = vmatmul.mubr.bf16.gmra.mxu0 %v1110_v18  ;;  %12781 = vmatmul.mubr.bf16.gmra.mxu1 %v1123_v21  ;;  %v658_v53 = vmax.f32 %v604_v33, 0.0  ;;  %v459_v21 = vld [vmem:[%s15660_s26 + $0x80] sm:$0xff] }
 0x10e   : > { %12732 = vmatprep.mubr.msk.bf16.mxu0 %vm15473_vm0, %v15959_v38  ;;  %12784 = vmatprep.mubr.msk.bf16.mxu1 %vm15473_vm0, %v15959_v38  ;;  %v1089_v56 = vld [vmem:[#allocation2 + $0x137] sm:$0xff]  ;;  %v1090_v57 = vld [vmem:[#allocation2 + $0x13f] sm:$0xff] }
 0x10f   : > { %1034 = vst [vmem:[#allocation2 + $0x148] sm:$0xff] %v980_v36  ;;  %1035 = vst [vmem:[#allocation2 + $0x150] sm:$0xff] %v981_v37  ;;  %v1124_v35 = vpack.c.bf16 %v1090_v57, %v1089_v56  ;;  %v632_v37 = vmax.f32 %v578_v58, 0.0  ;;  %v633_v56 = vmax.f32 %v579_v15, 0.0  ;;  %v520_v57 = vmul.f32 %v15856_v5, %v459_v21  ;;  %v463_v23 = vld [vmem:[%s15660_s26 + $0xa0] sm:$0xff] }
 0x110   : > { %v16110_v49 = vpop.permute.xlu0 %730  ;;  %v16112_v50 = vpop.permute.xlu1 %735  ;;  %v580_v15 = vadd.f32 %v15869_v11, %v519_v45 }
 0x111   : > { %19570 = vst [vmem:[#allocation41_spill] sm:$0xff] %v16110_v49  ;;  %19571 = vst [vmem:[#allocation42_spill] sm:$0xff] %v16112_v50  ;;  %v16118_v7 = vmul.f32 %v16110_v49, %v630_v25  ;;  %v16121_v8 = vmul.f32 %v16112_v50, %v631_v1  ;;  %v606_v1 = vadd.f32 %v15869_v11, %v545_v59  ;;  %v487_v25 = vld [vmem:[%s15660_s26 + $0x160] sm:$0xff] }
 0x112   : > { %v1063_v17 = vld [vmem:[#allocation2 + $0x67] sm:$0xff]  ;;  %v1064_v18 = vld [vmem:[#allocation2 + $0x6f] sm:$0xff]  ;;  %v548_v21 = vmul.f32 %v15856_v5, %v487_v25 }
 0x113   : > { %1008 = vst [vmem:[#allocation2 + $0x78] sm:$0xff] %v16118_v7  ;;  %1009 = vst [vmem:[#allocation2 + $0x80] sm:$0xff] %v16121_v8  ;;  %v1111_v33 = vpack.c.bf16 %v1064_v18, %v1063_v17  ;;  %v486_v18 = vld [vmem:[%s15660_s26 + $0x158] sm:$0xff]  ;;  %v660_v59 = vmax.f32 %v606_v1, 0.0 }
 0x114   : > { %v16130_v36 = vpop.permute.xlu0 %870  ;;  %v16132_v34 = vpop.permute.xlu1 %875  ;;  %v547_v16 = vmul.f32 %v15856_v5, %v486_v18 }
 0x115   : > { %19572 = vst [vmem:[#allocation43_spill] sm:$0xff] %v16130_v36  ;;  %19573 = vst [vmem:[#allocation44_spill] sm:$0xff] %v16132_v34  ;;  %v982_v46 = vmul.f32 %v16130_v36, %v658_v53  ;;  %v983_v17 = vmul.f32 %v16132_v34, %v659_v9  ;;  %12733 = vmatmul.mubr.bf16.gmra.mxu0 %v1111_v33  ;;  %12785 = vmatmul.mubr.bf16.gmra.mxu1 %v1124_v35 }
 0x116   : > { %12736 = vmatprep.mubr.msk.bf16.mxu0 %vm15473_vm0, %v15959_v38  ;;  %12788 = vmatprep.mubr.msk.bf16.mxu1 %vm15473_vm0, %v15959_v38  ;;  %v1091_v0 = vld [vmem:[#allocation2 + $0x147] sm:$0xff]  ;;  %v1092_v9 = vld [vmem:[#allocation2 + $0x14f] sm:$0xff]  ;;  %v608_v18 = vadd.f32 %v15869_v11, %v547_v16  ;;  %v609_v34 = vadd.f32 %v15869_v11, %v548_v21  ;;  %v521_v36 = vmul.f32 %v15856_v5, %v460_v22 }
 0x117   : > { %1036 = vst [vmem:[#allocation2 + $0x158] sm:$0xff] %v982_v46  ;;  %1037 = vst [vmem:[#allocation2 + $0x160] sm:$0xff] %v983_v17  ;;  %v661_v46 = vmax.f32 %v607_v39, 0.0  ;;  %v581_v17 = vadd.f32 %v15869_v11, %v520_v57  ;;  %v1125_v25 = vpack.c.bf16 %v1092_v9, %v1091_v0  ;;  %v634_v57 = vmax.f32 %v580_v15, 0.0  ;;  %v1539_v50 = vld [vmem:[#allocation2 + $0x148] sm:$0xff]  ;;  %v1540_v49 = vld [vmem:[#allocation2 + $0x150] sm:$0xff] }
 0x118   : > { %v16146_v53 = vpop.permute.xlu0 %740  ;;  %v16148_v58 = vpop.permute.xlu1 %745  ;;  %v522_v9 = vmul.f32 %v15856_v5, %v461_v42  ;;  %v662_v15 = vmax.f32 %v608_v18, 0.0  ;;  %v582_v42 = vadd.f32 %v15869_v11, %v521_v36 }
 0x119   : > { %19574 = vst [vmem:[#allocation45_spill] sm:$0xff] %v16146_v53  ;;  %19575 = vst [vmem:[#allocation46_spill] sm:$0xff] %v16148_v58  ;;  %v16154_v33 = vmul.f32 %v16146_v53, %v632_v37  ;;  %v16157_v35 = vmul.f32 %v16148_v58, %v633_v56  ;;  %v635_v0 = vmax.f32 %v581_v17, 0.0  ;;  %v489_v37 = vld [vmem:[%s15660_s26 + $0x170] sm:$0xff] }
 0x11a   : > { %v1065_v26 = vld [vmem:[#allocation2 + $0x77] sm:$0xff]  ;;  %v1066_v1 = vld [vmem:[#allocation2 + $0x7f] sm:$0xff]  ;;  %v550_v17 = vmul.f32 %v15856_v5, %v489_v37 }
 0x11b   : > { %1010 = vst [vmem:[#allocation2 + $0x88] sm:$0xff] %v16154_v33  ;;  %1011 = vst [vmem:[#allocation2 + $0x90] sm:$0xff] %v16157_v35  ;;  %v1112_v45 = vpack.c.bf16 %v1066_v1, %v1065_v26  ;;  %v488_v1 = vld [vmem:[%s15660_s26 + $0x168] sm:$0xff]  ;;  %v490_v37 = vld [vmem:[%s15660_s26 + $0x178] sm:$0xff] }
 0x11c   : > { %v16166_v56 = vpop.permute.xlu0 %880  ;;  %v16168_v39 = vpop.permute.xlu1 %885 }
 0x11d   : > { %19576 = vst [vmem:[#allocation47_spill] sm:$0xff] %v16166_v56  ;;  %19577 = vst [vmem:[#allocation48_spill] sm:$0xff] %v16168_v39  ;;  %v984_v24 = vmul.f32 %v16166_v56, %v660_v59  ;;  %v985_v26 = vmul.f32 %v16168_v39, %v661_v46  ;;  %12737 = vmatmul.mubr.bf16.gmra.mxu0 %v1112_v45  ;;  %12789 = vmatmul.mubr.bf16.gmra.mxu1 %v1125_v25  ;;  %v663_v25 = vmax.f32 %v609_v34, 0.0  ;;  %v462_v39 = vld [vmem:[%s15660_s26 + $0x98] sm:$0xff] }
 0x11e   : > { %12740 = vmatprep.mubr.msk.bf16.mxu0 %vm15473_vm0, %v15959_v38  ;;  %12792 = vmatprep.mubr.msk.bf16.mxu1 %vm15473_vm0, %v15959_v38  ;;  %v1093_v16 = vld [vmem:[#allocation2 + $0x157] sm:$0xff]  ;;  %v1094_v21 = vld [vmem:[#allocation2 + $0x15f] sm:$0xff]  ;;  %v549_v46 = vmul.f32 %v15856_v5, %v488_v1  ;;  %v611_v1 = vadd.f32 %v15869_v11, %v550_v17 }
 0x11f   : > { %1038 = vst [vmem:[#allocation2 + $0x168] sm:$0xff] %v984_v24  ;;  %1039 = vst [vmem:[#allocation2 + $0x170] sm:$0xff] %v985_v26  ;;  %v583_v26 = vadd.f32 %v15869_v11, %v522_v9  ;;  %v1126_v5 = vpack.c.bf16 %v1094_v21, %v1093_v16  ;;  %v1541_v61 = vld [vmem:[#allocation2 + $0x158] sm:$0xff]  ;;  %v1542_v60 = vld [vmem:[#allocation2 + $0x160] sm:$0xff] }
 0x120   : > { %v16182_v22 = vpop.permute.xlu0 %750  ;;  %v16184_v59 = vpop.permute.xlu1 %755  ;;  %v610_v9 = vadd.f32 %v15869_v11, %v549_v46  ;;  %v491_v46 = vld [vmem:[%s15660_s26 + $0x180] sm:$0xff] }
 0x121   : > { %19578 = vst [vmem:[#allocation49_spill] sm:$0xff] %v16182_v22  ;;  %19579 = vst [vmem:[#allocation50_spill] sm:$0xff] %v16184_v59  ;;  %v16190_v45 = vmul.f32 %v16182_v22, %v634_v57  ;;  %v16193_v24 = vmul.f32 %v16184_v59, %v635_v0  ;;  %v636_v0 = vmax.f32 %v582_v42, 0.0  ;;  %v524_v42 = vmul.f32 %v16211_v32, %v463_v23  ;;  %v16230_v23 = vld [vmem:[%s19464_s4] ss:$0 sm:$0xff]  ;;  %v1537_v59 = vld [vmem:[#allocation2 + $0x138] sm:$0xff] }
 0x122   : > { %v1067_v56 = vld [vmem:[#allocation2 + $0x87] sm:$0xff]  ;;  %v1068_v18 = vld [vmem:[#allocation2 + $0x8f] sm:$0xff] }
 0x123   : > { %1012 = vst [vmem:[#allocation2 + $0x98] sm:$0xff] %v16190_v45  ;;  %1013 = vst [vmem:[#allocation2 + $0xa0] sm:$0xff] %v16193_v24  ;;  %v1113_v36 = vpack.c.bf16 %v1068_v18, %v1067_v56  ;;  %v523_v56 = vmul.f32 %v16211_v32, %v462_v39  ;;  %v637_v18 = vmax.f32 %v583_v26, 0.0  ;;  %v1538_v22 = vld [vmem:[#allocation2 + $0x140] sm:$0xff] }
 0x124   : > { %v16202_v57 = vpop.permute.xlu0 %890  ;;  %v16204_v34 = vpop.permute.xlu1 %895 }
 0x125   : > { %19580 = vst [vmem:[#allocation51_spill] sm:$0xff] %v16202_v57  ;;  %19581 = vst [vmem:[#allocation52_spill] sm:$0xff] %v16204_v34  ;;  %v986_v16 = vmul.f32 %v16202_v57, %v662_v15  ;;  %v987_v21 = vmul.f32 %v16204_v34, %v663_v25  ;;  %12741 = vmatmul.mubr.bf16.gmra.mxu0 %v1113_v36  ;;  %12793 = vmatmul.mubr.bf16.gmra.mxu1 %v1126_v5  ;;  %v664_v15 = vmax.f32 %v610_v9, 0.0  ;;  %v464_v57 = vld [vmem:[%s15660_s26 + $0xa8] sm:$0xff] }
 0x126   : > { %12744 = vmatprep.mubr.msk.bf16.mxu0 %vm15473_vm0, %v15959_v38  ;;  %12796 = vmatprep.mubr.msk.bf16.mxu1 %vm15473_vm0, %v15959_v38  ;;  %v1095_v17 = vld [vmem:[#allocation2 + $0x167] sm:$0xff]  ;;  %v1096_v25 = vld [vmem:[#allocation2 + $0x16f] sm:$0xff]  ;;  %v584_v26 = vadd.f32 %v16230_v23, %v523_v56  ;;  %v551_v36 = vmul.f32 %v16211_v32, %v490_v37  ;;  %v552_v5 = vmul.f32 %v16211_v32, %v491_v46  ;;  %v665_v9 = vmax.f32 %v611_v1, 0.0 }
 0x127   : > { %1040 = vst [vmem:[#allocation2 + $0x178] sm:$0xff] %v986_v16  ;;  %1041 = vst [vmem:[#allocation2 + $0x180] sm:$0xff] %v987_v21  ;;  %v585_v34 = vadd.f32 %v16230_v23, %v524_v42  ;;  %v1127_v56 = vpack.c.bf16 %v1096_v25, %v1095_v17  ;;  %v525_v2 = vmul.f32 %v16211_v32, %v464_v57  ;;  %v492_v25 = vld [vmem:[%s15660_s26 + $0x188] sm:$0xff]  ;;  %v1544_v40 = vld [vmem:[#allocation2 + $0x170] sm:$0xff] }
 0x128   : > { %v16223_v11 = vpop.permute.xlu0 %760  ;;  %v16225_v39 = vpop.permute.xlu1 %765  ;;  %v638_v42 = vmax.f32 %v584_v26, 0.0  ;;  %v612_v46 = vadd.f32 %v16230_v23, %v551_v36  ;;  %v613_v3 = vadd.f32 %v16230_v23, %v552_v5  ;;  %v526_v17 = vmul.f32 %v16211_v32, %v465_v43  ;;  %v1543_v41 = vld [vmem:[#allocation2 + $0x168] sm:$0xff] }
 0x129   : > { %19582 = vst [vmem:[#allocation53_spill] sm:$0xff] %v16223_v11  ;;  %19583 = vst [vmem:[#allocation54_spill] sm:$0xff] %v16225_v39  ;;  %v16236_v16 = vmul.f32 %v16223_v11, %v636_v0  ;;  %v16239_v21 = vmul.f32 %v16225_v39, %v637_v18  ;;  %v493_v0 = vld [vmem:[%s15660_s26 + $0x190] sm:$0xff]  ;;  %v586_v43 = vadd.f32 %v16230_v23, %v525_v2 }
 0x12a   : > { %v1069_v31 = vld [vmem:[#allocation2 + $0x97] sm:$0xff]  ;;  %v1070_v44 = vld [vmem:[#allocation2 + $0x9f] sm:$0xff]  ;;  %v666_v26 = vmax.f32 %v612_v46, 0.0  ;;  %v553_v5 = vmul.f32 %v16211_v32, %v492_v25 }
 0x12b   : > { %1014 = vst [vmem:[#allocation2 + $0xa8] sm:$0xff] %v16236_v16  ;;  %1015 = vst [vmem:[#allocation2 + $0xb0] sm:$0xff] %v16239_v21  ;;  %v1114_v37 = vpack.c.bf16 %v1070_v44, %v1069_v31  ;;  %v639_v31 = vmax.f32 %v585_v34, 0.0 }
 0x12c   : > { %v16248_v18 = vpop.permute.xlu0 %900  ;;  %v16250_v1 = vpop.permute.xlu1 %905  ;;  %v614_v25 = vadd.f32 %v16230_v23, %v553_v5 }
 0x12d   : > { %19584 = vst [vmem:[#allocation55_spill] sm:$0xff] %v16248_v18  ;;  %19585 = vst [vmem:[#allocation56_spill] sm:$0xff] %v16250_v1  ;;  %v988_v28 = vmul.f32 %v16248_v18, %v664_v15  ;;  %v989_v44 = vmul.f32 %v16250_v1, %v665_v9  ;;  %12745 = vmatmul.mubr.bf16.gmra.mxu0 %v1114_v37  ;;  %12797 = vmatmul.mubr.bf16.gmra.mxu1 %v1127_v56  ;;  %v667_v56 = vmax.f32 %v613_v3, 0.0  ;;  %v466_v1 = vld [vmem:[%s15660_s26 + $0xb8] sm:$0xff] }
 0x12e   : > { %12748 = vmatprep.mubr.msk.bf16.mxu0 %vm15473_vm0, %v15959_v38  ;;  %12800 = vmatprep.mubr.msk.bf16.mxu1 %vm15473_vm0, %v15959_v38  ;;  %v1097_v34 = vld [vmem:[#allocation2 + $0x177] sm:$0xff]  ;;  %v1098_v36 = vld [vmem:[#allocation2 + $0x17f] sm:$0xff]  ;;  %v554_v9 = vmul.f32 %v16211_v32, %v493_v0  ;;  %v527_v62 = vmul.f32 %v16211_v32, %v466_v1  ;;  %v668_v5 = vmax.f32 %v614_v25, 0.0 }
 0x12f   : > { %1042 = vst [vmem:[#allocation2 + $0x188] sm:$0xff] %v988_v28  ;;  %1043 = vst [vmem:[#allocation2 + $0x190] sm:$0xff] %v989_v44  ;;  %v587_v44 = vadd.f32 %v16230_v23, %v526_v17  ;;  %v1128_v0 = vpack.c.bf16 %v1098_v36, %v1097_v34  ;;  %v640_v17 = vmax.f32 %v586_v43, 0.0  ;;  %v555_v36 = vmul.f32 %v16211_v32, %v494_v27  ;;  %v496_v43 = vld [vmem:[%s15660_s26 + $0x1a8] sm:$0xff] }
 0x130   : > { %v16264_v57 = vpop.permute.xlu0 %770  ;;  %v16266_v15 = vpop.permute.xlu1 %775  ;;  %v615_v63 = vadd.f32 %v16230_v23, %v554_v9  ;;  %v588_v27 = vadd.f32 %v16230_v23, %v527_v62  ;;  %v1545_v55 = vld [vmem:[#allocation2 + $0x178] sm:$0xff] }
 0x131   : > { %19586 = vst [vmem:[#allocation57_spill] sm:$0xff] %v16264_v57  ;;  %19587 = vst [vmem:[#allocation58_spill] sm:$0xff] %v16266_v15  ;;  %v16272_v37 = vmul.f32 %v16264_v57, %v638_v42  ;;  %v16275_v28 = vmul.f32 %v16266_v15, %v639_v31  ;;  %v641_v34 = vmax.f32 %v587_v44, 0.0  ;;  %v1535_v15 = vld [vmem:[#allocation2 + $0x128] sm:$0xff]  ;;  %v1536_v57 = vld [vmem:[#allocation2 + $0x130] sm:$0xff] }
 0x132   : > { %v1071_v18 = vld [vmem:[#allocation2 + $0xa7] sm:$0xff]  ;;  %v1072_v46 = vld [vmem:[#allocation2 + $0xaf] sm:$0xff]  ;;  %v669_v9 = vmax.f32 %v615_v63, 0.0 }
 0x133   : > { %1016 = vst [vmem:[#allocation2 + $0xb8] sm:$0xff] %v16272_v37  ;;  %1017 = vst [vmem:[#allocation2 + $0xc0] sm:$0xff] %v16275_v28  ;;  %v1115_v2 = vpack.c.bf16 %v1072_v46, %v1071_v18  ;;  %v495_v46 = vld [vmem:[%s15660_s26 + $0x1a0] sm:$0xff] }
 0x134   : > { %v16284_v31 = vpop.permute.xlu0 %910  ;;  %v16286_v3 = vpop.permute.xlu1 %915 }
 0x135   : > { %19588 = vst [vmem:[#allocation59_spill] sm:$0xff] %v16284_v31  ;;  %19589 = vst [vmem:[#allocation60_spill] sm:$0xff] %v16286_v3  ;;  %v990_v47 = vmul.f32 %v16284_v31, %v666_v26  ;;  %v991_v18 = vmul.f32 %v16286_v3, %v667_v56  ;;  %12749 = vmatmul.mubr.bf16.gmra.mxu0 %v1115_v2  ;;  %12801 = vmatmul.mubr.bf16.gmra.mxu1 %v1128_v0 }
 0x136   : > { %12752 = vmatprep.mubr.msk.bf16.mxu0 %vm15473_vm0, %v15959_v38  ;;  %12804 = vmatprep.mubr.msk.bf16.mxu1 %vm15473_vm0, %v15959_v38  ;;  %v1099_v56 = vld [vmem:[#allocation2 + $0x187] sm:$0xff]  ;;  %v1100_v44 = vld [vmem:[#allocation2 + $0x18f] sm:$0xff]  ;;  %v556_v2 = vmul.f32 %v16211_v32, %v495_v46 }
 0x137   : > { %1044 = vst [vmem:[#allocation2 + $0x198] sm:$0xff] %v990_v47  ;;  %1045 = vst [vmem:[#allocation2 + $0x1a0] sm:$0xff] %v991_v18  ;;  %v616_v47 = vadd.f32 %v16230_v23, %v555_v36  ;;  %v557_v18 = vmul.f32 %v16211_v32, %v496_v43  ;;  %v1129_v62 = vpack.c.bf16 %v1100_v44, %v1099_v56 }
 0x138   : > { %v16300_v1 = vpop.permute.xlu0 %780  ;;  %v16302_v26 = vpop.permute.xlu1 %785  ;;  %v617_v36 = vadd.f32 %v16230_v23, %v556_v2 }
 0x139   : > { %19590 = vst [vmem:[#allocation61_spill] sm:$0xff] %v16300_v1  ;;  %19591 = vst [vmem:[#allocation62_spill] sm:$0xff] %v16302_v26  ;;  %v16307_v0 = vmul.f32 %v16300_v1, %v640_v17  ;;  %v16310_v42 = vmul.f32 %v16302_v26, %v641_v34  ;;  %v642_v34 = vmax.f32 %v588_v27, 0.0  ;;  %v670_v54 = vmax.f32 %v616_v47, 0.0 }
 0x13a   : > { %v1073_v3 = vld [vmem:[#allocation2 + $0xb7] sm:$0xff]  ;;  %v1074_v31 = vld [vmem:[#allocation2 + $0xbf] sm:$0xff] }
 0x13b   : > { %1018 = vst [vmem:[#allocation2 + $0xc8] sm:$0xff] %v16307_v0  ;;  %1019 = vst [vmem:[#allocation2 + $0xd0] sm:$0xff] %v16310_v42  ;;  %v1116_v63 = vpack.c.bf16 %v1074_v31, %v1073_v3  ;;  %v618_v31 = vadd.f32 %v16230_v23, %v557_v18  ;;  %v671_v23 = vmax.f32 %v617_v36, 0.0 }
 0x13c   : > { %v16318_v17 = vpop.permute.xlu0 %920  ;;  %v16320_v46 = vpop.permute.xlu1 %925 }
 0x13d   : > { %19592 = vst [vmem:[#allocation63_spill] sm:$0xff] %v16318_v17  ;;  %19593 = vst [vmem:[#allocation64_spill] sm:$0xff] %v16320_v46  ;;  %v992_v32 = vmul.f32 %v16318_v17, %v668_v5  ;;  %v993_v43 = vmul.f32 %v16320_v46, %v669_v9  ;;  %12753 = vmatmul.mubr.bf16.gmra.mxu0 %v1116_v63  ;;  %12805 = vmatmul.mubr.bf16.gmra.mxu1 %v1129_v62  ;;  %v672_v2 = vmax.f32 %v618_v31, 0.0 }
 0x13e   : > { %12756 = vmatprep.mubr.msk.bf16.mxu0 %vm15473_vm0, %v15959_v38  ;;  %12808 = vmatprep.mubr.msk.bf16.mxu1 %vm15473_vm0, %v15959_v38  ;;  %v1101_v5 = vld [vmem:[#allocation2 + $0x197] sm:$0xff]  ;;  %v1102_v44 = vld [vmem:[#allocation2 + $0x19f] sm:$0xff] }
 0x13f   : > { %1046 = vst [vmem:[#allocation2 + $0x1a8] sm:$0xff] %v992_v32  ;;  %1047 = vst [vmem:[#allocation2 + $0x1b0] sm:$0xff] %v993_v43  ;;  %v1130_v62 = vpack.c.bf16 %v1102_v44, %v1101_v5 }
 0x140   : > { %v16330_v3 = vpop.permute.xlu0 %790  ;;  %v16332_v56 = vpop.permute.xlu1 %930 }
 0x141   : > { %19594 = vst [vmem:[#allocation65_spill] sm:$0xff] %v16330_v3  ;;  %19595 = vst [vmem:[#allocation66_spill] sm:$0xff] %v16332_v56  ;;  %v16335_v9 = vmul.f32 %v16330_v3, %v642_v34  ;;  %v994_v27 = vmul.f32 %v16332_v56, %v670_v54  ;;  %v1532_v56 = vld [vmem:[#allocation2 + $0x110] sm:$0xff]  ;;  %v1534_v3 = vld [vmem:[#allocation2 + $0x120] sm:$0xff] }
 0x142   : > { %v1075_v47 = vld [vmem:[#allocation2 + $0xc7] sm:$0xff]  ;;  %v1076_v18 = vld [vmem:[#allocation2 + $0xcf] sm:$0xff] }
 0x143   : > { %1020 = vst [vmem:[#allocation2 + $0xd8] sm:$0xff] %v16335_v9  ;;  %1048 = vst [vmem:[#allocation2 + $0x1b8] sm:$0xff] %v994_v27  ;;  %v1117_v63 = vpack.c.bf16 %v1076_v18, %v1075_v47  ;;  %v15170_v18 = vld [vmem:[#allocation7 + $0xf8] sm:$0xff]  }
 0x144   : > { %v16339_v32 = vpop.permute.xlu0 %935  ;;  %v16341_v43 = vpop.permute.xlu1 %940 }
 0x145   : > { %19596 = vst [vmem:[#allocation67_spill] sm:$0xff] %v16339_v32  ;;  %19597 = vst [vmem:[#allocation68_spill] sm:$0xff] %v16341_v43  ;;  %v995_v25 = vmul.f32 %v16339_v32, %v671_v23  ;;  %v996_v34 = vmul.f32 %v16341_v43, %v672_v2  ;;  %12757 = vmatmul.mubr.bf16.gmra.mxu0 %v1117_v63  ;;  %12809 = vmatmul.mubr.bf16.gmra.mxu1 %v1130_v62  ;;  %v2056_v23 = vld [vmem:[#allocation2 + $0x9] sm:$0xff]  ;;  %v2057_v2 = vld [vmem:[#allocation2 + $0x11] sm:$0xff]  ;;  %v16355_v62 = vpop.f32.mrf.mxu0 }
 0x146   : > { %12760 = vmatprep.mubr.msk.bf16.mxu0 %vm15473_vm0, %v15959_v38  ;;  %12812 = vmatprep.mubr.msk.bf16.mxu1 %vm15473_vm0, %v15959_v38  ;;  %v1103_v54 = vld [vmem:[#allocation2 + $0x1a7] sm:$0xff]  ;;  %v1104_v36 = vld [vmem:[#allocation2 + $0x1af] sm:$0xff]  ;;  %v2110_v47 = vpack.c.bf16 %v2057_v2, %v2056_v23  ;;  %v2058_v23 = vld [vmem:[#allocation2 + $0x19] sm:$0xff] }
 0x147   : > { %1049 = vst [vmem:[#allocation2 + $0x1c0] sm:$0xff] %v995_v25  ;;  %1050 = vst [vmem:[#allocation2 + $0x1c8] sm:$0xff] %v996_v34  ;;  %v1131_v27 = vpack.c.bf16 %v1104_v36, %v1103_v54  ;;  %v1553_v25 = vpack.c.bf16 %v15959_v38, %v15959_v38  ;;  %v15171_v63 = vld [vmem:[#allocation7 + $0x138] sm:$0xff]   ;;  %v12710_v34 = vpop.f32.mrf.mxu0  ;;  %v15172_v54 = vld [vmem:[#allocation7 + $0xf0] sm:$0xff]  }
 0x148   : > { %v15173_v36 = vld [vmem:[#allocation7 + $0x130] sm:$0xff]   ;;  %v15177_v34 = vld [vmem:[#allocation7 + $0x120] sm:$0xff]  }
 0x149   : > { %v16394_v32 = vld [vmem:[#allocation2] sm:$0xff] }
 0x14a   : > { %v1077_v31 = vld [vmem:[#allocation2 + $0xd7] sm:$0xff]  ;;  %v1078_v5 = vld [vmem:[#allocation2 + $0xdf] sm:$0xff] }
 0x14b   : > { %v1118_v44 = vpack.c.bf16 %v1078_v5, %v1077_v31  ;;  %v16357_v31 = vpop.f32.mrf.mxu0  ;;  %v16363_v5 = vld [vmem:[#allocation2 + $0x20] sm:$0xff] }
 0x14c   : > { %v1554_v2 = vpack.c.bf16 %v16363_v5, %v15959_v38 }
 0x14d   : > { %12761 = vmatmul.mubr.bf16.gmra.mxu0 %v1118_v44  ;;  %12813 = vmatmul.mubr.bf16.gmra.mxu1 %v1131_v27  ;;  %v2059_v44 = vld [vmem:[#allocation2 + $0x21] sm:$0xff]  ;;  %v12711_v27 = vpop.f32.mrf.mxu0 }
 0x14e   : > { %12832 = vmatprep.mubr.msk.bf16.mxu1 %vm15473_vm0, %v15959_v38  ;;  %12956 = vmatprep.mubr.msk.bf16.mxu0 %vm15473_vm0, %v15959_v38  ;;  %v2060_v27 = vld [vmem:[#allocation2 + $0x29] sm:$0xff] }
 0x155   : > { %12833 = vmatmul.mubr.bf16.vlgmr.msra.gmra.mxu1 %v1553_v25  ;;  %12957 = vmatmul.mubr.bf16.vlgmr.msra.gmra.mxu0 %v2110_v47  ;;  %v2111_v25 = vpack.c.bf16 %v2059_v44, %v2058_v23  ;;  %v15174_v47 = vld [vmem:[#allocation7 + $0xe8] sm:$0xff]  }
 0x156   : > { %13065 = vmatpush3.bf16.msra.mxu1 %v15170_v18  ;;  %13189 = vmatpush3.bf16.msra.mxu0 %v15171_v63  ;;  %v15175_v18 = vld [vmem:[#allocation7 + $0x128] sm:$0xff]   ;;  %v15176_v63 = vld [vmem:[#allocation7 + $0xe0] sm:$0xff]  }
 0x157   : > { %12836 = vmatprep.mubr.msk.bf16.mxu1 %vm15473_vm0, %v15959_v38  ;;  %12960 = vmatprep.mubr.msk.bf16.mxu0 %vm15473_vm0, %v15959_v38  ;;  %v2061_v44 = vld [vmem:[#allocation2 + $0x31] sm:$0xff] }
 0x158   : > { %13066 = vmatprep.subr.bf16.mxu1 %v15959_v38  ;;  %13190 = vmatprep.subr.bf16.mxu0 %v15959_v38 }
 0x15a   : > { %13067 = vmatpush3.bf16.msra.mxu1 %v15172_v54  ;;  %13191 = vmatpush3.bf16.msra.mxu0 %v15173_v36  ;;  %v16375_v54 = vld [vmem:[#allocation2 + $0x28] sm:$0xff]  ;;  %v16377_v36 = vld [vmem:[#allocation2 + $0x30] sm:$0xff] }
 0x15b   : > { %13068 = vmatprep.subr.bf16.mxu1 %v15959_v38  ;;  %13192 = vmatprep.subr.bf16.mxu0 %v15959_v38  ;;  %v1555_v23 = vpack.c.bf16 %v16377_v36, %v16375_v54 }
 0x15d   : > { %12837 = vmatmul.mubr.bf16.gmra.mxu1 %v1554_v2  ;;  %12961 = vmatmul.mubr.bf16.gmra.mxu0 %v2111_v25  ;;  %v2112_v2 = vpack.c.bf16 %v2061_v44, %v2060_v27  ;;  %v15178_v25 = vld [vmem:[#allocation7 + $0xd8] sm:$0xff]   ;;  %v15181_v44 = vld [vmem:[#allocation7 + $0x110] sm:$0xff]  }
 0x15e   : > { %12840 = vmatprep.mubr.msk.bf16.mxu1 %vm15473_vm0, %v15959_v38  ;;  %12964 = vmatprep.mubr.msk.bf16.mxu0 %vm15473_vm0, %v15959_v38  ;;  %v2063_v27 = vld [vmem:[#allocation2 + $0x41] sm:$0xff] }
 0x15f   : > { %13069 = vmatpush3.bf16.msra.mxu1 %v15174_v47  ;;  %13193 = vmatpush3.bf16.msra.mxu0 %v15175_v18  ;;  %v15179_v47 = vld [vmem:[#allocation7 + $0x118] sm:$0xff]   ;;  %v15180_v18 = vld [vmem:[#allocation7 + $0xd0] sm:$0xff]  }
 0x160   : > { %13070 = vmatprep.subr.bf16.mxu1 %v15959_v38  ;;  %13194 = vmatprep.subr.bf16.mxu0 %v15959_v38 }
 0x163   : > { %13071 = vmatpush3.bf16.msra.mxu1 %v15176_v63  ;;  %13195 = vmatpush3.bf16.msra.mxu0 %v15177_v34  ;;  %v16389_v63 = vld [vmem:[#allocation2 + $0x38] sm:$0xff]  ;;  %v1506_v34 = vld [vmem:[#allocation2 + $0x40] sm:$0xff] }
 0x164   : > { %13072 = vmatprep.subr.bf16.mxu1 %v15959_v38  ;;  %13196 = vmatprep.subr.bf16.mxu0 %v15959_v38 }
 0x165   : > { %12841 = vmatmul.mubr.bf16.gmra.mxu1 %v1555_v23  ;;  %12965 = vmatmul.mubr.bf16.gmra.mxu0 %v2112_v2  ;;  %v2062_v23 = vld [vmem:[#allocation2 + $0x39] sm:$0xff]  ;;  %v1556_v2 = vpack.c.bf16 %v1506_v34, %v16389_v63 }
 0x166   : > { %12844 = vmatprep.mubr.msk.bf16.mxu1 %vm15473_vm0, %v15959_v38  ;;  %12968 = vmatprep.mubr.msk.bf16.mxu0 %vm15473_vm0, %v15959_v38  ;;  %v2113_v43 = vpack.c.bf16 %v2063_v27, %v2062_v23  ;;  %v15183_v34 = vld [vmem:[#allocation7 + $0x108] sm:$0xff]  }
 0x167   : > { %13073 = vmatpush3.bf16.msra.mxu1 %v15178_v25  ;;  %13197 = vmatpush3.bf16.msra.mxu0 %v15179_v47  ;;  %v2064_v25 = vld [vmem:[#allocation2 + $0x49] sm:$0xff]  ;;  %v2066_v27 = vld [vmem:[#allocation2 + $0x59] sm:$0xff] }
 0x168   : > { %13074 = vmatprep.subr.bf16.mxu1 %v15959_v38  ;;  %13198 = vmatprep.subr.bf16.mxu0 %v15959_v38  ;;  %v2065_v38 = vld [vmem:[#allocation2 + $0x51] sm:$0xff] }
 0x169   : > { %v2114_v47 = vpack.c.bf16 %v2065_v38, %v2064_v25  ;;  %v19600_v25 = vpack.c.bf16 %v16084_v6, %v16081_v4  ;;  %v2073_v4 = vld [vmem:[#allocation2 + $0x91] sm:$0xff]  ;;  %v2072_v6 = vld [vmem:[#allocation2 + $0x89] sm:$0xff] }
 0x16b   : > { %13075 = vmatpush3.bf16.msra.mxu1 %v15180_v18  ;;  %13199 = vmatpush3.bf16.msra.mxu0 %v15181_v44  ;;  %v19598_v18 = vpack.c.bf16 %v16008_v30, %v16005_v29  ;;  %v2067_v44 = vld [vmem:[#allocation2 + $0x61] sm:$0xff]  ;;  %v19599_v29 = vpack.c.bf16 %v16046_v12, %v16043_v10  ;;  %v2069_v30 = vld [vmem:[#allocation2 + $0x71] sm:$0xff]  ;;  %v2070_v12 = vld [vmem:[#allocation2 + $0x79] sm:$0xff] }
 0x16c   : > { %13076 = vmatprep.subr.bf16.mxu1 %v16394_v32  ;;  %13200 = vmatprep.subr.bf16.mxu0 %v16394_v32  ;;  %v2115_v23 = vpack.c.bf16 %v2067_v44, %v2066_v27  ;;  %v2071_v10 = vld [vmem:[#allocation2 + $0x81] sm:$0xff]  ;;  %v2118_v44 = vpack.c.bf16 %v2073_v4, %v2072_v6  ;;  %v19602_v27 = vpack.c.bf16 %v16157_v35, %v16154_v33  ;;  %v2077_v33 = vld [vmem:[#allocation2 + $0xb1] sm:$0xff]  ;;  %v2076_v35 = vld [vmem:[#allocation2 + $0xa9] sm:$0xff] }
 0x16d   : > { %12845 = vmatmul.mubr.bf16.gmra.mxu1 %v1556_v2  ;;  %12969 = vmatmul.mubr.bf16.gmra.mxu0 %v2113_v43  ;;  %v15182_v43 = vld [vmem:[#allocation7 + $0xc8] sm:$0xff]   ;;  %v2068_v2 = vld [vmem:[#allocation2 + $0x69] sm:$0xff] }
 0x16e   : > { %12848 = vmatprep.mubr.msk.bf16.mxu1 %vm15473_vm0, %v16394_v32  ;;  %12972 = vmatprep.mubr.msk.bf16.mxu0 %vm15473_vm0, %v16394_v32  ;;  %v2116_v38 = vpack.c.bf16 %v2069_v30, %v2068_v2  ;;  %v2120_v30 = vpack.c.bf16 %v2077_v33, %v2076_v35  ;;  %v19604_v2 = vpack.c.bf16 %v16239_v21, %v16236_v16  ;;  %v2080_v6 = vld [vmem:[#allocation2 + $0xc9] sm:$0xff]  ;;  %v1526_v35 = vld [vmem:[#allocation2 + $0xe0] sm:$0xff] }
 0x16f   : > { %13077 = vmatpush3.bf16.msra.mxu1 %v15182_v43  ;;  %13201 = vmatpush3.bf16.msra.mxu0 %v15183_v34  ;;  %v15184_v43 = vld [vmem:[#allocation7 + $0xc0] sm:$0xff]  }
 0x170   : > { %13078 = vmatprep.subr.bf16.mxu1 %v16394_v32  ;;  %13202 = vmatprep.subr.bf16.mxu0 %v16394_v32  ;;  %v15185_v34 = vld [vmem:[#allocation7 + $0x100] sm:$0xff]  }
 0x173   : > { %13079 = vmatpush3.bf16.msra.mxu1 %v15184_v43  ;;  %13203 = vmatpush3.bf16.msra.mxu0 %v15185_v34 }
 0x174   : > { %13312 = vmatprep.subr.bf16.mxu1 %v16394_v32  ;;  %13436 = vmatprep.subr.bf16.mxu0 %v16394_v32 }
 0x175   : > { %12849 = vmatmul.mubr.bf16.gmra.mxu1 %v19598_v18  ;;  %12973 = vmatmul.mubr.bf16.gmra.mxu0 %v2114_v47  ;;  %v2117_v47 = vpack.c.bf16 %v2071_v10, %v2070_v12  ;;  %v19601_v18 = vpack.c.bf16 %v16121_v8, %v16118_v7  ;;  %v2075_v7 = vld [vmem:[#allocation2 + $0xa1] sm:$0xff]  ;;  %v2074_v8 = vld [vmem:[#allocation2 + $0x99] sm:$0xff]  ;;  %v19605_v12 = vpack.c.bf16 %v16275_v28, %v16272_v37 }
 0x176   : > { %12852 = vmatprep.mubr.msk.bf16.mxu1 %vm15473_vm0, %v16394_v32  ;;  %12976 = vmatprep.mubr.msk.bf16.mxu0 %vm15473_vm0, %v16394_v32 }
 0x17d   : > { %12853 = vmatmul.mubr.bf16.gmra.mxu1 %v19599_v29  ;;  %12977 = vmatmul.mubr.bf16.gmra.mxu0 %v2115_v23  ;;  %v2119_v23 = vpack.c.bf16 %v2075_v7, %v2074_v8  ;;  %v19603_v29 = vpack.c.bf16 %v16193_v24, %v16190_v45  ;;  %v2079_v45 = vld [vmem:[#allocation2 + $0xc1] sm:$0xff]  ;;  %v2078_v24 = vld [vmem:[#allocation2 + $0xb9] sm:$0xff] }
 0x17e   : > { %12856 = vmatprep.mubr.msk.bf16.mxu1 %vm15473_vm0, %v16394_v32  ;;  %12980 = vmatprep.mubr.msk.bf16.mxu0 %vm15473_vm0, %v16394_v32 }
 0x185   : > { %12857 = vmatmul.mubr.bf16.gmra.mxu1 %v19600_v25  ;;  %12981 = vmatmul.mubr.bf16.gmra.mxu0 %v2116_v38  ;;  %v2121_v38 = vpack.c.bf16 %v2079_v45, %v2078_v24 }
 0x186   : > { %12860 = vmatprep.mubr.msk.bf16.mxu1 %vm15473_vm0, %v16394_v32  ;;  %12984 = vmatprep.mubr.msk.bf16.mxu0 %vm15473_vm0, %v16394_v32 }
 0x18d   : > { %12861 = vmatmul.mubr.bf16.gmra.mxu1 %v19601_v18  ;;  %12985 = vmatmul.mubr.bf16.gmra.mxu0 %v2117_v47  ;;  %v2081_v47 = vld [vmem:[#allocation2 + $0xd1] sm:$0xff] }
 0x18e   : > { %12864 = vmatprep.mubr.msk.bf16.mxu1 %vm15473_vm0, %v16394_v32  ;;  %12988 = vmatprep.mubr.msk.bf16.mxu0 %vm15473_vm0, %v16394_v32  ;;  %v2122_v34 = vpack.c.bf16 %v2081_v47, %v2080_v6  ;;  %v2085_v47 = vld [vmem:[#allocation2 + $0xf1] sm:$0xff] }
 0x195   : > { %12865 = vmatmul.mubr.bf16.gmra.mxu1 %v19602_v27  ;;  %12989 = vmatmul.mubr.bf16.gmra.mxu0 %v2118_v44  ;;  %v19606_v27 = vpack.c.bf16 %v16310_v42, %v16307_v0  ;;  %v1566_v42 = vpack.c.bf16 %v1526_v35, %v16335_v9 }
 0x196   : > { %12868 = vmatprep.mubr.msk.bf16.mxu1 %vm15473_vm0, %v16394_v32  ;;  %12992 = vmatprep.mubr.msk.bf16.mxu0 %vm15473_vm0, %v16394_v32 }
 0x19d   : > { %12869 = vmatmul.mubr.bf16.gmra.mxu1 %v19603_v29  ;;  %12993 = vmatmul.mubr.bf16.gmra.mxu0 %v2119_v23  ;;  %v2082_v23 = vld [vmem:[#allocation2 + $0xd9] sm:$0xff] }
 0x19e   : > { %12872 = vmatprep.mubr.msk.bf16.mxu1 %vm15473_vm0, %v16394_v32  ;;  %12996 = vmatprep.mubr.msk.bf16.mxu0 %vm15473_vm0, %v16394_v32 }
 0x1a5   : > { %12873 = vmatmul.mubr.bf16.gmra.mxu1 %v19604_v2  ;;  %12997 = vmatmul.mubr.bf16.gmra.mxu0 %v2120_v30  ;;  %v2083_v30 = vld [vmem:[#allocation2 + $0xe1] sm:$0xff] }
 0x1a6   : > { %12876 = vmatprep.mubr.msk.bf16.mxu1 %vm15473_vm0, %v16394_v32  ;;  %13000 = vmatprep.mubr.msk.bf16.mxu0 %vm15473_vm0, %v16394_v32  ;;  %v2123_v0 = vpack.c.bf16 %v2083_v30, %v2082_v23 }
 0x1ad   : > { %v16455_v25 = vpop.f32.mrf.mxu0  ;;  %v16457_v10 = vpop.f32.mrf.mxu1  ;;  %12877 = vmatmul.mubr.bf16.gmra.mxu1 %v19605_v12  ;;  %13001 = vmatmul.mubr.bf16.gmra.mxu0 %v2121_v38 }
 0x1ae   : > { %12880 = vmatprep.mubr.msk.bf16.mxu1 %vm15473_vm0, %v16394_v32  ;;  %13004 = vmatprep.mubr.msk.bf16.mxu0 %vm15473_vm0, %v16394_v32 }
 0x1af   : > { %v12714_v16 = vpop.f32.mrf.mxu0  ;;  %v12766_v21 = vpop.f32.mrf.mxu1 }
 0x1b0   : > { %v1527_v21 = vld [vmem:[#allocation2 + $0xe8] sm:$0xff] }
 0x1b1   : > { %v16466_v18 = vpop.f32.mrf.mxu0  ;;  %v16468_v4 = vpop.f32.mrf.mxu1 }
 0x1b3   : > { %v12715_v43 = vpop.f32.mrf.mxu0  ;;  %v12767_v44 = vpop.f32.mrf.mxu1 }
 0x1b4   : > { %v1528_v43 = vld [vmem:[#allocation2 + $0xf0] sm:$0xff] }
 0x1b5   : > { %v16470_v37 = vpop.f32.mrf.mxu0  ;;  %v16472_v28 = vpop.f32.mrf.mxu1  ;;  %12881 = vmatmul.mubr.bf16.gmra.mxu1 %v19606_v27  ;;  %13005 = vmatmul.mubr.bf16.gmra.mxu0 %v2122_v34  ;;  %v2084_v44 = vld [vmem:[#allocation2 + $0xe9] sm:$0xff] }
 0x1b6   : > { %12884 = vmatprep.mubr.msk.bf16.mxu1 %vm15473_vm0, %v16394_v32  ;;  %13008 = vmatprep.mubr.msk.bf16.mxu0 %vm15473_vm0, %v16394_v32 }
 0x1b7   : > { %v12718_v7 = vpop.f32.mrf.mxu0  ;;  %v12770_v8 = vpop.f32.mrf.mxu1 }
 0x1b8   : > { %v1567_v7 = vpack.c.bf16 %v1528_v43, %v1527_v21  ;;  %v2124_v8 = vpack.c.bf16 %v2085_v47, %v2084_v44  ;;  %v2086_v21 = vld [vmem:[#allocation2 + $0xf9] sm:$0xff] }
 0x1b9   : > { %v16481_v29 = vpop.f32.mrf.mxu0  ;;  %v16483_v33 = vpop.f32.mrf.mxu1 }
 0x1bb   : > { %v12719_v2 = vpop.f32.mrf.mxu0  ;;  %v12771_v45 = vpop.f32.mrf.mxu1 }
 0x1bc   : > { %v1529_v45 = vld [vmem:[#allocation2 + $0xf8] sm:$0xff] }
 0x1bd   : > { %v16486_v24 = vpop.f32.mrf.mxu0  ;;  %v16488_v38 = vpop.f32.mrf.mxu1  ;;  %12885 = vmatmul.mubr.bf16.gmra.mxu1 %v1566_v42  ;;  %13009 = vmatmul.mubr.bf16.gmra.mxu0 %v2123_v0  ;;  %v1530_v42 = vld [vmem:[#allocation2 + $0x100] sm:$0xff] }
 0x1be   : > { %12888 = vmatprep.mubr.msk.bf16.mxu1 %vm15473_vm0, %v16394_v32  ;;  %13012 = vmatprep.mubr.msk.bf16.mxu0 %vm15473_vm0, %v16394_v32  ;;  %v2087_v0 = vld [vmem:[#allocation2 + $0x101] sm:$0xff]  ;;  %v1568_v44 = vpack.c.bf16 %v1530_v42, %v1529_v45  ;;  %v2088_v42 = vld [vmem:[#allocation2 + $0x109] sm:$0xff] }
 0x1bf   : > { %v12722_v12 = vpop.f32.mrf.mxu0  ;;  %v12774_v16 = vpop.f32.mrf.mxu1 }
 0x1c1   : > { %v16494_v6 = vpop.f32.mrf.mxu0  ;;  %v16496_v9 = vpop.f32.mrf.mxu1 }
 0x1c3   : > { %v12723_v34 = vpop.f32.mrf.mxu0  ;;  %v12775_v27 = vpop.f32.mrf.mxu1 }
 0x1c4   : > { %v2125_v34 = vpack.c.bf16 %v2087_v0, %v2086_v21 }
 0x1c5   : > { %v16498_v23 = vpop.f32.mrf.mxu0  ;;  %v16500_v35 = vpop.f32.mrf.mxu1  ;;  %12889 = vmatmul.mubr.bf16.gmra.mxu1 %v1567_v7  ;;  %13013 = vmatmul.mubr.bf16.gmra.mxu0 %v2124_v8 }
 0x1c6   : > { %12892 = vmatprep.mubr.msk.bf16.mxu1 %vm15473_vm0, %v16394_v32  ;;  %13016 = vmatprep.mubr.msk.bf16.mxu0 %vm15473_vm0, %v16394_v32 }
 0x1c7   : > { %v12726_v30 = vpop.f32.mrf.mxu0  ;;  %v12778_v2 = vpop.f32.mrf.mxu1 }
 0x1c8   : > { %v1531_v2 = vld [vmem:[#allocation2 + $0x108] sm:$0xff] }
 0x1c9   : > { %v16506_v12 = vpop.f32.mrf.mxu0  ;;  %v16508_v16 = vpop.f32.mrf.mxu1 }
 0x1cb   : > { %v12727_v47 = vpop.f32.mrf.mxu0  ;;  %v12779_v43 = vpop.f32.mrf.mxu1 }
 0x1cc   : > { %v2089_v47 = vld [vmem:[#allocation2 + $0x111] sm:$0xff] }
 0x1cd   : > { %v16510_v27 = vpop.f32.mrf.mxu0  ;;  %v16512_v7 = vpop.f32.mrf.mxu1  ;;  %12893 = vmatmul.mubr.bf16.gmra.mxu1 %v1568_v44  ;;  %13017 = vmatmul.mubr.bf16.gmra.mxu0 %v2125_v34  ;;  %v1569_v44 = vpack.c.bf16 %v1532_v56, %v1531_v2  ;;  %v2126_v34 = vpack.c.bf16 %v2089_v47, %v2088_v42  ;;  %v2090_v2 = vld [vmem:[#allocation2 + $0x119] sm:$0xff] }
 0x1ce   : > { %12896 = vmatprep.mubr.msk.bf16.mxu1 %vm15473_vm0, %v16394_v32  ;;  %13020 = vmatprep.mubr.msk.bf16.mxu0 %vm15473_vm0, %v16394_v32 }
 0x1cf   : > { %v12730_v8 = vpop.f32.mrf.mxu0  ;;  %v12782_v30 = vpop.f32.mrf.mxu1 }
 0x1d1   : > { %v16518_v43 = vpop.f32.mrf.mxu0  ;;  %v16520_v45 = vpop.f32.mrf.mxu1 }
 0x1d3   : > { %v12731_v0 = vpop.f32.mrf.mxu0  ;;  %v12783_v21 = vpop.f32.mrf.mxu1 }
 0x1d4   : > { %v2091_v0 = vld [vmem:[#allocation2 + $0x121] sm:$0xff] }
 0x1d5   : > { %v16522_v46 = vpop.f32.mrf.mxu0  ;;  %v16524_v17 = vpop.f32.mrf.mxu1  ;;  %12897 = vmatmul.mubr.bf16.gmra.mxu1 %v1569_v44  ;;  %13021 = vmatmul.mubr.bf16.gmra.mxu0 %v2126_v34  ;;  %v1570_v44 = vpack.c.bf16 %v1534_v3, %v1533_v48  ;;  %v2127_v34 = vpack.c.bf16 %v2091_v0, %v2090_v2  ;;  %v2092_v3 = vld [vmem:[#allocation2 + $0x129] sm:$0xff] }
 0x1d6   : > { %12900 = vmatprep.mubr.msk.bf16.mxu1 %vm15473_vm0, %v16394_v32  ;;  %13024 = vmatprep.mubr.msk.bf16.mxu0 %vm15473_vm0, %v16394_v32 }
 0x1d7   : > { %v12734_v8 = vpop.f32.mrf.mxu0  ;;  %v12786_v30 = vpop.f32.mrf.mxu1 }
 0x1d9   : > { %v16530_v21 = vpop.f32.mrf.mxu0  ;;  %v16532_v56 = vpop.f32.mrf.mxu1 }
 0x1db   : > { %v12735_v47 = vpop.f32.mrf.mxu0  ;;  %v12787_v42 = vpop.f32.mrf.mxu1 }
 0x1dc   : > { %v2093_v47 = vld [vmem:[#allocation2 + $0x131] sm:$0xff] }
 0x1dd   : > { %v16534_v26 = vpop.f32.mrf.mxu0  ;;  %v16536_v1 = vpop.f32.mrf.mxu1  ;;  %12901 = vmatmul.mubr.bf16.gmra.mxu1 %v1570_v44  ;;  %13025 = vmatmul.mubr.bf16.gmra.mxu0 %v2127_v34  ;;  %v1571_v44 = vpack.c.bf16 %v1536_v57, %v1535_v15  ;;  %v2128_v34 = vpack.c.bf16 %v2093_v47, %v2092_v3  ;;  %v2094_v15 = vld [vmem:[#allocation2 + $0x139] sm:$0xff] }
 0x1de   : > { %12904 = vmatprep.mubr.msk.bf16.mxu1 %vm15473_vm0, %v16394_v32  ;;  %13028 = vmatprep.mubr.msk.bf16.mxu0 %vm15473_vm0, %v16394_v32 }
 0x1df   : > { %v12738_v8 = vpop.f32.mrf.mxu0  ;;  %v12790_v30 = vpop.f32.mrf.mxu1 }
 0x1e1   : > { %v16542_v42 = vpop.f32.mrf.mxu0  ;;  %v16544_v48 = vpop.f32.mrf.mxu1 }
 0x1e3   : > { %v12739_v0 = vpop.f32.mrf.mxu0  ;;  %v12791_v2 = vpop.f32.mrf.mxu1 }
 0x1e4   : > { %v2095_v0 = vld [vmem:[#allocation2 + $0x141] sm:$0xff] }
 0x1e5   : > { %v16546_v39 = vpop.f32.mrf.mxu0  ;;  %v16548_v11 = vpop.f32.mrf.mxu1  ;;  %12905 = vmatmul.mubr.bf16.gmra.mxu1 %v1571_v44  ;;  %13029 = vmatmul.mubr.bf16.gmra.mxu0 %v2128_v34  ;;  %v1572_v44 = vpack.c.bf16 %v1538_v22, %v1537_v59  ;;  %v2129_v34 = vpack.c.bf16 %v2095_v0, %v2094_v15  ;;  %v2096_v59 = vld [vmem:[#allocation2 + $0x149] sm:$0xff] }
 0x1e6   : > { %19607 = vst [vmem:[#allocation69_spill] sm:$0xff] %v16548_v11  ;;  %12908 = vmatprep.mubr.msk.bf16.mxu1 %vm15473_vm0, %v16394_v32  ;;  %13032 = vmatprep.mubr.msk.bf16.mxu0 %vm15473_vm0, %v16394_v32 }
 0x1e7   : > { %v12742_v8 = vpop.f32.mrf.mxu0  ;;  %v12794_v30 = vpop.f32.mrf.mxu1 }
 0x1e9   : > { %v16554_v2 = vpop.f32.mrf.mxu0  ;;  %v16556_v57 = vpop.f32.mrf.mxu1 }
 0x1ea   : > { %19608 = vst [vmem:[#allocation70_spill] sm:$0xff] %v16556_v57 }
 0x1eb   : > { %v12743_v47 = vpop.f32.mrf.mxu0  ;;  %v12795_v3 = vpop.f32.mrf.mxu1 }
 0x1ec   : > { %v2097_v47 = vld [vmem:[#allocation2 + $0x151] sm:$0xff] }
 0x1ed   : > { %v16558_v58 = vpop.f32.mrf.mxu0  ;;  %v16560_v53 = vpop.f32.mrf.mxu1  ;;  %12909 = vmatmul.mubr.bf16.gmra.mxu1 %v1572_v44  ;;  %13033 = vmatmul.mubr.bf16.gmra.mxu0 %v2129_v34  ;;  %v1573_v44 = vpack.c.bf16 %v1540_v49, %v1539_v50  ;;  %v2130_v34 = vpack.c.bf16 %v2097_v47, %v2096_v59  ;;  %v2098_v50 = vld [vmem:[#allocation2 + $0x159] sm:$0xff] }
 0x1ee   : > { %19609 = vst [vmem:[#allocation71_spill] sm:$0xff] %v16560_v53  ;;  %12912 = vmatprep.mubr.msk.bf16.mxu1 %vm15473_vm0, %v16394_v32  ;;  %13036 = vmatprep.mubr.msk.bf16.mxu0 %vm15473_vm0, %v16394_v32 }
 0x1ef   : > { %v12746_v8 = vpop.f32.mrf.mxu0  ;;  %v12798_v30 = vpop.f32.mrf.mxu1 }
 0x1f1   : > { %v16566_v3 = vpop.f32.mrf.mxu0  ;;  %v16568_v22 = vpop.f32.mrf.mxu1 }
 0x1f2   : > { %19610 = vst [vmem:[#allocation72_spill] sm:$0xff] %v16568_v22 }
 0x1f3   : > { %v12747_v0 = vpop.f32.mrf.mxu0  ;;  %v12799_v15 = vpop.f32.mrf.mxu1 }
 0x1f4   : > { %v2099_v0 = vld [vmem:[#allocation2 + $0x161] sm:$0xff] }
 0x1f5   : > { %v16570_v52 = vpop.f32.mrf.mxu0  ;;  %v16572_v51 = vpop.f32.mrf.mxu1  ;;  %12913 = vmatmul.mubr.bf16.gmra.mxu1 %v1573_v44  ;;  %13037 = vmatmul.mubr.bf16.gmra.mxu0 %v2130_v34  ;;  %v1574_v44 = vpack.c.bf16 %v1542_v60, %v1541_v61  ;;  %v2131_v34 = vpack.c.bf16 %v2099_v0, %v2098_v50  ;;  %v2100_v61 = vld [vmem:[#allocation2 + $0x169] sm:$0xff] }
 0x1f6   : > { %19611 = vst [vmem:[#allocation73_spill] sm:$0xff] %v16572_v51  ;;  %12916 = vmatprep.mubr.msk.bf16.mxu1 %vm15473_vm0, %v16394_v32  ;;  %13040 = vmatprep.mubr.msk.bf16.mxu0 %vm15473_vm0, %v16394_v32 }
 0x1f7   : > { %v12750_v8 = vpop.f32.mrf.mxu0  ;;  %v12802_v30 = vpop.f32.mrf.mxu1 }
 0x1f9   : > { %v16578_v15 = vpop.f32.mrf.mxu0  ;;  %v16580_v49 = vpop.f32.mrf.mxu1 }
 0x1fa   : > { %19612 = vst [vmem:[#allocation74_spill] sm:$0xff] %v16580_v49  ;;  %v1548_v49 = vld [vmem:[#allocation2 + $0x190] sm:$0xff] }
 0x1fb   : > { %v12751_v47 = vpop.f32.mrf.mxu0  ;;  %v12803_v59 = vpop.f32.mrf.mxu1 }
 0x1fc   : > { %v2101_v47 = vld [vmem:[#allocation2 + $0x171] sm:$0xff] }
 0x1fd   : > { %v16582_v20 = vpop.f32.mrf.mxu0  ;;  %v16584_v19 = vpop.f32.mrf.mxu1  ;;  %12917 = vmatmul.mubr.bf16.gmra.mxu1 %v1574_v44  ;;  %13041 = vmatmul.mubr.bf16.gmra.mxu0 %v2131_v34  ;;  %v1575_v44 = vpack.c.bf16 %v1544_v40, %v1543_v41  ;;  %v2132_v34 = vpack.c.bf16 %v2101_v47, %v2100_v61  ;;  %v2102_v41 = vld [vmem:[#allocation2 + $0x179] sm:$0xff] }
 0x1fe   : > { %19613 = vst [vmem:[#allocation75_spill] sm:$0xff] %v16584_v19  ;;  %12920 = vmatprep.mubr.msk.bf16.mxu1 %vm15473_vm0, %v16394_v32  ;;  %13044 = vmatprep.mubr.msk.bf16.mxu0 %vm15473_vm0, %v16394_v32 }
 0x1ff   : > { %v12754_v8 = vpop.f32.mrf.mxu0  ;;  %v12806_v30 = vpop.f32.mrf.mxu1 }
 0x201   : > { %v16590_v59 = vpop.f32.mrf.mxu0  ;;  %v16592_v60 = vpop.f32.mrf.mxu1 }
 0x202   : > { %19614 = vst [vmem:[#allocation76_spill] sm:$0xff] %v16592_v60  ;;  %v1546_v60 = vld [vmem:[#allocation2 + $0x180] sm:$0xff] }
 0x203   : > { %v12755_v0 = vpop.f32.mrf.mxu0  ;;  %v12807_v50 = vpop.f32.mrf.mxu1 }
 0x204   : > { %v2103_v0 = vld [vmem:[#allocation2 + $0x181] sm:$0xff] }
 0x205   : > { %v16594_v14 = vpop.f32.mrf.mxu0  ;;  %v16596_v13 = vpop.f32.mrf.mxu1  ;;  %12921 = vmatmul.mubr.bf16.gmra.mxu1 %v1575_v44  ;;  %13045 = vmatmul.mubr.bf16.gmra.mxu0 %v2132_v34  ;;  %v1576_v44 = vpack.c.bf16 %v1546_v60, %v1545_v55  ;;  %v2133_v34 = vpack.c.bf16 %v2103_v0, %v2102_v41  ;;  %v2104_v60 = vld [vmem:[#allocation2 + $0x189] sm:$0xff] }
 0x206   : > { %19615 = vst [vmem:[#allocation77_spill] sm:$0xff] %v16596_v13  ;;  %12924 = vmatprep.mubr.msk.bf16.mxu1 %vm15473_vm0, %v16394_v32  ;;  %13048 = vmatprep.mubr.msk.bf16.mxu0 %vm15473_vm0, %v16394_v32 }
 0x207   : > { %v12758_v8 = vpop.f32.mrf.mxu0  ;;  %v12810_v30 = vpop.f32.mrf.mxu1 }
 0x209   : > { %v16602_v50 = vpop.f32.mrf.mxu0  ;;  %v16604_v40 = vpop.f32.mrf.mxu1 }
 0x20a   : > { %19616 = vst [vmem:[#allocation78_spill] sm:$0xff] %v16604_v40  ;;  %v1547_v40 = vld [vmem:[#allocation2 + $0x188] sm:$0xff] }
 0x20b   : > { %v12759_v47 = vpop.f32.mrf.mxu0  ;;  %v12811_v61 = vpop.f32.mrf.mxu1 }
 0x20c   : > { %v2105_v47 = vld [vmem:[#allocation2 + $0x191] sm:$0xff] }
 0x20d   : > { %v16606_v13 = vpop.f32.mrf.mxu0  ;;  %v16608_v19 = vpop.f32.mrf.mxu1  ;;  %12925 = vmatmul.mubr.bf16.gmra.mxu1 %v1576_v44  ;;  %13049 = vmatmul.mubr.bf16.gmra.mxu0 %v2133_v34  ;;  %v1577_v44 = vpack.c.bf16 %v1548_v49, %v1547_v40  ;;  %v2134_v34 = vpack.c.bf16 %v2105_v47, %v2104_v60  ;;  %v2107_v49 = vld [vmem:[#allocation2 + $0x1a1] sm:$0xff] }
 0x20e   : > { %19617 = vst [vmem:[#allocation79_spill] sm:$0xff] %v16608_v19  ;;  %12928 = vmatprep.mubr.msk.bf16.mxu1 %vm15473_vm0, %v16394_v32  ;;  %13052 = vmatprep.mubr.msk.bf16.mxu0 %vm15473_vm0, %v16394_v32 }
 0x20f   : > { %v12762_v8 = vpop.f32.mrf.mxu0  ;;  %v12814_v30 = vpop.f32.mrf.mxu1 }
 0x211   : > { %v16614_v61 = vpop.f32.mrf.mxu0  ;;  %v16616_v55 = vpop.f32.mrf.mxu1 }
 0x212   : > { %19618 = vst [vmem:[#allocation80_spill] sm:$0xff] %v16616_v55 }
 0x213   : > { %v12763_v0 = vpop.f32.mrf.mxu0  ;;  %v12815_v41 = vpop.f32.mrf.mxu1 }
 0x214   : > { %v1549_v0 = vld [vmem:[#allocation2 + $0x198] sm:$0xff]  ;;  %v1550_v41 = vld [vmem:[#allocation2 + $0x1a0] sm:$0xff] }
 0x215   : > { %v1679_v19 = vpop.f32.mrf.mxu1  ;;  %12929 = vmatmul.mubr.bf16.gmra.mxu1 %v1577_v44  ;;  %v2236_v51 = vpop.f32.mrf.mxu0  ;;  %13053 = vmatmul.mubr.bf16.gmra.mxu0 %v2134_v34  ;;  %v2106_v44 = vld [vmem:[#allocation2 + $0x199] sm:$0xff] }
 0x216   : > { %v1948_v22 = vadd.f32 %v1679_v19, %v16355_v62  ;;  %12932 = vmatprep.mubr.msk.bf16.mxu1 %vm15473_vm0, %v16394_v32  ;;  %13056 = vmatprep.mubr.msk.bf16.mxu0 %vm15473_vm0, %v16394_v32  ;;  %v1578_v62 = vpack.c.bf16 %v1550_v41, %v1549_v0  ;;  %v2135_v53 = vpack.c.bf16 %v2107_v49, %v2106_v44  ;;  %v1551_v0 = vld [vmem:[#allocation2 + $0x1a8] sm:$0xff]  ;;  %v1552_v41 = vld [vmem:[#allocation2 + $0x1b0] sm:$0xff] }
 0x217   : > { %v12834_v8 = vpop.f32.mrf.mxu1  ;;  %v12958_v30 = vpop.f32.mrf.mxu0  ;;  %v2109_v49 = vld [vmem:[#allocation2 + $0x1b1] sm:$0xff] }
 0x218   : > { %v16623_v55 = vadd.f32 %v2236_v51, %v1948_v22 }
 0x219   : > { %v1682_v40 = vpop.f32.mrf.mxu1  ;;  %v2239_v47 = vpop.f32.mrf.mxu0 }
 0x21a   : > { %v1949_v60 = vadd.f32 %v1682_v40, %v16357_v31 }
 0x21b   : > { %v12835_v34 = vpop.f32.mrf.mxu1  ;;  %v12959_v19 = vpop.f32.mrf.mxu0 }
 0x21c   : > { %v16626_v57 = vadd.f32 %v2239_v47, %v1949_v60 }
 0x21d   : > { %v1687_v11 = vpop.f32.mrf.mxu1  ;;  %12933 = vmatmul.mubr.bf16.gmra.mxu1 %v1578_v62  ;;  %v2244_v8 = vpop.f32.mrf.mxu0  ;;  %13057 = vmatmul.mubr.bf16.gmra.mxu0 %v2135_v53  ;;  %v2108_v53 = vld [vmem:[#allocation2 + $0x1a9] sm:$0xff] }
 0x21e   : > { %v1950_v51 = vadd.f32 %v1687_v11, %v16455_v25  ;;  %12936 = vmatprep.mubr.msk.bf16.mxu1 %vm15473_vm0, %v16394_v32  ;;  %13060 = vmatprep.mubr.msk.bf16.mxu0 %vm15473_vm0, %v16394_v32  ;;  %v1579_v25 = vpack.c.bf16 %v1552_v41, %v1551_v0  ;;  %v2136_v34 = vpack.c.bf16 %v2109_v49, %v2108_v53  ;;  %v2614_v0 = vld [vmem:[#allocation2 + $0x27] sm:$0xff] }
 0x21f   : > { %v12838_v31 = vpop.f32.mrf.mxu1  ;;  %v12962_v22 = vpop.f32.mrf.mxu0  ;;  %v15187_v53 = vld [vmem:[#allocation7 + $0x1b8] sm:$0xff]  }
 0x220   : > { %v16633_v30 = vadd.f32 %v2244_v8, %v1950_v51 }
 0x221   : > { %v1690_v40 = vpop.f32.mrf.mxu1  ;;  %v2247_v47 = vpop.f32.mrf.mxu0 }
 0x222   : > { %v1951_v60 = vadd.f32 %v1690_v40, %v16466_v18 }
 0x223   : > { %v12839_v44 = vpop.f32.mrf.mxu1  ;;  %v12963_v11 = vpop.f32.mrf.mxu0 }
 0x224   : > { %v16636_v19 = vadd.f32 %v2247_v47, %v1951_v60  ;;  %v2613_v47 = vld [vmem:[#allocation2 + $0x1f] sm:$0xff]  ;;  %v15186_v60 = vld [vmem:[#allocation7 + $0x178] sm:$0xff]  }
 0x225   : > { %v1695_v62 = vpop.f32.mrf.mxu1  ;;  %12937 = vmatmul.mubr.bf16.gmra.mxu1 %v1579_v25  ;;  %v2252_v31 = vpop.f32.mrf.mxu0  ;;  %13061 = vmatmul.mubr.bf16.gmra.mxu0 %v2136_v34  ;;  %v2667_v11 = vpack.c.bf16 %v2614_v0, %v2613_v47  ;;  %v3224_v25 = vpack.c.bf16 %v16375_v54, %v16363_v5  ;;  %v2616_v54 = vld [vmem:[#allocation2 + $0x37] sm:$0xff] }
 0x226   : > { %v1952_v8 = vadd.f32 %v1695_v62, %v16470_v37  ;;  %13080 = vmatprep.mubr.msk.bf16.mxu1 %vm15473_vm0, %v16394_v32  ;;  %13204 = vmatprep.mubr.msk.bf16.mxu0 %vm15473_vm0, %v16394_v32 }
 0x227   : > { %v12842_v18 = vpop.f32.mrf.mxu1  ;;  %v12966_v51 = vpop.f32.mrf.mxu0 }
 0x228   : > { %v16643_v22 = vadd.f32 %v2252_v31, %v1952_v8  ;;  %v15189_v8 = vld [vmem:[#allocation7 + $0x1b0] sm:$0xff]  }
 0x229   : > { %v1698_v41 = vpop.f32.mrf.mxu1  ;;  %v2255_v49 = vpop.f32.mrf.mxu0 }
 0x22a   : > { %v1953_v40 = vadd.f32 %v1698_v41, %v16481_v29  ;;  %v15188_v29 = vld [vmem:[#allocation7 + $0x170] sm:$0xff]  }
 0x22b   : > { %v12843_v44 = vpop.f32.mrf.mxu1  ;;  %v12967_v37 = vpop.f32.mrf.mxu0 }
 0x22c   : > { %v16648_v34 = vadd.f32 %v2255_v49, %v1953_v40  ;;  %v2615_v40 = vld [vmem:[#allocation2 + $0x2f] sm:$0xff]  ;;  %v3225_v44 = vpack.c.bf16 %v16389_v63, %v16377_v36  ;;  %v15190_v37 = vld [vmem:[#allocation7 + $0x168] sm:$0xff]  }
 0x22d   : > { %v1703_v62 = vpop.f32.mrf.mxu1  ;;  %v2260_v18 = vpop.f32.mrf.mxu0  ;;  %13081 = vmatmul.mubr.bf16.vlgmr.msra.gmra.mxu1 %v2667_v11  ;;  %13205 = vmatmul.mubr.bf16.vlgmr.msra.gmra.mxu0 %v3224_v25  ;;  %v15191_v11 = vld [vmem:[#allocation7 + $0x1a8] sm:$0xff]  }
 0x22e   : > { %v1954_v31 = vadd.f32 %v1703_v62, %v16486_v24  ;;  %13313 = vmatpush3.bf16.msra.mxu1 %v15186_v60  ;;  %13437 = vmatpush3.bf16.msra.mxu0 %v15187_v53  ;;  %v2668_v53 = vpack.c.bf16 %v2616_v54, %v2615_v40 }
 0x22f   : > { %v12846_v51 = vpop.f32.mrf.mxu1  ;;  %v12970_v41 = vpop.f32.mrf.mxu0  ;;  %13084 = vmatprep.mubr.msk.bf16.mxu1 %vm15473_vm0, %v16394_v32  ;;  %13208 = vmatprep.mubr.msk.bf16.mxu0 %vm15473_vm0, %v16394_v32 }
 0x230   : > { %v16655_v5 = vadd.f32 %v2260_v18, %v1954_v31  ;;  %13314 = vmatprep.subr.bf16.mxu1 %v16394_v32  ;;  %13438 = vmatprep.subr.bf16.mxu0 %v16394_v32  ;;  %v15192_v31 = vld [vmem:[#allocation7 + $0x160] sm:$0xff]   ;;  %v2618_v51 = vld [vmem:[#allocation2 + $0x47] sm:$0xff] }
 0x231   : > { %v1706_v24 = vpop.f32.mrf.mxu1  ;;  %v2263_v0 = vpop.f32.mrf.mxu0  ;;  %v3175_v41 = vld [vmem:[#allocation2 + $0x48] sm:$0xff] }
 0x232   : > { %v1955_v49 = vadd.f32 %v1706_v24, %v16494_v6  ;;  %13315 = vmatpush3.bf16.msra.mxu1 %v15188_v29  ;;  %13439 = vmatpush3.bf16.msra.mxu0 %v15189_v8  ;;  %v15193_v29 = vld [vmem:[#allocation7 + $0x1a0] sm:$0xff]  }
 0x233   : > { %v12847_v47 = vpop.f32.mrf.mxu1  ;;  %v12971_v60 = vpop.f32.mrf.mxu0  ;;  %13316 = vmatprep.subr.bf16.mxu1 %v16394_v32  ;;  %13440 = vmatprep.subr.bf16.mxu0 %v16394_v32 }
 0x234   : > { %v16664_v25 = vadd.f32 %v2263_v0, %v1955_v49  ;;  %v2617_v0 = vld [vmem:[#allocation2 + $0x3f] sm:$0xff] }
 0x235   : > { %v1711_v62 = vpop.f32.mrf.mxu1  ;;  %v2268_v18 = vpop.f32.mrf.mxu0  ;;  %13085 = vmatmul.mubr.bf16.gmra.mxu1 %v2668_v53  ;;  %13209 = vmatmul.mubr.bf16.gmra.mxu0 %v3225_v44  ;;  %v3174_v49 = vld [vmem:[#allocation2 + $0x40] sm:$0xff]  ;;  %v2669_v60 = vpack.c.bf16 %v2618_v51, %v2617_v0  ;;  %v15194_v44 = vld [vmem:[#allocation7 + $0x158] sm:$0xff]   ;;  %v2620_v51 = vld [vmem:[#allocation2 + $0x57] sm:$0xff] }
 0x236   : > { %v1956_v6 = vadd.f32 %v1711_v62, %v16498_v23  ;;  %13088 = vmatprep.mubr.msk.bf16.mxu1 %vm15473_vm0, %v16394_v32  ;;  %13212 = vmatprep.mubr.msk.bf16.mxu0 %vm15473_vm0, %v16394_v32  ;;  %v3226_v53 = vpack.c.bf16 %v3175_v41, %v3174_v49  ;;  %v3177_v41 = vld [vmem:[#allocation2 + $0x58] sm:$0xff]  ;;  %v3176_v0 = vld [vmem:[#allocation2 + $0x50] sm:$0xff] }
 0x237   : > { %v12850_v36 = vpop.f32.mrf.mxu1  ;;  %v12974_v63 = vpop.f32.mrf.mxu0  ;;  %13317 = vmatpush3.bf16.msra.mxu1 %v15190_v37  ;;  %13441 = vmatpush3.bf16.msra.mxu0 %v15191_v11  ;;  %v15195_v37 = vld [vmem:[#allocation7 + $0x198] sm:$0xff]  }
 0x238   : > { %v16671_v8 = vadd.f32 %v2268_v18, %v1956_v6  ;;  %13318 = vmatprep.subr.bf16.mxu1 %v16394_v32  ;;  %13442 = vmatprep.subr.bf16.mxu0 %v16394_v32  ;;  %v15196_v63 = vld [vmem:[#allocation7 + $0x150] sm:$0xff]  }
 0x239   : > { %v1714_v23 = vpop.f32.mrf.mxu1  ;;  %v2271_v54 = vpop.f32.mrf.mxu0 }
 0x23a   : > { %v1957_v24 = vadd.f32 %v1714_v23, %v16506_v12 }
 0x23b   : > { %v12851_v40 = vpop.f32.mrf.mxu1  ;;  %v12975_v47 = vpop.f32.mrf.mxu0  ;;  %13319 = vmatpush3.bf16.msra.mxu1 %v15192_v31  ;;  %13443 = vmatpush3.bf16.msra.mxu0 %v15193_v29  ;;  %v15197_v31 = vld [vmem:[#allocation7 + $0x190] sm:$0xff]  }
 0x23c   : > { %v16676_v11 = vadd.f32 %v2271_v54, %v1957_v24  ;;  %13320 = vmatprep.subr.bf16.mxu1 %v16394_v32  ;;  %13444 = vmatprep.subr.bf16.mxu0 %v16394_v32  ;;  %v2619_v24 = vld [vmem:[#allocation2 + $0x4f] sm:$0xff] }
 0x23d   : > { %v1719_v62 = vpop.f32.mrf.mxu1  ;;  %v2276_v18 = vpop.f32.mrf.mxu0  ;;  %13089 = vmatmul.mubr.bf16.gmra.mxu1 %v2669_v60  ;;  %13213 = vmatmul.mubr.bf16.gmra.mxu0 %v3226_v53  ;;  %v2670_v47 = vpack.c.bf16 %v2620_v51, %v2619_v24  ;;  %v3227_v60 = vpack.c.bf16 %v3177_v41, %v3176_v0  ;;  %v2621_v41 = vld [vmem:[#allocation2 + $0x5f] sm:$0xff] }
 0x23e   : > { %v1958_v12 = vadd.f32 %v1719_v62, %v16510_v27  ;;  %13092 = vmatprep.mubr.msk.bf16.mxu1 %vm15473_vm0, %v16394_v32  ;;  %13216 = vmatprep.mubr.msk.bf16.mxu0 %vm15473_vm0, %v16394_v32 }
 0x23f   : > { %v12854_v6 = vpop.f32.mrf.mxu1  ;;  %v12978_v36 = vpop.f32.mrf.mxu0  ;;  %13321 = vmatpush3.bf16.msra.mxu1 %v15194_v44  ;;  %13445 = vmatpush3.bf16.msra.mxu0 %v15195_v37  ;;  %v16692_v44 = vld [vmem:[#allocation2] sm:$0xff] }
 0x240   : > { %v16685_v29 = vadd.f32 %v2276_v18, %v1958_v12  ;;  %13322 = vmatprep.subr.bf16.mxu1 %v16394_v32  ;;  %13446 = vmatprep.subr.bf16.mxu0 %v16394_v32  ;;  %v2622_v6 = vld [vmem:[#allocation2 + $0x67] sm:$0xff] }
 0x241   : > { %v1722_v27 = vpop.f32.mrf.mxu1  ;;  %v2279_v23 = vpop.f32.mrf.mxu0  ;;  %v3179_v36 = vld [vmem:[#allocation2 + $0x68] sm:$0xff] }
 0x242   : > { %v1959_v54 = vadd.f32 %v1722_v27, %v16518_v43  ;;  %v3178_v27 = vld [vmem:[#allocation2 + $0x60] sm:$0xff] }
 0x243   : > { %v12855_v49 = vpop.f32.mrf.mxu1  ;;  %v12979_v40 = vpop.f32.mrf.mxu0  ;;  %13323 = vmatpush3.bf16.msra.mxu1 %v15196_v63  ;;  %13447 = vmatpush3.bf16.msra.mxu0 %v15197_v31  ;;  %v3228_v24 = vpack.c.bf16 %v3179_v36, %v3178_v27 }
 0x244   : > { %v16690_v53 = vadd.f32 %v2279_v23, %v1959_v54  ;;  %13324 = vmatprep.subr.bf16.mxu1 %v16692_v44  ;;  %13448 = vmatprep.subr.bf16.mxu0 %v16692_v44  ;;  %v2671_v54 = vpack.c.bf16 %v2622_v6, %v2621_v41 }
 0x245   : > { %v1727_v32 = vpop.f32.mrf.mxu1  ;;  %v2284_v37 = vpop.f32.mrf.mxu0  ;;  %13093 = vmatmul.mubr.bf16.gmra.mxu1 %v2670_v47  ;;  %13217 = vmatmul.mubr.bf16.gmra.mxu0 %v3227_v60 }
 0x246   : > { %v1960_v43 = vadd.f32 %v1727_v32, %v16522_v46  ;;  %13096 = vmatprep.mubr.msk.bf16.mxu1 %vm15473_vm0, %v16692_v44  ;;  %13220 = vmatprep.mubr.msk.bf16.mxu0 %vm15473_vm0, %v16692_v44 }
 0x247   : > { %v12858_v62 = vpop.f32.mrf.mxu1  ;;  %v12982_v18 = vpop.f32.mrf.mxu0 }
 0x248   : > { %v16701_v12 = vadd.f32 %v2284_v37, %v1960_v43  ;;  %v2624_v37 = vld [vmem:[#allocation2 + $0x77] sm:$0xff] }
 0x249   : > { %v1730_v63 = vpop.f32.mrf.mxu1  ;;  %v2287_v31 = vpop.f32.mrf.mxu0  ;;  %v3181_v43 = vld [vmem:[#allocation2 + $0x78] sm:$0xff] }
 0x24a   : > { %v1961_v51 = vadd.f32 %v1730_v63, %v16530_v21  ;;  %v15198_v62 = vld [vmem:[#allocation7 + $0x148] sm:$0xff]   ;;  %v2623_v63 = vld [vmem:[#allocation2 + $0x6f] sm:$0xff] }
 0x24b   : > { %v12859_v23 = vpop.f32.mrf.mxu1  ;;  %v12983_v46 = vpop.f32.mrf.mxu0  ;;  %13325 = vmatpush3.bf16.msra.mxu1 %v15198_v62  ;;  %v2672_v41 = vpack.c.bf16 %v2624_v37, %v2623_v63 }
 0x24c   : > { %v16704_v0 = vadd.f32 %v2287_v31, %v1961_v51  ;;  %v3180_v31 = vld [vmem:[#allocation2 + $0x70] sm:$0xff]  ;;  %13326 = vmatprep.subr.bf16.mxu1 %v16692_v44  ;;  %v15199_v46 = vld [vmem:[#allocation7 + $0x188] sm:$0xff]  }
 0x24d   : > { %v1735_v49 = vpop.f32.mrf.mxu1  ;;  %v2292_v40 = vpop.f32.mrf.mxu0  ;;  %13097 = vmatmul.mubr.bf16.gmra.mxu1 %v2671_v54  ;;  %13221 = vmatmul.mubr.bf16.gmra.mxu0 %v3228_v24  ;;  %v3229_v27 = vpack.c.bf16 %v3181_v43, %v3180_v31 }
 0x24e   : > { %v1962_v47 = vadd.f32 %v1735_v49, %v16534_v26  ;;  %13100 = vmatprep.mubr.msk.bf16.mxu1 %vm15473_vm0, %v16692_v44  ;;  %13224 = vmatprep.mubr.msk.bf16.mxu0 %vm15473_vm0, %v16692_v44 }
 0x24f   : > { %v12862_v21 = vpop.f32.mrf.mxu1  ;;  %v12986_v60 = vpop.f32.mrf.mxu0  ;;  %13449 = vmatpush3.bf16.msra.mxu0 %v15199_v46 }
 0x250   : > { %v16711_v32 = vadd.f32 %v2292_v40, %v1962_v47  ;;  %v2626_v21 = vld [vmem:[#allocation2 + $0x87] sm:$0xff]  ;;  %13450 = vmatprep.subr.bf16.mxu0 %v16692_v44 }
 0x251   : > { %v1738_v18 = vpop.f32.mrf.mxu1  ;;  %v2295_v6 = vpop.f32.mrf.mxu0  ;;  %v3183_v60 = vld [vmem:[#allocation2 + $0x88] sm:$0xff] }
 0x252   : > { %v1963_v36 = vadd.f32 %v1738_v18, %v16542_v42  ;;  %v3182_v18 = vld [vmem:[#allocation2 + $0x80] sm:$0xff] }
 0x253   : > { %v12863_v26 = vpop.f32.mrf.mxu1  ;;  %v12987_v51 = vpop.f32.mrf.mxu0  ;;  %v3230_v31 = vpack.c.bf16 %v3183_v60, %v3182_v18  ;;  %v2627_v60 = vld [vmem:[#allocation2 + $0x8f] sm:$0xff] }
 0x254   : > { %v16715_v23 = vadd.f32 %v2295_v6, %v1963_v36 }
 0x255   : > { %v1743_v54 = vpop.f32.mrf.mxu1  ;;  %v2300_v24 = vpop.f32.mrf.mxu0  ;;  %13101 = vmatmul.mubr.bf16.gmra.mxu1 %v2672_v41  ;;  %13225 = vmatmul.mubr.bf16.gmra.mxu0 %v3229_v27 }
 0x256   : > { %v1964_v49 = vadd.f32 %v1743_v54, %v16546_v39  ;;  %13104 = vmatprep.mubr.msk.bf16.mxu1 %vm15473_vm0, %v16692_v44  ;;  %13228 = vmatprep.mubr.msk.bf16.mxu0 %vm15473_vm0, %v16692_v44  ;;  %v2625_v39 = vld [vmem:[#allocation2 + $0x7f] sm:$0xff] }
 0x257   : > { %v12866_v42 = vpop.f32.mrf.mxu1  ;;  %v12990_v40 = vpop.f32.mrf.mxu0  ;;  %v2673_v63 = vpack.c.bf16 %v2626_v21, %v2625_v39 }
 0x258   : > { %v16722_v47 = vadd.f32 %v2300_v24, %v1964_v49  ;;  %v2628_v24 = vld [vmem:[#allocation2 + $0x97] sm:$0xff] }
 0x259   : > { %v1746_v37 = vpop.f32.mrf.mxu1  ;;  %v2303_v43 = vpop.f32.mrf.mxu0  ;;  %v3185_v49 = vld [vmem:[#allocation2 + $0x98] sm:$0xff] }
 0x25a   : > { %v1965_v62 = vadd.f32 %v1746_v37, %v16554_v2  ;;  %v3184_v37 = vld [vmem:[#allocation2 + $0x90] sm:$0xff] }
 0x25b   : > { %v12867_v6 = vpop.f32.mrf.mxu1  ;;  %v12991_v36 = vpop.f32.mrf.mxu0  ;;  %v3231_v39 = vpack.c.bf16 %v3185_v49, %v3184_v37  ;;  %v2629_v49 = vld [vmem:[#allocation2 + $0x9f] sm:$0xff] }
 0x25c   : > { %v16726_v26 = vadd.f32 %v2303_v43, %v1965_v62  ;;  %v2674_v62 = vpack.c.bf16 %v2628_v24, %v2627_v60 }
 0x25d   : > { %v1751_v51 = vpop.f32.mrf.mxu1  ;;  %v2308_v41 = vpop.f32.mrf.mxu0  ;;  %13105 = vmatmul.mubr.bf16.gmra.mxu1 %v2673_v63  ;;  %13229 = vmatmul.mubr.bf16.gmra.mxu0 %v3230_v31 }
 0x25e   : > { %v1966_v27 = vadd.f32 %v1751_v51, %v16558_v58  ;;  %13108 = vmatprep.mubr.msk.bf16.mxu1 %vm15473_vm0, %v16692_v44  ;;  %13232 = vmatprep.mubr.msk.bf16.mxu0 %vm15473_vm0, %v16692_v44 }
 0x25f   : > { %v12870_v2 = vpop.f32.mrf.mxu1  ;;  %v12994_v46 = vpop.f32.mrf.mxu0 }
 0x260   : > { %v16733_v54 = vadd.f32 %v2308_v41, %v1966_v27  ;;  %v2630_v41 = vld [vmem:[#allocation2 + $0xa7] sm:$0xff] }
 0x261   : > { %v1754_v42 = vpop.f32.mrf.mxu1  ;;  %v2311_v40 = vpop.f32.mrf.mxu0  ;;  %v3187_v27 = vld [vmem:[#allocation2 + $0xa8] sm:$0xff] }
 0x262   : > { %v1967_v21 = vadd.f32 %v1754_v42, %v16566_v3  ;;  %v3186_v42 = vld [vmem:[#allocation2 + $0xa0] sm:$0xff] }
 0x263   : > { %v12871_v43 = vpop.f32.mrf.mxu1  ;;  %v12995_v58 = vpop.f32.mrf.mxu0  ;;  %v3232_v60 = vpack.c.bf16 %v3187_v27, %v3186_v42 }
 0x264   : > { %v16736_v18 = vadd.f32 %v2311_v40, %v1967_v21  ;;  %v2675_v21 = vpack.c.bf16 %v2630_v41, %v2629_v49  ;;  %v15200_v43 = vld [vmem:[#allocation7 + $0x140] sm:$0xff]  }
 0x265   : > { %v1759_v6 = vpop.f32.mrf.mxu1  ;;  %v2316_v36 = vpop.f32.mrf.mxu0  ;;  %13109 = vmatmul.mubr.bf16.gmra.mxu1 %v2674_v62  ;;  %13233 = vmatmul.mubr.bf16.gmra.mxu0 %v3231_v39  ;;  %v15201_v58 = vld [vmem:[#allocation7 + $0x180] sm:$0xff]  }
 0x266   : > { %v1968_v63 = vadd.f32 %v1759_v6, %v16570_v52  ;;  %13112 = vmatprep.mubr.msk.bf16.mxu1 %vm15473_vm0, %v16692_v44  ;;  %13236 = vmatprep.mubr.msk.bf16.mxu0 %vm15473_vm0, %v16692_v44 }
 0x267   : > { %v12874_v3 = vpop.f32.mrf.mxu1  ;;  %v12998_v31 = vpop.f32.mrf.mxu0  ;;  %13327 = vmatpush3.bf16.msra.mxu1 %v15200_v43  ;;  %13451 = vmatpush3.bf16.msra.mxu0 %v15201_v58 }
 0x268   : > { %v16743_v51 = vadd.f32 %v2316_v36, %v1968_v63  ;;  %v2632_v3 = vld [vmem:[#allocation2 + $0xb7] sm:$0xff]  ;;  %13560 = vmatprep.subr.bf16.mxu1 %v16692_v44  ;;  %13684 = vmatprep.subr.bf16.mxu0 %v16692_v44 }
 0x269   : > { %v1762_v2 = vpop.f32.mrf.mxu1  ;;  %v2319_v46 = vpop.f32.mrf.mxu0  ;;  %v3189_v31 = vld [vmem:[#allocation2 + $0xb8] sm:$0xff] }
 0x26a   : > { %v1969_v24 = vadd.f32 %v1762_v2, %v16578_v15  ;;  %v2631_v2 = vld [vmem:[#allocation2 + $0xaf] sm:$0xff] }
 0x26b   : > { %v12875_v40 = vpop.f32.mrf.mxu1  ;;  %v12999_v52 = vpop.f32.mrf.mxu0  ;;  %v2676_v42 = vpack.c.bf16 %v2632_v3, %v2631_v2 }
 0x26c   : > { %v16746_v37 = vadd.f32 %v2319_v46, %v1969_v24  ;;  %v3188_v46 = vld [vmem:[#allocation2 + $0xb0] sm:$0xff] }
 0x26d   : > { %v1767_v62 = vpop.f32.mrf.mxu1  ;;  %v2324_v39 = vpop.f32.mrf.mxu0  ;;  %13113 = vmatmul.mubr.bf16.gmra.mxu1 %v2675_v21  ;;  %13237 = vmatmul.mubr.bf16.gmra.mxu0 %v3232_v60  ;;  %v3233_v40 = vpack.c.bf16 %v3189_v31, %v3188_v46  ;;  %v2633_v31 = vld [vmem:[#allocation2 + $0xbf] sm:$0xff] }
 0x26e   : > { %v1970_v6 = vadd.f32 %v1767_v62, %v16582_v20  ;;  %13116 = vmatprep.mubr.msk.bf16.mxu1 %vm15473_vm0, %v16692_v44  ;;  %13240 = vmatprep.mubr.msk.bf16.mxu0 %vm15473_vm0, %v16692_v44 }
 0x26f   : > { %v12878_v15 = vpop.f32.mrf.mxu1  ;;  %v13002_v36 = vpop.f32.mrf.mxu0 }
 0x270   : > { %v16753_v63 = vadd.f32 %v2324_v39, %v1970_v6  ;;  %v2634_v39 = vld [vmem:[#allocation2 + $0xc7] sm:$0xff] }
 0x271   : > { %v1770_v41 = vpop.f32.mrf.mxu1  ;;  %v2327_v20 = vpop.f32.mrf.mxu0  ;;  %v3191_v6 = vld [vmem:[#allocation2 + $0xc8] sm:$0xff] }
 0x272   : > { %v1971_v27 = vadd.f32 %v1770_v41, %v16590_v59  ;;  %v3190_v41 = vld [vmem:[#allocation2 + $0xc0] sm:$0xff] }
 0x273   : > { %v12879_v24 = vpop.f32.mrf.mxu1  ;;  %v13003_v49 = vpop.f32.mrf.mxu0  ;;  %v3234_v2 = vpack.c.bf16 %v3191_v6, %v3190_v41  ;;  %v2635_v6 = vld [vmem:[#allocation2 + $0xcf] sm:$0xff] }
 0x274   : > { %v16758_v52 = vadd.f32 %v2327_v20, %v1971_v27  ;;  %v2677_v27 = vpack.c.bf16 %v2634_v39, %v2633_v31 }
 0x275   : > { %v1775_v21 = vpop.f32.mrf.mxu1  ;;  %v2332_v60 = vpop.f32.mrf.mxu0  ;;  %13117 = vmatmul.mubr.bf16.gmra.mxu1 %v2676_v42  ;;  %13241 = vmatmul.mubr.bf16.gmra.mxu0 %v3233_v40 }
 0x276   : > { %v1972_v43 = vadd.f32 %v1775_v21, %v16594_v14  ;;  %13120 = vmatprep.mubr.msk.bf16.mxu1 %vm15473_vm0, %v16692_v44  ;;  %13244 = vmatprep.mubr.msk.bf16.mxu0 %vm15473_vm0, %v16692_v44 }
 0x277   : > { %v12882_v59 = vpop.f32.mrf.mxu1  ;;  %v13006_v58 = vpop.f32.mrf.mxu0 }
 0x278   : > { %v16765_v62 = vadd.f32 %v2332_v60, %v1972_v43  ;;  %v2636_v60 = vld [vmem:[#allocation2 + $0xd7] sm:$0xff] }
 0x279   : > { %v1778_v15 = vpop.f32.mrf.mxu1  ;;  %v2335_v36 = vpop.f32.mrf.mxu0  ;;  %v3193_v43 = vld [vmem:[#allocation2 + $0xd8] sm:$0xff] }
 0x27a   : > { %v1973_v3 = vadd.f32 %v1778_v15, %v16602_v50  ;;  %v3192_v15 = vld [vmem:[#allocation2 + $0xd0] sm:$0xff] }
 0x27b   : > { %v12883_v20 = vpop.f32.mrf.mxu1  ;;  %v13007_v14 = vpop.f32.mrf.mxu0  ;;  %v3235_v31 = vpack.c.bf16 %v3193_v43, %v3192_v15  ;;  %v2638_v43 = vld [vmem:[#allocation2 + $0xe7] sm:$0xff] }
 0x27c   : > { %v16768_v46 = vadd.f32 %v2335_v36, %v1973_v3  ;;  %v2678_v3 = vpack.c.bf16 %v2636_v60, %v2635_v6 }
 0x27d   : > { %v1783_v24 = vpop.f32.mrf.mxu1  ;;  %v2340_v49 = vpop.f32.mrf.mxu0  ;;  %13121 = vmatmul.mubr.bf16.gmra.mxu1 %v2677_v27  ;;  %13245 = vmatmul.mubr.bf16.gmra.mxu0 %v3234_v2 }
 0x27e   : > { %v1974_v42 = vadd.f32 %v1783_v24, %v16606_v13  ;;  %13124 = vmatprep.mubr.msk.bf16.mxu1 %vm15473_vm0, %v16692_v44  ;;  %13248 = vmatprep.mubr.msk.bf16.mxu0 %vm15473_vm0, %v16692_v44 }
 0x27f   : > { %v12886_v50 = vpop.f32.mrf.mxu1  ;;  %v13010_v40 = vpop.f32.mrf.mxu0 }
 0x280   : > { %v16775_v21 = vadd.f32 %v2340_v49, %v1974_v42  ;;  %v2637_v49 = vld [vmem:[#allocation2 + $0xdf] sm:$0xff]  ;;  %v3195_v42 = vld [vmem:[#allocation2 + $0xe8] sm:$0xff] }
 0x281   : > { %v1786_v59 = vpop.f32.mrf.mxu1  ;;  %v2343_v58 = vpop.f32.mrf.mxu0 }
 0x282   : > { %v1975_v39 = vadd.f32 %v1786_v59, %v16614_v61  ;;  %v3194_v59 = vld [vmem:[#allocation2 + $0xe0] sm:$0xff] }
 0x283   : > { %v12887_v36 = vpop.f32.mrf.mxu1  ;;  %v13011_v13 = vpop.f32.mrf.mxu0  ;;  %v3236_v6 = vpack.c.bf16 %v3195_v42, %v3194_v59  ;;  %v2639_v42 = vld [vmem:[#allocation2 + $0xef] sm:$0xff] }
 0x284   : > { %v16778_v41 = vadd.f32 %v2343_v58, %v1975_v39  ;;  %v2679_v39 = vpack.c.bf16 %v2638_v43, %v2637_v49 }
 0x285   : > { %v1791_v20 = vpop.f32.mrf.mxu1  ;;  %v2348_v14 = vpop.f32.mrf.mxu0  ;;  %13125 = vmatmul.mubr.bf16.gmra.mxu1 %v2678_v3  ;;  %13249 = vmatmul.mubr.bf16.gmra.mxu0 %v3235_v31 }
 0x286   : > { %v1976_v27 = vadd.f32 %v1791_v20, %v16457_v10  ;;  %13128 = vmatprep.mubr.msk.bf16.mxu1 %vm15473_vm0, %v16692_v44  ;;  %13252 = vmatprep.mubr.msk.bf16.mxu0 %vm15473_vm0, %v16692_v44 }
 0x287   : > { %v12890_v61 = vpop.f32.mrf.mxu1  ;;  %v13014_v2 = vpop.f32.mrf.mxu0 }
 0x288   : > { %v16785_v24 = vadd.f32 %v2348_v14, %v1976_v27  ;;  %v2640_v14 = vld [vmem:[#allocation2 + $0xf7] sm:$0xff] }
 0x289   : > { %v1794_v50 = vpop.f32.mrf.mxu1  ;;  %v2351_v40 = vpop.f32.mrf.mxu0  ;;  %v3197_v27 = vld [vmem:[#allocation2 + $0xf8] sm:$0xff] }
 0x28a   : > { %v1977_v60 = vadd.f32 %v1794_v50, %v16468_v4  ;;  %v3196_v50 = vld [vmem:[#allocation2 + $0xf0] sm:$0xff] }
 0x28b   : > { %v12891_v58 = vpop.f32.mrf.mxu1  ;;  %v13015_v10 = vpop.f32.mrf.mxu0  ;;  %v3237_v43 = vpack.c.bf16 %v3197_v27, %v3196_v50  ;;  %v2641_v27 = vld [vmem:[#allocation2 + $0xff] sm:$0xff] }
 0x28c   : > { %v16788_v15 = vadd.f32 %v2351_v40, %v1977_v60  ;;  %v2680_v60 = vpack.c.bf16 %v2640_v14, %v2639_v42 }
 0x28d   : > { %v1799_v36 = vpop.f32.mrf.mxu1  ;;  %v2356_v13 = vpop.f32.mrf.mxu0  ;;  %13129 = vmatmul.mubr.bf16.gmra.mxu1 %v2679_v39  ;;  %13253 = vmatmul.mubr.bf16.gmra.mxu0 %v3236_v6 }
 0x28e   : > { %v1978_v3 = vadd.f32 %v1799_v36, %v16472_v28  ;;  %13132 = vmatprep.mubr.msk.bf16.mxu1 %vm15473_vm0, %v16692_v44  ;;  %13256 = vmatprep.mubr.msk.bf16.mxu0 %vm15473_vm0, %v16692_v44 }
 0x28f   : > { %v12894_v4 = vpop.f32.mrf.mxu1  ;;  %v13018_v31 = vpop.f32.mrf.mxu0 }
 0x290   : > { %v16795_v20 = vadd.f32 %v2356_v13, %v1978_v3  ;;  %v2642_v13 = vld [vmem:[#allocation2 + $0x107] sm:$0xff] }
 0x291   : > { %v1802_v61 = vpop.f32.mrf.mxu1  ;;  %v2359_v2 = vpop.f32.mrf.mxu0  ;;  %v3199_v3 = vld [vmem:[#allocation2 + $0x108] sm:$0xff] }
 0x292   : > { %v1979_v49 = vadd.f32 %v1802_v61, %v16483_v33  ;;  %v3198_v61 = vld [vmem:[#allocation2 + $0x100] sm:$0xff] }
 0x293   : > { %v12895_v40 = vpop.f32.mrf.mxu1  ;;  %v13019_v28 = vpop.f32.mrf.mxu0  ;;  %v3238_v42 = vpack.c.bf16 %v3199_v3, %v3198_v61  ;;  %v2643_v3 = vld [vmem:[#allocation2 + $0x10f] sm:$0xff] }
 0x294   : > { %v16798_v59 = vadd.f32 %v2359_v2, %v1979_v49  ;;  %v2681_v49 = vpack.c.bf16 %v2642_v13, %v2641_v27 }
 0x295   : > { %v1807_v58 = vpop.f32.mrf.mxu1  ;;  %v2364_v10 = vpop.f32.mrf.mxu0  ;;  %13133 = vmatmul.mubr.bf16.gmra.mxu1 %v2680_v60  ;;  %13257 = vmatmul.mubr.bf16.gmra.mxu0 %v3237_v43 }
 0x296   : > { %v1980_v39 = vadd.f32 %v1807_v58, %v16488_v38  ;;  %13136 = vmatprep.mubr.msk.bf16.mxu1 %vm15473_vm0, %v16692_v44  ;;  %13260 = vmatprep.mubr.msk.bf16.mxu0 %vm15473_vm0, %v16692_v44 }
 0x297   : > { %v12898_v33 = vpop.f32.mrf.mxu1  ;;  %v13022_v6 = vpop.f32.mrf.mxu0 }
 0x298   : > { %v16805_v36 = vadd.f32 %v2364_v10, %v1980_v39  ;;  %v2644_v10 = vld [vmem:[#allocation2 + $0x117] sm:$0xff] }
 0x299   : > { %v1810_v4 = vpop.f32.mrf.mxu1  ;;  %v2367_v31 = vpop.f32.mrf.mxu0  ;;  %v3201_v39 = vld [vmem:[#allocation2 + $0x118] sm:$0xff] }
 0x29a   : > { %v1981_v14 = vadd.f32 %v1810_v4, %v16496_v9  ;;  %v3200_v4 = vld [vmem:[#allocation2 + $0x110] sm:$0xff] }
 0x29b   : > { %v12899_v2 = vpop.f32.mrf.mxu1  ;;  %v13023_v38 = vpop.f32.mrf.mxu0  ;;  %v3239_v27 = vpack.c.bf16 %v3201_v39, %v3200_v4  ;;  %v2645_v39 = vld [vmem:[#allocation2 + $0x11f] sm:$0xff] }
 0x29c   : > { %v16808_v50 = vadd.f32 %v2367_v31, %v1981_v14  ;;  %v2682_v14 = vpack.c.bf16 %v2644_v10, %v2643_v3 }
 0x29d   : > { %v1815_v40 = vpop.f32.mrf.mxu1  ;;  %v2372_v28 = vpop.f32.mrf.mxu0  ;;  %13137 = vmatmul.mubr.bf16.gmra.mxu1 %v2681_v49  ;;  %13261 = vmatmul.mubr.bf16.gmra.mxu0 %v3238_v42 }
 0x29e   : > { %v1982_v60 = vadd.f32 %v1815_v40, %v16500_v35  ;;  %13140 = vmatprep.mubr.msk.bf16.mxu1 %vm15473_vm0, %v16692_v44  ;;  %13264 = vmatprep.mubr.msk.bf16.mxu0 %vm15473_vm0, %v16692_v44 }
 0x29f   : > { %v12902_v9 = vpop.f32.mrf.mxu1  ;;  %v13026_v43 = vpop.f32.mrf.mxu0 }
 0x2a0   : > { %v16815_v58 = vadd.f32 %v2372_v28, %v1982_v60  ;;  %v2646_v28 = vld [vmem:[#allocation2 + $0x127] sm:$0xff] }
 0x2a1   : > { %v1818_v33 = vpop.f32.mrf.mxu1  ;;  %v2375_v6 = vpop.f32.mrf.mxu0  ;;  %v3203_v60 = vld [vmem:[#allocation2 + $0x128] sm:$0xff] }
 0x2a2   : > { %v1983_v13 = vadd.f32 %v1818_v33, %v16508_v16  ;;  %v3202_v33 = vld [vmem:[#allocation2 + $0x120] sm:$0xff] }
 0x2a3   : > { %v12903_v31 = vpop.f32.mrf.mxu1  ;;  %v13027_v35 = vpop.f32.mrf.mxu0  ;;  %v3240_v3 = vpack.c.bf16 %v3203_v60, %v3202_v33  ;;  %v2647_v60 = vld [vmem:[#allocation2 + $0x12f] sm:$0xff] }
 0x2a4   : > { %v16818_v61 = vadd.f32 %v2375_v6, %v1983_v13  ;;  %v2683_v13 = vpack.c.bf16 %v2646_v28, %v2645_v39 }
 0x2a5   : > { %v1823_v2 = vpop.f32.mrf.mxu1  ;;  %v2380_v38 = vpop.f32.mrf.mxu0  ;;  %13141 = vmatmul.mubr.bf16.gmra.mxu1 %v2682_v14  ;;  %13265 = vmatmul.mubr.bf16.gmra.mxu0 %v3239_v27 }
 0x2a6   : > { %v1984_v49 = vadd.f32 %v1823_v2, %v16512_v7  ;;  %13144 = vmatprep.mubr.msk.bf16.mxu1 %vm15473_vm0, %v16692_v44  ;;  %13268 = vmatprep.mubr.msk.bf16.mxu0 %vm15473_vm0, %v16692_v44 }
 0x2a7   : > { %v12906_v16 = vpop.f32.mrf.mxu1  ;;  %v13030_v42 = vpop.f32.mrf.mxu0 }
 0x2a8   : > { %v16825_v40 = vadd.f32 %v2380_v38, %v1984_v49  ;;  %v2648_v38 = vld [vmem:[#allocation2 + $0x137] sm:$0xff] }
 0x2a9   : > { %v1826_v9 = vpop.f32.mrf.mxu1  ;;  %v2383_v43 = vpop.f32.mrf.mxu0  ;;  %v3205_v49 = vld [vmem:[#allocation2 + $0x138] sm:$0xff] }
 0x2aa   : > { %v1985_v10 = vadd.f32 %v1826_v9, %v16520_v45  ;;  %v3204_v9 = vld [vmem:[#allocation2 + $0x130] sm:$0xff] }
 0x2ab   : > { %v12907_v6 = vpop.f32.mrf.mxu1  ;;  %v13031_v7 = vpop.f32.mrf.mxu0  ;;  %v3241_v39 = vpack.c.bf16 %v3205_v49, %v3204_v9  ;;  %v2649_v49 = vld [vmem:[#allocation2 + $0x13f] sm:$0xff] }
 0x2ac   : > { %v16828_v4 = vadd.f32 %v2383_v43, %v1985_v10  ;;  %v2684_v10 = vpack.c.bf16 %v2648_v38, %v2647_v60 }
 0x2ad   : > { %v1831_v31 = vpop.f32.mrf.mxu1  ;;  %v2388_v35 = vpop.f32.mrf.mxu0  ;;  %13145 = vmatmul.mubr.bf16.gmra.mxu1 %v2683_v13  ;;  %13269 = vmatmul.mubr.bf16.gmra.mxu0 %v3240_v3 }
 0x2ae   : > { %v1986_v14 = vadd.f32 %v1831_v31, %v16524_v17  ;;  %13148 = vmatprep.mubr.msk.bf16.mxu1 %vm15473_vm0, %v16692_v44  ;;  %13272 = vmatprep.mubr.msk.bf16.mxu0 %vm15473_vm0, %v16692_v44 }
 0x2af   : > { %v12910_v45 = vpop.f32.mrf.mxu1  ;;  %v13034_v27 = vpop.f32.mrf.mxu0 }
 0x2b0   : > { %v16835_v2 = vadd.f32 %v2388_v35, %v1986_v14  ;;  %v2650_v35 = vld [vmem:[#allocation2 + $0x147] sm:$0xff] }
 0x2b1   : > { %v1834_v16 = vpop.f32.mrf.mxu1  ;;  %v2391_v42 = vpop.f32.mrf.mxu0  ;;  %v3207_v14 = vld [vmem:[#allocation2 + $0x148] sm:$0xff] }
 0x2b2   : > { %v1987_v28 = vadd.f32 %v1834_v16, %v16532_v56  ;;  %v3206_v16 = vld [vmem:[#allocation2 + $0x140] sm:$0xff] }
 0x2b3   : > { %v12911_v43 = vpop.f32.mrf.mxu1  ;;  %v13035_v17 = vpop.f32.mrf.mxu0  ;;  %v3242_v60 = vpack.c.bf16 %v3207_v14, %v3206_v16  ;;  %v19620_v14 = vld [vmem:[#allocation70_spill] sm:$0xff] }
 0x2b4   : > { %v16838_v33 = vadd.f32 %v2391_v42, %v1987_v28  ;;  %v2685_v28 = vpack.c.bf16 %v2650_v35, %v2649_v49 }
 0x2b5   : > { %v1839_v6 = vpop.f32.mrf.mxu1  ;;  %v2396_v7 = vpop.f32.mrf.mxu0  ;;  %13149 = vmatmul.mubr.bf16.gmra.mxu1 %v2684_v10  ;;  %13273 = vmatmul.mubr.bf16.gmra.mxu0 %v3241_v39  ;;  %v19619_v10 = vld [vmem:[#allocation69_spill] sm:$0xff] }
 0x2b6   : > { %v1988_v13 = vadd.f32 %v1839_v6, %v16536_v1  ;;  %13152 = vmatprep.mubr.msk.bf16.mxu1 %vm15473_vm0, %v16692_v44  ;;  %13276 = vmatprep.mubr.msk.bf16.mxu0 %vm15473_vm0, %v16692_v44 }
 0x2b7   : > { %v12914_v56 = vpop.f32.mrf.mxu1  ;;  %v13038_v3 = vpop.f32.mrf.mxu0 }
 0x2b8   : > { %v16845_v31 = vadd.f32 %v2396_v7, %v1988_v13  ;;  %v2652_v13 = vld [vmem:[#allocation2 + $0x157] sm:$0xff] }
 0x2b9   : > { %v1842_v45 = vpop.f32.mrf.mxu1  ;;  %v2399_v27 = vpop.f32.mrf.mxu0  ;;  %v3209_v56 = vld [vmem:[#allocation2 + $0x158] sm:$0xff] }
 0x2ba   : > { %v1989_v38 = vadd.f32 %v1842_v45, %v16544_v48 }
 0x2bb   : > { %v12915_v42 = vpop.f32.mrf.mxu1  ;;  %v13039_v1 = vpop.f32.mrf.mxu0 }
 0x2bc   : > { %v16848_v9 = vadd.f32 %v2399_v27, %v1989_v38  ;;  %v2651_v27 = vld [vmem:[#allocation2 + $0x14f] sm:$0xff] }
 0x2bd   : > { %v1847_v43 = vpop.f32.mrf.mxu1  ;;  %v2404_v17 = vpop.f32.mrf.mxu0  ;;  %13153 = vmatmul.mubr.bf16.gmra.mxu1 %v2685_v28  ;;  %13277 = vmatmul.mubr.bf16.gmra.mxu0 %v3242_v60  ;;  %v3208_v38 = vld [vmem:[#allocation2 + $0x150] sm:$0xff]  ;;  %v2686_v42 = vpack.c.bf16 %v2652_v13, %v2651_v27  ;;  %v2654_v13 = vld [vmem:[#allocation2 + $0x167] sm:$0xff]  ;;  %v2653_v27 = vld [vmem:[#allocation2 + $0x15f] sm:$0xff] }
 0x2be   : > { %v1990_v39 = vadd.f32 %v1847_v43, %v19619_v10  ;;  %13156 = vmatprep.mubr.msk.bf16.mxu1 %vm15473_vm0, %v16692_v44  ;;  %13280 = vmatprep.mubr.msk.bf16.mxu0 %vm15473_vm0, %v16692_v44  ;;  %v3243_v1 = vpack.c.bf16 %v3209_v56, %v3208_v38  ;;  %v3211_v56 = vld [vmem:[#allocation2 + $0x168] sm:$0xff]  ;;  %v3210_v38 = vld [vmem:[#allocation2 + $0x160] sm:$0xff] }
 0x2bf   : > { %v12918_v48 = vpop.f32.mrf.mxu1  ;;  %v13042_v6 = vpop.f32.mrf.mxu0 }
 0x2c0   : > { %v16855_v7 = vadd.f32 %v2404_v17, %v1990_v39  ;;  %v19622_v17 = vld [vmem:[#allocation71_spill] sm:$0xff] }
 0x2c1   : > { %v1850_v3 = vpop.f32.mrf.mxu1  ;;  %v2407_v35 = vpop.f32.mrf.mxu0 }
 0x2c2   : > { %v1991_v45 = vadd.f32 %v1850_v3, %v19620_v14  ;;  %v19624_v14 = vld [vmem:[#allocation72_spill] sm:$0xff] }
 0x2c3   : > { %v12919_v49 = vpop.f32.mrf.mxu1  ;;  %v13043_v16 = vpop.f32.mrf.mxu0 }
 0x2c4   : > { %v16858_v28 = vadd.f32 %v2407_v35, %v1991_v45 }
 0x2c5   : > { %v1855_v60 = vpop.f32.mrf.mxu1  ;;  %v2412_v43 = vpop.f32.mrf.mxu0  ;;  %13157 = vmatmul.mubr.bf16.gmra.mxu1 %v2686_v42  ;;  %13281 = vmatmul.mubr.bf16.gmra.mxu0 %v3243_v1  ;;  %v2687_v42 = vpack.c.bf16 %v2654_v13, %v2653_v27  ;;  %v3244_v1 = vpack.c.bf16 %v3211_v56, %v3210_v38  ;;  %v2656_v13 = vld [vmem:[#allocation2 + $0x177] sm:$0xff]  ;;  %v2655_v38 = vld [vmem:[#allocation2 + $0x16f] sm:$0xff] }
 0x2c6   : > { %19621 = vst [vmem:[#allocation69_spill] sm:$0xff] %v16858_v28  ;;  %v1992_v10 = vadd.f32 %v1855_v60, %v19622_v17  ;;  %13160 = vmatprep.mubr.msk.bf16.mxu1 %vm15473_vm0, %v16692_v44  ;;  %13284 = vmatprep.mubr.msk.bf16.mxu0 %vm15473_vm0, %v16692_v44  ;;  %v3213_v56 = vld [vmem:[#allocation2 + $0x178] sm:$0xff] }
 0x2c7   : > { %v12922_v39 = vpop.f32.mrf.mxu1  ;;  %v13046_v48 = vpop.f32.mrf.mxu0 }
 0x2c8   : > { %v16865_v6 = vadd.f32 %v2412_v43, %v1992_v10  ;;  %v19626_v43 = vld [vmem:[#allocation73_spill] sm:$0xff] }
 0x2c9   : > { %v1858_v3 = vpop.f32.mrf.mxu1  ;;  %v2415_v35 = vpop.f32.mrf.mxu0 }
 0x2ca   : > { %19623 = vst [vmem:[#allocation70_spill] sm:$0xff] %v16865_v6  ;;  %v1993_v45 = vadd.f32 %v1858_v3, %v19624_v14 }
 0x2cb   : > { %v12923_v49 = vpop.f32.mrf.mxu1  ;;  %v13047_v16 = vpop.f32.mrf.mxu0 }
 0x2cc   : > { %v16868_v60 = vadd.f32 %v2415_v35, %v1993_v45  ;;  %v19628_v45 = vld [vmem:[#allocation74_spill] sm:$0xff]  ;;  %v3212_v49 = vld [vmem:[#allocation2 + $0x170] sm:$0xff] }
 0x2cd   : > { %v1863_v17 = vpop.f32.mrf.mxu1  ;;  %v2420_v28 = vpop.f32.mrf.mxu0  ;;  %13161 = vmatmul.mubr.bf16.gmra.mxu1 %v2687_v42  ;;  %13285 = vmatmul.mubr.bf16.gmra.mxu0 %v3244_v1  ;;  %v2688_v1 = vpack.c.bf16 %v2656_v13, %v2655_v38  ;;  %v2658_v13 = vld [vmem:[#allocation2 + $0x187] sm:$0xff] }
 0x2ce   : > { %19625 = vst [vmem:[#allocation71_spill] sm:$0xff] %v16868_v60  ;;  %v1994_v10 = vadd.f32 %v1863_v17, %v19626_v43  ;;  %13164 = vmatprep.mubr.msk.bf16.mxu1 %vm15473_vm0, %v16692_v44  ;;  %13288 = vmatprep.mubr.msk.bf16.mxu0 %vm15473_vm0, %v16692_v44  ;;  %v3245_v17 = vpack.c.bf16 %v3213_v56, %v3212_v49  ;;  %v3215_v56 = vld [vmem:[#allocation2 + $0x188] sm:$0xff]  ;;  %v2657_v49 = vld [vmem:[#allocation2 + $0x17f] sm:$0xff] }
 0x2cf   : > { %v12926_v39 = vpop.f32.mrf.mxu1  ;;  %v13050_v48 = vpop.f32.mrf.mxu0 }
 0x2d0   : > { %v16875_v3 = vadd.f32 %v2420_v28, %v1994_v10  ;;  %v19630_v28 = vld [vmem:[#allocation75_spill] sm:$0xff] }
 0x2d1   : > { %v1866_v35 = vpop.f32.mrf.mxu1  ;;  %v2423_v14 = vpop.f32.mrf.mxu0 }
 0x2d2   : > { %19627 = vst [vmem:[#allocation72_spill] sm:$0xff] %v16875_v3  ;;  %v1995_v27 = vadd.f32 %v1866_v35, %v19628_v45 }
 0x2d3   : > { %v12927_v16 = vpop.f32.mrf.mxu1  ;;  %v13051_v42 = vpop.f32.mrf.mxu0 }
 0x2d4   : > { %v16878_v43 = vadd.f32 %v2423_v14, %v1995_v27  ;;  %v19632_v27 = vld [vmem:[#allocation76_spill] sm:$0xff]  ;;  %v3214_v16 = vld [vmem:[#allocation2 + $0x180] sm:$0xff] }
 0x2d5   : > { %v1871_v60 = vpop.f32.mrf.mxu1  ;;  %v2428_v6 = vpop.f32.mrf.mxu0  ;;  %13165 = vmatmul.mubr.bf16.gmra.mxu1 %v2688_v1  ;;  %13289 = vmatmul.mubr.bf16.gmra.mxu0 %v3245_v17  ;;  %v2689_v1 = vpack.c.bf16 %v2658_v13, %v2657_v49  ;;  %v3246_v17 = vpack.c.bf16 %v3215_v56, %v3214_v16  ;;  %v2660_v13 = vld [vmem:[#allocation2 + $0x197] sm:$0xff]  ;;  %v2659_v16 = vld [vmem:[#allocation2 + $0x18f] sm:$0xff] }
 0x2d6   : > { %19629 = vst [vmem:[#allocation73_spill] sm:$0xff] %v16878_v43  ;;  %v1996_v10 = vadd.f32 %v1871_v60, %v19630_v28  ;;  %13168 = vmatprep.mubr.msk.bf16.mxu1 %vm15473_vm0, %v16692_v44  ;;  %13292 = vmatprep.mubr.msk.bf16.mxu0 %vm15473_vm0, %v16692_v44  ;;  %v3217_v56 = vld [vmem:[#allocation2 + $0x198] sm:$0xff] }
 0x2d7   : > { %v12930_v39 = vpop.f32.mrf.mxu1  ;;  %v13054_v48 = vpop.f32.mrf.mxu0 }
 0x2d8   : > { %v16885_v35 = vadd.f32 %v2428_v6, %v1996_v10  ;;  %v19634_v6 = vld [vmem:[#allocation77_spill] sm:$0xff] }
 0x2d9   : > { %v1874_v14 = vpop.f32.mrf.mxu1  ;;  %v2431_v45 = vpop.f32.mrf.mxu0 }
 0x2da   : > { %19631 = vst [vmem:[#allocation74_spill] sm:$0xff] %v16885_v35  ;;  %v1997_v38 = vadd.f32 %v1874_v14, %v19632_v27 }
 0x2db   : > { %v12931_v42 = vpop.f32.mrf.mxu1  ;;  %v13055_v60 = vpop.f32.mrf.mxu0 }
 0x2dc   : > { %v16888_v28 = vadd.f32 %v2431_v45, %v1997_v38  ;;  %v19635_v38 = vld [vmem:[#allocation78_spill] sm:$0xff]  ;;  %v3216_v42 = vld [vmem:[#allocation2 + $0x190] sm:$0xff] }
 0x2dd   : > { %v1879_v43 = vpop.f32.mrf.mxu1  ;;  %v2436_v3 = vpop.f32.mrf.mxu0  ;;  %13169 = vmatmul.mubr.bf16.gmra.mxu1 %v2689_v1  ;;  %13293 = vmatmul.mubr.bf16.gmra.mxu0 %v3246_v17  ;;  %v2690_v1 = vpack.c.bf16 %v2660_v13, %v2659_v16  ;;  %v3247_v17 = vpack.c.bf16 %v3217_v56, %v3216_v42  ;;  %v2662_v13 = vld [vmem:[#allocation2 + $0x1a7] sm:$0xff]  ;;  %v2661_v42 = vld [vmem:[#allocation2 + $0x19f] sm:$0xff] }
 0x2de   : > { %19633 = vst [vmem:[#allocation75_spill] sm:$0xff] %v16888_v28  ;;  %v1998_v10 = vadd.f32 %v1879_v43, %v19634_v6  ;;  %13172 = vmatprep.mubr.msk.bf16.mxu1 %vm15473_vm0, %v16692_v44  ;;  %13296 = vmatprep.mubr.msk.bf16.mxu0 %vm15473_vm0, %v16692_v44  ;;  %v3219_v56 = vld [vmem:[#allocation2 + $0x1a8] sm:$0xff] }
 0x2df   : > { %v12934_v39 = vpop.f32.mrf.mxu1  ;;  %v13058_v48 = vpop.f32.mrf.mxu0 }
 0x2e0   : > { %v16895_v14 = vadd.f32 %v2436_v3, %v1998_v10  ;;  %v19637_v3 = vld [vmem:[#allocation79_spill] sm:$0xff] }
 0x2e1   : > { %v1882_v45 = vpop.f32.mrf.mxu1  ;;  %v2439_v27 = vpop.f32.mrf.mxu0 }
 0x2e2   : > { %v1999_v49 = vadd.f32 %v1882_v45, %v19635_v38 }
 0x2e3   : > { %v12935_v60 = vpop.f32.mrf.mxu1  ;;  %v13059_v43 = vpop.f32.mrf.mxu0 }
 0x2e4   : > { %v16898_v6 = vadd.f32 %v2439_v27, %v1999_v49  ;;  %v19638_v49 = vld [vmem:[#allocation80_spill] sm:$0xff]  ;;  %v3218_v60 = vld [vmem:[#allocation2 + $0x1a0] sm:$0xff] }
 0x2e5   : > { %v1887_v28 = vpop.f32.mrf.mxu1  ;;  %v2444_v35 = vpop.f32.mrf.mxu0  ;;  %13173 = vmatmul.mubr.bf16.gmra.mxu1 %v2690_v1  ;;  %13297 = vmatmul.mubr.bf16.gmra.mxu0 %v3247_v17  ;;  %v2691_v1 = vpack.c.bf16 %v2662_v13, %v2661_v42  ;;  %v3248_v17 = vpack.c.bf16 %v3219_v56, %v3218_v60  ;;  %v2664_v13 = vld [vmem:[#allocation2 + $0x1b7] sm:$0xff]  ;;  %v2663_v42 = vld [vmem:[#allocation2 + $0x1af] sm:$0xff] }
 0x2e6   : > { %19636 = vst [vmem:[#allocation76_spill] sm:$0xff] %v16898_v6  ;;  %v2000_v10 = vadd.f32 %v1887_v28, %v19637_v3  ;;  %13176 = vmatprep.mubr.msk.bf16.mxu1 %vm15473_vm0, %v16692_v44  ;;  %13300 = vmatprep.mubr.msk.bf16.mxu0 %vm15473_vm0, %v16692_v44  ;;  %v3221_v56 = vld [vmem:[#allocation2 + $0x1b8] sm:$0xff]  ;;  %v3220_v60 = vld [vmem:[#allocation2 + $0x1b0] sm:$0xff] }
 0x2e7   : > { %v12938_v39 = vpop.f32.mrf.mxu1  ;;  %v13062_v48 = vpop.f32.mrf.mxu0 }
 0x2e8   : > { %v16905_v45 = vadd.f32 %v2444_v35, %v2000_v10 }
 0x2e9   : > { %v1890_v27 = vpop.f32.mrf.mxu1  ;;  %v2447_v38 = vpop.f32.mrf.mxu0 }
 0x2ea   : > { %v2001_v16 = vadd.f32 %v1890_v27, %v19638_v49 }
 0x2eb   : > { %v12939_v43 = vpop.f32.mrf.mxu1  ;;  %v13063_v28 = vpop.f32.mrf.mxu0 }
 0x2ec   : > { %v16908_v3 = vadd.f32 %v2447_v38, %v2001_v16  ;;  %v3249_v28 = vpack.c.bf16 %v3221_v56, %v3220_v60  ;;  %v3222_v56 = vld [vmem:[#allocation2 + $0x1c0] sm:$0xff] }
 0x2ed   : > { %v2793_v6 = vpop.f32.mrf.mxu1  ;;  %13177 = vmatmul.mubr.bf16.gmra.mxu1 %v2691_v1  ;;  %v3350_v39 = vpop.f32.mrf.mxu0  ;;  %13301 = vmatmul.mubr.bf16.gmra.mxu0 %v3248_v17 }
 0x2ee   : > { %v3062_v35 = vadd.f32 %v2793_v6, %v16623_v55  ;;  %13180 = vmatprep.mubr.msk.bf16.mxu1 %vm15473_vm0, %v16692_v44  ;;  %13304 = vmatprep.mubr.msk.bf16.mxu0 %vm15473_vm0, %v16692_v44  ;;  %v2692_v6 = vpack.c.bf16 %v2664_v13, %v2663_v42  ;;  %v2666_v13 = vld [vmem:[#allocation2 + $0x1c7] sm:$0xff] }
 0x2ef   : > { %v13082_v10 = vpop.f32.mrf.mxu1  ;;  %v13206_v48 = vpop.f32.mrf.mxu0 }
 0x2f0   : > { %v16915_v27 = vadd.f32 %v3350_v39, %v3062_v35  ;;  %v2665_v48 = vld [vmem:[#allocation2 + $0x1bf] sm:$0xff] }
 0x2f1   : > { %v2796_v38 = vpop.f32.mrf.mxu1  ;;  %v3353_v49 = vpop.f32.mrf.mxu0 }
 0x2f2   : > { %v3063_v16 = vadd.f32 %v2796_v38, %v16626_v57 }
 0x2f3   : > { %v13083_v43 = vpop.f32.mrf.mxu1  ;;  %v13207_v55 = vpop.f32.mrf.mxu0 }
 0x2f4   : > { %v16918_v1 = vadd.f32 %v3353_v49, %v3063_v16  ;;  %v3223_v49 = vld [vmem:[#allocation2 + $0x1c8] sm:$0xff]  ;;  %v2693_v55 = vpack.c.bf16 %v2666_v13, %v2665_v48 }
 0x2f5   : > { %v2801_v17 = vpop.f32.mrf.mxu1  ;;  %13181 = vmatmul.mubr.bf16.gmra.mxu1 %v2692_v6  ;;  %v3358_v10 = vpop.f32.mrf.mxu0  ;;  %13305 = vmatmul.mubr.bf16.gmra.mxu0 %v3249_v28  ;;  %v3250_v6 = vpack.c.bf16 %v3223_v49, %v3222_v56  ;;  %v3728_v13 = vld [vmem:[#allocation2 + $0x29] sm:$0xff]  ;;  %v4284_v56 = vld [vmem:[#allocation2 + $0x37] sm:$0xff]  ;;  %v4285_v49 = vld [vmem:[#allocation2 + $0x3f] sm:$0xff] }
 0x2f6   : > { %v3064_v39 = vadd.f32 %v2801_v17, %v16633_v30  ;;  %13184 = vmatprep.mubr.msk.bf16.mxu1 %vm15473_vm0, %v16692_v44  ;;  %13308 = vmatprep.mubr.msk.bf16.mxu0 %vm15473_vm0, %v16692_v44 }
 0x2f7   : > { %v13086_v57 = vpop.f32.mrf.mxu1  ;;  %v13210_v35 = vpop.f32.mrf.mxu0 }
 0x2f8   : > { %v16925_v38 = vadd.f32 %v3358_v10, %v3064_v39  ;;  %v16931_v39 = vld [vmem:[#allocation2] sm:$0xff] }
 0x2f9   : > { %v2804_v16 = vpop.f32.mrf.mxu1  ;;  %v3361_v42 = vpop.f32.mrf.mxu0  ;;  %v3727_v35 = vld [vmem:[#allocation2 + $0x21] sm:$0xff] }
 0x2fa   : > { %19639 = vst [vmem:[#allocation77_spill] sm:$0xff] %v16925_v38  ;;  %v3065_v60 = vadd.f32 %v2804_v16, %v16636_v19 }
 0x2fb   : > { %v13087_v43 = vpop.f32.mrf.mxu1  ;;  %v13211_v30 = vpop.f32.mrf.mxu0 }
 0x2fc   : > { %v16928_v28 = vadd.f32 %v3361_v42, %v3065_v60  ;;  %v15202_v60 = vld [vmem:[#allocation7 + $0x1f8] sm:$0xff]  }
 0x2fd   : > { %v2809_v17 = vpop.f32.mrf.mxu1  ;;  %13185 = vmatmul.mubr.bf16.gmra.mxu1 %v2693_v55  ;;  %v3366_v44 = vpop.f32.mrf.mxu0  ;;  %13309 = vmatmul.mubr.bf16.gmra.mxu0 %v3250_v6  ;;  %v15203_v43 = vld [vmem:[#allocation7 + $0x238] sm:$0xff]   ;;  %v3781_v6 = vpack.c.bf16 %v3728_v13, %v3727_v35  ;;  %v3729_v35 = vld [vmem:[#allocation2 + $0x31] sm:$0xff] }
 0x2fe   : > { %19640 = vst [vmem:[#allocation78_spill] sm:$0xff] %v16928_v28  ;;  %v3066_v10 = vadd.f32 %v2809_v17, %v16643_v22  ;;  %13328 = vmatprep.mubr.msk.bf16.mxu1 %vm15473_vm0, %v16931_v39  ;;  %13452 = vmatprep.mubr.msk.bf16.mxu0 %vm15473_vm0, %v16931_v39  ;;  %v4338_v17 = vpack.c.bf16 %v4285_v49, %v4284_v56  ;;  %v3730_v56 = vld [vmem:[#allocation2 + $0x39] sm:$0xff]  ;;  %v4286_v49 = vld [vmem:[#allocation2 + $0x47] sm:$0xff] }
 0x2ff   : > { %v13090_v19 = vpop.f32.mrf.mxu1  ;;  %v13214_v57 = vpop.f32.mrf.mxu0 }
 0x300   : > { %v16937_v48 = vadd.f32 %v3366_v44, %v3066_v10  ;;  %v15204_v10 = vld [vmem:[#allocation7 + $0x1f0] sm:$0xff]  }
 0x301   : > { %v2812_v16 = vpop.f32.mrf.mxu1  ;;  %v3369_v42 = vpop.f32.mrf.mxu0 }
 0x302   : > { %19641 = vst [vmem:[#allocation79_spill] sm:$0xff] %v16937_v48  ;;  %v3067_v22 = vadd.f32 %v2812_v16, %v16648_v34  ;;  %v15205_v48 = vld [vmem:[#allocation7 + $0x230] sm:$0xff]   ;;  %v4287_v16 = vld [vmem:[#allocation2 + $0x4f] sm:$0xff] }
 0x303   : > { %v13091_v30 = vpop.f32.mrf.mxu1  ;;  %v13215_v55 = vpop.f32.mrf.mxu0 }
 0x304   : > { %v16940_v28 = vadd.f32 %v3369_v42, %v3067_v22  ;;  %v4339_v30 = vpack.c.bf16 %v4287_v16, %v4286_v49  ;;  %v15206_v55 = vld [vmem:[#allocation7 + $0x1e8] sm:$0xff]   ;;  %v3732_v49 = vld [vmem:[#allocation2 + $0x49] sm:$0xff] }
 0x305   : > { %v2817_v19 = vpop.f32.mrf.mxu1  ;;  %v3374_v57 = vpop.f32.mrf.mxu0  ;;  %13329 = vmatmul.mubr.bf16.vlgmr.msra.gmra.mxu1 %v3781_v6  ;;  %13453 = vmatmul.mubr.bf16.vlgmr.msra.gmra.mxu0 %v4338_v17  ;;  %v15207_v6 = vld [vmem:[#allocation7 + $0x228] sm:$0xff]  }
 0x306   : > { %v3068_v44 = vadd.f32 %v2817_v19, %v16655_v5  ;;  %13561 = vmatpush3.bf16.msra.mxu1 %v15202_v60  ;;  %13685 = vmatpush3.bf16.msra.mxu0 %v15203_v43  ;;  %v3782_v43 = vpack.c.bf16 %v3730_v56, %v3729_v35  ;;  %v15209_v35 = vld [vmem:[#allocation7 + $0x220] sm:$0xff]  }
 0x307   : > { %v13094_v38 = vpop.f32.mrf.mxu1  ;;  %v13218_v34 = vpop.f32.mrf.mxu0  ;;  %13332 = vmatprep.mubr.msk.bf16.mxu1 %vm15473_vm0, %v16931_v39  ;;  %13456 = vmatprep.mubr.msk.bf16.mxu0 %vm15473_vm0, %v16931_v39  ;;  %v4288_v16 = vld [vmem:[#allocation2 + $0x57] sm:$0xff] }
 0x308   : > { %v16947_v13 = vadd.f32 %v3374_v57, %v3068_v44  ;;  %13562 = vmatprep.subr.bf16.mxu1 %v16931_v39  ;;  %13686 = vmatprep.subr.bf16.mxu0 %v16931_v39  ;;  %v15208_v34 = vld [vmem:[#allocation7 + $0x1e0] sm:$0xff]  }
 0x309   : > { %v2820_v5 = vpop.f32.mrf.mxu1  ;;  %v3377_v42 = vpop.f32.mrf.mxu0 }
 0x30a   : > { %v3069_v38 = vadd.f32 %v2820_v5, %v16664_v25  ;;  %13563 = vmatpush3.bf16.msra.mxu1 %v15204_v10  ;;  %13687 = vmatpush3.bf16.msra.mxu0 %v15205_v48  ;;  %v3731_v10 = vld [vmem:[#allocation2 + $0x41] sm:$0xff] }
 0x30b   : > { %v13095_v22 = vpop.f32.mrf.mxu1  ;;  %v13219_v60 = vpop.f32.mrf.mxu0  ;;  %13564 = vmatprep.subr.bf16.mxu1 %v16931_v39  ;;  %13688 = vmatprep.subr.bf16.mxu0 %v16931_v39  ;;  %v4289_v5 = vld [vmem:[#allocation2 + $0x5f] sm:$0xff] }
 0x30c   : > { %v16954_v17 = vadd.f32 %v3377_v42, %v3069_v38 }
 0x30d   : > { %v2825_v19 = vpop.f32.mrf.mxu1  ;;  %v3382_v57 = vpop.f32.mrf.mxu0  ;;  %13333 = vmatmul.mubr.bf16.gmra.mxu1 %v3782_v43  ;;  %13457 = vmatmul.mubr.bf16.gmra.mxu0 %v4339_v30  ;;  %v3783_v43 = vpack.c.bf16 %v3732_v49, %v3731_v10  ;;  %v4340_v30 = vpack.c.bf16 %v4289_v5, %v4288_v16  ;;  %v3733_v10 = vld [vmem:[#allocation2 + $0x51] sm:$0xff]  ;;  %v3734_v16 = vld [vmem:[#allocation2 + $0x59] sm:$0xff]  ;;  %v4290_v5 = vld [vmem:[#allocation2 + $0x67] sm:$0xff] }
 0x30e   : > { %v3070_v25 = vadd.f32 %v2825_v19, %v16671_v8  ;;  %13336 = vmatprep.mubr.msk.bf16.mxu1 %vm15473_vm0, %v16931_v39  ;;  %13460 = vmatprep.mubr.msk.bf16.mxu0 %vm15473_vm0, %v16931_v39 }
 0x30f   : > { %v13098_v48 = vpop.f32.mrf.mxu1  ;;  %v13222_v44 = vpop.f32.mrf.mxu0  ;;  %13565 = vmatpush3.bf16.msra.mxu1 %v15206_v55  ;;  %13689 = vmatpush3.bf16.msra.mxu0 %v15207_v6  ;;  %v15210_v55 = vld [vmem:[#allocation7 + $0x1d8] sm:$0xff]  }
 0x310   : > { %v16961_v56 = vadd.f32 %v3382_v57, %v3070_v25  ;;  %13566 = vmatprep.subr.bf16.mxu1 %v16931_v39  ;;  %13690 = vmatprep.subr.bf16.mxu0 %v16931_v39  ;;  %v15211_v6 = vld [vmem:[#allocation7 + $0x218] sm:$0xff]  }
 0x311   : > { %v2828_v8 = vpop.f32.mrf.mxu1  ;;  %v3385_v42 = vpop.f32.mrf.mxu0 }
 0x312   : > { %v3071_v38 = vadd.f32 %v2828_v8, %v16676_v11  ;;  %v4291_v8 = vld [vmem:[#allocation2 + $0x6f] sm:$0xff] }
 0x313   : > { %v13099_v22 = vpop.f32.mrf.mxu1  ;;  %v13223_v60 = vpop.f32.mrf.mxu0  ;;  %13567 = vmatpush3.bf16.msra.mxu1 %v15208_v34  ;;  %13691 = vmatpush3.bf16.msra.mxu0 %v15209_v35  ;;  %v15212_v34 = vld [vmem:[#allocation7 + $0x1d0] sm:$0xff]  }
 0x314   : > { %v16966_v19 = vadd.f32 %v3385_v42, %v3071_v38  ;;  %13568 = vmatprep.subr.bf16.mxu1 %v16931_v39  ;;  %13692 = vmatprep.subr.bf16.mxu0 %v16931_v39  ;;  %v15213_v35 = vld [vmem:[#allocation7 + $0x210] sm:$0xff]  }
 0x315   : > { %v2833_v57 = vpop.f32.mrf.mxu1  ;;  %v3390_v25 = vpop.f32.mrf.mxu0  ;;  %13337 = vmatmul.mubr.bf16.gmra.mxu1 %v3783_v43  ;;  %13461 = vmatmul.mubr.bf16.gmra.mxu0 %v4340_v30  ;;  %v3784_v43 = vpack.c.bf16 %v3734_v16, %v3733_v10  ;;  %v4341_v30 = vpack.c.bf16 %v4291_v8, %v4290_v5  ;;  %v3736_v10 = vld [vmem:[#allocation2 + $0x69] sm:$0xff] }
 0x316   : > { %v3072_v11 = vadd.f32 %v2833_v57, %v16685_v29  ;;  %13340 = vmatprep.mubr.msk.bf16.mxu1 %vm15473_vm0, %v16931_v39  ;;  %13464 = vmatprep.mubr.msk.bf16.mxu0 %vm15473_vm0, %v16931_v39 }
 0x317   : > { %v13102_v48 = vpop.f32.mrf.mxu1  ;;  %v13226_v44 = vpop.f32.mrf.mxu0  ;;  %13569 = vmatpush3.bf16.msra.mxu1 %v15210_v55  ;;  %13693 = vmatpush3.bf16.msra.mxu0 %v15211_v6 }
 0x318   : > { %v16975_v49 = vadd.f32 %v3390_v25, %v3072_v11  ;;  %13570 = vmatprep.subr.bf16.mxu1 %v16931_v39  ;;  %13694 = vmatprep.subr.bf16.mxu0 %v16931_v39  ;;  %v3735_v48 = vld [vmem:[#allocation2 + $0x61] sm:$0xff] }
 0x319   : > { %v2836_v29 = vpop.f32.mrf.mxu1  ;;  %v3393_v42 = vpop.f32.mrf.mxu0 }
 0x31a   : > { %v3073_v38 = vadd.f32 %v2836_v29, %v16690_v53 }
 0x31b   : > { %v13103_v22 = vpop.f32.mrf.mxu1  ;;  %v13227_v60 = vpop.f32.mrf.mxu0  ;;  %13571 = vmatpush3.bf16.msra.mxu1 %v15212_v34  ;;  %13695 = vmatpush3.bf16.msra.mxu0 %v15213_v35  ;;  %v4292_v34 = vld [vmem:[#allocation2 + $0x77] sm:$0xff]  ;;  %v4293_v35 = vld [vmem:[#allocation2 + $0x7f] sm:$0xff] }
 0x31c   : > { %v16980_v55 = vadd.f32 %v3393_v42, %v3073_v38  ;;  %13572 = vmatprep.subr.bf16.mxu1 %v16931_v39  ;;  %13696 = vmatprep.subr.bf16.mxu0 %v16931_v39  ;;  %v3785_v42 = vpack.c.bf16 %v3736_v10, %v3735_v48  ;;  %v4342_v38 = vpack.c.bf16 %v4293_v35, %v4292_v34  ;;  %v4295_v48 = vld [vmem:[#allocation2 + $0x8f] sm:$0xff]  ;;  %v15214_v10 = vld [vmem:[#allocation7 + $0x1c8] sm:$0xff]  }
 0x31d   : > { %v2841_v6 = vpop.f32.mrf.mxu1  ;;  %v3398_v57 = vpop.f32.mrf.mxu0  ;;  %13341 = vmatmul.mubr.bf16.gmra.mxu1 %v3784_v43  ;;  %13465 = vmatmul.mubr.bf16.gmra.mxu0 %v4341_v30 }
 0x31e   : > { %v3074_v25 = vadd.f32 %v2841_v6, %v16701_v12  ;;  %13344 = vmatprep.mubr.msk.bf16.mxu1 %vm15473_vm0, %v16931_v39  ;;  %13468 = vmatprep.mubr.msk.bf16.mxu0 %vm15473_vm0, %v16931_v39 }
 0x31f   : > { %v13106_v53 = vpop.f32.mrf.mxu1  ;;  %v13230_v11 = vpop.f32.mrf.mxu0  ;;  %13573 = vmatpush3.bf16.msra.mxu1 %v15214_v10 }
 0x320   : > { %v16989_v44 = vadd.f32 %v3398_v57, %v3074_v25  ;;  %v3737_v57 = vld [vmem:[#allocation2 + $0x71] sm:$0xff]  ;;  %v3738_v25 = vld [vmem:[#allocation2 + $0x79] sm:$0xff]  ;;  %v4294_v11 = vld [vmem:[#allocation2 + $0x87] sm:$0xff]  ;;  %13574 = vmatprep.subr.bf16.mxu1 %v16931_v39 }
 0x321   : > { %v2844_v16 = vpop.f32.mrf.mxu1  ;;  %v3401_v5 = vpop.f32.mrf.mxu0 }
 0x322   : > { %v3075_v8 = vadd.f32 %v2844_v16, %v16704_v0 }
 0x323   : > { %v13107_v29 = vpop.f32.mrf.mxu1  ;;  %v13231_v12 = vpop.f32.mrf.mxu0 }
 0x324   : > { %v16992_v22 = vadd.f32 %v3401_v5, %v3075_v8  ;;  %v3786_v8 = vpack.c.bf16 %v3738_v25, %v3737_v57  ;;  %v4343_v29 = vpack.c.bf16 %v4295_v48, %v4294_v11  ;;  %v3740_v57 = vld [vmem:[#allocation2 + $0x89] sm:$0xff]  ;;  %v4296_v25 = vld [vmem:[#allocation2 + $0x97] sm:$0xff]  ;;  %v4297_v11 = vld [vmem:[#allocation2 + $0x9f] sm:$0xff] }
 0x325   : > { %v2849_v60 = vpop.f32.mrf.mxu1  ;;  %v3406_v43 = vpop.f32.mrf.mxu0  ;;  %13345 = vmatmul.mubr.bf16.gmra.mxu1 %v3785_v42  ;;  %13469 = vmatmul.mubr.bf16.gmra.mxu0 %v4342_v38  ;;  %v15215_v42 = vld [vmem:[#allocation7 + $0x208] sm:$0xff]  }
 0x326   : > { %v3076_v30 = vadd.f32 %v2849_v60, %v16711_v32  ;;  %13348 = vmatprep.mubr.msk.bf16.mxu1 %vm15473_vm0, %v16931_v39  ;;  %13472 = vmatprep.mubr.msk.bf16.mxu0 %vm15473_vm0, %v16931_v39 }
 0x327   : > { %v13110_v6 = vpop.f32.mrf.mxu1  ;;  %v13234_v0 = vpop.f32.mrf.mxu0  ;;  %13697 = vmatpush3.bf16.msra.mxu0 %v15215_v42 }
 0x328   : > { %v16999_v53 = vadd.f32 %v3406_v43, %v3076_v30  ;;  %v3739_v6 = vld [vmem:[#allocation2 + $0x81] sm:$0xff]  ;;  %13698 = vmatprep.subr.bf16.mxu0 %v16931_v39 }
 0x329   : > { %v2852_v34 = vpop.f32.mrf.mxu1  ;;  %v3409_v35 = vpop.f32.mrf.mxu0 }
 0x32a   : > { %v3077_v16 = vadd.f32 %v2852_v34, %v16715_v23 }
 0x32b   : > { %v13111_v32 = vpop.f32.mrf.mxu1  ;;  %v13235_v5 = vpop.f32.mrf.mxu0 }
 0x32c   : > { %v17003_v12 = vadd.f32 %v3409_v35, %v3077_v16  ;;  %v3787_v16 = vpack.c.bf16 %v3740_v57, %v3739_v6  ;;  %v4344_v32 = vpack.c.bf16 %v4297_v11, %v4296_v25  ;;  %v4299_v6 = vld [vmem:[#allocation2 + $0xaf] sm:$0xff] }
 0x32d   : > { %v2857_v38 = vpop.f32.mrf.mxu1  ;;  %v3414_v60 = vpop.f32.mrf.mxu0  ;;  %13349 = vmatmul.mubr.bf16.gmra.mxu1 %v3786_v8  ;;  %13473 = vmatmul.mubr.bf16.gmra.mxu0 %v4343_v29 }
 0x32e   : > { %v3078_v43 = vadd.f32 %v2857_v38, %v16722_v47  ;;  %13352 = vmatprep.mubr.msk.bf16.mxu1 %vm15473_vm0, %v16931_v39  ;;  %13476 = vmatprep.mubr.msk.bf16.mxu0 %vm15473_vm0, %v16931_v39 }
 0x32f   : > { %v13114_v23 = vpop.f32.mrf.mxu1  ;;  %v13238_v30 = vpop.f32.mrf.mxu0 }
 0x330   : > { %v17010_v0 = vadd.f32 %v3414_v60, %v3078_v43  ;;  %v3741_v60 = vld [vmem:[#allocation2 + $0x91] sm:$0xff]  ;;  %v3742_v23 = vld [vmem:[#allocation2 + $0x99] sm:$0xff]  ;;  %v4298_v30 = vld [vmem:[#allocation2 + $0xa7] sm:$0xff] }
 0x331   : > { %v2860_v48 = vpop.f32.mrf.mxu1  ;;  %v3417_v10 = vpop.f32.mrf.mxu0 }
 0x332   : > { %v3079_v47 = vadd.f32 %v2860_v48, %v16726_v26 }
 0x333   : > { %v13115_v34 = vpop.f32.mrf.mxu1  ;;  %v13239_v35 = vpop.f32.mrf.mxu0 }
 0x334   : > { %v17014_v5 = vadd.f32 %v3417_v10, %v3079_v47  ;;  %v3788_v10 = vpack.c.bf16 %v3742_v23, %v3741_v60  ;;  %v4345_v47 = vpack.c.bf16 %v4299_v6, %v4298_v30  ;;  %v4301_v60 = vld [vmem:[#allocation2 + $0xbf] sm:$0xff] }
 0x335   : > { %v2865_v8 = vpop.f32.mrf.mxu1  ;;  %v3422_v29 = vpop.f32.mrf.mxu0  ;;  %13353 = vmatmul.mubr.bf16.gmra.mxu1 %v3787_v16  ;;  %13477 = vmatmul.mubr.bf16.gmra.mxu0 %v4344_v32 }
 0x336   : > { %v3080_v42 = vadd.f32 %v2865_v8, %v16733_v54  ;;  %13356 = vmatprep.mubr.msk.bf16.mxu1 %vm15473_vm0, %v16931_v39  ;;  %13480 = vmatprep.mubr.msk.bf16.mxu0 %vm15473_vm0, %v16931_v39 }
 0x337   : > { %v13118_v38 = vpop.f32.mrf.mxu1  ;;  %v13242_v26 = vpop.f32.mrf.mxu0 }
 0x338   : > { %v17021_v43 = vadd.f32 %v3422_v29, %v3080_v42  ;;  %v3743_v29 = vld [vmem:[#allocation2 + $0xa1] sm:$0xff]  ;;  %v3744_v38 = vld [vmem:[#allocation2 + $0xa9] sm:$0xff]  ;;  %v4300_v26 = vld [vmem:[#allocation2 + $0xb7] sm:$0xff] }
 0x339   : > { %v2868_v57 = vpop.f32.mrf.mxu1  ;;  %v3425_v25 = vpop.f32.mrf.mxu0 }
 0x33a   : > { %v3081_v11 = vadd.f32 %v2868_v57, %v16736_v18 }
 0x33b   : > { %v13119_v48 = vpop.f32.mrf.mxu1  ;;  %v13243_v54 = vpop.f32.mrf.mxu0 }
 0x33c   : > { %v17024_v34 = vadd.f32 %v3425_v25, %v3081_v11  ;;  %v3789_v25 = vpack.c.bf16 %v3744_v38, %v3743_v29  ;;  %v4346_v11 = vpack.c.bf16 %v4301_v60, %v4300_v26  ;;  %v15216_v54 = vld [vmem:[#allocation7 + $0x1c0] sm:$0xff]   ;;  %v3746_v29 = vld [vmem:[#allocation2 + $0xb9] sm:$0xff]  ;;  %v4302_v38 = vld [vmem:[#allocation2 + $0xc7] sm:$0xff] }
 0x33d   : > { %v2873_v35 = vpop.f32.mrf.mxu1  ;;  %v3430_v16 = vpop.f32.mrf.mxu0  ;;  %13357 = vmatmul.mubr.bf16.gmra.mxu1 %v3788_v10  ;;  %13481 = vmatmul.mubr.bf16.gmra.mxu0 %v4345_v47  ;;  %v15217_v10 = vld [vmem:[#allocation7 + $0x200] sm:$0xff]  }
 0x33e   : > { %v3082_v32 = vadd.f32 %v2873_v35, %v16743_v51  ;;  %13360 = vmatprep.mubr.msk.bf16.mxu1 %vm15473_vm0, %v16931_v39  ;;  %13484 = vmatprep.mubr.msk.bf16.mxu0 %vm15473_vm0, %v16931_v39  ;;  %v4303_v26 = vld [vmem:[#allocation2 + $0xcf] sm:$0xff] }
 0x33f   : > { %v13122_v8 = vpop.f32.mrf.mxu1  ;;  %v13246_v18 = vpop.f32.mrf.mxu0  ;;  %13575 = vmatpush3.bf16.msra.mxu1 %v15216_v54  ;;  %13699 = vmatpush3.bf16.msra.mxu0 %v15217_v10 }
 0x340   : > { %v17031_v42 = vadd.f32 %v3430_v16, %v3082_v32  ;;  %v3745_v8 = vld [vmem:[#allocation2 + $0xb1] sm:$0xff]  ;;  %13808 = vmatprep.subr.bf16.mxu1 %v16931_v39  ;;  %13932 = vmatprep.subr.bf16.mxu0 %v16931_v39 }
 0x341   : > { %v2876_v23 = vpop.f32.mrf.mxu1  ;;  %v3433_v30 = vpop.f32.mrf.mxu0 }
 0x342   : > { %v3083_v6 = vadd.f32 %v2876_v23, %v16746_v37 }
 0x343   : > { %v13123_v57 = vpop.f32.mrf.mxu1  ;;  %v13247_v51 = vpop.f32.mrf.mxu0 }
 0x344   : > { %v17034_v48 = vadd.f32 %v3433_v30, %v3083_v6  ;;  %v3790_v57 = vpack.c.bf16 %v3746_v29, %v3745_v8  ;;  %v4347_v51 = vpack.c.bf16 %v4303_v26, %v4302_v38  ;;  %v4305_v8 = vld [vmem:[#allocation2 + $0xdf] sm:$0xff] }
 0x345   : > { %v2881_v47 = vpop.f32.mrf.mxu1  ;;  %v3438_v35 = vpop.f32.mrf.mxu0  ;;  %13361 = vmatmul.mubr.bf16.gmra.mxu1 %v3789_v25  ;;  %13485 = vmatmul.mubr.bf16.gmra.mxu0 %v4346_v11 }
 0x346   : > { %v3084_v16 = vadd.f32 %v2881_v47, %v16753_v63  ;;  %13364 = vmatprep.mubr.msk.bf16.mxu1 %vm15473_vm0, %v16931_v39  ;;  %13488 = vmatprep.mubr.msk.bf16.mxu0 %vm15473_vm0, %v16931_v39 }
 0x347   : > { %v13126_v37 = vpop.f32.mrf.mxu1  ;;  %v13250_v32 = vpop.f32.mrf.mxu0 }
 0x348   : > { %v17041_v18 = vadd.f32 %v3438_v35, %v3084_v16  ;;  %v3747_v35 = vld [vmem:[#allocation2 + $0xc1] sm:$0xff]  ;;  %v3748_v37 = vld [vmem:[#allocation2 + $0xc9] sm:$0xff]  ;;  %v4304_v32 = vld [vmem:[#allocation2 + $0xd7] sm:$0xff] }
 0x349   : > { %v2884_v63 = vpop.f32.mrf.mxu1  ;;  %v3441_v60 = vpop.f32.mrf.mxu0 }
 0x34a   : > { %v3085_v23 = vadd.f32 %v2884_v63, %v16758_v52 }
 0x34b   : > { %v13127_v30 = vpop.f32.mrf.mxu1  ;;  %v13251_v6 = vpop.f32.mrf.mxu0 }
 0x34c   : > { %v17046_v25 = vadd.f32 %v3441_v60, %v3085_v23  ;;  %v3791_v60 = vpack.c.bf16 %v3748_v37, %v3747_v35  ;;  %v4348_v23 = vpack.c.bf16 %v4305_v8, %v4304_v32  ;;  %v4307_v35 = vld [vmem:[#allocation2 + $0xef] sm:$0xff] }
 0x34d   : > { %v2889_v11 = vpop.f32.mrf.mxu1  ;;  %v3446_v54 = vpop.f32.mrf.mxu0  ;;  %13365 = vmatmul.mubr.bf16.gmra.mxu1 %v3790_v57  ;;  %13489 = vmatmul.mubr.bf16.gmra.mxu0 %v4347_v51 }
 0x34e   : > { %v3086_v10 = vadd.f32 %v2889_v11, %v16765_v62  ;;  %13368 = vmatprep.mubr.msk.bf16.mxu1 %vm15473_vm0, %v16931_v39  ;;  %13492 = vmatprep.mubr.msk.bf16.mxu0 %vm15473_vm0, %v16931_v39 }
 0x34f   : > { %v13130_v47 = vpop.f32.mrf.mxu1  ;;  %v13254_v52 = vpop.f32.mrf.mxu0 }
 0x350   : > { %v17053_v16 = vadd.f32 %v3446_v54, %v3086_v10  ;;  %v4306_v54 = vld [vmem:[#allocation2 + $0xe7] sm:$0xff]  ;;  %v3749_v47 = vld [vmem:[#allocation2 + $0xd1] sm:$0xff]  ;;  %v3750_v52 = vld [vmem:[#allocation2 + $0xd9] sm:$0xff] }
 0x351   : > { %v2892_v29 = vpop.f32.mrf.mxu1  ;;  %v3449_v38 = vpop.f32.mrf.mxu0 }
 0x352   : > { %v3087_v26 = vadd.f32 %v2892_v29, %v16768_v46 }
 0x353   : > { %v13131_v63 = vpop.f32.mrf.mxu1  ;;  %v13255_v62 = vpop.f32.mrf.mxu0 }
 0x354   : > { %v17056_v30 = vadd.f32 %v3449_v38, %v3087_v26  ;;  %v3792_v38 = vpack.c.bf16 %v3750_v52, %v3749_v47  ;;  %v4349_v26 = vpack.c.bf16 %v4307_v35, %v4306_v54  ;;  %v4309_v54 = vld [vmem:[#allocation2 + $0xff] sm:$0xff] }
 0x355   : > { %v2897_v6 = vpop.f32.mrf.mxu1  ;;  %v3454_v57 = vpop.f32.mrf.mxu0  ;;  %13369 = vmatmul.mubr.bf16.gmra.mxu1 %v3791_v60  ;;  %13493 = vmatmul.mubr.bf16.gmra.mxu0 %v4348_v23 }
 0x356   : > { %v3088_v51 = vadd.f32 %v2897_v6, %v16775_v21  ;;  %13372 = vmatprep.mubr.msk.bf16.mxu1 %vm15473_vm0, %v16931_v39  ;;  %13496 = vmatprep.mubr.msk.bf16.mxu0 %vm15473_vm0, %v16931_v39 }
 0x357   : > { %v13134_v11 = vpop.f32.mrf.mxu1  ;;  %v13258_v46 = vpop.f32.mrf.mxu0 }
 0x358   : > { %v17063_v10 = vadd.f32 %v3454_v57, %v3088_v51  ;;  %v3751_v57 = vld [vmem:[#allocation2 + $0xe1] sm:$0xff]  ;;  %v3752_v11 = vld [vmem:[#allocation2 + $0xe9] sm:$0xff]  ;;  %v4308_v46 = vld [vmem:[#allocation2 + $0xf7] sm:$0xff] }
 0x359   : > { %v2900_v37 = vpop.f32.mrf.mxu1  ;;  %v3457_v32 = vpop.f32.mrf.mxu0 }
 0x35a   : > { %v3089_v8 = vadd.f32 %v2900_v37, %v16778_v41 }
 0x35b   : > { %v13135_v29 = vpop.f32.mrf.mxu1  ;;  %v13259_v21 = vpop.f32.mrf.mxu0 }
 0x35c   : > { %v17066_v63 = vadd.f32 %v3457_v32, %v3089_v8  ;;  %v3793_v32 = vpack.c.bf16 %v3752_v11, %v3751_v57  ;;  %v4350_v8 = vpack.c.bf16 %v4309_v54, %v4308_v46  ;;  %v4311_v57 = vld [vmem:[#allocation2 + $0x10f] sm:$0xff] }
 0x35d   : > { %v2905_v62 = vpop.f32.mrf.mxu1  ;;  %v3462_v60 = vpop.f32.mrf.mxu0  ;;  %13373 = vmatmul.mubr.bf16.gmra.mxu1 %v3792_v38  ;;  %13497 = vmatmul.mubr.bf16.gmra.mxu0 %v4349_v26 }
 0x35e   : > { %v3090_v23 = vadd.f32 %v2905_v62, %v16785_v24  ;;  %13376 = vmatprep.mubr.msk.bf16.mxu1 %vm15473_vm0, %v16931_v39  ;;  %13500 = vmatprep.mubr.msk.bf16.mxu0 %vm15473_vm0, %v16931_v39 }
 0x35f   : > { %v13138_v6 = vpop.f32.mrf.mxu1  ;;  %v13262_v41 = vpop.f32.mrf.mxu0 }
 0x360   : > { %v17073_v51 = vadd.f32 %v3462_v60, %v3090_v23  ;;  %v3753_v60 = vld [vmem:[#allocation2 + $0xf1] sm:$0xff]  ;;  %v3754_v6 = vld [vmem:[#allocation2 + $0xf9] sm:$0xff]  ;;  %v4310_v41 = vld [vmem:[#allocation2 + $0x107] sm:$0xff] }
 0x361   : > { %v2908_v47 = vpop.f32.mrf.mxu1  ;;  %v3465_v52 = vpop.f32.mrf.mxu0 }
 0x362   : > { %v3091_v35 = vadd.f32 %v2908_v47, %v16788_v15 }
 0x363   : > { %v13139_v37 = vpop.f32.mrf.mxu1  ;;  %v13263_v24 = vpop.f32.mrf.mxu0 }
 0x364   : > { %v17076_v29 = vadd.f32 %v3465_v52, %v3091_v35  ;;  %v3794_v52 = vpack.c.bf16 %v3754_v6, %v3753_v60  ;;  %v4351_v35 = vpack.c.bf16 %v4311_v57, %v4310_v41  ;;  %v4313_v60 = vld [vmem:[#allocation2 + $0x11f] sm:$0xff] }
 0x365   : > { %v2913_v21 = vpop.f32.mrf.mxu1  ;;  %v3470_v38 = vpop.f32.mrf.mxu0  ;;  %13377 = vmatmul.mubr.bf16.gmra.mxu1 %v3793_v32  ;;  %13501 = vmatmul.mubr.bf16.gmra.mxu0 %v4350_v8 }
 0x366   : > { %v3092_v26 = vadd.f32 %v2913_v21, %v16795_v20  ;;  %13380 = vmatprep.mubr.msk.bf16.mxu1 %vm15473_vm0, %v16931_v39  ;;  %13504 = vmatprep.mubr.msk.bf16.mxu0 %vm15473_vm0, %v16931_v39 }
 0x367   : > { %v13142_v62 = vpop.f32.mrf.mxu1  ;;  %v13266_v15 = vpop.f32.mrf.mxu0 }
 0x368   : > { %v17083_v23 = vadd.f32 %v3470_v38, %v3092_v26  ;;  %v3755_v38 = vld [vmem:[#allocation2 + $0x101] sm:$0xff]  ;;  %v3756_v62 = vld [vmem:[#allocation2 + $0x109] sm:$0xff]  ;;  %v4312_v15 = vld [vmem:[#allocation2 + $0x117] sm:$0xff] }
 0x369   : > { %v2916_v11 = vpop.f32.mrf.mxu1  ;;  %v3473_v46 = vpop.f32.mrf.mxu0 }
 0x36a   : > { %v3093_v54 = vadd.f32 %v2916_v11, %v16798_v59 }
 0x36b   : > { %v13143_v47 = vpop.f32.mrf.mxu1  ;;  %v13267_v20 = vpop.f32.mrf.mxu0 }
 0x36c   : > { %v17086_v37 = vadd.f32 %v3473_v46, %v3093_v54  ;;  %v3795_v46 = vpack.c.bf16 %v3756_v62, %v3755_v38  ;;  %v4352_v54 = vpack.c.bf16 %v4313_v60, %v4312_v15  ;;  %v4315_v38 = vld [vmem:[#allocation2 + $0x12f] sm:$0xff] }
 0x36d   : > { %v2921_v24 = vpop.f32.mrf.mxu1  ;;  %v3478_v32 = vpop.f32.mrf.mxu0  ;;  %13381 = vmatmul.mubr.bf16.gmra.mxu1 %v3794_v52  ;;  %13505 = vmatmul.mubr.bf16.gmra.mxu0 %v4351_v35 }
 0x36e   : > { %v3094_v8 = vadd.f32 %v2921_v24, %v16805_v36  ;;  %13384 = vmatprep.mubr.msk.bf16.mxu1 %vm15473_vm0, %v16931_v39  ;;  %13508 = vmatprep.mubr.msk.bf16.mxu0 %vm15473_vm0, %v16931_v39 }
 0x36f   : > { %v13146_v21 = vpop.f32.mrf.mxu1  ;;  %v13270_v59 = vpop.f32.mrf.mxu0 }
 0x370   : > { %v17093_v26 = vadd.f32 %v3478_v32, %v3094_v8  ;;  %v3757_v32 = vld [vmem:[#allocation2 + $0x111] sm:$0xff]  ;;  %v3758_v21 = vld [vmem:[#allocation2 + $0x119] sm:$0xff]  ;;  %v4314_v59 = vld [vmem:[#allocation2 + $0x127] sm:$0xff] }
 0x371   : > { %v2924_v6 = vpop.f32.mrf.mxu1  ;;  %v3481_v41 = vpop.f32.mrf.mxu0 }
 0x372   : > { %v3095_v57 = vadd.f32 %v2924_v6, %v16808_v50 }
 0x373   : > { %v13147_v11 = vpop.f32.mrf.mxu1  ;;  %v13271_v36 = vpop.f32.mrf.mxu0 }
 0x374   : > { %v17096_v47 = vadd.f32 %v3481_v41, %v3095_v57  ;;  %v3796_v41 = vpack.c.bf16 %v3758_v21, %v3757_v32  ;;  %v4353_v57 = vpack.c.bf16 %v4315_v38, %v4314_v59  ;;  %v4317_v32 = vld [vmem:[#allocation2 + $0x13f] sm:$0xff] }
 0x375   : > { %v2929_v20 = vpop.f32.mrf.mxu1  ;;  %v3486_v52 = vpop.f32.mrf.mxu0  ;;  %13385 = vmatmul.mubr.bf16.gmra.mxu1 %v3795_v46  ;;  %13509 = vmatmul.mubr.bf16.gmra.mxu0 %v4352_v54 }
 0x376   : > { %v3096_v35 = vadd.f32 %v2929_v20, %v16815_v58  ;;  %13388 = vmatprep.mubr.msk.bf16.mxu1 %vm15473_vm0, %v16931_v39  ;;  %13512 = vmatprep.mubr.msk.bf16.mxu0 %vm15473_vm0, %v16931_v39 }
 0x377   : > { %v13150_v24 = vpop.f32.mrf.mxu1  ;;  %v13274_v50 = vpop.f32.mrf.mxu0 }
 0x378   : > { %v17103_v8 = vadd.f32 %v3486_v52, %v3096_v35  ;;  %v3759_v52 = vld [vmem:[#allocation2 + $0x121] sm:$0xff]  ;;  %v3760_v24 = vld [vmem:[#allocation2 + $0x129] sm:$0xff]  ;;  %v4316_v50 = vld [vmem:[#allocation2 + $0x137] sm:$0xff] }
 0x379   : > { %v2932_v62 = vpop.f32.mrf.mxu1  ;;  %v3489_v15 = vpop.f32.mrf.mxu0 }
 0x37a   : > { %v3097_v60 = vadd.f32 %v2932_v62, %v16818_v61 }
 0x37b   : > { %v13151_v6 = vpop.f32.mrf.mxu1  ;;  %v13275_v58 = vpop.f32.mrf.mxu0 }
 0x37c   : > { %v17106_v11 = vadd.f32 %v3489_v15, %v3097_v60  ;;  %v3797_v15 = vpack.c.bf16 %v3760_v24, %v3759_v52  ;;  %v4354_v60 = vpack.c.bf16 %v4317_v32, %v4316_v50  ;;  %v4319_v52 = vld [vmem:[#allocation2 + $0x14f] sm:$0xff] }
 0x37d   : > { %v2937_v36 = vpop.f32.mrf.mxu1  ;;  %v3494_v46 = vpop.f32.mrf.mxu0  ;;  %13389 = vmatmul.mubr.bf16.gmra.mxu1 %v3796_v41  ;;  %13513 = vmatmul.mubr.bf16.gmra.mxu0 %v4353_v57 }
 0x37e   : > { %v3098_v54 = vadd.f32 %v2937_v36, %v16825_v40  ;;  %13392 = vmatprep.mubr.msk.bf16.mxu1 %vm15473_vm0, %v16931_v39  ;;  %13516 = vmatprep.mubr.msk.bf16.mxu0 %vm15473_vm0, %v16931_v39 }
 0x37f   : > { %v13154_v20 = vpop.f32.mrf.mxu1  ;;  %v13278_v61 = vpop.f32.mrf.mxu0 }
 0x380   : > { %v17113_v35 = vadd.f32 %v3494_v46, %v3098_v54  ;;  %v3761_v46 = vld [vmem:[#allocation2 + $0x131] sm:$0xff]  ;;  %v3762_v20 = vld [vmem:[#allocation2 + $0x139] sm:$0xff]  ;;  %v4318_v61 = vld [vmem:[#allocation2 + $0x147] sm:$0xff] }
 0x381   : > { %v2940_v21 = vpop.f32.mrf.mxu1  ;;  %v3497_v59 = vpop.f32.mrf.mxu0 }
 0x382   : > { %v3099_v38 = vadd.f32 %v2940_v21, %v16828_v4 }
 0x383   : > { %v13155_v62 = vpop.f32.mrf.mxu1  ;;  %v13279_v40 = vpop.f32.mrf.mxu0 }
 0x384   : > { %v17116_v6 = vadd.f32 %v3497_v59, %v3099_v38  ;;  %v3798_v59 = vpack.c.bf16 %v3762_v20, %v3761_v46  ;;  %v4355_v38 = vpack.c.bf16 %v4319_v52, %v4318_v61  ;;  %v4321_v46 = vld [vmem:[#allocation2 + $0x15f] sm:$0xff] }
 0x385   : > { %v2945_v58 = vpop.f32.mrf.mxu1  ;;  %v3502_v41 = vpop.f32.mrf.mxu0  ;;  %13393 = vmatmul.mubr.bf16.gmra.mxu1 %v3797_v15  ;;  %13517 = vmatmul.mubr.bf16.gmra.mxu0 %v4354_v60 }
 0x386   : > { %v3100_v57 = vadd.f32 %v2945_v58, %v16835_v2  ;;  %13396 = vmatprep.mubr.msk.bf16.mxu1 %vm15473_vm0, %v16931_v39  ;;  %13520 = vmatprep.mubr.msk.bf16.mxu0 %vm15473_vm0, %v16931_v39 }
 0x387   : > { %v13158_v36 = vpop.f32.mrf.mxu1  ;;  %v13282_v4 = vpop.f32.mrf.mxu0 }
 0x388   : > { %v17123_v54 = vadd.f32 %v3502_v41, %v3100_v57  ;;  %v3763_v41 = vld [vmem:[#allocation2 + $0x141] sm:$0xff]  ;;  %v3764_v36 = vld [vmem:[#allocation2 + $0x149] sm:$0xff]  ;;  %v4320_v4 = vld [vmem:[#allocation2 + $0x157] sm:$0xff] }
 0x389   : > { %v2948_v24 = vpop.f32.mrf.mxu1  ;;  %v3505_v50 = vpop.f32.mrf.mxu0 }
 0x38a   : > { %v3101_v32 = vadd.f32 %v2948_v24, %v16838_v33 }
 0x38b   : > { %v13159_v21 = vpop.f32.mrf.mxu1  ;;  %v13283_v2 = vpop.f32.mrf.mxu0 }
 0x38c   : > { %v17126_v62 = vadd.f32 %v3505_v50, %v3101_v32  ;;  %v3799_v50 = vpack.c.bf16 %v3764_v36, %v3763_v41  ;;  %v4356_v32 = vpack.c.bf16 %v4321_v46, %v4320_v4  ;;  %v4323_v41 = vld [vmem:[#allocation2 + $0x16f] sm:$0xff]  ;;  %v19642_v46 = vld [vmem:[#allocation69_spill] sm:$0xff] }
 0x38d   : > { %v2953_v40 = vpop.f32.mrf.mxu1  ;;  %v3510_v15 = vpop.f32.mrf.mxu0  ;;  %13397 = vmatmul.mubr.bf16.gmra.mxu1 %v3798_v59  ;;  %13521 = vmatmul.mubr.bf16.gmra.mxu0 %v4355_v38 }
 0x38e   : > { %v3102_v60 = vadd.f32 %v2953_v40, %v16845_v31  ;;  %13400 = vmatprep.mubr.msk.bf16.mxu1 %vm15473_vm0, %v16931_v39  ;;  %13524 = vmatprep.mubr.msk.bf16.mxu0 %vm15473_vm0, %v16931_v39 }
 0x38f   : > { %v13162_v58 = vpop.f32.mrf.mxu1  ;;  %v13286_v33 = vpop.f32.mrf.mxu0 }
 0x390   : > { %v17133_v57 = vadd.f32 %v3510_v15, %v3102_v60  ;;  %v3765_v15 = vld [vmem:[#allocation2 + $0x151] sm:$0xff]  ;;  %v3766_v58 = vld [vmem:[#allocation2 + $0x159] sm:$0xff]  ;;  %v4322_v33 = vld [vmem:[#allocation2 + $0x167] sm:$0xff] }
 0x391   : > { %v2956_v20 = vpop.f32.mrf.mxu1  ;;  %v3513_v61 = vpop.f32.mrf.mxu0 }
 0x392   : > { %v3103_v52 = vadd.f32 %v2956_v20, %v16848_v9 }
 0x393   : > { %v13163_v24 = vpop.f32.mrf.mxu1  ;;  %v13287_v31 = vpop.f32.mrf.mxu0 }
 0x394   : > { %v17136_v21 = vadd.f32 %v3513_v61, %v3103_v52  ;;  %v3800_v52 = vpack.c.bf16 %v3766_v58, %v3765_v15  ;;  %v4357_v24 = vpack.c.bf16 %v4323_v41, %v4322_v33  ;;  %v3768_v15 = vld [vmem:[#allocation2 + $0x169] sm:$0xff]  ;;  %v4324_v58 = vld [vmem:[#allocation2 + $0x177] sm:$0xff]  ;;  %v4325_v33 = vld [vmem:[#allocation2 + $0x17f] sm:$0xff] }
 0x395   : > { %v2961_v2 = vpop.f32.mrf.mxu1  ;;  %v3518_v59 = vpop.f32.mrf.mxu0  ;;  %13401 = vmatmul.mubr.bf16.gmra.mxu1 %v3799_v50  ;;  %13525 = vmatmul.mubr.bf16.gmra.mxu0 %v4356_v32 }
 0x396   : > { %v3104_v38 = vadd.f32 %v2961_v2, %v16855_v7  ;;  %13404 = vmatprep.mubr.msk.bf16.mxu1 %vm15473_vm0, %v16931_v39  ;;  %13528 = vmatprep.mubr.msk.bf16.mxu0 %vm15473_vm0, %v16931_v39  ;;  %v19644_v2 = vld [vmem:[#allocation70_spill] sm:$0xff] }
 0x397   : > { %v13166_v40 = vpop.f32.mrf.mxu1  ;;  %v13290_v9 = vpop.f32.mrf.mxu0 }
 0x398   : > { %v17143_v60 = vadd.f32 %v3518_v59, %v3104_v38  ;;  %v3767_v9 = vld [vmem:[#allocation2 + $0x161] sm:$0xff] }
 0x399   : > { %v2964_v36 = vpop.f32.mrf.mxu1  ;;  %v3521_v4 = vpop.f32.mrf.mxu0 }
 0x39a   : > { %v3105_v20 = vadd.f32 %v2964_v36, %v19642_v46  ;;  %v19646_v46 = vld [vmem:[#allocation71_spill] sm:$0xff] }
 0x39b   : > { %v13167_v61 = vpop.f32.mrf.mxu1  ;;  %v13291_v7 = vpop.f32.mrf.mxu0 }
 0x39c   : > { %v17146_v31 = vadd.f32 %v3521_v4, %v3105_v20 }
 0x39d   : > { %v2969_v50 = vpop.f32.mrf.mxu1  ;;  %v3526_v32 = vpop.f32.mrf.mxu0  ;;  %13405 = vmatmul.mubr.bf16.gmra.mxu1 %v3800_v52  ;;  %13529 = vmatmul.mubr.bf16.gmra.mxu0 %v4357_v24  ;;  %v3801_v52 = vpack.c.bf16 %v3768_v15, %v3767_v9  ;;  %v4358_v24 = vpack.c.bf16 %v4325_v33, %v4324_v58  ;;  %v3770_v9 = vld [vmem:[#allocation2 + $0x179] sm:$0xff]  ;;  %v4326_v15 = vld [vmem:[#allocation2 + $0x187] sm:$0xff]  ;;  %v4327_v58 = vld [vmem:[#allocation2 + $0x18f] sm:$0xff] }
 0x39e   : > { %19643 = vst [vmem:[#allocation80_spill] sm:$0xff] %v17146_v31  ;;  %v3106_v59 = vadd.f32 %v2969_v50, %v19644_v2  ;;  %13408 = vmatprep.mubr.msk.bf16.mxu1 %vm15473_vm0, %v16931_v39  ;;  %13532 = vmatprep.mubr.msk.bf16.mxu0 %vm15473_vm0, %v16931_v39 }
 0x39f   : > { %v13170_v38 = vpop.f32.mrf.mxu1  ;;  %v13294_v40 = vpop.f32.mrf.mxu0 }
 0x3a0   : > { %v17153_v36 = vadd.f32 %v3526_v32, %v3106_v59  ;;  %v19648_v38 = vld [vmem:[#allocation72_spill] sm:$0xff] }
 0x3a1   : > { %v2972_v41 = vpop.f32.mrf.mxu1  ;;  %v3529_v4 = vpop.f32.mrf.mxu0 }
 0x3a2   : > { %19645 = vst [vmem:[#allocation69_spill] sm:$0xff] %v17153_v36  ;;  %v3107_v20 = vadd.f32 %v2972_v41, %v19646_v46  ;;  %v3769_v41 = vld [vmem:[#allocation2 + $0x171] sm:$0xff] }
 0x3a3   : > { %v13171_v61 = vpop.f32.mrf.mxu1  ;;  %v13295_v7 = vpop.f32.mrf.mxu0 }
 0x3a4   : > { %v17156_v50 = vadd.f32 %v3529_v4, %v3107_v20  ;;  %v19650_v20 = vld [vmem:[#allocation73_spill] sm:$0xff] }
 0x3a5   : > { %v2977_v2 = vpop.f32.mrf.mxu1  ;;  %v3534_v31 = vpop.f32.mrf.mxu0  ;;  %13409 = vmatmul.mubr.bf16.gmra.mxu1 %v3801_v52  ;;  %13533 = vmatmul.mubr.bf16.gmra.mxu0 %v4358_v24  ;;  %v3802_v24 = vpack.c.bf16 %v3770_v9, %v3769_v41  ;;  %v3771_v41 = vld [vmem:[#allocation2 + $0x181] sm:$0xff] }
 0x3a6   : > { %19647 = vst [vmem:[#allocation70_spill] sm:$0xff] %v17156_v50  ;;  %v3108_v32 = vadd.f32 %v2977_v2, %v19648_v38  ;;  %13412 = vmatprep.mubr.msk.bf16.mxu1 %vm15473_vm0, %v16931_v39  ;;  %13536 = vmatprep.mubr.msk.bf16.mxu0 %vm15473_vm0, %v16931_v39  ;;  %v4359_v2 = vpack.c.bf16 %v4327_v58, %v4326_v15  ;;  %v3772_v15 = vld [vmem:[#allocation2 + $0x189] sm:$0xff]  ;;  %v4328_v58 = vld [vmem:[#allocation2 + $0x197] sm:$0xff] }
 0x3a7   : > { %v13174_v59 = vpop.f32.mrf.mxu1  ;;  %v13298_v40 = vpop.f32.mrf.mxu0 }
 0x3a8   : > { %v17163_v46 = vadd.f32 %v3534_v31, %v3108_v32  ;;  %v19652_v59 = vld [vmem:[#allocation74_spill] sm:$0xff]  ;;  %v17169_v32 = vld [vmem:[#allocation2] sm:$0xff] }
 0x3a9   : > { %v2980_v33 = vpop.f32.mrf.mxu1  ;;  %v3537_v4 = vpop.f32.mrf.mxu0 }
 0x3aa   : > { %19649 = vst [vmem:[#allocation71_spill] sm:$0xff] %v17163_v46  ;;  %v3109_v61 = vadd.f32 %v2980_v33, %v19650_v20 }
 0x3ab   : > { %v13175_v7 = vpop.f32.mrf.mxu1  ;;  %v13299_v52 = vpop.f32.mrf.mxu0 }
 0x3ac   : > { %v17166_v38 = vadd.f32 %v3537_v4, %v3109_v61  ;;  %v4329_v4 = vld [vmem:[#allocation2 + $0x19f] sm:$0xff]  ;;  %v19653_v7 = vld [vmem:[#allocation75_spill] sm:$0xff] }
 0x3ad   : > { %v2985_v50 = vpop.f32.mrf.mxu1  ;;  %v3542_v39 = vpop.f32.mrf.mxu0  ;;  %13413 = vmatmul.mubr.bf16.gmra.mxu1 %v3802_v24  ;;  %13537 = vmatmul.mubr.bf16.gmra.mxu0 %v4359_v2  ;;  %v3803_v2 = vpack.c.bf16 %v3772_v15, %v3771_v41  ;;  %v3774_v41 = vld [vmem:[#allocation2 + $0x199] sm:$0xff]  ;;  %v4330_v15 = vld [vmem:[#allocation2 + $0x1a7] sm:$0xff] }
 0x3ae   : > { %19651 = vst [vmem:[#allocation72_spill] sm:$0xff] %v17166_v38  ;;  %v3110_v31 = vadd.f32 %v2985_v50, %v19652_v59  ;;  %13416 = vmatprep.mubr.msk.bf16.mxu1 %vm15473_vm0, %v17169_v32  ;;  %13540 = vmatprep.mubr.msk.bf16.mxu0 %vm15473_vm0, %v17169_v32  ;;  %v4360_v59 = vpack.c.bf16 %v4329_v4, %v4328_v58  ;;  %v4331_v58 = vld [vmem:[#allocation2 + $0x1af] sm:$0xff] }
 0x3af   : > { %v13178_v40 = vpop.f32.mrf.mxu1  ;;  %v13302_v33 = vpop.f32.mrf.mxu0 }
 0x3b0   : > { %v17175_v9 = vadd.f32 %v3542_v39, %v3110_v31  ;;  %v3773_v33 = vld [vmem:[#allocation2 + $0x191] sm:$0xff] }
 0x3b1   : > { %v2988_v20 = vpop.f32.mrf.mxu1  ;;  %v3545_v61 = vpop.f32.mrf.mxu0 }
 0x3b2   : > { %v3111_v50 = vadd.f32 %v2988_v20, %v19653_v7  ;;  %v19655_v7 = vld [vmem:[#allocation76_spill] sm:$0xff] }
 0x3b3   : > { %v13179_v52 = vpop.f32.mrf.mxu1  ;;  %v13303_v24 = vpop.f32.mrf.mxu0 }
 0x3b4   : > { %v17178_v38 = vadd.f32 %v3545_v61, %v3111_v50  ;;  %v4361_v24 = vpack.c.bf16 %v4331_v58, %v4330_v15  ;;  %v4333_v15 = vld [vmem:[#allocation2 + $0x1bf] sm:$0xff] }
 0x3b5   : > { %v2993_v46 = vpop.f32.mrf.mxu1  ;;  %v3550_v36 = vpop.f32.mrf.mxu0  ;;  %13417 = vmatmul.mubr.bf16.gmra.mxu1 %v3803_v2  ;;  %13541 = vmatmul.mubr.bf16.gmra.mxu0 %v4360_v59 }
 0x3b6   : > { %19654 = vst [vmem:[#allocation73_spill] sm:$0xff] %v17178_v38  ;;  %v3112_v39 = vadd.f32 %v2993_v46, %v16895_v14  ;;  %13420 = vmatprep.mubr.msk.bf16.mxu1 %vm15473_vm0, %v17169_v32  ;;  %13544 = vmatprep.mubr.msk.bf16.mxu0 %vm15473_vm0, %v17169_v32  ;;  %v3804_v46 = vpack.c.bf16 %v3774_v41, %v3773_v33  ;;  %v3775_v33 = vld [vmem:[#allocation2 + $0x1a1] sm:$0xff]  ;;  %v3776_v41 = vld [vmem:[#allocation2 + $0x1a9] sm:$0xff] }
 0x3b7   : > { %v13182_v31 = vpop.f32.mrf.mxu1  ;;  %v13306_v40 = vpop.f32.mrf.mxu0 }
 0x3b8   : > { %v17185_v20 = vadd.f32 %v3550_v36, %v3112_v39 }
 0x3b9   : > { %v2996_v4 = vpop.f32.mrf.mxu1  ;;  %v3553_v61 = vpop.f32.mrf.mxu0 }
 0x3ba   : > { %v3113_v50 = vadd.f32 %v2996_v4, %v19655_v7  ;;  %v4332_v7 = vld [vmem:[#allocation2 + $0x1b7] sm:$0xff] }
 0x3bb   : > { %v13183_v52 = vpop.f32.mrf.mxu1  ;;  %v13307_v14 = vpop.f32.mrf.mxu0 }
 0x3bc   : > { %v17188_v2 = vadd.f32 %v3553_v61, %v3113_v50  ;;  %v3805_v52 = vpack.c.bf16 %v3776_v41, %v3775_v33  ;;  %v4362_v14 = vpack.c.bf16 %v4333_v15, %v4332_v7  ;;  %v4334_v33 = vld [vmem:[#allocation2 + $0x1c7] sm:$0xff]  ;;  %v4335_v41 = vld [vmem:[#allocation2 + $0x1cf] sm:$0xff] }
 0x3bd   : > { %v3001_v59 = vpop.f32.mrf.mxu1  ;;  %v3558_v38 = vpop.f32.mrf.mxu0  ;;  %13421 = vmatmul.mubr.bf16.gmra.mxu1 %v3804_v46  ;;  %13545 = vmatmul.mubr.bf16.gmra.mxu0 %v4361_v24 }
 0x3be   : > { %v3114_v36 = vadd.f32 %v3001_v59, %v16905_v45  ;;  %13424 = vmatprep.mubr.msk.bf16.mxu1 %vm15473_vm0, %v17169_v32  ;;  %13548 = vmatprep.mubr.msk.bf16.mxu0 %vm15473_vm0, %v17169_v32 }
 0x3bf   : > { %v13186_v39 = vpop.f32.mrf.mxu1  ;;  %v13310_v31 = vpop.f32.mrf.mxu0 }
 0x3c0   : > { %v17195_v40 = vadd.f32 %v3558_v38, %v3114_v36  ;;  %v3778_v31 = vld [vmem:[#allocation2 + $0x1b9] sm:$0xff] }
 0x3c1   : > { %v3004_v58 = vpop.f32.mrf.mxu1  ;;  %v3561_v4 = vpop.f32.mrf.mxu0 }
 0x3c2   : > { %v3115_v61 = vadd.f32 %v3004_v58, %v16908_v3 }
 0x3c3   : > { %v13187_v50 = vpop.f32.mrf.mxu1  ;;  %v13311_v45 = vpop.f32.mrf.mxu0 }
 0x3c4   : > { %v17198_v46 = vadd.f32 %v3561_v4, %v3115_v61  ;;  %v3777_v61 = vld [vmem:[#allocation2 + $0x1b1] sm:$0xff]  ;;  %v4363_v45 = vpack.c.bf16 %v4335_v41, %v4334_v33  ;;  %v3779_v33 = vld [vmem:[#allocation2 + $0x1c1] sm:$0xff]  ;;  %v3780_v41 = vld [vmem:[#allocation2 + $0x1c9] sm:$0xff] }
 0x3c5   : > { %v3907_v24 = vpop.f32.mrf.mxu1  ;;  %13425 = vmatmul.mubr.bf16.gmra.mxu1 %v3805_v52  ;;  %v4464_v59 = vpop.f32.mrf.mxu0  ;;  %13549 = vmatmul.mubr.bf16.gmra.mxu0 %v4362_v14  ;;  %v3806_v50 = vpack.c.bf16 %v3778_v31, %v3777_v61 }
 0x3c6   : > { %v4176_v38 = vadd.f32 %v3907_v24, %v16915_v27  ;;  %13428 = vmatprep.mubr.msk.bf16.mxu1 %vm15473_vm0, %v17169_v32  ;;  %13552 = vmatprep.mubr.msk.bf16.mxu0 %vm15473_vm0, %v17169_v32 }
 0x3c7   : > { %v13330_v3 = vpop.f32.mrf.mxu1  ;;  %v13454_v36 = vpop.f32.mrf.mxu0 }
 0x3c8   : > { %v17205_v39 = vadd.f32 %v4464_v59, %v4176_v38  ;;  %v19658_v59 = vld [vmem:[#allocation77_spill] sm:$0xff] }
 0x3c9   : > { %v3910_v15 = vpop.f32.mrf.mxu1  ;;  %v4467_v58 = vpop.f32.mrf.mxu0  ;;  %v4337_v3 = vld [vmem:[#allocation2 + $0x1df] sm:$0xff] }
 0x3ca   : > { %19656 = vst [vmem:[#allocation74_spill] sm:$0xff] %v17205_v39  ;;  %v4177_v4 = vadd.f32 %v3910_v15, %v16918_v1  ;;  %v4336_v1 = vld [vmem:[#allocation2 + $0x1d7] sm:$0xff] }
 0x3cb   : > { %v13331_v7 = vpop.f32.mrf.mxu1  ;;  %v13455_v27 = vpop.f32.mrf.mxu0  ;;  %v4364_v61 = vpack.c.bf16 %v4337_v3, %v4336_v1  ;;  %v4841_v3 = vld [vmem:[#allocation2 + $0x38] sm:$0xff] }
 0x3cc   : > { %v17208_v52 = vadd.f32 %v4467_v58, %v4177_v4  ;;  %v19659_v7 = vld [vmem:[#allocation78_spill] sm:$0xff] }
 0x3cd   : > { %v3915_v14 = vpop.f32.mrf.mxu1  ;;  %13429 = vmatmul.mubr.bf16.gmra.mxu1 %v3806_v50  ;;  %v4472_v24 = vpop.f32.mrf.mxu0  ;;  %13553 = vmatmul.mubr.bf16.gmra.mxu0 %v4363_v45 }
 0x3ce   : > { %19657 = vst [vmem:[#allocation75_spill] sm:$0xff] %v17208_v52  ;;  %v4178_v38 = vadd.f32 %v3915_v14, %v19658_v59  ;;  %13432 = vmatprep.mubr.msk.bf16.mxu1 %vm15473_vm0, %v17169_v32  ;;  %13556 = vmatprep.mubr.msk.bf16.mxu0 %vm15473_vm0, %v17169_v32  ;;  %v3807_v14 = vpack.c.bf16 %v3780_v41, %v3779_v33  ;;  %v4842_v33 = vld [vmem:[#allocation2 + $0x40] sm:$0xff] }
 0x3cf   : > { %v13334_v36 = vpop.f32.mrf.mxu1  ;;  %v13458_v15 = vpop.f32.mrf.mxu0  ;;  %v5399_v41 = vld [vmem:[#allocation2 + $0x41] sm:$0xff] }
 0x3d0   : > { %v17215_v31 = vadd.f32 %v4472_v24, %v4178_v38  ;;  %v19661_v36 = vld [vmem:[#allocation79_spill] sm:$0xff] }
 0x3d1   : > { %v3918_v58 = vpop.f32.mrf.mxu1  ;;  %v4475_v4 = vpop.f32.mrf.mxu0 }
 0x3d2   : > { %v4179_v27 = vadd.f32 %v3918_v58, %v19659_v7 }
 0x3d3   : > { %v13335_v50 = vpop.f32.mrf.mxu1  ;;  %v13459_v45 = vpop.f32.mrf.mxu0 }
 0x3d4   : > { %v17218_v59 = vadd.f32 %v4475_v4, %v4179_v27  ;;  %v15218_v27 = vld [vmem:[#allocation9 + $0x38] sm:$0xff]  }
 0x3d5   : > { %v3923_v52 = vpop.f32.mrf.mxu1  ;;  %13433 = vmatmul.mubr.bf16.gmra.mxu1 %v3807_v14  ;;  %v4480_v39 = vpop.f32.mrf.mxu0  ;;  %13557 = vmatmul.mubr.bf16.gmra.mxu0 %v4364_v61  ;;  %v5398_v61 = vld [vmem:[#allocation2 + $0x39] sm:$0xff]  ;;  %v4895_v14 = vpack.c.bf16 %v4842_v33, %v4841_v3  ;;  %v4843_v33 = vld [vmem:[#allocation2 + $0x48] sm:$0xff] }
 0x3d6   : > { %19660 = vst [vmem:[#allocation76_spill] sm:$0xff] %v17218_v59  ;;  %v4180_v15 = vadd.f32 %v3923_v52, %v19661_v36  ;;  %13576 = vmatprep.mubr.msk.bf16.mxu1 %vm15473_vm0, %v17169_v32  ;;  %13700 = vmatprep.mubr.msk.bf16.mxu0 %vm15473_vm0, %v17169_v32  ;;  %v15219_v52 = vld [vmem:[#allocation9 + $0x78] sm:$0xff]   ;;  %v5452_v36 = vpack.c.bf16 %v5399_v41, %v5398_v61  ;;  %v4844_v41 = vld [vmem:[#allocation2 + $0x50] sm:$0xff] }
 0x3d7   : > { %v13338_v24 = vpop.f32.mrf.mxu1  ;;  %v13462_v38 = vpop.f32.mrf.mxu0 }
 0x3d8   : > { %v17225_v1 = vadd.f32 %v4480_v39, %v4180_v15  ;;  %v15220_v15 = vld [vmem:[#allocation9 + $0x30] sm:$0xff]  }
 0x3d9   : > { %v3926_v58 = vpop.f32.mrf.mxu1  ;;  %v4483_v4 = vpop.f32.mrf.mxu0 }
 0x3da   : > { %19662 = vst [vmem:[#allocation77_spill] sm:$0xff] %v17225_v1  ;;  %v4181_v7 = vadd.f32 %v3926_v58, %v16940_v28  ;;  %v15221_v1 = vld [vmem:[#allocation9 + $0x70] sm:$0xff]  }
 0x3db   : > { %v13339_v50 = vpop.f32.mrf.mxu1  ;;  %v13463_v45 = vpop.f32.mrf.mxu0 }
 0x3dc   : > { %v17228_v59 = vadd.f32 %v4483_v4, %v4181_v7  ;;  %v5401_v4 = vld [vmem:[#allocation2 + $0x51] sm:$0xff]  ;;  %v4896_v45 = vpack.c.bf16 %v4844_v41, %v4843_v33 }
 0x3dd   : > { %v3931_v24 = vpop.f32.mrf.mxu1  ;;  %v4488_v38 = vpop.f32.mrf.mxu0  ;;  %13577 = vmatmul.mubr.bf16.vlgmr.msra.gmra.mxu1 %v4895_v14  ;;  %13701 = vmatmul.mubr.bf16.vlgmr.msra.gmra.mxu0 %v5452_v36  ;;  %v15222_v36 = vld [vmem:[#allocation9 + $0x28] sm:$0xff]   ;;  %v15225_v33 = vld [vmem:[#allocation9 + $0x60] sm:$0xff]  }
 0x3de   : > { %v4182_v39 = vadd.f32 %v3931_v24, %v16947_v13  ;;  %13809 = vmatpush3.bf16.msra.mxu1 %v15218_v27  ;;  %13933 = vmatpush3.bf16.msra.mxu0 %v15219_v52  ;;  %v5400_v27 = vld [vmem:[#allocation2 + $0x49] sm:$0xff]  ;;  %v15223_v24 = vld [vmem:[#allocation9 + $0x68] sm:$0xff]  }
 0x3df   : > { %v13342_v28 = vpop.f32.mrf.mxu1  ;;  %v13466_v58 = vpop.f32.mrf.mxu0  ;;  %13580 = vmatprep.mubr.msk.bf16.mxu1 %vm15473_vm0, %v17169_v32  ;;  %13704 = vmatprep.mubr.msk.bf16.mxu0 %vm15473_vm0, %v17169_v32  ;;  %v5453_v14 = vpack.c.bf16 %v5401_v4, %v5400_v27  ;;  %v4845_v4 = vld [vmem:[#allocation2 + $0x58] sm:$0xff] }
 0x3e0   : > { %v17235_v3 = vadd.f32 %v4488_v38, %v4182_v39  ;;  %13810 = vmatprep.subr.bf16.mxu1 %v17169_v32  ;;  %13934 = vmatprep.subr.bf16.mxu0 %v17169_v32  ;;  %v15224_v58 = vld [vmem:[#allocation9 + $0x20] sm:$0xff]  }
 0x3e1   : > { %v3934_v13 = vpop.f32.mrf.mxu1  ;;  %v4491_v7 = vpop.f32.mrf.mxu0 }
 0x3e2   : > { %v4183_v61 = vadd.f32 %v3934_v13, %v16954_v17  ;;  %13811 = vmatpush3.bf16.msra.mxu1 %v15220_v15  ;;  %13935 = vmatpush3.bf16.msra.mxu0 %v15221_v1  ;;  %v4846_v13 = vld [vmem:[#allocation2 + $0x60] sm:$0xff] }
 0x3e3   : > { %v13343_v52 = vpop.f32.mrf.mxu1  ;;  %v13467_v50 = vpop.f32.mrf.mxu0  ;;  %13812 = vmatprep.subr.bf16.mxu1 %v17169_v32  ;;  %13936 = vmatprep.subr.bf16.mxu0 %v17169_v32 }
 0x3e4   : > { %v17242_v38 = vadd.f32 %v4491_v7, %v4183_v61  ;;  %v5403_v7 = vld [vmem:[#allocation2 + $0x61] sm:$0xff]  ;;  %v5402_v52 = vld [vmem:[#allocation2 + $0x59] sm:$0xff] }
 0x3e5   : > { %v3939_v39 = vpop.f32.mrf.mxu1  ;;  %v4496_v28 = vpop.f32.mrf.mxu0  ;;  %13581 = vmatmul.mubr.bf16.gmra.mxu1 %v4896_v45  ;;  %13705 = vmatmul.mubr.bf16.gmra.mxu0 %v5453_v14  ;;  %v4897_v14 = vpack.c.bf16 %v4846_v13, %v4845_v4  ;;  %v15229_v4 = vld [vmem:[#allocation9 + $0x50] sm:$0xff]  }
 0x3e6   : > { %v4184_v17 = vadd.f32 %v3939_v39, %v16961_v56  ;;  %13584 = vmatprep.mubr.msk.bf16.mxu1 %vm15473_vm0, %v17169_v32  ;;  %13708 = vmatprep.mubr.msk.bf16.mxu0 %vm15473_vm0, %v17169_v32  ;;  %v15227_v39 = vld [vmem:[#allocation9 + $0x58] sm:$0xff]  }
 0x3e7   : > { %v13346_v1 = vpop.f32.mrf.mxu1  ;;  %v13470_v15 = vpop.f32.mrf.mxu0  ;;  %13813 = vmatpush3.bf16.msra.mxu1 %v15222_v36  ;;  %13937 = vmatpush3.bf16.msra.mxu0 %v15223_v24  ;;  %v5454_v36 = vpack.c.bf16 %v5403_v7, %v5402_v52  ;;  %v15226_v24 = vld [vmem:[#allocation9 + $0x18] sm:$0xff]  }
 0x3e8   : > { %v17249_v41 = vadd.f32 %v4496_v28, %v4184_v17  ;;  %13814 = vmatprep.subr.bf16.mxu1 %v17169_v32  ;;  %13938 = vmatprep.subr.bf16.mxu0 %v17169_v32  ;;  %v4847_v7 = vld [vmem:[#allocation2 + $0x68] sm:$0xff] }
 0x3e9   : > { %v3942_v56 = vpop.f32.mrf.mxu1  ;;  %v4499_v61 = vpop.f32.mrf.mxu0 }
 0x3ea   : > { %v4185_v27 = vadd.f32 %v3942_v56, %v16966_v19  ;;  %v4848_v56 = vld [vmem:[#allocation2 + $0x70] sm:$0xff] }
 0x3eb   : > { %v13347_v50 = vpop.f32.mrf.mxu1  ;;  %v13471_v45 = vpop.f32.mrf.mxu0  ;;  %13815 = vmatpush3.bf16.msra.mxu1 %v15224_v58  ;;  %13939 = vmatpush3.bf16.msra.mxu0 %v15225_v33  ;;  %v15228_v33 = vld [vmem:[#allocation9 + $0x10] sm:$0xff]  }
 0x3ec   : > { %v17254_v28 = vadd.f32 %v4499_v61, %v4185_v27  ;;  %13816 = vmatprep.subr.bf16.mxu1 %v17169_v32  ;;  %13940 = vmatprep.subr.bf16.mxu0 %v17169_v32  ;;  %v5405_v61 = vld [vmem:[#allocation2 + $0x71] sm:$0xff]  ;;  %v5404_v50 = vld [vmem:[#allocation2 + $0x69] sm:$0xff] }
 0x3ed   : > { %v3947_v17 = vpop.f32.mrf.mxu1  ;;  %v4504_v1 = vpop.f32.mrf.mxu0  ;;  %13585 = vmatmul.mubr.bf16.gmra.mxu1 %v4897_v14  ;;  %13709 = vmatmul.mubr.bf16.gmra.mxu0 %v5454_v36  ;;  %v4898_v36 = vpack.c.bf16 %v4848_v56, %v4847_v7  ;;  %v5407_v7 = vld [vmem:[#allocation2 + $0x81] sm:$0xff] }
 0x3ee   : > { %v4186_v19 = vadd.f32 %v3947_v17, %v16975_v49  ;;  %13588 = vmatprep.mubr.msk.bf16.mxu1 %vm15473_vm0, %v17169_v32  ;;  %13712 = vmatprep.mubr.msk.bf16.mxu0 %vm15473_vm0, %v17169_v32 }
 0x3ef   : > { %v13350_v15 = vpop.f32.mrf.mxu1  ;;  %v13474_v58 = vpop.f32.mrf.mxu0  ;;  %13817 = vmatpush3.bf16.msra.mxu1 %v15226_v24  ;;  %13941 = vmatpush3.bf16.msra.mxu0 %v15227_v39  ;;  %v5455_v24 = vpack.c.bf16 %v5405_v61, %v5404_v50 }
 0x3f0   : > { %v17263_v13 = vadd.f32 %v4504_v1, %v4186_v19  ;;  %13818 = vmatprep.subr.bf16.mxu1 %v17169_v32  ;;  %13942 = vmatprep.subr.bf16.mxu0 %v17169_v32 }
 0x3f1   : > { %v3950_v49 = vpop.f32.mrf.mxu1  ;;  %v4507_v27 = vpop.f32.mrf.mxu0 }
 0x3f2   : > { %v4187_v52 = vadd.f32 %v3950_v49, %v16980_v55 }
 0x3f3   : > { %v13351_v45 = vpop.f32.mrf.mxu1  ;;  %v13475_v14 = vpop.f32.mrf.mxu0  ;;  %13819 = vmatpush3.bf16.msra.mxu1 %v15228_v33  ;;  %13943 = vmatpush3.bf16.msra.mxu0 %v15229_v4  ;;  %v4849_v33 = vld [vmem:[#allocation2 + $0x78] sm:$0xff]  ;;  %v4850_v4 = vld [vmem:[#allocation2 + $0x80] sm:$0xff] }
 0x3f4   : > { %v17268_v39 = vadd.f32 %v4507_v27, %v4187_v52  ;;  %13820 = vmatprep.subr.bf16.mxu1 %v17169_v32  ;;  %13944 = vmatprep.subr.bf16.mxu0 %v17169_v32  ;;  %v5406_v27 = vld [vmem:[#allocation2 + $0x79] sm:$0xff]  ;;  %v4899_v50 = vpack.c.bf16 %v4850_v4, %v4849_v33  ;;  %v5409_v33 = vld [vmem:[#allocation2 + $0x91] sm:$0xff] }
 0x3f5   : > { %v3955_v17 = vpop.f32.mrf.mxu1  ;;  %v4512_v1 = vpop.f32.mrf.mxu0  ;;  %13589 = vmatmul.mubr.bf16.gmra.mxu1 %v4898_v36  ;;  %13713 = vmatmul.mubr.bf16.gmra.mxu0 %v5455_v24  ;;  %v5456_v45 = vpack.c.bf16 %v5407_v7, %v5406_v27  ;;  %v15230_v4 = vld [vmem:[#allocation9 + $0x8] sm:$0xff]  }
 0x3f6   : > { %v4188_v19 = vadd.f32 %v3955_v17, %v16989_v44  ;;  %13592 = vmatprep.mubr.msk.bf16.mxu1 %vm15473_vm0, %v17169_v32  ;;  %13716 = vmatprep.mubr.msk.bf16.mxu0 %vm15473_vm0, %v17169_v32 }
 0x3f7   : > { %v13354_v55 = vpop.f32.mrf.mxu1  ;;  %v13478_v15 = vpop.f32.mrf.mxu0  ;;  %13821 = vmatpush3.bf16.msra.mxu1 %v15230_v4 }
 0x3f8   : > { %v17277_v58 = vadd.f32 %v4512_v1, %v4188_v19  ;;  %v4851_v19 = vld [vmem:[#allocation2 + $0x88] sm:$0xff]  ;;  %v4852_v15 = vld [vmem:[#allocation2 + $0x90] sm:$0xff]  ;;  %13822 = vmatprep.subr.bf16.mxu1 %v17169_v32 }
 0x3f9   : > { %v3958_v56 = vpop.f32.mrf.mxu1  ;;  %v4515_v61 = vpop.f32.mrf.mxu0 }
 0x3fa   : > { %v4189_v49 = vadd.f32 %v3958_v56, %v16992_v22 }
 0x3fb   : > { %v13355_v52 = vpop.f32.mrf.mxu1  ;;  %v13479_v44 = vpop.f32.mrf.mxu0 }
 0x3fc   : > { %v17280_v14 = vadd.f32 %v4515_v61, %v4189_v49  ;;  %v5408_v49 = vld [vmem:[#allocation2 + $0x89] sm:$0xff]  ;;  %v4900_v52 = vpack.c.bf16 %v4852_v15, %v4851_v19  ;;  %v4853_v19 = vld [vmem:[#allocation2 + $0x98] sm:$0xff]  ;;  %v4854_v15 = vld [vmem:[#allocation2 + $0xa0] sm:$0xff] }
 0x3fd   : > { %v3963_v36 = vpop.f32.mrf.mxu1  ;;  %v4520_v24 = vpop.f32.mrf.mxu0  ;;  %13593 = vmatmul.mubr.bf16.gmra.mxu1 %v4899_v50  ;;  %13717 = vmatmul.mubr.bf16.gmra.mxu0 %v5456_v45  ;;  %v5457_v44 = vpack.c.bf16 %v5409_v33, %v5408_v49  ;;  %v15231_v45 = vld [vmem:[#allocation9 + $0x48] sm:$0xff]   ;;  %v5411_v33 = vld [vmem:[#allocation2 + $0xa1] sm:$0xff] }
 0x3fe   : > { %v4190_v17 = vadd.f32 %v3963_v36, %v16999_v53  ;;  %13596 = vmatprep.mubr.msk.bf16.mxu1 %vm15473_vm0, %v17169_v32  ;;  %13720 = vmatprep.mubr.msk.bf16.mxu0 %vm15473_vm0, %v17169_v32 }
 0x3ff   : > { %v13358_v22 = vpop.f32.mrf.mxu1  ;;  %v13482_v1 = vpop.f32.mrf.mxu0  ;;  %13945 = vmatpush3.bf16.msra.mxu0 %v15231_v45 }
 0x400   : > { %v17287_v55 = vadd.f32 %v4520_v24, %v4190_v17  ;;  %13946 = vmatprep.subr.bf16.mxu0 %v17169_v32 }
 0x401   : > { %v3966_v7 = vpop.f32.mrf.mxu1  ;;  %v4523_v56 = vpop.f32.mrf.mxu0 }
 0x402   : > { %v4191_v61 = vadd.f32 %v3966_v7, %v17003_v12 }
 0x403   : > { %v13359_v53 = vpop.f32.mrf.mxu1  ;;  %v13483_v27 = vpop.f32.mrf.mxu0 }
 0x404   : > { %v17291_v50 = vadd.f32 %v4523_v56, %v4191_v61  ;;  %v5410_v56 = vld [vmem:[#allocation2 + $0x99] sm:$0xff]  ;;  %v4901_v53 = vpack.c.bf16 %v4854_v15, %v4853_v19  ;;  %v5413_v19 = vld [vmem:[#allocation2 + $0xb1] sm:$0xff] }
 0x405   : > { %v3971_v36 = vpop.f32.mrf.mxu1  ;;  %v4528_v24 = vpop.f32.mrf.mxu0  ;;  %13597 = vmatmul.mubr.bf16.gmra.mxu1 %v4900_v52  ;;  %13721 = vmatmul.mubr.bf16.gmra.mxu0 %v5457_v44  ;;  %v5458_v27 = vpack.c.bf16 %v5411_v33, %v5410_v56 }
 0x406   : > { %v4192_v17 = vadd.f32 %v3971_v36, %v17010_v0  ;;  %13600 = vmatprep.mubr.msk.bf16.mxu1 %vm15473_vm0, %v17169_v32  ;;  %13724 = vmatprep.mubr.msk.bf16.mxu0 %vm15473_vm0, %v17169_v32 }
 0x407   : > { %v13362_v12 = vpop.f32.mrf.mxu1  ;;  %v13486_v22 = vpop.f32.mrf.mxu0 }
 0x408   : > { %v17298_v1 = vadd.f32 %v4528_v24, %v4192_v17  ;;  %v4855_v12 = vld [vmem:[#allocation2 + $0xa8] sm:$0xff]  ;;  %v4856_v22 = vld [vmem:[#allocation2 + $0xb0] sm:$0xff] }
 0x409   : > { %v3974_v4 = vpop.f32.mrf.mxu1  ;;  %v4531_v7 = vpop.f32.mrf.mxu0  ;;  %v4902_v56 = vpack.c.bf16 %v4856_v22, %v4855_v12  ;;  %v5415_v12 = vld [vmem:[#allocation2 + $0xc1] sm:$0xff] }
 0x40a   : > { %v4193_v0 = vadd.f32 %v3974_v4, %v17014_v5 }
 0x40b   : > { %v13363_v61 = vpop.f32.mrf.mxu1  ;;  %v13487_v49 = vpop.f32.mrf.mxu0 }
 0x40c   : > { %v17302_v52 = vadd.f32 %v4531_v7, %v4193_v0  ;;  %v5412_v7 = vld [vmem:[#allocation2 + $0xa9] sm:$0xff] }
 0x40d   : > { %v3979_v44 = vpop.f32.mrf.mxu1  ;;  %v4536_v45 = vpop.f32.mrf.mxu0  ;;  %13601 = vmatmul.mubr.bf16.gmra.mxu1 %v4901_v53  ;;  %13725 = vmatmul.mubr.bf16.gmra.mxu0 %v5458_v27  ;;  %v5459_v61 = vpack.c.bf16 %v5413_v19, %v5412_v7 }
 0x40e   : > { %v4194_v36 = vadd.f32 %v3979_v44, %v17021_v43  ;;  %13604 = vmatprep.mubr.msk.bf16.mxu1 %vm15473_vm0, %v17169_v32  ;;  %13728 = vmatprep.mubr.msk.bf16.mxu0 %vm15473_vm0, %v17169_v32 }
 0x40f   : > { %v13366_v5 = vpop.f32.mrf.mxu1  ;;  %v13490_v24 = vpop.f32.mrf.mxu0 }
 0x410   : > { %v17309_v17 = vadd.f32 %v4536_v45, %v4194_v36  ;;  %v4857_v5 = vld [vmem:[#allocation2 + $0xb8] sm:$0xff]  ;;  %v4858_v24 = vld [vmem:[#allocation2 + $0xc0] sm:$0xff] }
 0x411   : > { %v3982_v15 = vpop.f32.mrf.mxu1  ;;  %v4539_v33 = vpop.f32.mrf.mxu0  ;;  %v4903_v7 = vpack.c.bf16 %v4858_v24, %v4857_v5  ;;  %v4859_v5 = vld [vmem:[#allocation2 + $0xc8] sm:$0xff]  ;;  %v4860_v24 = vld [vmem:[#allocation2 + $0xd0] sm:$0xff] }
 0x412   : > { %v4195_v4 = vadd.f32 %v3982_v15, %v17024_v34 }
 0x413   : > { %v13367_v0 = vpop.f32.mrf.mxu1  ;;  %v13491_v43 = vpop.f32.mrf.mxu0 }
 0x414   : > { %v17312_v49 = vadd.f32 %v4539_v33, %v4195_v4  ;;  %v5414_v33 = vld [vmem:[#allocation2 + $0xb9] sm:$0xff] }
 0x415   : > { %v3987_v53 = vpop.f32.mrf.mxu1  ;;  %v4544_v27 = vpop.f32.mrf.mxu0  ;;  %13605 = vmatmul.mubr.bf16.gmra.mxu1 %v4902_v56  ;;  %13729 = vmatmul.mubr.bf16.gmra.mxu0 %v5459_v61  ;;  %v5460_v0 = vpack.c.bf16 %v5415_v12, %v5414_v33  ;;  %v15232_v56 = vld [vmem:[#allocation9] sm:$0xff]  }
 0x416   : > { %v4196_v44 = vadd.f32 %v3987_v53, %v17031_v42  ;;  %13608 = vmatprep.mubr.msk.bf16.mxu1 %vm15473_vm0, %v17169_v32  ;;  %13732 = vmatprep.mubr.msk.bf16.mxu0 %vm15473_vm0, %v17169_v32  ;;  %v15233_v61 = vld [vmem:[#allocation9 + $0x40] sm:$0xff]  }
 0x417   : > { %v13370_v34 = vpop.f32.mrf.mxu1  ;;  %v13494_v45 = vpop.f32.mrf.mxu0  ;;  %13823 = vmatpush3.bf16.msra.mxu1 %v15232_v56  ;;  %13947 = vmatpush3.bf16.msra.mxu0 %v15233_v61  ;;  %v5417_v12 = vld [vmem:[#allocation2 + $0xd1] sm:$0xff] }
 0x418   : > { %v17319_v36 = vadd.f32 %v4544_v27, %v4196_v44  ;;  %14056 = vmatprep.subr.bf16.mxu1 %v17169_v32  ;;  %14180 = vmatprep.subr.bf16.mxu0 %v17169_v32 }
 0x419   : > { %v3990_v22 = vpop.f32.mrf.mxu1  ;;  %v4547_v19 = vpop.f32.mrf.mxu0 }
 0x41a   : > { %v4197_v15 = vadd.f32 %v3990_v22, %v17034_v48 }
 0x41b   : > { %v13371_v4 = vpop.f32.mrf.mxu1  ;;  %v13495_v42 = vpop.f32.mrf.mxu0 }
 0x41c   : > { %v17322_v43 = vadd.f32 %v4547_v19, %v4197_v15  ;;  %v5416_v15 = vld [vmem:[#allocation2 + $0xc9] sm:$0xff]  ;;  %v4904_v42 = vpack.c.bf16 %v4860_v24, %v4859_v5 }
 0x41d   : > { %v3995_v53 = vpop.f32.mrf.mxu1  ;;  %v4552_v34 = vpop.f32.mrf.mxu0  ;;  %13609 = vmatmul.mubr.bf16.gmra.mxu1 %v4903_v7  ;;  %13733 = vmatmul.mubr.bf16.gmra.mxu0 %v5460_v0  ;;  %v5461_v7 = vpack.c.bf16 %v5417_v12, %v5416_v15 }
 0x41e   : > { %v4198_v27 = vadd.f32 %v3995_v53, %v17041_v18  ;;  %13612 = vmatprep.mubr.msk.bf16.mxu1 %vm15473_vm0, %v17169_v32  ;;  %13736 = vmatprep.mubr.msk.bf16.mxu0 %vm15473_vm0, %v17169_v32 }
 0x41f   : > { %v13374_v48 = vpop.f32.mrf.mxu1  ;;  %v13498_v44 = vpop.f32.mrf.mxu0 }
 0x420   : > { %v17329_v45 = vadd.f32 %v4552_v34, %v4198_v27  ;;  %v4861_v48 = vld [vmem:[#allocation2 + $0xd8] sm:$0xff] }
 0x421   : > { %v3998_v18 = vpop.f32.mrf.mxu1  ;;  %v4555_v22 = vpop.f32.mrf.mxu0  ;;  %v5418_v44 = vld [vmem:[#allocation2 + $0xd9] sm:$0xff] }
 0x422   : > { %v4199_v19 = vadd.f32 %v3998_v18, %v17046_v25  ;;  %v4862_v18 = vld [vmem:[#allocation2 + $0xe0] sm:$0xff] }
 0x423   : > { %v13375_v33 = vpop.f32.mrf.mxu1  ;;  %v13499_v4 = vpop.f32.mrf.mxu0  ;;  %v4905_v15 = vpack.c.bf16 %v4862_v18, %v4861_v48 }
 0x424   : > { %v17334_v0 = vadd.f32 %v4555_v22, %v4199_v19  ;;  %v5419_v22 = vld [vmem:[#allocation2 + $0xe1] sm:$0xff] }
 0x425   : > { %v4003_v56 = vpop.f32.mrf.mxu1  ;;  %v4560_v61 = vpop.f32.mrf.mxu0  ;;  %13613 = vmatmul.mubr.bf16.gmra.mxu1 %v4904_v42  ;;  %13737 = vmatmul.mubr.bf16.gmra.mxu0 %v5461_v7  ;;  %v5462_v33 = vpack.c.bf16 %v5419_v22, %v5418_v44 }
 0x426   : > { %v4200_v53 = vadd.f32 %v4003_v56, %v17053_v16  ;;  %13616 = vmatprep.mubr.msk.bf16.mxu1 %vm15473_vm0, %v17169_v32  ;;  %13740 = vmatprep.mubr.msk.bf16.mxu0 %vm15473_vm0, %v17169_v32 }
 0x427   : > { %v13378_v25 = vpop.f32.mrf.mxu1  ;;  %v13502_v34 = vpop.f32.mrf.mxu0 }
 0x428   : > { %v17341_v27 = vadd.f32 %v4560_v61, %v4200_v53  ;;  %v4863_v25 = vld [vmem:[#allocation2 + $0xe8] sm:$0xff]  ;;  %v5421_v34 = vld [vmem:[#allocation2 + $0xf1] sm:$0xff] }
 0x429   : > { %v4006_v5 = vpop.f32.mrf.mxu1  ;;  %v4563_v24 = vpop.f32.mrf.mxu0 }
 0x42a   : > { %v4201_v12 = vadd.f32 %v4006_v5, %v17056_v30 }
 0x42b   : > { %v13379_v19 = vpop.f32.mrf.mxu1  ;;  %v13503_v16 = vpop.f32.mrf.mxu0 }
 0x42c   : > { %v17344_v4 = vadd.f32 %v4563_v24, %v4201_v12  ;;  %v4864_v24 = vld [vmem:[#allocation2 + $0xf0] sm:$0xff] }
 0x42d   : > { %v4011_v42 = vpop.f32.mrf.mxu1  ;;  %v4568_v7 = vpop.f32.mrf.mxu0  ;;  %13617 = vmatmul.mubr.bf16.gmra.mxu1 %v4905_v15  ;;  %13741 = vmatmul.mubr.bf16.gmra.mxu0 %v5462_v33  ;;  %v5420_v12 = vld [vmem:[#allocation2 + $0xe9] sm:$0xff]  ;;  %v4906_v22 = vpack.c.bf16 %v4864_v24, %v4863_v25  ;;  %v5423_v25 = vld [vmem:[#allocation2 + $0x101] sm:$0xff] }
 0x42e   : > { %v4202_v56 = vadd.f32 %v4011_v42, %v17063_v10  ;;  %13620 = vmatprep.mubr.msk.bf16.mxu1 %vm15473_vm0, %v17169_v32  ;;  %13744 = vmatprep.mubr.msk.bf16.mxu0 %vm15473_vm0, %v17169_v32  ;;  %v5463_v19 = vpack.c.bf16 %v5421_v34, %v5420_v12 }
 0x42f   : > { %v13382_v30 = vpop.f32.mrf.mxu1  ;;  %v13506_v61 = vpop.f32.mrf.mxu0 }
 0x430   : > { %v17351_v53 = vadd.f32 %v4568_v7, %v4202_v56  ;;  %v4865_v30 = vld [vmem:[#allocation2 + $0xf8] sm:$0xff]  ;;  %v4866_v61 = vld [vmem:[#allocation2 + $0x100] sm:$0xff] }
 0x431   : > { %v4014_v48 = vpop.f32.mrf.mxu1  ;;  %v4571_v44 = vpop.f32.mrf.mxu0  ;;  %v4907_v12 = vpack.c.bf16 %v4866_v61, %v4865_v30  ;;  %v5425_v30 = vld [vmem:[#allocation2 + $0x111] sm:$0xff] }
 0x432   : > { %v4203_v5 = vadd.f32 %v4014_v48, %v17066_v63 }
 0x433   : > { %v13383_v18 = vpop.f32.mrf.mxu1  ;;  %v13507_v10 = vpop.f32.mrf.mxu0 }
 0x434   : > { %v17354_v16 = vadd.f32 %v4571_v44, %v4203_v5  ;;  %v5422_v5 = vld [vmem:[#allocation2 + $0xf9] sm:$0xff] }
 0x435   : > { %v4019_v15 = vpop.f32.mrf.mxu1  ;;  %v4576_v33 = vpop.f32.mrf.mxu0  ;;  %13621 = vmatmul.mubr.bf16.gmra.mxu1 %v4906_v22  ;;  %13745 = vmatmul.mubr.bf16.gmra.mxu0 %v5463_v19  ;;  %v5464_v18 = vpack.c.bf16 %v5423_v25, %v5422_v5 }
 0x436   : > { %v4204_v42 = vadd.f32 %v4019_v15, %v17073_v51  ;;  %13624 = vmatprep.mubr.msk.bf16.mxu1 %vm15473_vm0, %v17169_v32  ;;  %13748 = vmatprep.mubr.msk.bf16.mxu0 %vm15473_vm0, %v17169_v32 }
 0x437   : > { %v13386_v63 = vpop.f32.mrf.mxu1  ;;  %v13510_v7 = vpop.f32.mrf.mxu0 }
 0x438   : > { %v17361_v56 = vadd.f32 %v4576_v33, %v4204_v42  ;;  %v4867_v63 = vld [vmem:[#allocation2 + $0x108] sm:$0xff]  ;;  %v4868_v7 = vld [vmem:[#allocation2 + $0x110] sm:$0xff] }
 0x439   : > { %v4022_v34 = vpop.f32.mrf.mxu1  ;;  %v4579_v48 = vpop.f32.mrf.mxu0  ;;  %v4908_v5 = vpack.c.bf16 %v4868_v7, %v4867_v63  ;;  %v5427_v63 = vld [vmem:[#allocation2 + $0x121] sm:$0xff] }
 0x43a   : > { %v4205_v44 = vadd.f32 %v4022_v34, %v17076_v29 }
 0x43b   : > { %v13387_v24 = vpop.f32.mrf.mxu1  ;;  %v13511_v51 = vpop.f32.mrf.mxu0 }
 0x43c   : > { %v17364_v10 = vadd.f32 %v4579_v48, %v4205_v44  ;;  %v5424_v48 = vld [vmem:[#allocation2 + $0x109] sm:$0xff] }
 0x43d   : > { %v4027_v22 = vpop.f32.mrf.mxu1  ;;  %v4584_v19 = vpop.f32.mrf.mxu0  ;;  %13625 = vmatmul.mubr.bf16.gmra.mxu1 %v4907_v12  ;;  %13749 = vmatmul.mubr.bf16.gmra.mxu0 %v5464_v18  ;;  %v5465_v24 = vpack.c.bf16 %v5425_v30, %v5424_v48 }
 0x43e   : > { %v4206_v15 = vadd.f32 %v4027_v22, %v17083_v23  ;;  %13628 = vmatprep.mubr.msk.bf16.mxu1 %vm15473_vm0, %v17169_v32  ;;  %13752 = vmatprep.mubr.msk.bf16.mxu0 %vm15473_vm0, %v17169_v32 }
 0x43f   : > { %v13390_v29 = vpop.f32.mrf.mxu1  ;;  %v13514_v33 = vpop.f32.mrf.mxu0 }
 0x440   : > { %v17371_v42 = vadd.f32 %v4584_v19, %v4206_v15  ;;  %v4869_v29 = vld [vmem:[#allocation2 + $0x118] sm:$0xff]  ;;  %v4870_v33 = vld [vmem:[#allocation2 + $0x120] sm:$0xff] }
 0x441   : > { %v4030_v61 = vpop.f32.mrf.mxu1  ;;  %v4587_v25 = vpop.f32.mrf.mxu0  ;;  %v4909_v48 = vpack.c.bf16 %v4870_v33, %v4869_v29  ;;  %v5429_v29 = vld [vmem:[#allocation2 + $0x131] sm:$0xff] }
 0x442   : > { %v4207_v34 = vadd.f32 %v4030_v61, %v17086_v37 }
 0x443   : > { %v13391_v44 = vpop.f32.mrf.mxu1  ;;  %v13515_v23 = vpop.f32.mrf.mxu0 }
 0x444   : > { %v17374_v51 = vadd.f32 %v4587_v25, %v4207_v34  ;;  %v5426_v25 = vld [vmem:[#allocation2 + $0x119] sm:$0xff] }
 0x445   : > { %v4035_v12 = vpop.f32.mrf.mxu1  ;;  %v4592_v18 = vpop.f32.mrf.mxu0  ;;  %13629 = vmatmul.mubr.bf16.gmra.mxu1 %v4908_v5  ;;  %13753 = vmatmul.mubr.bf16.gmra.mxu0 %v5465_v24  ;;  %v5466_v44 = vpack.c.bf16 %v5427_v63, %v5426_v25 }
 0x446   : > { %v4208_v22 = vadd.f32 %v4035_v12, %v17093_v26  ;;  %13632 = vmatprep.mubr.msk.bf16.mxu1 %vm15473_vm0, %v17169_v32  ;;  %13756 = vmatprep.mubr.msk.bf16.mxu0 %vm15473_vm0, %v17169_v32 }
 0x447   : > { %v13394_v37 = vpop.f32.mrf.mxu1  ;;  %v13518_v19 = vpop.f32.mrf.mxu0 }
 0x448   : > { %v17381_v15 = vadd.f32 %v4592_v18, %v4208_v22  ;;  %v4871_v37 = vld [vmem:[#allocation2 + $0x128] sm:$0xff]  ;;  %v4872_v19 = vld [vmem:[#allocation2 + $0x130] sm:$0xff] }
 0x449   : > { %v4038_v7 = vpop.f32.mrf.mxu1  ;;  %v4595_v30 = vpop.f32.mrf.mxu0  ;;  %v4910_v25 = vpack.c.bf16 %v4872_v19, %v4871_v37  ;;  %v5431_v37 = vld [vmem:[#allocation2 + $0x141] sm:$0xff] }
 0x44a   : > { %v4209_v61 = vadd.f32 %v4038_v7, %v17096_v47 }
 0x44b   : > { %v13395_v34 = vpop.f32.mrf.mxu1  ;;  %v13519_v26 = vpop.f32.mrf.mxu0 }
 0x44c   : > { %v17384_v23 = vadd.f32 %v4595_v30, %v4209_v61  ;;  %v5428_v30 = vld [vmem:[#allocation2 + $0x129] sm:$0xff] }
 0x44d   : > { %v4043_v5 = vpop.f32.mrf.mxu1  ;;  %v4600_v24 = vpop.f32.mrf.mxu0  ;;  %13633 = vmatmul.mubr.bf16.gmra.mxu1 %v4909_v48  ;;  %13757 = vmatmul.mubr.bf16.gmra.mxu0 %v5466_v44  ;;  %v5467_v34 = vpack.c.bf16 %v5429_v29, %v5428_v30 }
 0x44e   : > { %v4210_v12 = vadd.f32 %v4043_v5, %v17103_v8  ;;  %13636 = vmatprep.mubr.msk.bf16.mxu1 %vm15473_vm0, %v17169_v32  ;;  %13760 = vmatprep.mubr.msk.bf16.mxu0 %vm15473_vm0, %v17169_v32 }
 0x44f   : > { %v13398_v47 = vpop.f32.mrf.mxu1  ;;  %v13522_v18 = vpop.f32.mrf.mxu0 }
 0x450   : > { %v17391_v22 = vadd.f32 %v4600_v24, %v4210_v12  ;;  %v4873_v47 = vld [vmem:[#allocation2 + $0x138] sm:$0xff]  ;;  %v4874_v18 = vld [vmem:[#allocation2 + $0x140] sm:$0xff] }
 0x451   : > { %v4046_v33 = vpop.f32.mrf.mxu1  ;;  %v4603_v63 = vpop.f32.mrf.mxu0  ;;  %v4911_v30 = vpack.c.bf16 %v4874_v18, %v4873_v47  ;;  %v5433_v47 = vld [vmem:[#allocation2 + $0x151] sm:$0xff] }
 0x452   : > { %v4211_v7 = vadd.f32 %v4046_v33, %v17106_v11 }
 0x453   : > { %v13399_v61 = vpop.f32.mrf.mxu1  ;;  %v13523_v8 = vpop.f32.mrf.mxu0 }
 0x454   : > { %v17394_v26 = vadd.f32 %v4603_v63, %v4211_v7  ;;  %v5430_v63 = vld [vmem:[#allocation2 + $0x139] sm:$0xff] }
 0x455   : > { %v4051_v48 = vpop.f32.mrf.mxu1  ;;  %v4608_v44 = vpop.f32.mrf.mxu0  ;;  %13637 = vmatmul.mubr.bf16.gmra.mxu1 %v4910_v25  ;;  %13761 = vmatmul.mubr.bf16.gmra.mxu0 %v5467_v34  ;;  %v5468_v61 = vpack.c.bf16 %v5431_v37, %v5430_v63 }
 0x456   : > { %v4212_v5 = vadd.f32 %v4051_v48, %v17113_v35  ;;  %13640 = vmatprep.mubr.msk.bf16.mxu1 %vm15473_vm0, %v17169_v32  ;;  %13764 = vmatprep.mubr.msk.bf16.mxu0 %vm15473_vm0, %v17169_v32  ;;  %v17407_v48 = vld [vmem:[#allocation2] sm:$0xff] }
 0x457   : > { %v13402_v11 = vpop.f32.mrf.mxu1  ;;  %v13526_v24 = vpop.f32.mrf.mxu0 }
 0x458   : > { %v17401_v12 = vadd.f32 %v4608_v44, %v4212_v5  ;;  %v4875_v11 = vld [vmem:[#allocation2 + $0x148] sm:$0xff]  ;;  %v4876_v24 = vld [vmem:[#allocation2 + $0x150] sm:$0xff] }
 0x459   : > { %v4054_v19 = vpop.f32.mrf.mxu1  ;;  %v4611_v29 = vpop.f32.mrf.mxu0  ;;  %v4912_v63 = vpack.c.bf16 %v4876_v24, %v4875_v11  ;;  %v5435_v11 = vld [vmem:[#allocation2 + $0x161] sm:$0xff] }
 0x45a   : > { %v4213_v33 = vadd.f32 %v4054_v19, %v17116_v6 }
 0x45b   : > { %v13403_v7 = vpop.f32.mrf.mxu1  ;;  %v13527_v35 = vpop.f32.mrf.mxu0 }
 0x45c   : > { %v17404_v8 = vadd.f32 %v4611_v29, %v4213_v33 }
 0x45d   : > { %v4059_v25 = vpop.f32.mrf.mxu1  ;;  %v4616_v32 = vpop.f32.mrf.mxu0  ;;  %13641 = vmatmul.mubr.bf16.gmra.mxu1 %v4911_v30  ;;  %13765 = vmatmul.mubr.bf16.gmra.mxu0 %v5468_v61 }
 0x45e   : > { %v4214_v34 = vadd.f32 %v4059_v25, %v17123_v54  ;;  %13644 = vmatprep.mubr.msk.bf16.mxu1 %vm15473_vm0, %v17407_v48  ;;  %13768 = vmatprep.mubr.msk.bf16.mxu0 %vm15473_vm0, %v17407_v48  ;;  %v5432_v54 = vld [vmem:[#allocation2 + $0x149] sm:$0xff] }
 0x45f   : > { %v13406_v6 = vpop.f32.mrf.mxu1  ;;  %v13530_v44 = vpop.f32.mrf.mxu0  ;;  %v5469_v7 = vpack.c.bf16 %v5433_v47, %v5432_v54 }
 0x460   : > { %v17413_v5 = vadd.f32 %v4616_v32, %v4214_v34  ;;  %v4877_v6 = vld [vmem:[#allocation2 + $0x158] sm:$0xff]  ;;  %v4878_v44 = vld [vmem:[#allocation2 + $0x160] sm:$0xff] }
 0x461   : > { %v4062_v18 = vpop.f32.mrf.mxu1  ;;  %v4619_v37 = vpop.f32.mrf.mxu0  ;;  %v4913_v54 = vpack.c.bf16 %v4878_v44, %v4877_v6  ;;  %v5437_v6 = vld [vmem:[#allocation2 + $0x171] sm:$0xff] }
 0x462   : > { %v4215_v19 = vadd.f32 %v4062_v18, %v17126_v62 }
 0x463   : > { %v13407_v29 = vpop.f32.mrf.mxu1  ;;  %v13531_v33 = vpop.f32.mrf.mxu0 }
 0x464   : > { %v17416_v35 = vadd.f32 %v4619_v37, %v4215_v19  ;;  %v5434_v37 = vld [vmem:[#allocation2 + $0x159] sm:$0xff] }
 0x465   : > { %v4067_v30 = vpop.f32.mrf.mxu1  ;;  %v4624_v61 = vpop.f32.mrf.mxu0  ;;  %13645 = vmatmul.mubr.bf16.gmra.mxu1 %v4912_v63  ;;  %13769 = vmatmul.mubr.bf16.gmra.mxu0 %v5469_v7  ;;  %v5470_v29 = vpack.c.bf16 %v5435_v11, %v5434_v37 }
 0x466   : > { %v4216_v25 = vadd.f32 %v4067_v30, %v17133_v57  ;;  %13648 = vmatprep.mubr.msk.bf16.mxu1 %vm15473_vm0, %v17407_v48  ;;  %13772 = vmatprep.mubr.msk.bf16.mxu0 %vm15473_vm0, %v17407_v48 }
 0x467   : > { %v13410_v62 = vpop.f32.mrf.mxu1  ;;  %v13534_v32 = vpop.f32.mrf.mxu0 }
 0x468   : > { %v17423_v34 = vadd.f32 %v4624_v61, %v4216_v25  ;;  %v4879_v62 = vld [vmem:[#allocation2 + $0x168] sm:$0xff]  ;;  %v4880_v32 = vld [vmem:[#allocation2 + $0x170] sm:$0xff] }
 0x469   : > { %v4070_v24 = vpop.f32.mrf.mxu1  ;;  %v4627_v47 = vpop.f32.mrf.mxu0 }
 0x46a   : > { %v4217_v18 = vadd.f32 %v4070_v24, %v17136_v21  ;;  %v19664_v24 = vld [vmem:[#allocation80_spill] sm:$0xff] }
 0x46b   : > { %v13411_v19 = vpop.f32.mrf.mxu1  ;;  %v13535_v57 = vpop.f32.mrf.mxu0 }
 0x46c   : > { %v17426_v33 = vadd.f32 %v4627_v47, %v4217_v18  ;;  %v5436_v18 = vld [vmem:[#allocation2 + $0x169] sm:$0xff]  ;;  %v4914_v19 = vpack.c.bf16 %v4880_v32, %v4879_v62  ;;  %v4881_v62 = vld [vmem:[#allocation2 + $0x178] sm:$0xff]  ;;  %v4882_v32 = vld [vmem:[#allocation2 + $0x180] sm:$0xff] }
 0x46d   : > { %v4075_v63 = vpop.f32.mrf.mxu1  ;;  %v4632_v7 = vpop.f32.mrf.mxu0  ;;  %13649 = vmatmul.mubr.bf16.gmra.mxu1 %v4913_v54  ;;  %13773 = vmatmul.mubr.bf16.gmra.mxu0 %v5470_v29  ;;  %v5471_v57 = vpack.c.bf16 %v5437_v6, %v5436_v18  ;;  %v5439_v6 = vld [vmem:[#allocation2 + $0x181] sm:$0xff] }
 0x46e   : > { %v4218_v30 = vadd.f32 %v4075_v63, %v17143_v60  ;;  %13652 = vmatprep.mubr.msk.bf16.mxu1 %vm15473_vm0, %v17407_v48  ;;  %13776 = vmatprep.mubr.msk.bf16.mxu0 %vm15473_vm0, %v17407_v48 }
 0x46f   : > { %v13414_v21 = vpop.f32.mrf.mxu1  ;;  %v13538_v61 = vpop.f32.mrf.mxu0 }
 0x470   : > { %v17433_v25 = vadd.f32 %v4632_v7, %v4218_v30  ;;  %v19666_v7 = vld [vmem:[#allocation69_spill] sm:$0xff] }
 0x471   : > { %v4078_v44 = vpop.f32.mrf.mxu1  ;;  %v4635_v11 = vpop.f32.mrf.mxu0 }
 0x472   : > { %19663 = vst [vmem:[#allocation78_spill] sm:$0xff] %v17433_v25  ;;  %v4219_v47 = vadd.f32 %v4078_v44, %v19664_v24 }
 0x473   : > { %v13415_v37 = vpop.f32.mrf.mxu1  ;;  %v13539_v60 = vpop.f32.mrf.mxu0 }
 0x474   : > { %v17436_v54 = vadd.f32 %v4635_v11, %v4219_v47  ;;  %v19668_v47 = vld [vmem:[#allocation70_spill] sm:$0xff]  ;;  %v5438_v37 = vld [vmem:[#allocation2 + $0x179] sm:$0xff] }
 0x475   : > { %v4083_v29 = vpop.f32.mrf.mxu1  ;;  %v4640_v63 = vpop.f32.mrf.mxu0  ;;  %13653 = vmatmul.mubr.bf16.gmra.mxu1 %v4914_v19  ;;  %13777 = vmatmul.mubr.bf16.gmra.mxu0 %v5471_v57  ;;  %v4915_v57 = vpack.c.bf16 %v4882_v32, %v4881_v62  ;;  %v4883_v62 = vld [vmem:[#allocation2 + $0x188] sm:$0xff]  ;;  %v4884_v32 = vld [vmem:[#allocation2 + $0x190] sm:$0xff] }
 0x476   : > { %19665 = vst [vmem:[#allocation79_spill] sm:$0xff] %v17436_v54  ;;  %v4220_v30 = vadd.f32 %v4083_v29, %v19666_v7  ;;  %13656 = vmatprep.mubr.msk.bf16.mxu1 %vm15473_vm0, %v17407_v48  ;;  %13780 = vmatprep.mubr.msk.bf16.mxu0 %vm15473_vm0, %v17407_v48  ;;  %v5472_v29 = vpack.c.bf16 %v5439_v6, %v5438_v37  ;;  %v5441_v6 = vld [vmem:[#allocation2 + $0x191] sm:$0xff] }
 0x477   : > { %v13418_v21 = vpop.f32.mrf.mxu1  ;;  %v13542_v61 = vpop.f32.mrf.mxu0 }
 0x478   : > { %v17443_v44 = vadd.f32 %v4640_v63, %v4220_v30  ;;  %v19670_v63 = vld [vmem:[#allocation71_spill] sm:$0xff] }
 0x479   : > { %v4086_v11 = vpop.f32.mrf.mxu1  ;;  %v4643_v24 = vpop.f32.mrf.mxu0 }
 0x47a   : > { %19667 = vst [vmem:[#allocation80_spill] sm:$0xff] %v17443_v44  ;;  %v4221_v18 = vadd.f32 %v4086_v11, %v19668_v47 }
 0x47b   : > { %v13419_v60 = vpop.f32.mrf.mxu1  ;;  %v13543_v19 = vpop.f32.mrf.mxu0 }
 0x47c   : > { %v17446_v7 = vadd.f32 %v4643_v24, %v4221_v18  ;;  %v19671_v18 = vld [vmem:[#allocation72_spill] sm:$0xff]  ;;  %v5440_v60 = vld [vmem:[#allocation2 + $0x189] sm:$0xff] }
 0x47d   : > { %v4091_v54 = vpop.f32.mrf.mxu1  ;;  %v4648_v25 = vpop.f32.mrf.mxu0  ;;  %13657 = vmatmul.mubr.bf16.gmra.mxu1 %v4915_v57  ;;  %13781 = vmatmul.mubr.bf16.gmra.mxu0 %v5472_v29  ;;  %v4916_v57 = vpack.c.bf16 %v4884_v32, %v4883_v62  ;;  %v5473_v29 = vpack.c.bf16 %v5441_v6, %v5440_v60  ;;  %v4885_v62 = vld [vmem:[#allocation2 + $0x198] sm:$0xff]  ;;  %v4886_v32 = vld [vmem:[#allocation2 + $0x1a0] sm:$0xff] }
 0x47e   : > { %19669 = vst [vmem:[#allocation69_spill] sm:$0xff] %v17446_v7  ;;  %v4222_v30 = vadd.f32 %v4091_v54, %v19670_v63  ;;  %13660 = vmatprep.mubr.msk.bf16.mxu1 %vm15473_vm0, %v17407_v48  ;;  %13784 = vmatprep.mubr.msk.bf16.mxu0 %vm15473_vm0, %v17407_v48  ;;  %v5443_v6 = vld [vmem:[#allocation2 + $0x1a1] sm:$0xff]  ;;  %v5442_v60 = vld [vmem:[#allocation2 + $0x199] sm:$0xff] }
 0x47f   : > { %v13422_v21 = vpop.f32.mrf.mxu1  ;;  %v13546_v61 = vpop.f32.mrf.mxu0 }
 0x480   : > { %v17453_v11 = vadd.f32 %v4648_v25, %v4222_v30 }
 0x481   : > { %v4094_v24 = vpop.f32.mrf.mxu1  ;;  %v4651_v47 = vpop.f32.mrf.mxu0 }
 0x482   : > { %v4223_v37 = vadd.f32 %v4094_v24, %v19671_v18  ;;  %v19674_v18 = vld [vmem:[#allocation73_spill] sm:$0xff] }
 0x483   : > { %v13423_v19 = vpop.f32.mrf.mxu1  ;;  %v13547_v54 = vpop.f32.mrf.mxu0 }
 0x484   : > { %v17456_v63 = vadd.f32 %v4651_v47, %v4223_v37  ;;  %v5474_v54 = vpack.c.bf16 %v5443_v6, %v5442_v60  ;;  %v5445_v6 = vld [vmem:[#allocation2 + $0x1b1] sm:$0xff] }
 0x485   : > { %v4099_v7 = vpop.f32.mrf.mxu1  ;;  %v4656_v44 = vpop.f32.mrf.mxu0  ;;  %13661 = vmatmul.mubr.bf16.gmra.mxu1 %v4916_v57  ;;  %13785 = vmatmul.mubr.bf16.gmra.mxu0 %v5473_v29 }
 0x486   : > { %19672 = vst [vmem:[#allocation70_spill] sm:$0xff] %v17456_v63  ;;  %v4224_v25 = vadd.f32 %v4099_v7, %v17175_v9  ;;  %13664 = vmatprep.mubr.msk.bf16.mxu1 %vm15473_vm0, %v17407_v48  ;;  %13788 = vmatprep.mubr.msk.bf16.mxu0 %vm15473_vm0, %v17407_v48  ;;  %v4917_v7 = vpack.c.bf16 %v4886_v32, %v4885_v62  ;;  %v4887_v62 = vld [vmem:[#allocation2 + $0x1a8] sm:$0xff]  ;;  %v4888_v32 = vld [vmem:[#allocation2 + $0x1b0] sm:$0xff] }
 0x487   : > { %v13426_v30 = vpop.f32.mrf.mxu1  ;;  %v13550_v21 = vpop.f32.mrf.mxu0 }
 0x488   : > { %v17463_v61 = vadd.f32 %v4656_v44, %v4224_v25 }
 0x489   : > { %v4102_v24 = vpop.f32.mrf.mxu1  ;;  %v4659_v47 = vpop.f32.mrf.mxu0 }
 0x48a   : > { %19673 = vst [vmem:[#allocation71_spill] sm:$0xff] %v17463_v61  ;;  %v4225_v37 = vadd.f32 %v4102_v24, %v19674_v18  ;;  %v15235_v61 = vld [vmem:[#allocation9 + $0xf8] sm:$0xff]  }
 0x48b   : > { %v13427_v19 = vpop.f32.mrf.mxu1  ;;  %v13551_v9 = vpop.f32.mrf.mxu0 }
 0x48c   : > { %v17466_v57 = vadd.f32 %v4659_v47, %v4225_v37  ;;  %v5444_v37 = vld [vmem:[#allocation2 + $0x1a9] sm:$0xff]  ;;  %v4918_v19 = vpack.c.bf16 %v4888_v32, %v4887_v62  ;;  %v5446_v62 = vld [vmem:[#allocation2 + $0x1b9] sm:$0xff]  ;;  %v5447_v32 = vld [vmem:[#allocation2 + $0x1c1] sm:$0xff] }
 0x48d   : > { %v4107_v29 = vpop.f32.mrf.mxu1  ;;  %v4664_v63 = vpop.f32.mrf.mxu0  ;;  %13665 = vmatmul.mubr.bf16.gmra.mxu1 %v4917_v7  ;;  %13789 = vmatmul.mubr.bf16.gmra.mxu0 %v5474_v54  ;;  %v5475_v9 = vpack.c.bf16 %v5445_v6, %v5444_v37 }
 0x48e   : > { %19675 = vst [vmem:[#allocation72_spill] sm:$0xff] %v17466_v57  ;;  %v4226_v44 = vadd.f32 %v4107_v29, %v17185_v20  ;;  %13668 = vmatprep.mubr.msk.bf16.mxu1 %vm15473_vm0, %v17407_v48  ;;  %13792 = vmatprep.mubr.msk.bf16.mxu0 %vm15473_vm0, %v17407_v48  ;;  %v15234_v57 = vld [vmem:[#allocation9 + $0xb8] sm:$0xff]  }
 0x48f   : > { %v13430_v25 = vpop.f32.mrf.mxu1  ;;  %v13554_v30 = vpop.f32.mrf.mxu0 }
 0x490   : > { %v17473_v21 = vadd.f32 %v4664_v63, %v4226_v44  ;;  %v4890_v30 = vld [vmem:[#allocation2 + $0x1c0] sm:$0xff] }
 0x491   : > { %v4110_v24 = vpop.f32.mrf.mxu1  ;;  %v4667_v47 = vpop.f32.mrf.mxu0 }
 0x492   : > { %19676 = vst [vmem:[#allocation73_spill] sm:$0xff] %v17473_v21  ;;  %v4227_v18 = vadd.f32 %v4110_v24, %v17188_v2 }
 0x493   : > { %v13431_v60 = vpop.f32.mrf.mxu1  ;;  %v13555_v20 = vpop.f32.mrf.mxu0 }
 0x494   : > { %v17476_v7 = vadd.f32 %v4667_v47, %v4227_v18  ;;  %v4889_v18 = vld [vmem:[#allocation2 + $0x1b8] sm:$0xff]  ;;  %v5476_v20 = vpack.c.bf16 %v5447_v32, %v5446_v62  ;;  %v4891_v62 = vld [vmem:[#allocation2 + $0x1c8] sm:$0xff] }
 0x495   : > { %v4115_v54 = vpop.f32.mrf.mxu1  ;;  %v4672_v29 = vpop.f32.mrf.mxu0  ;;  %13669 = vmatmul.mubr.bf16.gmra.mxu1 %v4918_v19  ;;  %13793 = vmatmul.mubr.bf16.gmra.mxu0 %v5475_v9  ;;  %v4919_v60 = vpack.c.bf16 %v4890_v30, %v4889_v18  ;;  %v5448_v32 = vld [vmem:[#allocation2 + $0x1c9] sm:$0xff] }
 0x496   : > { %19677 = vst [vmem:[#allocation81_spill] sm:$0xff] %v17476_v7  ;;  %v4228_v63 = vadd.f32 %v4115_v54, %v17195_v40  ;;  %13672 = vmatprep.mubr.msk.bf16.mxu1 %vm15473_vm0, %v17407_v48  ;;  %13796 = vmatprep.mubr.msk.bf16.mxu0 %vm15473_vm0, %v17407_v48 }
 0x497   : > { %v13434_v2 = vpop.f32.mrf.mxu1  ;;  %v13558_v44 = vpop.f32.mrf.mxu0 }
 0x498   : > { %v17483_v25 = vadd.f32 %v4672_v29, %v4228_v63  ;;  %v19680_v29 = vld [vmem:[#allocation74_spill] sm:$0xff] }
 0x499   : > { %v4118_v6 = vpop.f32.mrf.mxu1  ;;  %v4675_v24 = vpop.f32.mrf.mxu0 }
 0x49a   : > { %19678 = vst [vmem:[#allocation82_spill] sm:$0xff] %v17483_v25  ;;  %v4229_v47 = vadd.f32 %v4118_v6, %v17198_v46  ;;  %v17496_v46 = vld [vmem:[%s19466_s6] ss:$0 sm:$0xff]  ;;  %v5449_v6 = vld [vmem:[#allocation2 + $0x1d1] sm:$0xff] }
 0x49b   : > { %v13435_v37 = vpop.f32.mrf.mxu1  ;;  %v13559_v40 = vpop.f32.mrf.mxu0 }
 0x49c   : > { %v17486_v19 = vadd.f32 %v4675_v24, %v4229_v47  ;;  %v17501_v24 = vld [vmem:[%s19467_s7] ss:$0 sm:$0xff]  ;;  %v19681_v40 = vld [vmem:[#allocation75_spill] sm:$0xff] }
 0x49d   : > { %v5021_v9 = vpop.f32.mrf.mxu1  ;;  %13673 = vmatmul.mubr.bf16.gmra.mxu1 %v4919_v60  ;;  %v5578_v54 = vpop.f32.mrf.mxu0  ;;  %13797 = vmatmul.mubr.bf16.gmra.mxu0 %v5476_v20 }
 0x49e   : > { %19679 = vst [vmem:[#allocation83_spill] sm:$0xff] %v17486_v19  ;;  %v5290_v63 = vadd.f32 %v5021_v9, %v19680_v29  ;;  %13676 = vmatprep.mubr.msk.bf16.mxu1 %vm15473_vm0, %v17407_v48  ;;  %13800 = vmatprep.mubr.msk.bf16.mxu0 %vm15473_vm0, %v17407_v48  ;;  %v4920_v29 = vpack.c.bf16 %v17407_v48, %v4891_v62  ;;  %v5451_v62 = vld [vmem:[#allocation2 + $0x1e1] sm:$0xff] }
 0x49f   : > { %v13578_v2 = vpop.f32.mrf.mxu1  ;;  %v13702_v44 = vpop.f32.mrf.mxu0 }
 0x4a0   : > { %v5847_v30 = vadd.f32 %v5578_v54, %v5290_v63  ;;  %v5477_v2 = vpack.c.bf16 %v5449_v6, %v5448_v32 }
 0x4a1   : > { %v5024_v47 = vpop.f32.mrf.mxu1  ;;  %v5581_v18 = vpop.f32.mrf.mxu0 }
 0x4a2   : > { %v6016_v37 = vmul.f32 %v17496_v46, %v5847_v30  ;;  %v5291_v60 = vadd.f32 %v5024_v47, %v19681_v40  ;;  %v5450_v30 = vld [vmem:[#allocation2 + $0x1d9] sm:$0xff]  ;;  %v19682_v47 = vld [vmem:[#allocation18_spill] sm:$0xff] }
 0x4a3   : > { %v13579_v20 = vpop.f32.mrf.mxu1  ;;  %v13703_v9 = vpop.f32.mrf.mxu0 }
 0x4a4   : > { %v6077_v54 = vadd.f32 %v17501_v24, %v6016_v37  ;;  %v5848_v63 = vadd.f32 %v5581_v18, %v5291_v60  ;;  %v5478_v9 = vpack.c.bf16 %v5451_v62, %v5450_v30 }
 0x4a5   : > { %v5029_v44 = vpop.f32.mrf.mxu1  ;;  %13677 = vmatmul.mubr.bf16.gmra.mxu1 %v4920_v29  ;;  %v5586_v19 = vpop.f32.mrf.mxu0  ;;  %13801 = vmatmul.mubr.bf16.gmra.mxu0 %v5477_v2 }
 0x4a6   : > { %v6131_v25 = vmax.f32 %v6077_v54, 0.0  ;;  %v6017_v7 = vmul.f32 %v17496_v46, %v5848_v63  ;;  %v5292_v21 = vadd.f32 %v5029_v44, %v17215_v31  ;;  %13680 = vmatprep.mubr.msk.bf16.mxu1 %vm15473_vm0, %v17407_v48  ;;  %13804 = vmatprep.mubr.msk.bf16.mxu0 %vm15473_vm0, %v17407_v48  ;;  %v4921_v31 = vpack.c.bf16 %v17407_v48, %v17407_v48  ;;  %v19683_v54 = vld [vmem:[#allocation76_spill] sm:$0xff] }
 0x4a7   : > { %v13582_v32 = vpop.f32.mrf.mxu1  ;;  %v13706_v6 = vpop.f32.mrf.mxu0 }
 0x4a8   : > { %v17514_v18 = vmul.f32 %v6131_v25, %v19682_v47  ;;  %v6078_v37 = vadd.f32 %v17501_v24, %v6017_v7  ;;  %v5849_v40 = vadd.f32 %v5586_v19, %v5292_v21  ;;  %v19684_v25 = vld [vmem:[#allocation21_spill] sm:$0xff] }
 0x4a9   : > { %v5032_v60 = vpop.f32.mrf.mxu1  ;;  %v5589_v20 = vpop.f32.mrf.mxu0 }
 0x4aa   : > { %6239 = vst [vmem:[#allocation2 + $0x20] sm:$0xff] %v17514_v18  ;;  %v6132_v29 = vmax.f32 %v6078_v37, 0.0  ;;  %v6018_v2 = vmul.f32 %v17496_v46, %v5849_v40  ;;  %v5293_v63 = vadd.f32 %v5032_v60, %v19683_v54  ;;  %v19685_v37 = vld [vmem:[#allocation77_spill] sm:$0xff]  ;;  %v19686_v54 = vld [vmem:[#allocation22_spill] sm:$0xff] }
 0x4ab   : > { %v13583_v44 = vpop.f32.mrf.mxu1  ;;  %v13707_v32 = vpop.f32.mrf.mxu0  ;;  %v6293_v60 = vld [vmem:[#allocation2 + $0x7] sm:$0xff] }
 0x4ac   : > { %v17523_v6 = vmul.f32 %v6132_v29, %v19684_v25  ;;  %v6079_v21 = vadd.f32 %v17501_v24, %v6018_v2  ;;  %v5850_v7 = vadd.f32 %v5589_v20, %v5293_v63  ;;  %v6294_v29 = vld [vmem:[#allocation2 + $0xf] sm:$0xff] }
 0x4ad   : > { %v5037_v19 = vpop.f32.mrf.mxu1  ;;  %13681 = vmatmul.mubr.bf16.gmra.mxu1 %v4921_v31  ;;  %v5594_v47 = vpop.f32.mrf.mxu0  ;;  %13805 = vmatmul.mubr.bf16.gmra.mxu0 %v5478_v9 }
 0x4ae   : > { %6240 = vst [vmem:[#allocation2 + $0x28] sm:$0xff] %v17523_v6  ;;  %v6133_v30 = vmax.f32 %v6079_v21, 0.0  ;;  %v6019_v62 = vmul.f32 %v17496_v46, %v5850_v7  ;;  %v5294_v40 = vadd.f32 %v5037_v19, %v19685_v37  ;;  %13824 = vmatprep.mubr.msk.bf16.mxu1 %vm15473_vm0, %v17407_v48  ;;  %13948 = vmatprep.mubr.msk.bf16.mxu0 %vm15473_vm0, %v17407_v48 }
 0x4af   : > { %v13586_v20 = vpop.f32.mrf.mxu1  ;;  %v13710_v2 = vpop.f32.mrf.mxu0  ;;  %v6347_v21 = vpack.c.bf16 %v6294_v29, %v6293_v60 }
 0x4b0   : > { %v17534_v63 = vmul.f32 %v6133_v30, %v19686_v54  ;;  %v6080_v9 = vadd.f32 %v17501_v24, %v6019_v62  ;;  %v5851_v44 = vadd.f32 %v5594_v47, %v5294_v40  ;;  %v19687_v54 = vld [vmem:[#allocation25_spill] sm:$0xff] }
 0x4b1   : > { %v5040_v32 = vpop.f32.mrf.mxu1  ;;  %v5597_v25 = vpop.f32.mrf.mxu0 }
 0x4b2   : > { %6241 = vst [vmem:[#allocation2 + $0x30] sm:$0xff] %v17534_v63  ;;  %v6134_v7 = vmax.f32 %v6080_v9, 0.0  ;;  %v6020_v19 = vmul.f32 %v17496_v46, %v5851_v44  ;;  %v5295_v37 = vadd.f32 %v5040_v32, %v17228_v59  ;;  %v6797_v30 = vpack.c.bf16 %v17534_v63, %v17523_v6  ;;  %v15236_v32 = vld [vmem:[#allocation9 + $0xb0] sm:$0xff]   ;;  %v19692_v6 = vld [vmem:[#allocation34_spill] sm:$0xff] }
 0x4b3   : > { %v13587_v20 = vpop.f32.mrf.mxu1  ;;  %v13711_v2 = vpop.f32.mrf.mxu0 }
 0x4b4   : > { %v17543_v62 = vmul.f32 %v6134_v7, %v19687_v54  ;;  %v6081_v47 = vadd.f32 %v17501_v24, %v6020_v19  ;;  %v5852_v40 = vadd.f32 %v5597_v25, %v5295_v37  ;;  %v15237_v20 = vld [vmem:[#allocation9 + $0xf0] sm:$0xff]   ;;  %v6295_v37 = vld [vmem:[#allocation2 + $0x17] sm:$0xff] }
 0x4b5   : > { %v5045_v60 = vpop.f32.mrf.mxu1  ;;  %v5602_v29 = vpop.f32.mrf.mxu0  ;;  %13825 = vmatmul.mubr.bf16.vlgmr.msra.gmra.mxu1 %v6347_v21  ;;  %13949 = vmatmul.mubr.bf16.vlgmr.msra.gmra.mxu0 %v4921_v31  ;;  %v19688_v31 = vld [vmem:[#allocation26_spill] sm:$0xff] }
 0x4b6   : > { %6242 = vst [vmem:[#allocation2 + $0x38] sm:$0xff] %v17543_v62  ;;  %v6135_v59 = vmax.f32 %v6081_v47, 0.0  ;;  %v6021_v9 = vmul.f32 %v17496_v46, %v5852_v40  ;;  %v5296_v44 = vadd.f32 %v5045_v60, %v17235_v3  ;;  %14057 = vmatpush3.bf16.msra.mxu1 %v15234_v57  ;;  %14181 = vmatpush3.bf16.msra.mxu0 %v15235_v61  ;;  %v6296_v3 = vld [vmem:[#allocation2 + $0x1f] sm:$0xff] }
 0x4b7   : > { %v13590_v7 = vpop.f32.mrf.mxu1  ;;  %v13714_v2 = vpop.f32.mrf.mxu0  ;;  %13828 = vmatprep.mubr.msk.bf16.mxu1 %vm15473_vm0, %v17407_v48  ;;  %13952 = vmatprep.mubr.msk.bf16.mxu0 %vm15473_vm0, %v17407_v48 }
 0x4b8   : > { %v17554_v25 = vmul.f32 %v6135_v59, %v19688_v31  ;;  %v6082_v21 = vadd.f32 %v17501_v24, %v6021_v9  ;;  %v5853_v19 = vadd.f32 %v5602_v29, %v5296_v44  ;;  %14058 = vmatprep.subr.bf16.mxu1 %v17407_v48  ;;  %14182 = vmatprep.subr.bf16.mxu0 %v17407_v48  ;;  %v15238_v7 = vld [vmem:[#allocation9 + $0xa8] sm:$0xff]   ;;  %v19689_v31 = vld [vmem:[#allocation29_spill] sm:$0xff] }
 0x4b9   : > { %v5048_v61 = vpop.f32.mrf.mxu1  ;;  %v5605_v57 = vpop.f32.mrf.mxu0  ;;  %v6348_v29 = vpack.c.bf16 %v6296_v3, %v6295_v37  ;;  %v6796_v9 = vpack.c.bf16 %v17514_v18, %v17407_v48  ;;  %v15239_v2 = vld [vmem:[#allocation9 + $0xe8] sm:$0xff]  }
 0x4ba   : > { %6243 = vst [vmem:[#allocation2 + $0x40] sm:$0xff] %v17554_v25  ;;  %v6136_v54 = vmax.f32 %v6082_v21, 0.0  ;;  %v6022_v47 = vmul.f32 %v17496_v46, %v5853_v19  ;;  %v5297_v40 = vadd.f32 %v5048_v61, %v17242_v38  ;;  %14059 = vmatpush3.bf16.msra.mxu1 %v15236_v32  ;;  %14183 = vmatpush3.bf16.msra.mxu0 %v15237_v20 }
 0x4bb   : > { %v13591_v60 = vpop.f32.mrf.mxu1  ;;  %v13715_v59 = vpop.f32.mrf.mxu0  ;;  %14060 = vmatprep.subr.bf16.mxu1 %v17407_v48  ;;  %14184 = vmatprep.subr.bf16.mxu0 %v17407_v48 }
 0x4bc   : > { %v17569_v21 = vmul.f32 %v6136_v54, %v19689_v31  ;;  %v6083_v38 = vadd.f32 %v17501_v24, %v6022_v47  ;;  %v5854_v32 = vadd.f32 %v5605_v57, %v5297_v40  ;;  %v15240_v57 = vld [vmem:[#allocation9 + $0xa0] sm:$0xff]   ;;  %v19690_v40 = vld [vmem:[#allocation30_spill] sm:$0xff] }
 0x4bd   : > { %v5053_v20 = vpop.f32.mrf.mxu1  ;;  %v5610_v19 = vpop.f32.mrf.mxu0  ;;  %13829 = vmatmul.mubr.bf16.gmra.mxu1 %v6348_v29  ;;  %13953 = vmatmul.mubr.bf16.gmra.mxu0 %v6796_v9  ;;  %v15241_v47 = vld [vmem:[#allocation9 + $0xe0] sm:$0xff]  }
 0x4be   : > { %6244 = vst [vmem:[#allocation2 + $0x48] sm:$0xff] %v17569_v21  ;;  %v6137_v18 = vmax.f32 %v6083_v38, 0.0  ;;  %v6023_v37 = vmul.f32 %v17496_v46, %v5854_v32  ;;  %v5298_v3 = vadd.f32 %v5053_v20, %v17249_v41  ;;  %13832 = vmatprep.mubr.msk.bf16.mxu1 %vm15473_vm0, %v17407_v48  ;;  %13956 = vmatprep.mubr.msk.bf16.mxu0 %vm15473_vm0, %v17407_v48  ;;  %v6298_v9 = vld [vmem:[#allocation2 + $0x2f] sm:$0xff]  ;;  %v6297_v32 = vld [vmem:[#allocation2 + $0x27] sm:$0xff] }
 0x4bf   : > { %v13594_v61 = vpop.f32.mrf.mxu1  ;;  %v13718_v54 = vpop.f32.mrf.mxu0  ;;  %14061 = vmatpush3.bf16.msra.mxu1 %v15238_v7  ;;  %14185 = vmatpush3.bf16.msra.mxu0 %v15239_v2 }
 0x4c0   : > { %v17580_v60 = vmul.f32 %v6137_v18, %v19690_v40  ;;  %v6084_v59 = vadd.f32 %v17501_v24, %v6023_v37  ;;  %v5855_v29 = vadd.f32 %v5610_v19, %v5298_v3  ;;  %14062 = vmatprep.subr.bf16.mxu1 %v17407_v48  ;;  %14186 = vmatprep.subr.bf16.mxu0 %v17407_v48  ;;  %v15242_v37 = vld [vmem:[#allocation9 + $0x98] sm:$0xff]   ;;  %v19691_v54 = vld [vmem:[#allocation33_spill] sm:$0xff] }
 0x4c1   : > { %v5056_v41 = vpop.f32.mrf.mxu1  ;;  %v5613_v31 = vpop.f32.mrf.mxu0  ;;  %v6349_v61 = vpack.c.bf16 %v6298_v9, %v6297_v32  ;;  %v15243_v3 = vld [vmem:[#allocation9 + $0xd8] sm:$0xff]  }
 0x4c2   : > { %6245 = vst [vmem:[#allocation2 + $0x50] sm:$0xff] %v17580_v60  ;;  %v6138_v38 = vmax.f32 %v6084_v59, 0.0  ;;  %v6024_v7 = vmul.f32 %v17496_v46, %v5855_v29  ;;  %v5299_v2 = vadd.f32 %v5056_v41, %v17254_v28  ;;  %v6799_v19 = vpack.c.bf16 %v17580_v60, %v17569_v21 }
 0x4c3   : > { %v13595_v20 = vpop.f32.mrf.mxu1  ;;  %v13719_v18 = vpop.f32.mrf.mxu0  ;;  %14063 = vmatpush3.bf16.msra.mxu1 %v15240_v57  ;;  %14187 = vmatpush3.bf16.msra.mxu0 %v15241_v47 }
 0x4c4   : > { %v17591_v40 = vmul.f32 %v6138_v38, %v19691_v54  ;;  %v6085_v59 = vadd.f32 %v17501_v24, %v6024_v7  ;;  %v5856_v44 = vadd.f32 %v5613_v31, %v5299_v2  ;;  %14064 = vmatprep.subr.bf16.mxu1 %v17407_v48  ;;  %14188 = vmatprep.subr.bf16.mxu0 %v17407_v48  ;;  %v15244_v38 = vld [vmem:[#allocation9 + $0x90] sm:$0xff]  }
 0x4c5   : > { %v5061_v28 = vpop.f32.mrf.mxu1  ;;  %v5618_v29 = vpop.f32.mrf.mxu0  ;;  %13833 = vmatmul.mubr.bf16.gmra.mxu1 %v6349_v61  ;;  %13957 = vmatmul.mubr.bf16.gmra.mxu0 %v6797_v30  ;;  %v6299_v61 = vld [vmem:[#allocation2 + $0x37] sm:$0xff] }
 0x4c6   : > { %6246 = vst [vmem:[#allocation2 + $0x58] sm:$0xff] %v17591_v40  ;;  %v6139_v57 = vmax.f32 %v6085_v59, 0.0  ;;  %v6025_v47 = vmul.f32 %v17496_v46, %v5856_v44  ;;  %v5300_v9 = vadd.f32 %v5061_v28, %v17263_v13  ;;  %13836 = vmatprep.mubr.msk.bf16.mxu1 %vm15473_vm0, %v17407_v48  ;;  %13960 = vmatprep.mubr.msk.bf16.mxu0 %vm15473_vm0, %v17407_v48  ;;  %v6300_v44 = vld [vmem:[#allocation2 + $0x3f] sm:$0xff] }
 0x4c7   : > { %v13598_v41 = vpop.f32.mrf.mxu1  ;;  %v13722_v31 = vpop.f32.mrf.mxu0  ;;  %14065 = vmatpush3.bf16.msra.mxu1 %v15242_v37  ;;  %14189 = vmatpush3.bf16.msra.mxu0 %v15243_v3  ;;  %v15245_v37 = vld [vmem:[#allocation9 + $0xd0] sm:$0xff]   ;;  %v6350_v59 = vpack.c.bf16 %v6300_v44, %v6299_v61 }
 0x4c8   : > { %v17607_v63 = vmul.f32 %v6139_v57, %v19692_v6  ;;  %v6086_v30 = vadd.f32 %v17501_v24, %v6025_v47  ;;  %v5857_v7 = vadd.f32 %v5618_v29, %v5300_v9  ;;  %14066 = vmatprep.subr.bf16.mxu1 %v17407_v48  ;;  %14190 = vmatprep.subr.bf16.mxu0 %v17407_v48  ;;  %v19693_v29 = vld [vmem:[#allocation37_spill] sm:$0xff] }
 0x4c9   : > { %v5064_v13 = vpop.f32.mrf.mxu1  ;;  %v5621_v2 = vpop.f32.mrf.mxu0  ;;  %v19694_v31 = vpack.c.bf16 %v17554_v25, %v17543_v62 }
 0x4ca   : > { %6247 = vst [vmem:[#allocation2 + $0x60] sm:$0xff] %v17607_v63  ;;  %v6140_v32 = vmax.f32 %v6086_v30, 0.0  ;;  %v6026_v20 = vmul.f32 %v17496_v46, %v5857_v7  ;;  %v5301_v18 = vadd.f32 %v5064_v13, %v17268_v39  ;;  %v6800_v28 = vpack.c.bf16 %v17607_v63, %v17591_v40  ;;  %v19695_v13 = vld [vmem:[#allocation38_spill] sm:$0xff] }
 0x4cb   : > { %v13599_v3 = vpop.f32.mrf.mxu1  ;;  %v13723_v54 = vpop.f32.mrf.mxu0  ;;  %14067 = vmatpush3.bf16.msra.mxu1 %v15244_v38  ;;  %14191 = vmatpush3.bf16.msra.mxu0 %v15245_v37 }
 0x4cc   : > { %v17618_v57 = vmul.f32 %v6140_v32, %v19693_v29  ;;  %v6087_v47 = vadd.f32 %v17501_v24, %v6026_v20  ;;  %v5858_v9 = vadd.f32 %v5621_v2, %v5301_v18  ;;  %14068 = vmatprep.subr.bf16.mxu1 %v17407_v48  ;;  %14192 = vmatprep.subr.bf16.mxu0 %v17407_v48  ;;  %v6302_v32 = vld [vmem:[#allocation2 + $0x4f] sm:$0xff]  ;;  %v6301_v3 = vld [vmem:[#allocation2 + $0x47] sm:$0xff] }
 0x4cd   : > { %v5069_v41 = vpop.f32.mrf.mxu1  ;;  %v5626_v39 = vpop.f32.mrf.mxu0  ;;  %13837 = vmatmul.mubr.bf16.gmra.mxu1 %v6350_v59  ;;  %13961 = vmatmul.mubr.bf16.gmra.mxu0 %v19694_v31  ;;  %v6351_v29 = vpack.c.bf16 %v6302_v32, %v6301_v3 }
 0x4ce   : > { %6248 = vst [vmem:[#allocation2 + $0x68] sm:$0xff] %v17618_v57  ;;  %v6141_v6 = vmax.f32 %v6087_v47, 0.0  ;;  %v6027_v38 = vmul.f32 %v17496_v46, %v5858_v9  ;;  %v5302_v30 = vadd.f32 %v5069_v41, %v17277_v58  ;;  %13840 = vmatprep.mubr.msk.bf16.mxu1 %vm15473_vm0, %v17407_v48  ;;  %13964 = vmatprep.mubr.msk.bf16.mxu0 %vm15473_vm0, %v17407_v48  ;;  %v19696_v9 = vld [vmem:[#allocation41_spill] sm:$0xff] }
 0x4cf   : > { %v13602_v7 = vpop.f32.mrf.mxu1  ;;  %v13726_v44 = vpop.f32.mrf.mxu0 }
 0x4d0   : > { %v17634_v62 = vmul.f32 %v6141_v6, %v19695_v13  ;;  %v6088_v25 = vadd.f32 %v17501_v24, %v6027_v38  ;;  %v5859_v2 = vadd.f32 %v5626_v39, %v5302_v30 }
 0x4d1   : > { %v5072_v20 = vpop.f32.mrf.mxu1  ;;  %v5629_v18 = vpop.f32.mrf.mxu0 }
 0x4d2   : > { %6249 = vst [vmem:[#allocation2 + $0x70] sm:$0xff] %v17634_v62  ;;  %v6142_v58 = vmax.f32 %v6088_v25, 0.0  ;;  %v6028_v61 = vmul.f32 %v17496_v46, %v5859_v2  ;;  %v5303_v37 = vadd.f32 %v5072_v20, %v17280_v14  ;;  %v6801_v47 = vpack.c.bf16 %v17634_v62, %v17618_v57  ;;  %v19697_v25 = vld [vmem:[#allocation42_spill] sm:$0xff] }
 0x4d3   : > { %v13603_v54 = vpop.f32.mrf.mxu1  ;;  %v13727_v59 = vpop.f32.mrf.mxu0  ;;  %v19701_v57 = vld [vmem:[#allocation50_spill] sm:$0xff] }
 0x4d4   : > { %v17643_v41 = vmul.f32 %v6142_v58, %v19696_v9  ;;  %v6089_v39 = vadd.f32 %v17501_v24, %v6028_v61  ;;  %v5860_v31 = vadd.f32 %v5629_v18, %v5303_v37  ;;  %v6303_v61 = vld [vmem:[#allocation2 + $0x57] sm:$0xff] }
 0x4d5   : > { %v5077_v6 = vpop.f32.mrf.mxu1  ;;  %v5634_v38 = vpop.f32.mrf.mxu0  ;;  %13841 = vmatmul.mubr.bf16.gmra.mxu1 %v6351_v29  ;;  %13965 = vmatmul.mubr.bf16.gmra.mxu0 %v6799_v19  ;;  %v6304_v19 = vld [vmem:[#allocation2 + $0x5f] sm:$0xff] }
 0x4d6   : > { %6250 = vst [vmem:[#allocation2 + $0x78] sm:$0xff] %v17643_v41  ;;  %v6143_v14 = vmax.f32 %v6089_v39, 0.0  ;;  %v6029_v30 = vmul.f32 %v17496_v46, %v5860_v31  ;;  %v5304_v7 = vadd.f32 %v5077_v6, %v17287_v55  ;;  %13844 = vmatprep.mubr.msk.bf16.mxu1 %vm15473_vm0, %v17407_v48  ;;  %13968 = vmatprep.mubr.msk.bf16.mxu0 %vm15473_vm0, %v17407_v48  ;;  %v19698_v29 = vld [vmem:[#allocation45_spill] sm:$0xff] }
 0x4d7   : > { %v13606_v44 = vpop.f32.mrf.mxu1  ;;  %v13730_v13 = vpop.f32.mrf.mxu0  ;;  %v6352_v54 = vpack.c.bf16 %v6304_v19, %v6303_v61 }
 0x4d8   : > { %v17657_v2 = vmul.f32 %v6143_v14, %v19697_v25  ;;  %v6090_v21 = vadd.f32 %v17501_v24, %v6029_v30  ;;  %v5861_v60 = vadd.f32 %v5634_v38, %v5304_v7  ;;  %v19699_v13 = vld [vmem:[#allocation46_spill] sm:$0xff] }
 0x4d9   : > { %v5080_v32 = vpop.f32.mrf.mxu1  ;;  %v5637_v20 = vpop.f32.mrf.mxu0 }
 0x4da   : > { %6251 = vst [vmem:[#allocation2 + $0x80] sm:$0xff] %v17657_v2  ;;  %v6144_v55 = vmax.f32 %v6090_v21, 0.0  ;;  %v6030_v18 = vmul.f32 %v17496_v46, %v5861_v60  ;;  %v5305_v58 = vadd.f32 %v5080_v32, %v17291_v50  ;;  %v6802_v59 = vpack.c.bf16 %v17657_v2, %v17643_v41 }
 0x4db   : > { %v13607_v37 = vpop.f32.mrf.mxu1  ;;  %v13731_v3 = vpop.f32.mrf.mxu0 }
 0x4dc   : > { %v17666_v9 = vmul.f32 %v6144_v55, %v19698_v29  ;;  %v6091_v39 = vadd.f32 %v17501_v24, %v6030_v18  ;;  %v5862_v31 = vadd.f32 %v5637_v20, %v5305_v58  ;;  %v6305_v20 = vld [vmem:[#allocation2 + $0x67] sm:$0xff]  ;;  %v15246_v55 = vld [vmem:[#allocation9 + $0x88] sm:$0xff]  }
 0x4dd   : > { %v5085_v6 = vpop.f32.mrf.mxu1  ;;  %v5642_v38 = vpop.f32.mrf.mxu0  ;;  %13845 = vmatmul.mubr.bf16.gmra.mxu1 %v6352_v54  ;;  %13969 = vmatmul.mubr.bf16.gmra.mxu0 %v6800_v28  ;;  %v6306_v28 = vld [vmem:[#allocation2 + $0x6f] sm:$0xff]  ;;  %v19700_v3 = vld [vmem:[#allocation49_spill] sm:$0xff] }
 0x4de   : > { %6252 = vst [vmem:[#allocation2 + $0x88] sm:$0xff] %v17666_v9  ;;  %v6145_v50 = vmax.f32 %v6091_v39, 0.0  ;;  %v6031_v14 = vmul.f32 %v17496_v46, %v5862_v31  ;;  %v5306_v30 = vadd.f32 %v5085_v6, %v17298_v1  ;;  %13848 = vmatprep.mubr.msk.bf16.mxu1 %vm15473_vm0, %v17407_v48  ;;  %13972 = vmatprep.mubr.msk.bf16.mxu0 %vm15473_vm0, %v17407_v48 }
 0x4df   : > { %v13610_v7 = vpop.f32.mrf.mxu1  ;;  %v13734_v44 = vpop.f32.mrf.mxu0  ;;  %v6353_v61 = vpack.c.bf16 %v6306_v28, %v6305_v20  ;;  %14069 = vmatpush3.bf16.msra.mxu1 %v15246_v55  ;;  %v19702_v55 = vld [vmem:[#allocation53_spill] sm:$0xff] }
 0x4e0   : > { %v17680_v25 = vmul.f32 %v6145_v50, %v19699_v13  ;;  %v6092_v40 = vadd.f32 %v17501_v24, %v6031_v14  ;;  %v5863_v63 = vadd.f32 %v5642_v38, %v5306_v30  ;;  %v15247_v14 = vld [vmem:[#allocation9 + $0xc8] sm:$0xff]   ;;  %14070 = vmatprep.subr.bf16.mxu1 %v17407_v48 }
 0x4e1   : > { %v5088_v21 = vpop.f32.mrf.mxu1  ;;  %v5645_v60 = vpop.f32.mrf.mxu0  ;;  %v6308_v13 = vld [vmem:[#allocation2 + $0x7f] sm:$0xff]  ;;  %14193 = vmatpush3.bf16.msra.mxu0 %v15247_v14 }
 0x4e2   : > { %6253 = vst [vmem:[#allocation2 + $0x90] sm:$0xff] %v17680_v25  ;;  %v6146_v1 = vmax.f32 %v6092_v40, 0.0  ;;  %v6032_v19 = vmul.f32 %v17496_v46, %v5863_v63  ;;  %v5307_v32 = vadd.f32 %v5088_v21, %v17302_v52  ;;  %v6803_v37 = vpack.c.bf16 %v17680_v25, %v17666_v9  ;;  %14194 = vmatprep.subr.bf16.mxu0 %v17407_v48 }
 0x4e3   : > { %v13611_v18 = vpop.f32.mrf.mxu1  ;;  %v13735_v58 = vpop.f32.mrf.mxu0 }
 0x4e4   : > { %v17689_v54 = vmul.f32 %v6146_v1, %v19700_v3  ;;  %v6093_v29 = vadd.f32 %v17501_v24, %v6032_v19  ;;  %v5864_v39 = vadd.f32 %v5645_v60, %v5307_v32  ;;  %v6307_v60 = vld [vmem:[#allocation2 + $0x77] sm:$0xff] }
 0x4e5   : > { %v5093_v31 = vpop.f32.mrf.mxu1  ;;  %v5650_v6 = vpop.f32.mrf.mxu0  ;;  %13849 = vmatmul.mubr.bf16.gmra.mxu1 %v6353_v61  ;;  %13973 = vmatmul.mubr.bf16.gmra.mxu0 %v6801_v47  ;;  %v6354_v32 = vpack.c.bf16 %v6308_v13, %v6307_v60 }
 0x4e6   : > { %6254 = vst [vmem:[#allocation2 + $0x98] sm:$0xff] %v17689_v54  ;;  %v6147_v52 = vmax.f32 %v6093_v29, 0.0  ;;  %v6033_v38 = vmul.f32 %v17496_v46, %v5864_v39  ;;  %v5308_v50 = vadd.f32 %v5093_v31, %v17309_v17  ;;  %13852 = vmatprep.mubr.msk.bf16.mxu1 %vm15473_vm0, %v17407_v48  ;;  %13976 = vmatprep.mubr.msk.bf16.mxu0 %vm15473_vm0, %v17407_v48  ;;  %v17723_v31 = vld [vmem:[#allocation2] sm:$0xff] }
 0x4e7   : > { %v13614_v30 = vpop.f32.mrf.mxu1  ;;  %v13738_v7 = vpop.f32.mrf.mxu0 }
 0x4e8   : > { %v17704_v62 = vmul.f32 %v6147_v52, %v19701_v57  ;;  %v6094_v47 = vadd.f32 %v17501_v24, %v6033_v38  ;;  %v5865_v44 = vadd.f32 %v5650_v6, %v5308_v50  ;;  %v19703_v38 = vld [vmem:[#allocation54_spill] sm:$0xff] }
 0x4e9   : > { %v5096_v17 = vpop.f32.mrf.mxu1  ;;  %v5653_v40 = vpop.f32.mrf.mxu0  ;;  %v6310_v50 = vld [vmem:[#allocation2 + $0x8f] sm:$0xff] }
 0x4ea   : > { %6255 = vst [vmem:[#allocation2 + $0xa0] sm:$0xff] %v17704_v62  ;;  %v6148_v63 = vmax.f32 %v6094_v47, 0.0  ;;  %v6034_v28 = vmul.f32 %v17496_v46, %v5865_v44  ;;  %v5309_v21 = vadd.f32 %v5096_v17, %v17312_v49  ;;  %v6804_v20 = vpack.c.bf16 %v17704_v62, %v17689_v54  ;;  %v6309_v47 = vld [vmem:[#allocation2 + $0x87] sm:$0xff] }
 0x4eb   : > { %v13615_v1 = vpop.f32.mrf.mxu1  ;;  %v13739_v19 = vpop.f32.mrf.mxu0  ;;  %v6355_v17 = vpack.c.bf16 %v6310_v50, %v6309_v47 }
 0x4ec   : > { %v17714_v18 = vmul.f32 %v6148_v63, %v19702_v55  ;;  %v6095_v58 = vadd.f32 %v17501_v24, %v6034_v28  ;;  %v5866_v48 = vadd.f32 %v5653_v40, %v5309_v21  ;;  %v19704_v63 = vld [vmem:[#allocation57_spill] sm:$0xff] }
 0x4ed   : > { %v5101_v61 = vpop.f32.mrf.mxu1  ;;  %v5658_v3 = vpop.f32.mrf.mxu0  ;;  %13853 = vmatmul.mubr.bf16.gmra.mxu1 %v6354_v32  ;;  %13977 = vmatmul.mubr.bf16.gmra.mxu0 %v6802_v59 }
 0x4ee   : > { %6256 = vst [vmem:[#allocation2 + $0xa8] sm:$0xff] %v17714_v18  ;;  %v6149_v49 = vmax.f32 %v6095_v58, 0.0  ;;  %v6035_v29 = vmul.f32 %v17496_v46, %v5866_v48  ;;  %v5310_v39 = vadd.f32 %v5101_v61, %v17319_v36  ;;  %13856 = vmatprep.mubr.msk.bf16.mxu1 %vm15473_vm0, %v17723_v31  ;;  %13980 = vmatprep.mubr.msk.bf16.mxu0 %vm15473_vm0, %v17723_v31  ;;  %v19705_v61 = vld [vmem:[#allocation58_spill] sm:$0xff] }
 0x4ef   : > { %v13618_v6 = vpop.f32.mrf.mxu1  ;;  %v13742_v52 = vpop.f32.mrf.mxu0 }
 0x4f0   : > { %v17730_v41 = vmul.f32 %v6149_v49, %v19703_v38  ;;  %v6096_v2 = vadd.f32 %v17501_v24, %v6035_v29  ;;  %v5867_v59 = vadd.f32 %v5658_v3, %v5310_v39  ;;  %v6311_v52 = vld [vmem:[#allocation2 + $0x97] sm:$0xff] }
 0x4f1   : > { %v5104_v14 = vpop.f32.mrf.mxu1  ;;  %v5661_v30 = vpop.f32.mrf.mxu0 }
 0x4f2   : > { %6257 = vst [vmem:[#allocation2 + $0xb0] sm:$0xff] %v17730_v41  ;;  %v6150_v36 = vmax.f32 %v6096_v2, 0.0  ;;  %v6036_v7 = vmul.f32 %v17496_v46, %v5867_v59  ;;  %v5311_v57 = vadd.f32 %v5104_v14, %v17322_v43  ;;  %v6805_v40 = vpack.c.bf16 %v17730_v41, %v17714_v18  ;;  %v19706_v14 = vld [vmem:[#allocation61_spill] sm:$0xff] }
 0x4f3   : > { %v13619_v44 = vpop.f32.mrf.mxu1  ;;  %v13743_v13 = vpop.f32.mrf.mxu0 }
 0x4f4   : > { %v17739_v28 = vmul.f32 %v6150_v36, %v19704_v63  ;;  %v6097_v21 = vadd.f32 %v17501_v24, %v6036_v7  ;;  %v5868_v60 = vadd.f32 %v5661_v30, %v5311_v57  ;;  %v15249_v63 = vld [vmem:[#allocation9 + $0xc0] sm:$0xff]  }
 0x4f5   : > { %v5109_v1 = vpop.f32.mrf.mxu1  ;;  %v5666_v19 = vpop.f32.mrf.mxu0  ;;  %13857 = vmatmul.mubr.bf16.gmra.mxu1 %v6355_v17  ;;  %13981 = vmatmul.mubr.bf16.gmra.mxu0 %v6803_v37  ;;  %v6312_v37 = vld [vmem:[#allocation2 + $0x9f] sm:$0xff]  ;;  %v15248_v17 = vld [vmem:[#allocation9 + $0x80] sm:$0xff]  }
 0x4f6   : > { %6258 = vst [vmem:[#allocation2 + $0xb8] sm:$0xff] %v17739_v28  ;;  %v6151_v43 = vmax.f32 %v6097_v21, 0.0  ;;  %v6037_v32 = vmul.f32 %v17496_v46, %v5868_v60  ;;  %v5312_v55 = vadd.f32 %v5109_v1, %v17329_v45  ;;  %13860 = vmatprep.mubr.msk.bf16.mxu1 %vm15473_vm0, %v17723_v31  ;;  %13984 = vmatprep.mubr.msk.bf16.mxu0 %vm15473_vm0, %v17723_v31  ;;  %v19707_v1 = vld [vmem:[#allocation62_spill] sm:$0xff] }
 0x4f7   : > { %v13622_v58 = vpop.f32.mrf.mxu1  ;;  %v13746_v48 = vpop.f32.mrf.mxu0  ;;  %v6356_v59 = vpack.c.bf16 %v6312_v37, %v6311_v52  ;;  %14071 = vmatpush3.bf16.msra.mxu1 %v15248_v17  ;;  %14195 = vmatpush3.bf16.msra.mxu0 %v15249_v63 }
 0x4f8   : > { %v17753_v3 = vmul.f32 %v6151_v43, %v19705_v61  ;;  %v6098_v9 = vadd.f32 %v17501_v24, %v6037_v32  ;;  %v5869_v25 = vadd.f32 %v5666_v19, %v5312_v55  ;;  %14304 = vmatprep.subr.bf16.mxu1 %v17723_v31  ;;  %14428 = vmatprep.subr.bf16.mxu0 %v17723_v31  ;;  %v6313_v48 = vld [vmem:[#allocation2 + $0xa7] sm:$0xff] }
 0x4f9   : > { %v5112_v49 = vpop.f32.mrf.mxu1  ;;  %v5669_v29 = vpop.f32.mrf.mxu0  ;;  %v6314_v19 = vld [vmem:[#allocation2 + $0xaf] sm:$0xff] }
 0x4fa   : > { %6259 = vst [vmem:[#allocation2 + $0xc0] sm:$0xff] %v17753_v3  ;;  %v6152_v45 = vmax.f32 %v6098_v9, 0.0  ;;  %v6038_v39 = vmul.f32 %v17496_v46, %v5869_v25  ;;  %v5313_v6 = vadd.f32 %v5112_v49, %v17334_v0  ;;  %v6806_v50 = vpack.c.bf16 %v17753_v3, %v17739_v28  ;;  %v19708_v49 = vld [vmem:[#allocation65_spill] sm:$0xff] }
 0x4fb   : > { %v13623_v38 = vpop.f32.mrf.mxu1  ;;  %v13747_v2 = vpop.f32.mrf.mxu0  ;;  %v6357_v25 = vpack.c.bf16 %v6314_v19, %v6313_v48 }
 0x4fc   : > { %v17762_v30 = vmul.f32 %v6152_v45, %v19706_v14  ;;  %v6099_v36 = vadd.f32 %v17501_v24, %v6038_v39  ;;  %v5870_v7 = vadd.f32 %v5669_v29, %v5313_v6 }
 0x4fd   : > { %v5117_v57 = vpop.f32.mrf.mxu1  ;;  %v5674_v47 = vpop.f32.mrf.mxu0  ;;  %13861 = vmatmul.mubr.bf16.gmra.mxu1 %v6356_v59  ;;  %13985 = vmatmul.mubr.bf16.gmra.mxu0 %v6804_v20 }
 0x4fe   : > { %6260 = vst [vmem:[#allocation2 + $0xc8] sm:$0xff] %v17762_v30  ;;  %v6153_v0 = vmax.f32 %v6099_v36, 0.0  ;;  %v6039_v44 = vmul.f32 %v17496_v46, %v5870_v7  ;;  %v5314_v13 = vadd.f32 %v5117_v57, %v17341_v27  ;;  %13864 = vmatprep.mubr.msk.bf16.mxu1 %vm15473_vm0, %v17723_v31  ;;  %13988 = vmatprep.mubr.msk.bf16.mxu0 %vm15473_vm0, %v17723_v31  ;;  %v19709_v36 = vld [vmem:[#allocation16_spill] sm:$0xff] }
 0x4ff   : > { %v13626_v21 = vpop.f32.mrf.mxu1  ;;  %v13750_v60 = vpop.f32.mrf.mxu0 }
 0x500   : > { %v17776_v54 = vmul.f32 %v6153_v0, %v19707_v1  ;;  %v6100_v62 = vadd.f32 %v17501_v24, %v6039_v44  ;;  %v5871_v20 = vadd.f32 %v5674_v47, %v5314_v13  ;;  %v6315_v13 = vld [vmem:[#allocation2 + $0xb7] sm:$0xff]  ;;  %v19710_v1 = vld [vmem:[#allocation17_spill] sm:$0xff] }
 0x501   : > { %v5120_v27 = vpop.f32.mrf.mxu1  ;;  %v5677_v43 = vpop.f32.mrf.mxu0 }
 0x502   : > { %6261 = vst [vmem:[#allocation2 + $0xd0] sm:$0xff] %v17776_v54  ;;  %v6154_v32 = vmax.f32 %v6100_v62, 0.0  ;;  %v6040_v55 = vmul.f32 %v17496_v46, %v5871_v20  ;;  %v5315_v58 = vadd.f32 %v5120_v27, %v17344_v4  ;;  %v6807_v37 = vpack.c.bf16 %v17776_v54, %v17762_v30 }
 0x503   : > { %v13627_v61 = vpop.f32.mrf.mxu1  ;;  %v13751_v9 = vpop.f32.mrf.mxu0 }
 0x504   : > { %v17787_v29 = vmul.f32 %v6154_v32, %v19708_v49  ;;  %v6101_v45 = vadd.f32 %v17501_v24, %v6040_v55  ;;  %v5872_v39 = vadd.f32 %v5677_v43, %v5315_v58  ;;  %v19711_v61 = vld [vmem:[#allocation15_spill] sm:$0xff] }
 0x505   : > { %v5125_v6 = vpop.f32.mrf.mxu1  ;;  %v5682_v52 = vpop.f32.mrf.mxu0  ;;  %13865 = vmatmul.mubr.bf16.gmra.mxu1 %v6357_v25  ;;  %13989 = vmatmul.mubr.bf16.gmra.mxu0 %v6805_v40  ;;  %v6316_v40 = vld [vmem:[#allocation2 + $0xbf] sm:$0xff] }
 0x506   : > { %6262 = vst [vmem:[#allocation2 + $0xd8] sm:$0xff] %v17787_v29  ;;  %v6155_v4 = vmax.f32 %v6101_v45, 0.0  ;;  %v6041_v38 = vmul.f32 %v17496_v46, %v5872_v39  ;;  %v5316_v2 = vadd.f32 %v5125_v6, %v17351_v53  ;;  %13868 = vmatprep.mubr.msk.bf16.mxu1 %vm15473_vm0, %v17723_v31  ;;  %13992 = vmatprep.mubr.msk.bf16.mxu0 %vm15473_vm0, %v17723_v31  ;;  %v6317_v6 = vld [vmem:[#allocation2 + $0xc7] sm:$0xff] }
 0x507   : > { %v13630_v59 = vpop.f32.mrf.mxu1  ;;  %v13754_v14 = vpop.f32.mrf.mxu0  ;;  %v6358_v21 = vpack.c.bf16 %v6316_v40, %v6315_v13 }
 0x508   : > { %v17801_v7 = vmul.f32 %v6155_v4, %v19709_v36  ;;  %v6102_v18 = vadd.f32 %v17501_v24, %v6041_v38  ;;  %v5873_v41 = vadd.f32 %v5682_v52, %v5316_v2  ;;  %v19712_v59 = vld [vmem:[#allocation19_spill] sm:$0xff] }
 0x509   : > { %v5128_v57 = vpop.f32.mrf.mxu1  ;;  %v5685_v47 = vpop.f32.mrf.mxu0 }
 0x50a   : > { %6263 = vst [vmem:[#allocation2 + $0xe0] sm:$0xff] %v17801_v7  ;;  %v6156_v53 = vmax.f32 %v6102_v18, 0.0  ;;  %v6042_v0 = vmul.f32 %v17496_v46, %v5873_v41  ;;  %v5317_v44 = vadd.f32 %v5128_v57, %v17354_v16  ;;  %v6808_v60 = vpack.c.bf16 %v17801_v7, %v17787_v29 }
 0x50b   : > { %v13631_v17 = vpop.f32.mrf.mxu1  ;;  %v13755_v63 = vpop.f32.mrf.mxu0 }
 0x50c   : > { %v17810_v62 = vmul.f32 %v6156_v53, %v19710_v1  ;;  %v6103_v20 = vadd.f32 %v17501_v24, %v6042_v0  ;;  %v5874_v19 = vadd.f32 %v5685_v47, %v5317_v44  ;;  %v19713_v44 = vld [vmem:[#allocation20_spill] sm:$0xff] }
 0x50d   : > { %v5133_v27 = vpop.f32.mrf.mxu1  ;;  %v5690_v43 = vpop.f32.mrf.mxu0  ;;  %13869 = vmatmul.mubr.bf16.gmra.mxu1 %v6358_v21  ;;  %13993 = vmatmul.mubr.bf16.gmra.mxu0 %v6806_v50  ;;  %v6318_v50 = vld [vmem:[#allocation2 + $0xcf] sm:$0xff] }
 0x50e   : > { %6264 = vst [vmem:[#allocation2 + $0xe8] sm:$0xff] %v17810_v62  ;;  %v6157_v16 = vmax.f32 %v6103_v20, 0.0  ;;  %v6043_v32 = vmul.f32 %v17496_v46, %v5874_v19  ;;  %v5318_v55 = vadd.f32 %v5133_v27, %v17361_v56  ;;  %13872 = vmatprep.mubr.msk.bf16.mxu1 %vm15473_vm0, %v17723_v31  ;;  %13996 = vmatprep.mubr.msk.bf16.mxu0 %vm15473_vm0, %v17723_v31  ;;  %v6319_v20 = vld [vmem:[#allocation2 + $0xd7] sm:$0xff] }
 0x50f   : > { %v13634_v58 = vpop.f32.mrf.mxu1  ;;  %v13758_v48 = vpop.f32.mrf.mxu0  ;;  %v6359_v38 = vpack.c.bf16 %v6318_v50, %v6317_v6 }
 0x510   : > { %v17824_v9 = vmul.f32 %v6157_v16, %v19711_v61  ;;  %v6104_v28 = vadd.f32 %v17501_v24, %v6043_v32  ;;  %v5875_v3 = vadd.f32 %v5690_v43, %v5318_v55  ;;  %v19714_v32 = vld [vmem:[#allocation23_spill] sm:$0xff] }
 0x511   : > { %v5136_v25 = vpop.f32.mrf.mxu1  ;;  %v5693_v49 = vpop.f32.mrf.mxu0 }
 0x512   : > { %6265 = vst [vmem:[#allocation2 + $0xf0] sm:$0xff] %v17824_v9  ;;  %v6158_v56 = vmax.f32 %v6104_v28, 0.0  ;;  %v6044_v45 = vmul.f32 %v17496_v46, %v5875_v3  ;;  %v5319_v39 = vadd.f32 %v5136_v25, %v17364_v10  ;;  %v6809_v2 = vpack.c.bf16 %v17824_v9, %v17810_v62  ;;  %v17880_v25 = vld [vmem:[%s19467_s7] ss:$0 sm:$0xff] }
 0x513   : > { %v13635_v52 = vpop.f32.mrf.mxu1  ;;  %v13759_v4 = vpop.f32.mrf.mxu0 }
 0x514   : > { %v17833_v14 = vmul.f32 %v6158_v56, %v19712_v59  ;;  %v6105_v36 = vadd.f32 %v17501_v24, %v6044_v45  ;;  %v5876_v18 = vadd.f32 %v5693_v49, %v5319_v39 }
 0x515   : > { %v5141_v41 = vpop.f32.mrf.mxu1  ;;  %v5698_v40 = vpop.f32.mrf.mxu0  ;;  %13873 = vmatmul.mubr.bf16.gmra.mxu1 %v6359_v38  ;;  %13997 = vmatmul.mubr.bf16.gmra.mxu0 %v6807_v37  ;;  %v6320_v37 = vld [vmem:[#allocation2 + $0xdf] sm:$0xff]  ;;  %v6321_v38 = vld [vmem:[#allocation2 + $0xe7] sm:$0xff] }
 0x516   : > { %6266 = vst [vmem:[#allocation2 + $0xf8] sm:$0xff] %v17833_v14  ;;  %v6159_v10 = vmax.f32 %v6105_v36, 0.0  ;;  %v6045_v57 = vmul.f32 %v17496_v46, %v5876_v18  ;;  %v5320_v47 = vadd.f32 %v5141_v41, %v17371_v42  ;;  %13876 = vmatprep.mubr.msk.bf16.mxu1 %vm15473_vm0, %v17723_v31  ;;  %14000 = vmatprep.mubr.msk.bf16.mxu0 %vm15473_vm0, %v17723_v31 }
 0x517   : > { %v13638_v53 = vpop.f32.mrf.mxu1  ;;  %v13762_v0 = vpop.f32.mrf.mxu0  ;;  %v6360_v43 = vpack.c.bf16 %v6320_v37, %v6319_v20 }
 0x518   : > { %v17847_v13 = vmul.f32 %v6159_v10, %v19713_v44  ;;  %v6106_v30 = vadd.f32 %v17501_v24, %v6045_v57  ;;  %v5877_v54 = vadd.f32 %v5698_v40, %v5320_v47  ;;  %v19716_v40 = vld [vmem:[#allocation27_spill] sm:$0xff] }
 0x519   : > { %v5144_v17 = vpop.f32.mrf.mxu1  ;;  %v5701_v63 = vpop.f32.mrf.mxu0 }
 0x51a   : > { %6267 = vst [vmem:[#allocation2 + $0x100] sm:$0xff] %v17847_v13  ;;  %v6160_v42 = vmax.f32 %v6106_v30, 0.0  ;;  %v6046_v21 = vmul.f32 %v17496_v46, %v5877_v54  ;;  %v5321_v1 = vadd.f32 %v5144_v17, %v17374_v51  ;;  %v6810_v16 = vpack.c.bf16 %v17847_v13, %v17833_v14  ;;  %v17866_v46 = vld [vmem:[%s19466_s6] ss:$0 sm:$0xff]  ;;  %v19717_v17 = vld [vmem:[#allocation28_spill] sm:$0xff] }
 0x51b   : > { %v13639_v19 = vpop.f32.mrf.mxu1  ;;  %v13763_v27 = vpop.f32.mrf.mxu0 }
 0x51c   : > { %v17856_v55 = vmul.f32 %v6160_v42, %v19714_v32  ;;  %v6107_v58 = vadd.f32 %v17501_v24, %v6046_v21  ;;  %v5878_v48 = vadd.f32 %v5701_v63, %v5321_v1 }
 0x51d   : > { %v5149_v61 = vpop.f32.mrf.mxu1  ;;  %v5706_v28 = vpop.f32.mrf.mxu0  ;;  %13877 = vmatmul.mubr.bf16.gmra.mxu1 %v6360_v43  ;;  %14001 = vmatmul.mubr.bf16.gmra.mxu0 %v6808_v60  ;;  %v19715_v60 = vld [vmem:[#allocation24_spill] sm:$0xff] }
 0x51e   : > { %6268 = vst [vmem:[#allocation2 + $0x108] sm:$0xff] %v17856_v55  ;;  %v6161_v51 = vmax.f32 %v6107_v58, 0.0  ;;  %v6047_v3 = vmul.f32 %v17866_v46, %v5878_v48  ;;  %v5322_v24 = vadd.f32 %v5149_v61, %v17381_v15  ;;  %13880 = vmatprep.mubr.msk.bf16.mxu1 %vm15473_vm0, %v17723_v31  ;;  %14004 = vmatprep.mubr.msk.bf16.mxu0 %vm15473_vm0, %v17723_v31  ;;  %v6322_v15 = vld [vmem:[#allocation2 + $0xef] sm:$0xff]  ;;  %v6323_v19 = vld [vmem:[#allocation2 + $0xf7] sm:$0xff] }
 0x51f   : > { %v13642_v29 = vpop.f32.mrf.mxu1  ;;  %v13766_v7 = vpop.f32.mrf.mxu0  ;;  %v6361_v18 = vpack.c.bf16 %v6322_v15, %v6321_v38  ;;  %v19718_v48 = vld [vmem:[#allocation31_spill] sm:$0xff] }
 0x520   : > { %v17875_v50 = vmul.f32 %v6161_v51, %v19715_v60  ;;  %v6108_v49 = vadd.f32 %v17880_v25, %v6047_v3  ;;  %v5879_v56 = vadd.f32 %v5706_v28, %v5322_v24 }
 0x521   : > { %v5152_v45 = vpop.f32.mrf.mxu1  ;;  %v5709_v39 = vpop.f32.mrf.mxu0 }
 0x522   : > { %6269 = vst [vmem:[#allocation2 + $0x110] sm:$0xff] %v17875_v50  ;;  %v6162_v6 = vmax.f32 %v6108_v49, 0.0  ;;  %v6048_v52 = vmul.f32 %v17866_v46, %v5879_v56  ;;  %v5323_v4 = vadd.f32 %v5152_v45, %v17384_v23  ;;  %v6811_v41 = vpack.c.bf16 %v17875_v50, %v17856_v55  ;;  %v19719_v56 = vld [vmem:[#allocation32_spill] sm:$0xff] }
 0x523   : > { %v13643_v59 = vpop.f32.mrf.mxu1  ;;  %v13767_v36 = vpop.f32.mrf.mxu0 }
 0x524   : > { %v17889_v10 = vmul.f32 %v6162_v6, %v19716_v40  ;;  %v6109_v57 = vadd.f32 %v17880_v25, %v6048_v52  ;;  %v5880_v47 = vadd.f32 %v5709_v39, %v5323_v4  ;;  %v19720_v40 = vld [vmem:[#allocation35_spill] sm:$0xff] }
 0x525   : > { %v5157_v53 = vpop.f32.mrf.mxu1  ;;  %v5714_v0 = vpop.f32.mrf.mxu0  ;;  %13881 = vmatmul.mubr.bf16.gmra.mxu1 %v6361_v18  ;;  %14005 = vmatmul.mubr.bf16.gmra.mxu0 %v6809_v2  ;;  %v6324_v2 = vld [vmem:[#allocation2 + $0xff] sm:$0xff]  ;;  %v6325_v4 = vld [vmem:[#allocation2 + $0x107] sm:$0xff] }
 0x526   : > { %6270 = vst [vmem:[#allocation2 + $0x118] sm:$0xff] %v17889_v10  ;;  %v6163_v23 = vmax.f32 %v6109_v57, 0.0  ;;  %v6049_v44 = vmul.f32 %v17866_v46, %v5880_v47  ;;  %v5324_v30 = vadd.f32 %v5157_v53, %v17391_v22  ;;  %13884 = vmatprep.mubr.msk.bf16.mxu1 %vm15473_vm0, %v17723_v31  ;;  %14008 = vmatprep.mubr.msk.bf16.mxu0 %vm15473_vm0, %v17723_v31 }
 0x527   : > { %v13646_v54 = vpop.f32.mrf.mxu1  ;;  %v13770_v37 = vpop.f32.mrf.mxu0  ;;  %v6362_v32 = vpack.c.bf16 %v6324_v2, %v6323_v19 }
 0x528   : > { %v17903_v63 = vmul.f32 %v6163_v23, %v19717_v17  ;;  %v6110_v62 = vadd.f32 %v17880_v25, %v6049_v44  ;;  %v5881_v9 = vadd.f32 %v5714_v0, %v5324_v30  ;;  %v19721_v17 = vld [vmem:[#allocation36_spill] sm:$0xff] }
 0x529   : > { %v5160_v42 = vpop.f32.mrf.mxu1  ;;  %v5717_v21 = vpop.f32.mrf.mxu0 }
 0x52a   : > { %6271 = vst [vmem:[#allocation2 + $0x120] sm:$0xff] %v17903_v63  ;;  %v6164_v22 = vmax.f32 %v6110_v62, 0.0  ;;  %v6050_v1 = vmul.f32 %v17866_v46, %v5881_v9  ;;  %v5325_v20 = vadd.f32 %v5160_v42, %v17394_v26  ;;  %v6812_v58 = vpack.c.bf16 %v17903_v63, %v17889_v10 }
 0x52b   : > { %v13647_v27 = vpop.f32.mrf.mxu1  ;;  %v13771_v43 = vpop.f32.mrf.mxu0 }
 0x52c   : > { %v17912_v61 = vmul.f32 %v6164_v22, %v19718_v48  ;;  %v6111_v28 = vadd.f32 %v17880_v25, %v6050_v1  ;;  %v5882_v51 = vadd.f32 %v5717_v21, %v5325_v20  ;;  %v19722_v43 = vld [vmem:[#allocation39_spill] sm:$0xff] }
 0x52d   : > { %v5165_v3 = vpop.f32.mrf.mxu1  ;;  %v5722_v24 = vpop.f32.mrf.mxu0  ;;  %13885 = vmatmul.mubr.bf16.gmra.mxu1 %v6362_v32  ;;  %14009 = vmatmul.mubr.bf16.gmra.mxu0 %v6810_v16  ;;  %v6326_v16 = vld [vmem:[#allocation2 + $0x10f] sm:$0xff]  ;;  %v6327_v22 = vld [vmem:[#allocation2 + $0x117] sm:$0xff] }
 0x52e   : > { %6272 = vst [vmem:[#allocation2 + $0x128] sm:$0xff] %v17912_v61  ;;  %v6165_v26 = vmax.f32 %v6111_v28, 0.0  ;;  %v6051_v29 = vmul.f32 %v17866_v46, %v5882_v51  ;;  %v5326_v7 = vadd.f32 %v5165_v3, %v17401_v12  ;;  %13888 = vmatprep.mubr.msk.bf16.mxu1 %vm15473_vm0, %v17723_v31  ;;  %14012 = vmatprep.mubr.msk.bf16.mxu0 %vm15473_vm0, %v17723_v31 }
 0x52f   : > { %v13650_v60 = vpop.f32.mrf.mxu1  ;;  %v13774_v49 = vpop.f32.mrf.mxu0  ;;  %v6363_v36 = vpack.c.bf16 %v6326_v16, %v6325_v4  ;;  %v19724_v4 = vld [vmem:[#allocation43_spill] sm:$0xff] }
 0x530   : > { %v17926_v15 = vmul.f32 %v6165_v26, %v19719_v56  ;;  %v6112_v14 = vadd.f32 %v17880_v25, %v6051_v29  ;;  %v5883_v13 = vadd.f32 %v5722_v24, %v5326_v7  ;;  %v19723_v60 = vld [vmem:[#allocation40_spill] sm:$0xff] }
 0x531   : > { %v5168_v45 = vpop.f32.mrf.mxu1  ;;  %v5725_v39 = vpop.f32.mrf.mxu0 }
 0x532   : > { %6273 = vst [vmem:[#allocation2 + $0x130] sm:$0xff] %v17926_v15  ;;  %v6166_v12 = vmax.f32 %v6112_v14, 0.0  ;;  %v6052_v6 = vmul.f32 %v17866_v46, %v5883_v13  ;;  %v5327_v52 = vadd.f32 %v5168_v45, %v17404_v8  ;;  %v6813_v18 = vpack.c.bf16 %v17926_v15, %v17912_v61 }
 0x533   : > { %v13651_v38 = vpop.f32.mrf.mxu1  ;;  %v13775_v59 = vpop.f32.mrf.mxu0 }
 0x534   : > { %v17935_v57 = vmul.f32 %v6166_v12, %v19720_v40  ;;  %v6113_v47 = vadd.f32 %v17880_v25, %v6052_v6  ;;  %v5884_v53 = vadd.f32 %v5725_v39, %v5327_v52 }
 0x535   : > { %v5173_v0 = vpop.f32.mrf.mxu1  ;;  %v5730_v23 = vpop.f32.mrf.mxu0  ;;  %13889 = vmatmul.mubr.bf16.gmra.mxu1 %v6363_v36  ;;  %14013 = vmatmul.mubr.bf16.gmra.mxu0 %v6811_v41  ;;  %v6328_v41 = vld [vmem:[#allocation2 + $0x11f] sm:$0xff]  ;;  %v6329_v45 = vld [vmem:[#allocation2 + $0x127] sm:$0xff] }
 0x536   : > { %6274 = vst [vmem:[#allocation2 + $0x138] sm:$0xff] %v17935_v57  ;;  %v6167_v8 = vmax.f32 %v6113_v47, 0.0  ;;  %v6053_v44 = vmul.f32 %v17866_v46, %v5884_v53  ;;  %v5328_v30 = vadd.f32 %v5173_v0, %v17413_v5  ;;  %13892 = vmatprep.mubr.msk.bf16.mxu1 %vm15473_vm0, %v17723_v31  ;;  %14016 = vmatprep.mubr.msk.bf16.mxu0 %vm15473_vm0, %v17723_v31  ;;  %v19725_v0 = vld [vmem:[#allocation78_spill] sm:$0xff] }
 0x537   : > { %v13654_v54 = vpop.f32.mrf.mxu1  ;;  %v13778_v37 = vpop.f32.mrf.mxu0  ;;  %v6364_v19 = vpack.c.bf16 %v6328_v41, %v6327_v22  ;;  %v19727_v41 = vld [vmem:[#allocation79_spill] sm:$0xff] }
 0x538   : > { %v17949_v62 = vmul.f32 %v6167_v8, %v19721_v17  ;;  %v6114_v55 = vadd.f32 %v17880_v25, %v6053_v44  ;;  %v5885_v50 = vadd.f32 %v5730_v23, %v5328_v30  ;;  %v19726_v30 = vld [vmem:[#allocation44_spill] sm:$0xff] }
 0x539   : > { %v5176_v9 = vpop.f32.mrf.mxu1  ;;  %v5733_v2 = vpop.f32.mrf.mxu0 }
 0x53a   : > { %6275 = vst [vmem:[#allocation2 + $0x140] sm:$0xff] %v17949_v62  ;;  %v6168_v5 = vmax.f32 %v6114_v55, 0.0  ;;  %v6054_v42 = vmul.f32 %v17866_v46, %v5885_v50  ;;  %v5329_v21 = vadd.f32 %v5176_v9, %v17416_v35  ;;  %v6814_v27 = vpack.c.bf16 %v17949_v62, %v17935_v57 }
 0x53b   : > { %v13655_v1 = vpop.f32.mrf.mxu1  ;;  %v13779_v20 = vpop.f32.mrf.mxu0 }
 0x53c   : > { %v17958_v32 = vmul.f32 %v6168_v5, %v19722_v43  ;;  %v6115_v48 = vadd.f32 %v17880_v25, %v6054_v42  ;;  %v5886_v28 = vadd.f32 %v5733_v2, %v5329_v21  ;;  %v19728_v1 = vld [vmem:[#allocation47_spill] sm:$0xff] }
 0x53d   : > { %v5181_v51 = vpop.f32.mrf.mxu1  ;;  %v5738_v3 = vpop.f32.mrf.mxu0  ;;  %13893 = vmatmul.mubr.bf16.gmra.mxu1 %v6364_v19  ;;  %14017 = vmatmul.mubr.bf16.gmra.mxu0 %v6812_v58  ;;  %v6330_v58 = vld [vmem:[#allocation2 + $0x12f] sm:$0xff]  ;;  %v6331_v2 = vld [vmem:[#allocation2 + $0x137] sm:$0xff] }
 0x53e   : > { %6276 = vst [vmem:[#allocation2 + $0x148] sm:$0xff] %v17958_v32  ;;  %v6169_v35 = vmax.f32 %v6115_v48, 0.0  ;;  %v6055_v24 = vmul.f32 %v17866_v46, %v5886_v28  ;;  %v5330_v26 = vadd.f32 %v5181_v51, %v17423_v34  ;;  %13896 = vmatprep.mubr.msk.bf16.mxu1 %vm15473_vm0, %v17723_v31  ;;  %14020 = vmatprep.mubr.msk.bf16.mxu0 %vm15473_vm0, %v17723_v31 }
 0x53f   : > { %v13658_v29 = vpop.f32.mrf.mxu1  ;;  %v13782_v7 = vpop.f32.mrf.mxu0  ;;  %v6365_v6 = vpack.c.bf16 %v6330_v58, %v6329_v45 }
 0x540   : > { %v17972_v49 = vmul.f32 %v6169_v35, %v19723_v60  ;;  %v6116_v10 = vadd.f32 %v17880_v25, %v6055_v24  ;;  %v5887_v63 = vadd.f32 %v5738_v3, %v5330_v26  ;;  %v19729_v35 = vld [vmem:[#allocation80_spill] sm:$0xff] }
 0x541   : > { %v5184_v56 = vpop.f32.mrf.mxu1  ;;  %v5741_v14 = vpop.f32.mrf.mxu0  ;;  %v19730_v7 = vld [vmem:[#allocation48_spill] sm:$0xff] }
 0x542   : > { %6277 = vst [vmem:[#allocation2 + $0x150] sm:$0xff] %v17972_v49  ;;  %v6170_v34 = vmax.f32 %v6116_v10, 0.0  ;;  %v6056_v13 = vmul.f32 %v17866_v46, %v5887_v63  ;;  %v5331_v16 = vadd.f32 %v5184_v56, %v17426_v33  ;;  %v6815_v52 = vpack.c.bf16 %v17972_v49, %v17958_v32 }
 0x543   : > { %v13659_v39 = vpop.f32.mrf.mxu1  ;;  %v13783_v12 = vpop.f32.mrf.mxu0 }
 0x544   : > { %v17981_v38 = vmul.f32 %v6170_v34, %v19724_v4  ;;  %v6117_v59 = vadd.f32 %v17880_v25, %v6056_v13  ;;  %v5888_v36 = vadd.f32 %v5741_v14, %v5331_v16  ;;  %v19731_v14 = vld [vmem:[#allocation69_spill] sm:$0xff] }
 0x545   : > { %v5189_v40 = vpop.f32.mrf.mxu1  ;;  %v5746_v47 = vpop.f32.mrf.mxu0  ;;  %13897 = vmatmul.mubr.bf16.gmra.mxu1 %v6365_v6  ;;  %14021 = vmatmul.mubr.bf16.gmra.mxu0 %v6813_v18  ;;  %v6332_v18 = vld [vmem:[#allocation2 + $0x13f] sm:$0xff]  ;;  %v6333_v13 = vld [vmem:[#allocation2 + $0x147] sm:$0xff]  ;;  %v19732_v6 = vld [vmem:[#allocation51_spill] sm:$0xff] }
 0x546   : > { %6278 = vst [vmem:[#allocation2 + $0x158] sm:$0xff] %v17981_v38  ;;  %v6171_v33 = vmax.f32 %v6117_v59, 0.0  ;;  %v6057_v53 = vmul.f32 %v17866_v46, %v5888_v36  ;;  %v5332_v23 = vadd.f32 %v5189_v40, %v19725_v0  ;;  %13900 = vmatprep.mubr.msk.bf16.mxu1 %vm15473_vm0, %v17723_v31  ;;  %14024 = vmatprep.mubr.msk.bf16.mxu0 %vm15473_vm0, %v17723_v31 }
 0x547   : > { %v13662_v8 = vpop.f32.mrf.mxu1  ;;  %v13786_v44 = vpop.f32.mrf.mxu0  ;;  %v6366_v21 = vpack.c.bf16 %v6332_v18, %v6331_v2 }
 0x548   : > { %v17995_v54 = vmul.f32 %v6171_v33, %v19726_v30  ;;  %v6118_v61 = vadd.f32 %v17880_v25, %v6057_v53  ;;  %v5889_v15 = vadd.f32 %v5746_v47, %v5332_v23  ;;  %v19733_v44 = vld [vmem:[#allocation52_spill] sm:$0xff] }
 0x549   : > { %v5192_v37 = vpop.f32.mrf.mxu1  ;;  %v5749_v17 = vpop.f32.mrf.mxu0 }
 0x54a   : > { %6279 = vst [vmem:[#allocation2 + $0x160] sm:$0xff] %v17995_v54  ;;  %v6172_v55 = vmax.f32 %v6118_v61, 0.0  ;;  %v6058_v50 = vmul.f32 %v17866_v46, %v5889_v15  ;;  %v5333_v9 = vadd.f32 %v5192_v37, %v19727_v41  ;;  %v6816_v22 = vpack.c.bf16 %v17995_v54, %v17981_v38  ;;  %v19734_v37 = vld [vmem:[#allocation70_spill] sm:$0xff] }
 0x54b   : > { %v13663_v5 = vpop.f32.mrf.mxu1  ;;  %v13787_v42 = vpop.f32.mrf.mxu0 }
 0x54c   : > { %v18004_v20 = vmul.f32 %v6172_v55, %v19728_v1  ;;  %v6119_v19 = vadd.f32 %v17880_v25, %v6058_v50  ;;  %v5890_v43 = vadd.f32 %v5749_v17, %v5333_v9  ;;  %v19735_v5 = vld [vmem:[#allocation55_spill] sm:$0xff] }
 0x54d   : > { %v5197_v48 = vpop.f32.mrf.mxu1  ;;  %v5754_v28 = vpop.f32.mrf.mxu0  ;;  %13901 = vmatmul.mubr.bf16.gmra.mxu1 %v6366_v21  ;;  %14025 = vmatmul.mubr.bf16.gmra.mxu0 %v6814_v27  ;;  %v6334_v27 = vld [vmem:[#allocation2 + $0x14f] sm:$0xff]  ;;  %v6335_v55 = vld [vmem:[#allocation2 + $0x157] sm:$0xff] }
 0x54e   : > { %6280 = vst [vmem:[#allocation2 + $0x168] sm:$0xff] %v18004_v20  ;;  %v6173_v51 = vmax.f32 %v6119_v19, 0.0  ;;  %v6059_v3 = vmul.f32 %v17866_v46, %v5890_v43  ;;  %v5334_v24 = vadd.f32 %v5197_v48, %v19729_v35  ;;  %13904 = vmatprep.mubr.msk.bf16.mxu1 %vm15473_vm0, %v17723_v31  ;;  %14028 = vmatprep.mubr.msk.bf16.mxu0 %vm15473_vm0, %v17723_v31 }
 0x54f   : > { %v13666_v26 = vpop.f32.mrf.mxu1  ;;  %v13790_v29 = vpop.f32.mrf.mxu0  ;;  %v6367_v39 = vpack.c.bf16 %v6334_v27, %v6333_v13 }
 0x550   : > { %v18018_v60 = vmul.f32 %v6173_v51, %v19730_v7  ;;  %v6120_v57 = vadd.f32 %v17880_v25, %v6059_v3  ;;  %v5891_v62 = vadd.f32 %v5754_v28, %v5334_v24  ;;  %v19736_v51 = vld [vmem:[#allocation71_spill] sm:$0xff]  ;;  %v19737_v26 = vld [vmem:[#allocation56_spill] sm:$0xff] }
 0x551   : > { %v5200_v10 = vpop.f32.mrf.mxu1  ;;  %v5757_v63 = vpop.f32.mrf.mxu0 }
 0x552   : > { %6281 = vst [vmem:[#allocation2 + $0x170] sm:$0xff] %v18018_v60  ;;  %v6174_v58 = vmax.f32 %v6120_v57, 0.0  ;;  %v6060_v56 = vmul.f32 %v17866_v46, %v5891_v62  ;;  %v5335_v34 = vadd.f32 %v5200_v10, %v19731_v14  ;;  %v6817_v12 = vpack.c.bf16 %v18018_v60, %v18004_v20  ;;  %v19738_v10 = vld [vmem:[#allocation72_spill] sm:$0xff] }
 0x553   : > { %v13667_v16 = vpop.f32.mrf.mxu1  ;;  %v13791_v45 = vpop.f32.mrf.mxu0 }
 0x554   : > { %v18027_v4 = vmul.f32 %v6174_v58, %v19732_v6  ;;  %v6121_v59 = vadd.f32 %v17880_v25, %v6060_v56  ;;  %v5892_v36 = vadd.f32 %v5757_v63, %v5335_v34  ;;  %v19739_v16 = vld [vmem:[#allocation59_spill] sm:$0xff] }
 0x555   : > { %v5205_v40 = vpop.f32.mrf.mxu1  ;;  %v5762_v47 = vpop.f32.mrf.mxu0  ;;  %13905 = vmatmul.mubr.bf16.gmra.mxu1 %v6367_v39  ;;  %14029 = vmatmul.mubr.bf16.gmra.mxu0 %v6815_v52  ;;  %v6336_v52 = vld [vmem:[#allocation2 + $0x15f] sm:$0xff]  ;;  %v6337_v58 = vld [vmem:[#allocation2 + $0x167] sm:$0xff] }
 0x556   : > { %6282 = vst [vmem:[#allocation2 + $0x178] sm:$0xff] %v18027_v4  ;;  %v6175_v33 = vmax.f32 %v6121_v59, 0.0  ;;  %v6061_v53 = vmul.f32 %v17866_v46, %v5892_v36  ;;  %v5336_v0 = vadd.f32 %v5205_v40, %v17453_v11  ;;  %13908 = vmatprep.mubr.msk.bf16.mxu1 %vm15473_vm0, %v17723_v31  ;;  %14032 = vmatprep.mubr.msk.bf16.mxu0 %vm15473_vm0, %v17723_v31 }
 0x557   : > { %v13670_v23 = vpop.f32.mrf.mxu1  ;;  %v13794_v8 = vpop.f32.mrf.mxu0  ;;  %v6368_v9 = vpack.c.bf16 %v6336_v52, %v6335_v55 }
 0x558   : > { %v18041_v30 = vmul.f32 %v6175_v33, %v19733_v44  ;;  %v6122_v32 = vadd.f32 %v17880_v25, %v6061_v53  ;;  %v5893_v49 = vadd.f32 %v5762_v47, %v5336_v0  ;;  %v19740_v33 = vld [vmem:[#allocation73_spill] sm:$0xff]  ;;  %v19741_v8 = vld [vmem:[#allocation60_spill] sm:$0xff] }
 0x559   : > { %v5208_v61 = vpop.f32.mrf.mxu1  ;;  %v5765_v15 = vpop.f32.mrf.mxu0 }
 0x55a   : > { %6283 = vst [vmem:[#allocation2 + $0x180] sm:$0xff] %v18041_v30  ;;  %v6176_v11 = vmax.f32 %v6122_v32, 0.0  ;;  %v6062_v18 = vmul.f32 %v17866_v46, %v5893_v49  ;;  %v5337_v17 = vadd.f32 %v5208_v61, %v19734_v37  ;;  %v6818_v2 = vpack.c.bf16 %v18041_v30, %v18027_v4 }
 0x55b   : > { %v13671_v50 = vpop.f32.mrf.mxu1  ;;  %v13795_v41 = vpop.f32.mrf.mxu0 }
 0x55c   : > { %v18050_v42 = vmul.f32 %v6176_v11, %v19735_v5  ;;  %v6123_v21 = vadd.f32 %v17880_v25, %v6062_v18  ;;  %v5894_v1 = vadd.f32 %v5765_v15, %v5337_v17  ;;  %v19742_v15 = vld [vmem:[#allocation81_spill] sm:$0xff]  ;;  %v19743_v41 = vld [vmem:[#allocation63_spill] sm:$0xff] }
 0x55d   : > { %v5213_v19 = vpop.f32.mrf.mxu1  ;;  %v5770_v43 = vpop.f32.mrf.mxu0  ;;  %13909 = vmatmul.mubr.bf16.gmra.mxu1 %v6368_v9  ;;  %14033 = vmatmul.mubr.bf16.gmra.mxu0 %v6816_v22  ;;  %v6338_v22 = vld [vmem:[#allocation2 + $0x16f] sm:$0xff]  ;;  %v6339_v18 = vld [vmem:[#allocation2 + $0x177] sm:$0xff] }
 0x55e   : > { %6284 = vst [vmem:[#allocation2 + $0x188] sm:$0xff] %v18050_v42  ;;  %v6177_v48 = vmax.f32 %v6123_v21, 0.0  ;;  %v6063_v28 = vmul.f32 %v17866_v46, %v5894_v1  ;;  %v5338_v3 = vadd.f32 %v5213_v19, %v19736_v51  ;;  %13912 = vmatprep.mubr.msk.bf16.mxu1 %vm15473_vm0, %v17723_v31  ;;  %14036 = vmatprep.mubr.msk.bf16.mxu0 %vm15473_vm0, %v17723_v31 }
 0x55f   : > { %v13674_v35 = vpop.f32.mrf.mxu1  ;;  %v13798_v24 = vpop.f32.mrf.mxu0  ;;  %v6369_v34 = vpack.c.bf16 %v6338_v22, %v6337_v58 }
 0x560   : > { %v18064_v29 = vmul.f32 %v6177_v48, %v19737_v26  ;;  %v6124_v38 = vadd.f32 %v17880_v25, %v6063_v28  ;;  %v5895_v54 = vadd.f32 %v5770_v43, %v5338_v3  ;;  %v19744_v28 = vld [vmem:[#allocation82_spill] sm:$0xff]  ;;  %v19745_v24 = vld [vmem:[#allocation64_spill] sm:$0xff] }
 0x561   : > { %v5216_v7 = vpop.f32.mrf.mxu1  ;;  %v5773_v57 = vpop.f32.mrf.mxu0 }
 0x562   : > { %6285 = vst [vmem:[#allocation2 + $0x190] sm:$0xff] %v18064_v29  ;;  %v6178_v62 = vmax.f32 %v6124_v38, 0.0  ;;  %v6064_v27 = vmul.f32 %v17866_v46, %v5895_v54  ;;  %v5339_v63 = vadd.f32 %v5216_v7, %v19738_v10  ;;  %v6819_v13 = vpack.c.bf16 %v18064_v29, %v18050_v42 }
 0x563   : > { %v13675_v56 = vpop.f32.mrf.mxu1  ;;  %v13799_v14 = vpop.f32.mrf.mxu0 }
 0x564   : > { %v18073_v45 = vmul.f32 %v6178_v62, %v19739_v16  ;;  %v6125_v39 = vadd.f32 %v17880_v25, %v6064_v27  ;;  %v5896_v6 = vadd.f32 %v5773_v57, %v5339_v63  ;;  %v19746_v57 = vld [vmem:[#allocation83_spill] sm:$0xff]  ;;  %v19747_v56 = vld [vmem:[#allocation66_spill] sm:$0xff] }
 0x565   : > { %v5221_v59 = vpop.f32.mrf.mxu1  ;;  %v5778_v36 = vpop.f32.mrf.mxu0  ;;  %13913 = vmatmul.mubr.bf16.gmra.mxu1 %v6369_v34  ;;  %14037 = vmatmul.mubr.bf16.gmra.mxu0 %v6817_v12  ;;  %v6340_v12 = vld [vmem:[#allocation2 + $0x17f] sm:$0xff]  ;;  %v6341_v27 = vld [vmem:[#allocation2 + $0x187] sm:$0xff] }
 0x566   : > { %6286 = vst [vmem:[#allocation2 + $0x198] sm:$0xff] %v18073_v45  ;;  %v6179_v40 = vmax.f32 %v6125_v39, 0.0  ;;  %v6065_v47 = vmul.f32 %v17866_v46, %v5896_v6  ;;  %v5340_v53 = vadd.f32 %v5221_v59, %v19740_v33  ;;  %13916 = vmatprep.mubr.msk.bf16.mxu1 %vm15473_vm0, %v17723_v31  ;;  %14040 = vmatprep.mubr.msk.bf16.mxu0 %vm15473_vm0, %v17723_v31 }
 0x567   : > { %v13678_v0 = vpop.f32.mrf.mxu1  ;;  %v13802_v23 = vpop.f32.mrf.mxu0  ;;  %v6370_v55 = vpack.c.bf16 %v6340_v12, %v6339_v18 }
 0x568   : > { %v18087_v44 = vmul.f32 %v6179_v40, %v19741_v8  ;;  %v6126_v20 = vadd.f32 %v17880_v25, %v6065_v47  ;;  %v5897_v60 = vadd.f32 %v5778_v36, %v5340_v53  ;;  %v18126_v40 = vld [vmem:[#allocation2] sm:$0xff]  ;;  %v19748_v53 = vld [vmem:[#allocation67_spill] sm:$0xff] }
 0x569   : > { %v5224_v32 = vpop.f32.mrf.mxu1  ;;  %v5781_v49 = vpop.f32.mrf.mxu0 }
 0x56a   : > { %6287 = vst [vmem:[#allocation2 + $0x1a0] sm:$0xff] %v18087_v44  ;;  %v6180_v52 = vmax.f32 %v6126_v20, 0.0  ;;  %v6066_v61 = vmul.f32 %v17866_v46, %v5897_v60  ;;  %v5341_v11 = vadd.f32 %v5224_v32, %v19742_v15  ;;  %v6820_v50 = vpack.c.bf16 %v18087_v44, %v18073_v45  ;;  %v19749_v32 = vld [vmem:[#allocation68_spill] sm:$0xff] }
 0x56b   : > { %v13679_v37 = vpop.f32.mrf.mxu1  ;;  %v13803_v17 = vpop.f32.mrf.mxu0 }
 0x56c   : > { %v18096_v9 = vmul.f32 %v6180_v52, %v19743_v41  ;;  %v6127_v5 = vadd.f32 %v17880_v25, %v6066_v61  ;;  %v5898_v21 = vadd.f32 %v5781_v49, %v5341_v11 }
 0x56d   : > { %v5229_v1 = vpop.f32.mrf.mxu1  ;;  %v5786_v19 = vpop.f32.mrf.mxu0  ;;  %13917 = vmatmul.mubr.bf16.gmra.mxu1 %v6370_v55  ;;  %14041 = vmatmul.mubr.bf16.gmra.mxu0 %v6818_v2  ;;  %v6342_v2 = vld [vmem:[#allocation2 + $0x18f] sm:$0xff]  ;;  %v6343_v44 = vld [vmem:[#allocation2 + $0x197] sm:$0xff] }
 0x56e   : > { %6288 = vst [vmem:[#allocation2 + $0x1a8] sm:$0xff] %v18096_v9  ;;  %v6181_v43 = vmax.f32 %v6127_v5, 0.0  ;;  %v6067_v48 = vmul.f32 %v17866_v46, %v5898_v21  ;;  %v5342_v51 = vadd.f32 %v5229_v1, %v19744_v28  ;;  %13920 = vmatprep.mubr.msk.bf16.mxu1 %vm15473_vm0, %v17723_v31  ;;  %14044 = vmatprep.mubr.msk.bf16.mxu0 %vm15473_vm0, %v17723_v31 }
 0x56f   : > { %v13682_v3 = vpop.f32.mrf.mxu1  ;;  %v13806_v35 = vpop.f32.mrf.mxu0  ;;  %v6371_v63 = vpack.c.bf16 %v6342_v2, %v6341_v27  ;;  %v15250_v2 = vld [vmem:[#allocation9 + $0x138] sm:$0xff]  }
 0x570   : > { %v18110_v26 = vmul.f32 %v6181_v43, %v19745_v24  ;;  %v6128_v4 = vadd.f32 %v17880_v25, %v6067_v48  ;;  %v5899_v30 = vadd.f32 %v5786_v19, %v5342_v51  ;;  %v7298_v43 = vld [vmem:[#allocation2 + $0x9] sm:$0xff]  ;;  %v7299_v48 = vld [vmem:[#allocation2 + $0x11] sm:$0xff] }
 0x571   : > { %v5232_v38 = vpop.f32.mrf.mxu1  ;;  %v5789_v54 = vpop.f32.mrf.mxu0  ;;  %v6344_v29 = vld [vmem:[#allocation2 + $0x19f] sm:$0xff]  ;;  %v7856_v3 = vld [vmem:[#allocation2 + $0x27] sm:$0xff] }
 0x572   : > { %6289 = vst [vmem:[#allocation2 + $0x1b0] sm:$0xff] %v18110_v26  ;;  %v6182_v22 = vmax.f32 %v6128_v4, 0.0  ;;  %v6068_v7 = vmul.f32 %v17866_v46, %v5899_v30  ;;  %v5343_v62 = vadd.f32 %v5232_v38, %v19746_v57  ;;  %v6821_v58 = vpack.c.bf16 %v18110_v26, %v18096_v9  ;;  %v7855_v30 = vld [vmem:[#allocation2 + $0x1f] sm:$0xff]  ;;  %v15251_v38 = vld [vmem:[#allocation9 + $0x178] sm:$0xff]  }
 0x573   : > { %v13683_v31 = vpop.f32.mrf.mxu1  ;;  %v13807_v10 = vpop.f32.mrf.mxu0  ;;  %v6372_v12 = vpack.c.bf16 %v6344_v29, %v6343_v44  ;;  %v7352_v26 = vpack.c.bf16 %v7299_v48, %v7298_v43 }
 0x574   : > { %v6236_v14 = vmul.f32 %v6182_v22, %v19747_v56  ;;  %v6129_v34 = vadd.f32 %v17880_v25, %v6068_v7  ;;  %v5900_v16 = vadd.f32 %v5789_v54, %v5343_v62  ;;  %v7909_v7 = vpack.c.bf16 %v7856_v3, %v7855_v30  ;;  %v15252_v31 = vld [vmem:[#allocation9 + $0x130] sm:$0xff]  }
 0x575   : > { %v6472_v45 = vpop.f32.mrf.mxu1  ;;  %13921 = vmatmul.mubr.bf16.gmra.mxu1 %v6371_v63  ;;  %v6921_v39 = vpop.f32.mrf.mxu0  ;;  %14045 = vmatmul.mubr.bf16.gmra.mxu0 %v6819_v13  ;;  %v6345_v41 = vld [vmem:[#allocation2 + $0x1a7] sm:$0xff] }
 0x576   : > { %6290 = vst [vmem:[#allocation2 + $0x1b8] sm:$0xff] %v6236_v14  ;;  %v6183_v6 = vmax.f32 %v6129_v34, 0.0  ;;  %v6069_v59 = vmul.f32 %v17866_v46, %v5900_v16  ;;  %v18124_v36 = vadd.f32 %v6921_v39, %v6472_v45  ;;  %13924 = vmatprep.mubr.msk.bf16.mxu1 %vm15473_vm0, %v18126_v40  ;;  %14048 = vmatprep.mubr.msk.bf16.mxu0 %vm15473_vm0, %v18126_v40  ;;  %v15253_v10 = vld [vmem:[#allocation9 + $0x170] sm:$0xff]   ;;  %v7858_v14 = vld [vmem:[#allocation2 + $0x37] sm:$0xff] }
 0x577   : > { %v13826_v47 = vpop.f32.mrf.mxu1  ;;  %v13950_v33 = vpop.f32.mrf.mxu0  ;;  %v7301_v56 = vld [vmem:[#allocation2 + $0x21] sm:$0xff]  ;;  %v7300_v39 = vld [vmem:[#allocation2 + $0x19] sm:$0xff] }
 0x578   : > { %v6237_v0 = vmul.f32 %v6183_v6, %v19748_v53  ;;  %v6130_v42 = vadd.f32 %v17880_v25, %v6069_v59  ;;  %v7857_v6 = vld [vmem:[#allocation2 + $0x2f] sm:$0xff]  ;;  %v7353_v33 = vpack.c.bf16 %v7301_v56, %v7300_v39  ;;  %v7305_v3 = vld [vmem:[#allocation2 + $0x41] sm:$0xff] }
 0x579   : > { %v6475_v13 = vpop.f32.mrf.mxu1  ;;  %v6924_v23 = vpop.f32.mrf.mxu0  ;;  %v6346_v18 = vld [vmem:[#allocation2 + $0x1af] sm:$0xff]  ;;  %v7910_v53 = vpack.c.bf16 %v7858_v14, %v7857_v6  ;;  %v7864_v14 = vld [vmem:[#allocation2 + $0x67] sm:$0xff] }
 0x57a   : > { %6291 = vst [vmem:[#allocation2 + $0x1c0] sm:$0xff] %v6237_v0  ;;  %v6184_v46 = vmax.f32 %v6130_v42, 0.0  ;;  %v18134_v8 = vadd.f32 %v6924_v23, %v6475_v13  ;;  %v15254_v0 = vld [vmem:[#allocation9 + $0x128] sm:$0xff]   ;;  %v7306_v6 = vld [vmem:[#allocation2 + $0x49] sm:$0xff] }
 0x57b   : > { %v13827_v20 = vpop.f32.mrf.mxu1  ;;  %v13951_v60 = vpop.f32.mrf.mxu0  ;;  %v15255_v42 = vld [vmem:[#allocation9 + $0x168] sm:$0xff]  }
 0x57c   : > { %v6238_v49 = vmul.f32 %v6184_v46, %v19749_v32  ;;  %v15256_v20 = vld [vmem:[#allocation9 + $0x120] sm:$0xff]   ;;  %v7860_v32 = vld [vmem:[#allocation2 + $0x47] sm:$0xff] }
 0x57d   : > { %v6480_v52 = vpop.f32.mrf.mxu1  ;;  %13925 = vmatmul.mubr.bf16.gmra.mxu1 %v6372_v12  ;;  %v6929_v61 = vpop.f32.mrf.mxu0  ;;  %14049 = vmatmul.mubr.bf16.gmra.mxu0 %v6820_v50  ;;  %v6373_v50 = vpack.c.bf16 %v6346_v18, %v6345_v41  ;;  %v15257_v60 = vld [vmem:[#allocation9 + $0x160] sm:$0xff]  }
 0x57e   : > { %6292 = vst [vmem:[#allocation2 + $0x1c8] sm:$0xff] %v6238_v49  ;;  %v18137_v15 = vadd.f32 %v6929_v61, %v6480_v52  ;;  %13928 = vmatprep.mubr.msk.bf16.mxu1 %vm15473_vm0, %v18126_v40  ;;  %14052 = vmatprep.mubr.msk.bf16.mxu0 %vm15473_vm0, %v18126_v40  ;;  %v7303_v12 = vld [vmem:[#allocation2 + $0x31] sm:$0xff] }
 0x57f   : > { %v13830_v25 = vpop.f32.mrf.mxu1  ;;  %v13954_v11 = vpop.f32.mrf.mxu0  ;;  %v7307_v56 = vld [vmem:[#allocation2 + $0x51] sm:$0xff] }
 0x580   : > { %v7302_v25 = vld [vmem:[#allocation2 + $0x29] sm:$0xff]  ;;  %v7859_v11 = vld [vmem:[#allocation2 + $0x3f] sm:$0xff] }
 0x581   : > { %v6483_v37 = vpop.f32.mrf.mxu1  ;;  %v6932_v17 = vpop.f32.mrf.mxu0  ;;  %v7911_v41 = vpack.c.bf16 %v7860_v32, %v7859_v11  ;;  %v7865_v11 = vld [vmem:[#allocation2 + $0x6f] sm:$0xff] }
 0x582   : > { %v18143_v55 = vadd.f32 %v6932_v17, %v6483_v37  ;;  %v7354_v17 = vpack.c.bf16 %v7303_v12, %v7302_v25  ;;  %v7866_v12 = vld [vmem:[#allocation2 + $0x77] sm:$0xff] }
 0x583   : > { %v13831_v9 = vpop.f32.mrf.mxu1  ;;  %v13955_v5 = vpop.f32.mrf.mxu0  ;;  %v7308_v25 = vld [vmem:[#allocation2 + $0x59] sm:$0xff] }
 0x584   : > { %v15258_v9 = vld [vmem:[#allocation9 + $0x118] sm:$0xff]  }
 0x585   : > { %v6488_v21 = vpop.f32.mrf.mxu1  ;;  %13929 = vmatmul.mubr.bf16.gmra.mxu1 %v6373_v50  ;;  %v6937_v1 = vpop.f32.mrf.mxu0  ;;  %14053 = vmatmul.mubr.bf16.gmra.mxu0 %v6821_v58  ;;  %v15259_v5 = vld [vmem:[#allocation9 + $0x158] sm:$0xff]  }
 0x586   : > { %v18145_v19 = vadd.f32 %v6937_v1, %v6488_v21  ;;  %14072 = vmatprep.mubr.msk.bf16.mxu1 %vm15473_vm0, %v18126_v40  ;;  %14196 = vmatprep.mubr.msk.bf16.mxu0 %vm15473_vm0, %v18126_v40 }
 0x587   : > { %v13834_v28 = vpop.f32.mrf.mxu1  ;;  %v13958_v51 = vpop.f32.mrf.mxu0 }
 0x588   : > { %v15260_v28 = vld [vmem:[#allocation9 + $0x110] sm:$0xff]  }
 0x589   : > { %v6491_v35 = vpop.f32.mrf.mxu1  ;;  %v6940_v24 = vpop.f32.mrf.mxu0  ;;  %v15261_v51 = vld [vmem:[#allocation9 + $0x150] sm:$0xff]  }
 0x58a   : > { %v18151_v4 = vadd.f32 %v6940_v24, %v6491_v35  ;;  %v7862_v35 = vld [vmem:[#allocation2 + $0x57] sm:$0xff] }
 0x58b   : > { %v13835_v54 = vpop.f32.mrf.mxu1  ;;  %v13959_v22 = vpop.f32.mrf.mxu0 }
 0x58d   : > { %v6496_v57 = vpop.f32.mrf.mxu1  ;;  %v6945_v62 = vpop.f32.mrf.mxu0  ;;  %14073 = vmatmul.mubr.bf16.vlgmr.msra.gmra.mxu1 %v7352_v26  ;;  %14197 = vmatmul.mubr.bf16.vlgmr.msra.gmra.mxu0 %v7909_v7 }
 0x58e   : > { %v18153_v27 = vadd.f32 %v6945_v62, %v6496_v57  ;;  %14305 = vmatpush3.bf16.msra.mxu1 %v15250_v2  ;;  %14429 = vmatpush3.bf16.msra.mxu0 %v15251_v38  ;;  %v7304_v2 = vld [vmem:[#allocation2 + $0x39] sm:$0xff]  ;;  %v7861_v38 = vld [vmem:[#allocation2 + $0x4f] sm:$0xff] }
 0x58f   : > { %v13838_v63 = vpop.f32.mrf.mxu1  ;;  %v13962_v58 = vpop.f32.mrf.mxu0  ;;  %14076 = vmatprep.mubr.msk.bf16.mxu1 %vm15473_vm0, %v18126_v40  ;;  %14200 = vmatprep.mubr.msk.bf16.mxu0 %vm15473_vm0, %v18126_v40  ;;  %v7355_v7 = vpack.c.bf16 %v7305_v3, %v7304_v2  ;;  %v7912_v57 = vpack.c.bf16 %v7862_v35, %v7861_v38  ;;  %v7867_v2 = vld [vmem:[#allocation2 + $0x7f] sm:$0xff] }
 0x590   : > { %14306 = vmatprep.subr.bf16.mxu1 %v18126_v40  ;;  %14430 = vmatprep.subr.bf16.mxu0 %v18126_v40 }
 0x591   : > { %v6499_v34 = vpop.f32.mrf.mxu1  ;;  %v6948_v16 = vpop.f32.mrf.mxu0 }
 0x592   : > { %v18161_v45 = vadd.f32 %v6948_v16, %v6499_v34  ;;  %14307 = vmatpush3.bf16.msra.mxu1 %v15252_v31  ;;  %14431 = vmatpush3.bf16.msra.mxu0 %v15253_v10 }
 0x593   : > { %v13839_v59 = vpop.f32.mrf.mxu1  ;;  %v13963_v47 = vpop.f32.mrf.mxu0  ;;  %14308 = vmatprep.subr.bf16.mxu1 %v18126_v40  ;;  %14432 = vmatprep.subr.bf16.mxu0 %v18126_v40 }
 0x594   : > { %v7863_v59 = vld [vmem:[#allocation2 + $0x5f] sm:$0xff] }
 0x595   : > { %v6504_v29 = vpop.f32.mrf.mxu1  ;;  %v6953_v13 = vpop.f32.mrf.mxu0  ;;  %14077 = vmatmul.mubr.bf16.gmra.mxu1 %v7353_v33  ;;  %14201 = vmatmul.mubr.bf16.gmra.mxu0 %v7910_v53  ;;  %v7356_v53 = vpack.c.bf16 %v7307_v56, %v7306_v6  ;;  %v7313_v56 = vld [vmem:[#allocation2 + $0x81] sm:$0xff] }
 0x596   : > { %v18165_v23 = vadd.f32 %v6953_v13, %v6504_v29  ;;  %14080 = vmatprep.mubr.msk.bf16.mxu1 %vm15473_vm0, %v18126_v40  ;;  %14204 = vmatprep.mubr.msk.bf16.mxu0 %vm15473_vm0, %v18126_v40 }
 0x597   : > { %v13842_v46 = vpop.f32.mrf.mxu1  ;;  %v13966_v44 = vpop.f32.mrf.mxu0  ;;  %14309 = vmatpush3.bf16.msra.mxu1 %v15254_v0  ;;  %14433 = vmatpush3.bf16.msra.mxu0 %v15255_v42  ;;  %v7913_v0 = vpack.c.bf16 %v7864_v14, %v7863_v59  ;;  %v7870_v14 = vld [vmem:[#allocation2 + $0x97] sm:$0xff] }
 0x598   : > { %14310 = vmatprep.subr.bf16.mxu1 %v18126_v40  ;;  %14434 = vmatprep.subr.bf16.mxu0 %v18126_v40  ;;  %v7312_v59 = vld [vmem:[#allocation2 + $0x79] sm:$0xff] }
 0x599   : > { %v6507_v49 = vpop.f32.mrf.mxu1  ;;  %v6956_v52 = vpop.f32.mrf.mxu0 }
 0x59a   : > { %v18173_v61 = vadd.f32 %v6956_v52, %v6507_v49 }
 0x59b   : > { %v13843_v18 = vpop.f32.mrf.mxu1  ;;  %v13967_v37 = vpop.f32.mrf.mxu0  ;;  %14311 = vmatpush3.bf16.msra.mxu1 %v15256_v20  ;;  %14435 = vmatpush3.bf16.msra.mxu0 %v15257_v60  ;;  %v15262_v20 = vld [vmem:[#allocation9 + $0x108] sm:$0xff]   ;;  %v7309_v60 = vld [vmem:[#allocation2 + $0x61] sm:$0xff] }
 0x59c   : > { %14312 = vmatprep.subr.bf16.mxu1 %v18126_v40  ;;  %14436 = vmatprep.subr.bf16.mxu0 %v18126_v40  ;;  %v15263_v18 = vld [vmem:[#allocation9 + $0x148] sm:$0xff]  }
 0x59d   : > { %v6512_v50 = vpop.f32.mrf.mxu1  ;;  %v6961_v21 = vpop.f32.mrf.mxu0  ;;  %14081 = vmatmul.mubr.bf16.gmra.mxu1 %v7354_v17  ;;  %14205 = vmatmul.mubr.bf16.gmra.mxu0 %v7911_v41  ;;  %v7357_v41 = vpack.c.bf16 %v7309_v60, %v7308_v25 }
 0x59e   : > { %v18177_v1 = vadd.f32 %v6961_v21, %v6512_v50  ;;  %14084 = vmatprep.mubr.msk.bf16.mxu1 %vm15473_vm0, %v18126_v40  ;;  %14208 = vmatprep.mubr.msk.bf16.mxu0 %vm15473_vm0, %v18126_v40 }
 0x59f   : > { %v13846_v43 = vpop.f32.mrf.mxu1  ;;  %v13970_v48 = vpop.f32.mrf.mxu0  ;;  %14313 = vmatpush3.bf16.msra.mxu1 %v15258_v9  ;;  %14437 = vmatpush3.bf16.msra.mxu0 %v15259_v5  ;;  %v7914_v9 = vpack.c.bf16 %v7866_v12, %v7865_v11  ;;  %v7315_v12 = vld [vmem:[#allocation2 + $0x91] sm:$0xff] }
 0x5a0   : > { %14314 = vmatprep.subr.bf16.mxu1 %v18126_v40  ;;  %14438 = vmatprep.subr.bf16.mxu0 %v18126_v40 }
 0x5a1   : > { %v6515_v24 = vpop.f32.mrf.mxu1  ;;  %v6964_v26 = vpop.f32.mrf.mxu0 }
 0x5a2   : > { %v18185_v30 = vadd.f32 %v6964_v26, %v6515_v24  ;;  %v7310_v26 = vld [vmem:[#allocation2 + $0x69] sm:$0xff] }
 0x5a3   : > { %v13847_v54 = vpop.f32.mrf.mxu1  ;;  %v13971_v22 = vpop.f32.mrf.mxu0  ;;  %14315 = vmatpush3.bf16.msra.mxu1 %v15260_v28  ;;  %14439 = vmatpush3.bf16.msra.mxu0 %v15261_v51  ;;  %v7311_v28 = vld [vmem:[#allocation2 + $0x71] sm:$0xff]  ;;  %v7868_v51 = vld [vmem:[#allocation2 + $0x87] sm:$0xff] }
 0x5a4   : > { %14316 = vmatprep.subr.bf16.mxu1 %v18126_v40  ;;  %14440 = vmatprep.subr.bf16.mxu0 %v18126_v40  ;;  %v7358_v22 = vpack.c.bf16 %v7311_v28, %v7310_v26  ;;  %v7317_v26 = vld [vmem:[#allocation2 + $0xa1] sm:$0xff] }
 0x5a5   : > { %v6520_v62 = vpop.f32.mrf.mxu1  ;;  %v6969_v31 = vpop.f32.mrf.mxu0  ;;  %14085 = vmatmul.mubr.bf16.gmra.mxu1 %v7355_v7  ;;  %14209 = vmatmul.mubr.bf16.gmra.mxu0 %v7912_v57  ;;  %v7915_v7 = vpack.c.bf16 %v7868_v51, %v7867_v2  ;;  %v7874_v2 = vld [vmem:[#allocation2 + $0xb7] sm:$0xff] }
 0x5a6   : > { %v18189_v10 = vadd.f32 %v6969_v31, %v6520_v62  ;;  %14088 = vmatprep.mubr.msk.bf16.mxu1 %vm15473_vm0, %v18126_v40  ;;  %14212 = vmatprep.mubr.msk.bf16.mxu0 %vm15473_vm0, %v18126_v40 }
 0x5a7   : > { %v13850_v63 = vpop.f32.mrf.mxu1  ;;  %v13974_v58 = vpop.f32.mrf.mxu0  ;;  %14317 = vmatpush3.bf16.msra.mxu1 %v15262_v20  ;;  %14441 = vmatpush3.bf16.msra.mxu0 %v15263_v18  ;;  %v7314_v18 = vld [vmem:[#allocation2 + $0x89] sm:$0xff] }
 0x5a8   : > { %14318 = vmatprep.subr.bf16.mxu1 %v18126_v40  ;;  %14442 = vmatprep.subr.bf16.mxu0 %v18126_v40 }
 0x5a9   : > { %v6523_v34 = vpop.f32.mrf.mxu1  ;;  %v6972_v16 = vpop.f32.mrf.mxu0 }
 0x5aa   : > { %v18195_v39 = vadd.f32 %v6972_v16, %v6523_v34 }
 0x5ab   : > { %v13851_v47 = vpop.f32.mrf.mxu1  ;;  %v13975_v33 = vpop.f32.mrf.mxu0 }
 0x5ac   : > { %v7869_v47 = vld [vmem:[#allocation2 + $0x8f] sm:$0xff] }
 0x5ad   : > { %v6528_v42 = vpop.f32.mrf.mxu1  ;;  %v6977_v29 = vpop.f32.mrf.mxu0  ;;  %14089 = vmatmul.mubr.bf16.gmra.mxu1 %v7356_v53  ;;  %14213 = vmatmul.mubr.bf16.gmra.mxu0 %v7913_v0  ;;  %v7359_v0 = vpack.c.bf16 %v7313_v56, %v7312_v59 }
 0x5ae   : > { %v18197_v13 = vadd.f32 %v6977_v29, %v6528_v42  ;;  %14092 = vmatprep.mubr.msk.bf16.mxu1 %vm15473_vm0, %v18126_v40  ;;  %14216 = vmatprep.mubr.msk.bf16.mxu0 %vm15473_vm0, %v18126_v40  ;;  %v7916_v42 = vpack.c.bf16 %v7870_v14, %v7869_v47 }
 0x5af   : > { %v13854_v46 = vpop.f32.mrf.mxu1  ;;  %v13978_v44 = vpop.f32.mrf.mxu0 }
 0x5b1   : > { %v6531_v32 = vpop.f32.mrf.mxu1  ;;  %v6980_v49 = vpop.f32.mrf.mxu0 }
 0x5b2   : > { %v18203_v52 = vadd.f32 %v6980_v49, %v6531_v32  ;;  %v7872_v32 = vld [vmem:[#allocation2 + $0xa7] sm:$0xff] }
 0x5b3   : > { %v13855_v37 = vpop.f32.mrf.mxu1  ;;  %v13979_v17 = vpop.f32.mrf.mxu0 }
 0x5b4   : > { %v7871_v37 = vld [vmem:[#allocation2 + $0x9f] sm:$0xff]  ;;  %v15264_v17 = vld [vmem:[#allocation9 + $0x100] sm:$0xff]  }
 0x5b5   : > { %v6536_v5 = vpop.f32.mrf.mxu1  ;;  %v6985_v50 = vpop.f32.mrf.mxu0  ;;  %14093 = vmatmul.mubr.bf16.gmra.mxu1 %v7357_v41  ;;  %14217 = vmatmul.mubr.bf16.gmra.mxu0 %v7914_v9 }
 0x5b6   : > { %v18206_v21 = vadd.f32 %v6985_v50, %v6536_v5  ;;  %14096 = vmatprep.mubr.msk.bf16.mxu1 %vm15473_vm0, %v18126_v40  ;;  %14220 = vmatprep.mubr.msk.bf16.mxu0 %vm15473_vm0, %v18126_v40  ;;  %v7360_v5 = vpack.c.bf16 %v7315_v12, %v7314_v18  ;;  %v7917_v50 = vpack.c.bf16 %v7872_v32, %v7871_v37 }
 0x5b7   : > { %v13858_v43 = vpop.f32.mrf.mxu1  ;;  %v13982_v48 = vpop.f32.mrf.mxu0  ;;  %14319 = vmatpush3.bf16.msra.mxu1 %v15264_v17 }
 0x5b8   : > { %v15265_v43 = vld [vmem:[#allocation9 + $0x140] sm:$0xff]   ;;  %14552 = vmatprep.subr.bf16.mxu1 %v18126_v40 }
 0x5b9   : > { %v6539_v3 = vpop.f32.mrf.mxu1  ;;  %v6988_v35 = vpop.f32.mrf.mxu0  ;;  %14443 = vmatpush3.bf16.msra.mxu0 %v15265_v43 }
 0x5ba   : > { %v18213_v24 = vadd.f32 %v6988_v35, %v6539_v3  ;;  %14676 = vmatprep.subr.bf16.mxu0 %v18126_v40 }
 0x5bb   : > { %v13859_v38 = vpop.f32.mrf.mxu1  ;;  %v13983_v54 = vpop.f32.mrf.mxu0 }
 0x5bd   : > { %v6544_v57 = vpop.f32.mrf.mxu1  ;;  %v6993_v62 = vpop.f32.mrf.mxu0  ;;  %14097 = vmatmul.mubr.bf16.gmra.mxu1 %v7358_v22  ;;  %14221 = vmatmul.mubr.bf16.gmra.mxu0 %v7915_v7  ;;  %v7316_v7 = vld [vmem:[#allocation2 + $0x99] sm:$0xff] }
 0x5be   : > { %v18215_v31 = vadd.f32 %v6993_v62, %v6544_v57  ;;  %14100 = vmatprep.mubr.msk.bf16.mxu1 %vm15473_vm0, %v18126_v40  ;;  %14224 = vmatprep.mubr.msk.bf16.mxu0 %vm15473_vm0, %v18126_v40  ;;  %v7873_v57 = vld [vmem:[#allocation2 + $0xaf] sm:$0xff] }
 0x5bf   : > { %v13862_v63 = vpop.f32.mrf.mxu1  ;;  %v13986_v58 = vpop.f32.mrf.mxu0  ;;  %v7918_v56 = vpack.c.bf16 %v7874_v2, %v7873_v57 }
 0x5c0   : > { %v7361_v58 = vpack.c.bf16 %v7317_v26, %v7316_v7 }
 0x5c1   : > { %v6547_v34 = vpop.f32.mrf.mxu1  ;;  %v6996_v16 = vpop.f32.mrf.mxu0 }
 0x5c2   : > { %v18221_v6 = vadd.f32 %v6996_v16, %v6547_v34 }
 0x5c3   : > { %v13863_v33 = vpop.f32.mrf.mxu1  ;;  %v13987_v53 = vpop.f32.mrf.mxu0 }
 0x5c4   : > { %v7319_v33 = vld [vmem:[#allocation2 + $0xb1] sm:$0xff]  ;;  %v7876_v53 = vld [vmem:[#allocation2 + $0xc7] sm:$0xff] }
 0x5c5   : > { %v6552_v29 = vpop.f32.mrf.mxu1  ;;  %v7001_v46 = vpop.f32.mrf.mxu0  ;;  %14101 = vmatmul.mubr.bf16.gmra.mxu1 %v7359_v0  ;;  %14225 = vmatmul.mubr.bf16.gmra.mxu0 %v7916_v42 }
 0x5c6   : > { %v18223_v44 = vadd.f32 %v7001_v46, %v6552_v29  ;;  %14104 = vmatprep.mubr.msk.bf16.mxu1 %vm15473_vm0, %v18126_v40  ;;  %14228 = vmatprep.mubr.msk.bf16.mxu0 %vm15473_vm0, %v18126_v40  ;;  %v7318_v46 = vld [vmem:[#allocation2 + $0xa9] sm:$0xff] }
 0x5c7   : > { %v13866_v20 = vpop.f32.mrf.mxu1  ;;  %v13990_v60 = vpop.f32.mrf.mxu0  ;;  %v7362_v32 = vpack.c.bf16 %v7319_v33, %v7318_v46  ;;  %v7879_v33 = vld [vmem:[#allocation2 + $0xdf] sm:$0xff] }
 0x5c8   : > { %v7875_v20 = vld [vmem:[#allocation2 + $0xbf] sm:$0xff] }
 0x5c9   : > { %v6555_v49 = vpop.f32.mrf.mxu1  ;;  %v7004_v25 = vpop.f32.mrf.mxu0 }
 0x5ca   : > { %v18229_v11 = vadd.f32 %v7004_v25, %v6555_v49  ;;  %v7919_v49 = vpack.c.bf16 %v7876_v53, %v7875_v20 }
 0x5cb   : > { %v13867_v41 = vpop.f32.mrf.mxu1  ;;  %v13991_v9 = vpop.f32.mrf.mxu0 }
 0x5cc   : > { %v7321_v9 = vld [vmem:[#allocation2 + $0xc1] sm:$0xff] }
 0x5cd   : > { %v6560_v48 = vpop.f32.mrf.mxu1  ;;  %v7009_v28 = vpop.f32.mrf.mxu0  ;;  %14105 = vmatmul.mubr.bf16.gmra.mxu1 %v7360_v5  ;;  %14229 = vmatmul.mubr.bf16.gmra.mxu0 %v7917_v50  ;;  %v7878_v5 = vld [vmem:[#allocation2 + $0xd7] sm:$0xff] }
 0x5ce   : > { %v18231_v51 = vadd.f32 %v7009_v28, %v6560_v48  ;;  %14108 = vmatprep.mubr.msk.bf16.mxu1 %vm15473_vm0, %v18126_v40  ;;  %14232 = vmatprep.mubr.msk.bf16.mxu0 %vm15473_vm0, %v18126_v40  ;;  %v7320_v28 = vld [vmem:[#allocation2 + $0xb9] sm:$0xff] }
 0x5cf   : > { %v13870_v3 = vpop.f32.mrf.mxu1  ;;  %v13994_v35 = vpop.f32.mrf.mxu0  ;;  %v7363_v2 = vpack.c.bf16 %v7321_v9, %v7320_v28 }
 0x5d0   : > { %v7877_v3 = vld [vmem:[#allocation2 + $0xcf] sm:$0xff] }
 0x5d1   : > { %v6563_v38 = vpop.f32.mrf.mxu1  ;;  %v7012_v54 = vpop.f32.mrf.mxu0 }
 0x5d2   : > { %v18239_v22 = vadd.f32 %v7012_v54, %v6563_v38  ;;  %v7920_v38 = vpack.c.bf16 %v7878_v5, %v7877_v3  ;;  %v7324_v5 = vld [vmem:[#allocation2 + $0xd9] sm:$0xff] }
 0x5d3   : > { %v13871_v62 = vpop.f32.mrf.mxu1  ;;  %v13995_v63 = vpop.f32.mrf.mxu0 }
 0x5d5   : > { %v6568_v14 = vpop.f32.mrf.mxu1  ;;  %v7017_v34 = vpop.f32.mrf.mxu0  ;;  %14109 = vmatmul.mubr.bf16.gmra.mxu1 %v7361_v58  ;;  %14233 = vmatmul.mubr.bf16.gmra.mxu0 %v7918_v56  ;;  %v7323_v58 = vld [vmem:[#allocation2 + $0xd1] sm:$0xff]  ;;  %v7880_v56 = vld [vmem:[#allocation2 + $0xe7] sm:$0xff] }
 0x5d6   : > { %v18241_v16 = vadd.f32 %v7017_v34, %v6568_v14  ;;  %14112 = vmatprep.mubr.msk.bf16.mxu1 %vm15473_vm0, %v18126_v40  ;;  %14236 = vmatprep.mubr.msk.bf16.mxu0 %vm15473_vm0, %v18126_v40  ;;  %v7921_v46 = vpack.c.bf16 %v7880_v56, %v7879_v33 }
 0x5d7   : > { %v13874_v59 = vpop.f32.mrf.mxu1  ;;  %v13998_v47 = vpop.f32.mrf.mxu0 }
 0x5d8   : > { %v7322_v47 = vld [vmem:[#allocation2 + $0xc9] sm:$0xff] }
 0x5d9   : > { %v6571_v0 = vpop.f32.mrf.mxu1  ;;  %v7020_v42 = vpop.f32.mrf.mxu0 }
 0x5da   : > { %v18247_v29 = vadd.f32 %v7020_v42, %v6571_v0  ;;  %v7364_v42 = vpack.c.bf16 %v7323_v58, %v7322_v47  ;;  %v7883_v47 = vld [vmem:[#allocation2 + $0xff] sm:$0xff] }
 0x5db   : > { %v13875_v60 = vpop.f32.mrf.mxu1  ;;  %v13999_v12 = vpop.f32.mrf.mxu0 }
 0x5dd   : > { %v6576_v25 = vpop.f32.mrf.mxu1  ;;  %v7025_v18 = vpop.f32.mrf.mxu0  ;;  %14113 = vmatmul.mubr.bf16.gmra.mxu1 %v7362_v32  ;;  %14237 = vmatmul.mubr.bf16.gmra.mxu0 %v7919_v49 }
 0x5de   : > { %v18249_v37 = vadd.f32 %v7025_v18, %v6576_v25  ;;  %14116 = vmatprep.mubr.msk.bf16.mxu1 %vm15473_vm0, %v18126_v40  ;;  %14240 = vmatprep.mubr.msk.bf16.mxu0 %vm15473_vm0, %v18126_v40  ;;  %v7325_v25 = vld [vmem:[#allocation2 + $0xe1] sm:$0xff]  ;;  %v7882_v18 = vld [vmem:[#allocation2 + $0xf7] sm:$0xff] }
 0x5df   : > { %v13878_v17 = vpop.f32.mrf.mxu1  ;;  %v14002_v41 = vpop.f32.mrf.mxu0  ;;  %v7365_v3 = vpack.c.bf16 %v7325_v25, %v7324_v5  ;;  %v7329_v25 = vld [vmem:[#allocation2 + $0x101] sm:$0xff] }
 0x5e1   : > { %v6579_v50 = vpop.f32.mrf.mxu1  ;;  %v7028_v43 = vpop.f32.mrf.mxu0 }
 0x5e2   : > { %v18255_v48 = vadd.f32 %v7028_v43, %v6579_v50  ;;  %v7881_v50 = vld [vmem:[#allocation2 + $0xef] sm:$0xff] }
 0x5e3   : > { %v13879_v35 = vpop.f32.mrf.mxu1  ;;  %v14003_v26 = vpop.f32.mrf.mxu0 }
 0x5e4   : > { %v7922_v35 = vpack.c.bf16 %v7882_v18, %v7881_v50  ;;  %v7886_v18 = vld [vmem:[#allocation2 + $0x117] sm:$0xff] }
 0x5e5   : > { %v6584_v54 = vpop.f32.mrf.mxu1  ;;  %v7033_v7 = vpop.f32.mrf.mxu0  ;;  %14117 = vmatmul.mubr.bf16.gmra.mxu1 %v7363_v2  ;;  %14241 = vmatmul.mubr.bf16.gmra.mxu0 %v7920_v38  ;;  %v7328_v50 = vld [vmem:[#allocation2 + $0xf9] sm:$0xff] }
 0x5e6   : > { %v18257_v57 = vadd.f32 %v7033_v7, %v6584_v54  ;;  %14120 = vmatprep.mubr.msk.bf16.mxu1 %vm15473_vm0, %v18126_v40  ;;  %14244 = vmatprep.mubr.msk.bf16.mxu0 %vm15473_vm0, %v18126_v40 }
 0x5e7   : > { %v13882_v62 = vpop.f32.mrf.mxu1  ;;  %v14006_v63 = vpop.f32.mrf.mxu0 }
 0x5e8   : > { %v7327_v62 = vld [vmem:[#allocation2 + $0xf1] sm:$0xff]  ;;  %v7884_v63 = vld [vmem:[#allocation2 + $0x107] sm:$0xff] }
 0x5e9   : > { %v6587_v14 = vpop.f32.mrf.mxu1  ;;  %v7036_v34 = vpop.f32.mrf.mxu0 }
 0x5ea   : > { %v18263_v59 = vadd.f32 %v7036_v34, %v6587_v14  ;;  %v7326_v34 = vld [vmem:[#allocation2 + $0xe9] sm:$0xff] }
 0x5eb   : > { %v13883_v53 = vpop.f32.mrf.mxu1  ;;  %v14007_v0 = vpop.f32.mrf.mxu0 }
 0x5ec   : > { %v7366_v0 = vpack.c.bf16 %v7327_v62, %v7326_v34 }
 0x5ed   : > { %v6592_v20 = vpop.f32.mrf.mxu1  ;;  %v7041_v60 = vpop.f32.mrf.mxu0  ;;  %14121 = vmatmul.mubr.bf16.gmra.mxu1 %v7364_v42  ;;  %14245 = vmatmul.mubr.bf16.gmra.mxu0 %v7921_v46  ;;  %v7923_v42 = vpack.c.bf16 %v7884_v63, %v7883_v47 }
 0x5ee   : > { %v18265_v12 = vadd.f32 %v7041_v60, %v6592_v20  ;;  %14124 = vmatprep.mubr.msk.bf16.mxu1 %vm15473_vm0, %v18126_v40  ;;  %14248 = vmatprep.mubr.msk.bf16.mxu0 %vm15473_vm0, %v18126_v40 }
 0x5ef   : > { %v13886_v32 = vpop.f32.mrf.mxu1  ;;  %v14010_v49 = vpop.f32.mrf.mxu0 }
 0x5f1   : > { %v6595_v17 = vpop.f32.mrf.mxu1  ;;  %v7044_v41 = vpop.f32.mrf.mxu0 }
 0x5f2   : > { %v18271_v9 = vadd.f32 %v7044_v41, %v6595_v17 }
 0x5f3   : > { %v13887_v43 = vpop.f32.mrf.mxu1  ;;  %v14011_v28 = vpop.f32.mrf.mxu0 }
 0x5f4   : > { %v7885_v43 = vld [vmem:[#allocation2 + $0x10f] sm:$0xff] }
 0x5f5   : > { %v6600_v26 = vpop.f32.mrf.mxu1  ;;  %v7049_v2 = vpop.f32.mrf.mxu0  ;;  %14125 = vmatmul.mubr.bf16.gmra.mxu1 %v7365_v3  ;;  %14249 = vmatmul.mubr.bf16.gmra.mxu0 %v7922_v35  ;;  %v7367_v35 = vpack.c.bf16 %v7329_v25, %v7328_v50  ;;  %v7333_v50 = vld [vmem:[#allocation2 + $0x121] sm:$0xff] }
 0x5f6   : > { %v18273_v38 = vadd.f32 %v7049_v2, %v6600_v26  ;;  %14128 = vmatprep.mubr.msk.bf16.mxu1 %vm15473_vm0, %v18126_v40  ;;  %14252 = vmatprep.mubr.msk.bf16.mxu0 %vm15473_vm0, %v18126_v40  ;;  %v7924_v26 = vpack.c.bf16 %v7886_v18, %v7885_v43  ;;  %v7890_v43 = vld [vmem:[#allocation2 + $0x137] sm:$0xff] }
 0x5f7   : > { %v13890_v54 = vpop.f32.mrf.mxu1  ;;  %v14014_v7 = vpop.f32.mrf.mxu0 }
 0x5f9   : > { %v6603_v58 = vpop.f32.mrf.mxu1  ;;  %v7052_v56 = vpop.f32.mrf.mxu0 }
 0x5fa   : > { %v18279_v14 = vadd.f32 %v7052_v56, %v6603_v58  ;;  %v7331_v58 = vld [vmem:[#allocation2 + $0x111] sm:$0xff]  ;;  %v7888_v56 = vld [vmem:[#allocation2 + $0x127] sm:$0xff] }
 0x5fb   : > { %v13891_v33 = vpop.f32.mrf.mxu1  ;;  %v14015_v53 = vpop.f32.mrf.mxu0 }
 0x5fc   : > { %v7330_v53 = vld [vmem:[#allocation2 + $0x109] sm:$0xff] }
 0x5fd   : > { %v6608_v46 = vpop.f32.mrf.mxu1  ;;  %v7057_v20 = vpop.f32.mrf.mxu0  ;;  %14129 = vmatmul.mubr.bf16.gmra.mxu1 %v7366_v0  ;;  %14253 = vmatmul.mubr.bf16.gmra.mxu0 %v7923_v42  ;;  %v7887_v0 = vld [vmem:[#allocation2 + $0x11f] sm:$0xff] }
 0x5fe   : > { %v18281_v60 = vadd.f32 %v7057_v20, %v6608_v46  ;;  %14132 = vmatprep.mubr.msk.bf16.mxu1 %vm15473_vm0, %v18126_v40  ;;  %14256 = vmatprep.mubr.msk.bf16.mxu0 %vm15473_vm0, %v18126_v40  ;;  %v7368_v20 = vpack.c.bf16 %v7331_v58, %v7330_v53 }
 0x5ff   : > { %v13894_v32 = vpop.f32.mrf.mxu1  ;;  %v14018_v49 = vpop.f32.mrf.mxu0 }
 0x600   : > { %v7925_v32 = vpack.c.bf16 %v7888_v56, %v7887_v0 }
 0x601   : > { %v6611_v17 = vpop.f32.mrf.mxu1  ;;  %v7060_v41 = vpop.f32.mrf.mxu0 }
 0x602   : > { %v18287_v5 = vadd.f32 %v7060_v41, %v6611_v17 }
 0x603   : > { %v13895_v28 = vpop.f32.mrf.mxu1  ;;  %v14019_v3 = vpop.f32.mrf.mxu0 }
 0x605   : > { %v6616_v2 = vpop.f32.mrf.mxu1  ;;  %v7065_v54 = vpop.f32.mrf.mxu0  ;;  %14133 = vmatmul.mubr.bf16.gmra.mxu1 %v7367_v35  ;;  %14257 = vmatmul.mubr.bf16.gmra.mxu0 %v7924_v26  ;;  %v7332_v26 = vld [vmem:[#allocation2 + $0x119] sm:$0xff] }
 0x606   : > { %v18289_v7 = vadd.f32 %v7065_v54, %v6616_v2  ;;  %14136 = vmatprep.mubr.msk.bf16.mxu1 %vm15473_vm0, %v18126_v40  ;;  %14260 = vmatprep.mubr.msk.bf16.mxu0 %vm15473_vm0, %v18126_v40  ;;  %v7889_v2 = vld [vmem:[#allocation2 + $0x12f] sm:$0xff] }
 0x607   : > { %v13898_v62 = vpop.f32.mrf.mxu1  ;;  %v14022_v63 = vpop.f32.mrf.mxu0  ;;  %v7926_v58 = vpack.c.bf16 %v7890_v43, %v7889_v2 }
 0x608   : > { %v7369_v63 = vpack.c.bf16 %v7333_v50, %v7332_v26 }
 0x609   : > { %v6619_v34 = vpop.f32.mrf.mxu1  ;;  %v7068_v47 = vpop.f32.mrf.mxu0 }
 0x60a   : > { %v18295_v33 = vadd.f32 %v7068_v47, %v6619_v34 }
 0x60b   : > { %v13899_v42 = vpop.f32.mrf.mxu1  ;;  %v14023_v46 = vpop.f32.mrf.mxu0 }
 0x60c   : > { %v7335_v42 = vld [vmem:[#allocation2 + $0x131] sm:$0xff]  ;;  %v7892_v46 = vld [vmem:[#allocation2 + $0x147] sm:$0xff] }
 0x60d   : > { %v6624_v49 = vpop.f32.mrf.mxu1  ;;  %v7073_v25 = vpop.f32.mrf.mxu0  ;;  %14137 = vmatmul.mubr.bf16.gmra.mxu1 %v7368_v20  ;;  %14261 = vmatmul.mubr.bf16.gmra.mxu0 %v7925_v32 }
 0x60e   : > { %v18297_v18 = vadd.f32 %v7073_v25, %v6624_v49  ;;  %14140 = vmatprep.mubr.msk.bf16.mxu1 %vm15473_vm0, %v18126_v40  ;;  %14264 = vmatprep.mubr.msk.bf16.mxu0 %vm15473_vm0, %v18126_v40  ;;  %v7334_v25 = vld [vmem:[#allocation2 + $0x129] sm:$0xff] }
 0x60f   : > { %v13902_v17 = vpop.f32.mrf.mxu1  ;;  %v14026_v41 = vpop.f32.mrf.mxu0  ;;  %v7370_v43 = vpack.c.bf16 %v7335_v42, %v7334_v25  ;;  %v7893_v42 = vld [vmem:[#allocation2 + $0x14f] sm:$0xff] }
 0x610   : > { %v7891_v17 = vld [vmem:[#allocation2 + $0x13f] sm:$0xff] }
 0x611   : > { %v6627_v28 = vpop.f32.mrf.mxu1  ;;  %v7076_v3 = vpop.f32.mrf.mxu0 }
 0x612   : > { %v18303_v35 = vadd.f32 %v7076_v3, %v6627_v28  ;;  %v7927_v28 = vpack.c.bf16 %v7892_v46, %v7891_v17 }
 0x613   : > { %v13903_v54 = vpop.f32.mrf.mxu1  ;;  %v14027_v62 = vpop.f32.mrf.mxu0 }
 0x615   : > { %v6632_v56 = vpop.f32.mrf.mxu1  ;;  %v7081_v34 = vpop.f32.mrf.mxu0  ;;  %14141 = vmatmul.mubr.bf16.gmra.mxu1 %v7369_v63  ;;  %14265 = vmatmul.mubr.bf16.gmra.mxu0 %v7926_v58  ;;  %v7337_v63 = vld [vmem:[#allocation2 + $0x141] sm:$0xff]  ;;  %v7894_v58 = vld [vmem:[#allocation2 + $0x157] sm:$0xff] }
 0x616   : > { %v18305_v47 = vadd.f32 %v7081_v34, %v6632_v56  ;;  %14144 = vmatprep.mubr.msk.bf16.mxu1 %vm15473_vm0, %v18126_v40  ;;  %14268 = vmatprep.mubr.msk.bf16.mxu0 %vm15473_vm0, %v18126_v40  ;;  %v7928_v25 = vpack.c.bf16 %v7894_v58, %v7893_v42  ;;  %v7338_v58 = vld [vmem:[#allocation2 + $0x149] sm:$0xff] }
 0x617   : > { %v13906_v53 = vpop.f32.mrf.mxu1  ;;  %v14030_v0 = vpop.f32.mrf.mxu0 }
 0x618   : > { %v7336_v0 = vld [vmem:[#allocation2 + $0x139] sm:$0xff] }
 0x619   : > { %v6635_v20 = vpop.f32.mrf.mxu1  ;;  %v7084_v32 = vpop.f32.mrf.mxu0 }
 0x61a   : > { %v18311_v49 = vadd.f32 %v7084_v32, %v6635_v20  ;;  %v7371_v32 = vpack.c.bf16 %v7337_v63, %v7336_v0 }
 0x61b   : > { %v13907_v41 = vpop.f32.mrf.mxu1  ;;  %v14031_v50 = vpop.f32.mrf.mxu0 }
 0x61d   : > { %v6640_v3 = vpop.f32.mrf.mxu1  ;;  %v7089_v26 = vpop.f32.mrf.mxu0  ;;  %14145 = vmatmul.mubr.bf16.gmra.mxu1 %v7370_v43  ;;  %14269 = vmatmul.mubr.bf16.gmra.mxu0 %v7927_v28 }
 0x61e   : > { %v18313_v2 = vadd.f32 %v7089_v26, %v6640_v3  ;;  %14148 = vmatprep.mubr.msk.bf16.mxu1 %vm15473_vm0, %v18126_v40  ;;  %14272 = vmatprep.mubr.msk.bf16.mxu0 %vm15473_vm0, %v18126_v40  ;;  %v7339_v3 = vld [vmem:[#allocation2 + $0x151] sm:$0xff]  ;;  %v7896_v26 = vld [vmem:[#allocation2 + $0x167] sm:$0xff] }
 0x61f   : > { %v13910_v54 = vpop.f32.mrf.mxu1  ;;  %v14034_v62 = vpop.f32.mrf.mxu0  ;;  %v7372_v42 = vpack.c.bf16 %v7339_v3, %v7338_v58  ;;  %v7897_v58 = vld [vmem:[#allocation2 + $0x16f] sm:$0xff] }
 0x621   : > { %v6643_v56 = vpop.f32.mrf.mxu1  ;;  %v7092_v34 = vpop.f32.mrf.mxu0 }
 0x622   : > { %v18319_v53 = vadd.f32 %v7092_v34, %v6643_v56  ;;  %v7895_v56 = vld [vmem:[#allocation2 + $0x15f] sm:$0xff] }
 0x623   : > { %v13911_v46 = vpop.f32.mrf.mxu1  ;;  %v14035_v20 = vpop.f32.mrf.mxu0 }
 0x624   : > { %v7929_v46 = vpack.c.bf16 %v7896_v26, %v7895_v56  ;;  %v7340_v26 = vld [vmem:[#allocation2 + $0x159] sm:$0xff] }
 0x625   : > { %v6648_v17 = vpop.f32.mrf.mxu1  ;;  %v7097_v41 = vpop.f32.mrf.mxu0  ;;  %14149 = vmatmul.mubr.bf16.gmra.mxu1 %v7371_v32  ;;  %14273 = vmatmul.mubr.bf16.gmra.mxu0 %v7928_v25 }
 0x626   : > { %v18321_v50 = vadd.f32 %v7097_v41, %v6648_v17  ;;  %14152 = vmatprep.mubr.msk.bf16.mxu1 %vm15473_vm0, %v18126_v40  ;;  %14276 = vmatprep.mubr.msk.bf16.mxu0 %vm15473_vm0, %v18126_v40 }
 0x627   : > { %v13914_v43 = vpop.f32.mrf.mxu1  ;;  %v14038_v28 = vpop.f32.mrf.mxu0 }
 0x628   : > { %v7341_v43 = vld [vmem:[#allocation2 + $0x161] sm:$0xff]  ;;  %v7898_v28 = vld [vmem:[#allocation2 + $0x177] sm:$0xff] }
 0x629   : > { %v6651_v54 = vpop.f32.mrf.mxu1  ;;  %v7100_v62 = vpop.f32.mrf.mxu0 }
 0x62a   : > { %v18327_v63 = vadd.f32 %v7100_v62, %v6651_v54 }
 0x62b   : > { %v13915_v34 = vpop.f32.mrf.mxu1  ;;  %v14039_v0 = vpop.f32.mrf.mxu0 }
 0x62c   : > { %v7373_v0 = vpack.c.bf16 %v7341_v43, %v7340_v26 }
 0x62d   : > { %v6656_v20 = vpop.f32.mrf.mxu1  ;;  %v7105_v32 = vpop.f32.mrf.mxu0  ;;  %14153 = vmatmul.mubr.bf16.gmra.mxu1 %v7372_v42  ;;  %14277 = vmatmul.mubr.bf16.gmra.mxu0 %v7929_v46  ;;  %v7930_v42 = vpack.c.bf16 %v7898_v28, %v7897_v58  ;;  %v7342_v58 = vld [vmem:[#allocation2 + $0x169] sm:$0xff] }
 0x62e   : > { %v18329_v25 = vadd.f32 %v7105_v32, %v6656_v20  ;;  %14156 = vmatprep.mubr.msk.bf16.mxu1 %vm15473_vm0, %v18126_v40  ;;  %14280 = vmatprep.mubr.msk.bf16.mxu0 %vm15473_vm0, %v18126_v40  ;;  %v18339_v40 = vld [vmem:[#allocation2] sm:$0xff] }
 0x62f   : > { %v13918_v17 = vpop.f32.mrf.mxu1  ;;  %v14042_v41 = vpop.f32.mrf.mxu0 }
 0x630   : > { %19750 = vst [vmem:[#allocation74_spill] sm:$0xff] %v18329_v25 }
 0x631   : > { %v6659_v54 = vpop.f32.mrf.mxu1  ;;  %v7108_v62 = vpop.f32.mrf.mxu0 }
 0x632   : > { %v18335_v3 = vadd.f32 %v7108_v62, %v6659_v54  ;;  %v7343_v54 = vld [vmem:[#allocation2 + $0x171] sm:$0xff]  ;;  %v7900_v62 = vld [vmem:[#allocation2 + $0x187] sm:$0xff] }
 0x633   : > { %v13919_v56 = vpop.f32.mrf.mxu1  ;;  %v14043_v34 = vpop.f32.mrf.mxu0 }
 0x634   : > { %19751 = vst [vmem:[#allocation75_spill] sm:$0xff] %v18335_v3  ;;  %v7899_v56 = vld [vmem:[#allocation2 + $0x17f] sm:$0xff] }
 0x635   : > { %v6664_v46 = vpop.f32.mrf.mxu1  ;;  %v7113_v20 = vpop.f32.mrf.mxu0  ;;  %14157 = vmatmul.mubr.bf16.gmra.mxu1 %v7373_v0  ;;  %14281 = vmatmul.mubr.bf16.gmra.mxu0 %v7930_v42  ;;  %v7374_v42 = vpack.c.bf16 %v7343_v54, %v7342_v58  ;;  %v7901_v58 = vld [vmem:[#allocation2 + $0x18f] sm:$0xff] }
 0x636   : > { %v18337_v32 = vadd.f32 %v7113_v20, %v6664_v46  ;;  %14160 = vmatprep.mubr.msk.bf16.mxu1 %vm15473_vm0, %v18339_v40  ;;  %14284 = vmatprep.mubr.msk.bf16.mxu0 %vm15473_vm0, %v18339_v40  ;;  %v7931_v46 = vpack.c.bf16 %v7900_v62, %v7899_v56  ;;  %v7344_v62 = vld [vmem:[#allocation2 + $0x179] sm:$0xff] }
 0x637   : > { %v13922_v17 = vpop.f32.mrf.mxu1  ;;  %v14046_v41 = vpop.f32.mrf.mxu0 }
 0x638   : > { %19752 = vst [vmem:[#allocation18_spill] sm:$0xff] %v18337_v32 }
 0x639   : > { %v6667_v43 = vpop.f32.mrf.mxu1  ;;  %v7116_v28 = vpop.f32.mrf.mxu0 }
 0x63a   : > { %v18345_v26 = vadd.f32 %v7116_v28, %v6667_v43  ;;  %v7345_v43 = vld [vmem:[#allocation2 + $0x181] sm:$0xff]  ;;  %v7902_v28 = vld [vmem:[#allocation2 + $0x197] sm:$0xff] }
 0x63b   : > { %v13923_v34 = vpop.f32.mrf.mxu1  ;;  %v14047_v0 = vpop.f32.mrf.mxu0 }
 0x63c   : > { %19753 = vst [vmem:[#allocation76_spill] sm:$0xff] %v18345_v26 }
 0x63d   : > { %v6672_v20 = vpop.f32.mrf.mxu1  ;;  %v7121_v32 = vpop.f32.mrf.mxu0  ;;  %14161 = vmatmul.mubr.bf16.gmra.mxu1 %v7374_v42  ;;  %14285 = vmatmul.mubr.bf16.gmra.mxu0 %v7931_v46  ;;  %v7932_v46 = vpack.c.bf16 %v7902_v28, %v7901_v58  ;;  %v7346_v28 = vld [vmem:[#allocation2 + $0x189] sm:$0xff] }
 0x63e   : > { %v18347_v3 = vadd.f32 %v7121_v32, %v6672_v20  ;;  %14164 = vmatprep.mubr.msk.bf16.mxu1 %vm15473_vm0, %v18339_v40  ;;  %14288 = vmatprep.mubr.msk.bf16.mxu0 %vm15473_vm0, %v18339_v40  ;;  %v7375_v32 = vpack.c.bf16 %v7345_v43, %v7344_v62  ;;  %v7903_v62 = vld [vmem:[#allocation2 + $0x19f] sm:$0xff] }
 0x63f   : > { %v13926_v17 = vpop.f32.mrf.mxu1  ;;  %v14050_v41 = vpop.f32.mrf.mxu0 }
 0x640   : > { %19754 = vst [vmem:[#allocation21_spill] sm:$0xff] %v18347_v3 }
 0x641   : > { %v6675_v34 = vpop.f32.mrf.mxu1  ;;  %v7124_v0 = vpop.f32.mrf.mxu0 }
 0x642   : > { %v18353_v54 = vadd.f32 %v7124_v0, %v6675_v34  ;;  %v7347_v34 = vld [vmem:[#allocation2 + $0x191] sm:$0xff]  ;;  %v7904_v0 = vld [vmem:[#allocation2 + $0x1a7] sm:$0xff] }
 0x643   : > { %v13927_v56 = vpop.f32.mrf.mxu1  ;;  %v14051_v42 = vpop.f32.mrf.mxu0 }
 0x644   : > { %19755 = vst [vmem:[#allocation77_spill] sm:$0xff] %v18353_v54 }
 0x645   : > { %v6680_v20 = vpop.f32.mrf.mxu1  ;;  %v7129_v3 = vpop.f32.mrf.mxu0  ;;  %14165 = vmatmul.mubr.bf16.gmra.mxu1 %v7375_v32  ;;  %14289 = vmatmul.mubr.bf16.gmra.mxu0 %v7932_v46  ;;  %v7933_v46 = vpack.c.bf16 %v7904_v0, %v7903_v62  ;;  %v7348_v62 = vld [vmem:[#allocation2 + $0x199] sm:$0xff] }
 0x646   : > { %v18355_v26 = vadd.f32 %v7129_v3, %v6680_v20  ;;  %14168 = vmatprep.mubr.msk.bf16.mxu1 %vm15473_vm0, %v18339_v40  ;;  %14292 = vmatprep.mubr.msk.bf16.mxu0 %vm15473_vm0, %v18339_v40  ;;  %v7376_v3 = vpack.c.bf16 %v7347_v34, %v7346_v28 }
 0x647   : > { %v13930_v17 = vpop.f32.mrf.mxu1  ;;  %v14054_v41 = vpop.f32.mrf.mxu0 }
 0x648   : > { %19756 = vst [vmem:[#allocation22_spill] sm:$0xff] %v18355_v26 }
 0x649   : > { %v6683_v56 = vpop.f32.mrf.mxu1  ;;  %v7132_v42 = vpop.f32.mrf.mxu0 }
 0x64a   : > { %v18361_v43 = vadd.f32 %v7132_v42, %v6683_v56  ;;  %v7349_v42 = vld [vmem:[#allocation2 + $0x1a1] sm:$0xff] }
 0x64b   : > { %v13931_v58 = vpop.f32.mrf.mxu1  ;;  %v14055_v32 = vpop.f32.mrf.mxu0 }
 0x64c   : > { %19757 = vst [vmem:[#allocation25_spill] sm:$0xff] %v18361_v43  ;;  %v7906_v58 = vld [vmem:[#allocation2 + $0x1b7] sm:$0xff]  ;;  %v7905_v32 = vld [vmem:[#allocation2 + $0x1af] sm:$0xff] }
 0x64d   : > { %v7478_v20 = vpop.f32.mrf.mxu1  ;;  %14169 = vmatmul.mubr.bf16.gmra.mxu1 %v7376_v3  ;;  %v8035_v26 = vpop.f32.mrf.mxu0  ;;  %14293 = vmatmul.mubr.bf16.gmra.mxu0 %v7933_v46  ;;  %v7377_v46 = vpack.c.bf16 %v7349_v42, %v7348_v62  ;;  %v7351_v42 = vld [vmem:[#allocation2 + $0x1b1] sm:$0xff]  ;;  %v7350_v62 = vld [vmem:[#allocation2 + $0x1a9] sm:$0xff] }
 0x64e   : > { %v7747_v54 = vadd.f32 %v7478_v20, %v18124_v36  ;;  %14172 = vmatprep.mubr.msk.bf16.mxu1 %vm15473_vm0, %v18339_v40  ;;  %14296 = vmatprep.mubr.msk.bf16.mxu0 %vm15473_vm0, %v18339_v40  ;;  %v7934_v20 = vpack.c.bf16 %v7906_v58, %v7905_v32  ;;  %v7908_v58 = vld [vmem:[#allocation2 + $0x1c7] sm:$0xff]  ;;  %v7907_v32 = vld [vmem:[#allocation2 + $0x1bf] sm:$0xff] }
 0x64f   : > { %v14074_v17 = vpop.f32.mrf.mxu1  ;;  %v14198_v41 = vpop.f32.mrf.mxu0 }
 0x650   : > { %v18368_v56 = vadd.f32 %v8035_v26, %v7747_v54 }
 0x651   : > { %v7481_v34 = vpop.f32.mrf.mxu1  ;;  %v8038_v0 = vpop.f32.mrf.mxu0 }
 0x652   : > { %v7748_v28 = vadd.f32 %v7481_v34, %v18134_v8 }
 0x653   : > { %v14075_v3 = vpop.f32.mrf.mxu1  ;;  %v14199_v36 = vpop.f32.mrf.mxu0 }
 0x654   : > { %v18371_v43 = vadd.f32 %v8038_v0, %v7748_v28  ;;  %v7935_v36 = vpack.c.bf16 %v7908_v58, %v7907_v32  ;;  %v8970_v58 = vld [vmem:[#allocation2 + $0x29] sm:$0xff]  ;;  %v8969_v32 = vld [vmem:[#allocation2 + $0x21] sm:$0xff] }
 0x655   : > { %v7486_v25 = vpop.f32.mrf.mxu1  ;;  %14173 = vmatmul.mubr.bf16.gmra.mxu1 %v7377_v46  ;;  %v8043_v17 = vpop.f32.mrf.mxu0  ;;  %14297 = vmatmul.mubr.bf16.gmra.mxu0 %v7934_v20 }
 0x656   : > { %v7749_v26 = vadd.f32 %v7486_v25, %v18137_v15  ;;  %14176 = vmatprep.mubr.msk.bf16.mxu1 %vm15473_vm0, %v18339_v40  ;;  %14300 = vmatprep.mubr.msk.bf16.mxu0 %vm15473_vm0, %v18339_v40  ;;  %v7378_v25 = vpack.c.bf16 %v7351_v42, %v7350_v62  ;;  %v8413_v42 = vld [vmem:[#allocation2 + $0x28] sm:$0xff] }
 0x657   : > { %v14078_v8 = vpop.f32.mrf.mxu1  ;;  %v14202_v54 = vpop.f32.mrf.mxu0 }
 0x658   : > { %v18378_v41 = vadd.f32 %v8043_v17, %v7749_v26 }
 0x659   : > { %v7489_v34 = vpop.f32.mrf.mxu1  ;;  %v8046_v0 = vpop.f32.mrf.mxu0 }
 0x65a   : > { %v7750_v28 = vadd.f32 %v7489_v34, %v18143_v55 }
 0x65b   : > { %v14079_v3 = vpop.f32.mrf.mxu1  ;;  %v14203_v15 = vpop.f32.mrf.mxu0 }
 0x65c   : > { %v18381_v46 = vadd.f32 %v8046_v0, %v7750_v28  ;;  %v8412_v28 = vld [vmem:[#allocation2 + $0x20] sm:$0xff]  ;;  %v15266_v3 = vld [vmem:[#allocation9 + $0x1b8] sm:$0xff]  }
 0x65d   : > { %v7494_v20 = vpop.f32.mrf.mxu1  ;;  %14177 = vmatmul.mubr.bf16.gmra.mxu1 %v7378_v25  ;;  %v8051_v8 = vpop.f32.mrf.mxu0  ;;  %14301 = vmatmul.mubr.bf16.gmra.mxu0 %v7935_v36  ;;  %v8466_v36 = vpack.c.bf16 %v8413_v42, %v8412_v28 }
 0x65e   : > { %19758 = vst [vmem:[#allocation26_spill] sm:$0xff] %v18381_v46  ;;  %v7751_v17 = vadd.f32 %v7494_v20, %v18145_v19  ;;  %14320 = vmatprep.mubr.msk.bf16.mxu1 %vm15473_vm0, %v18339_v40  ;;  %14444 = vmatprep.mubr.msk.bf16.mxu0 %vm15473_vm0, %v18339_v40  ;;  %v15267_v19 = vld [vmem:[#allocation9 + $0x1f8] sm:$0xff]   ;;  %v9023_v20 = vpack.c.bf16 %v8970_v58, %v8969_v32  ;;  %v8415_v58 = vld [vmem:[#allocation2 + $0x38] sm:$0xff]  ;;  %v8414_v32 = vld [vmem:[#allocation2 + $0x30] sm:$0xff] }
 0x65f   : > { %v14082_v55 = vpop.f32.mrf.mxu1  ;;  %v14206_v26 = vpop.f32.mrf.mxu0 }
 0x660   : > { %v18388_v54 = vadd.f32 %v8051_v8, %v7751_v17  ;;  %v15268_v17 = vld [vmem:[#allocation9 + $0x1b0] sm:$0xff]  }
 0x661   : > { %v7497_v34 = vpop.f32.mrf.mxu1  ;;  %v8054_v0 = vpop.f32.mrf.mxu0 }
 0x662   : > { %19759 = vst [vmem:[#allocation29_spill] sm:$0xff] %v18388_v54  ;;  %v7752_v62 = vadd.f32 %v7497_v34, %v18151_v4  ;;  %v15269_v54 = vld [vmem:[#allocation9 + $0x1f0] sm:$0xff]  }
 0x663   : > { %v14083_v15 = vpop.f32.mrf.mxu1  ;;  %v14207_v25 = vpop.f32.mrf.mxu0 }
 0x664   : > { %v18391_v46 = vadd.f32 %v8054_v0, %v7752_v62  ;;  %v8972_v0 = vld [vmem:[#allocation2 + $0x39] sm:$0xff]  ;;  %v8467_v25 = vpack.c.bf16 %v8415_v58, %v8414_v32  ;;  %v15273_v58 = vld [vmem:[#allocation9 + $0x1e0] sm:$0xff]  }
 0x665   : > { %v7502_v55 = vpop.f32.mrf.mxu1  ;;  %v8059_v26 = vpop.f32.mrf.mxu0  ;;  %14321 = vmatmul.mubr.bf16.vlgmr.msra.gmra.mxu1 %v8466_v36  ;;  %14445 = vmatmul.mubr.bf16.vlgmr.msra.gmra.mxu0 %v9023_v20  ;;  %v15270_v20 = vld [vmem:[#allocation9 + $0x1a8] sm:$0xff]  }
 0x666   : > { %v7753_v8 = vadd.f32 %v7502_v55, %v18153_v27  ;;  %14553 = vmatpush3.bf16.msra.mxu1 %v15266_v3  ;;  %14677 = vmatpush3.bf16.msra.mxu0 %v15267_v19  ;;  %v8971_v3 = vld [vmem:[#allocation2 + $0x31] sm:$0xff] }
 0x667   : > { %v14086_v4 = vpop.f32.mrf.mxu1  ;;  %v14210_v34 = vpop.f32.mrf.mxu0  ;;  %14324 = vmatprep.mubr.msk.bf16.mxu1 %vm15473_vm0, %v18339_v40  ;;  %14448 = vmatprep.mubr.msk.bf16.mxu0 %vm15473_vm0, %v18339_v40  ;;  %v9024_v36 = vpack.c.bf16 %v8972_v0, %v8971_v3  ;;  %v15271_v55 = vld [vmem:[#allocation9 + $0x1e8] sm:$0xff]   ;;  %v8416_v3 = vld [vmem:[#allocation2 + $0x40] sm:$0xff] }
 0x668   : > { %v18398_v42 = vadd.f32 %v8059_v26, %v7753_v8  ;;  %14554 = vmatprep.subr.bf16.mxu1 %v18339_v40  ;;  %14678 = vmatprep.subr.bf16.mxu0 %v18339_v40  ;;  %v15272_v34 = vld [vmem:[#allocation9 + $0x1a0] sm:$0xff]  }
 0x669   : > { %v7505_v27 = vpop.f32.mrf.mxu1  ;;  %v8062_v28 = vpop.f32.mrf.mxu0 }
 0x66a   : > { %v7754_v62 = vadd.f32 %v7505_v27, %v18161_v45  ;;  %14555 = vmatpush3.bf16.msra.mxu1 %v15268_v17  ;;  %14679 = vmatpush3.bf16.msra.mxu0 %v15269_v54  ;;  %v8417_v27 = vld [vmem:[#allocation2 + $0x48] sm:$0xff] }
 0x66b   : > { %v14087_v19 = vpop.f32.mrf.mxu1  ;;  %v14211_v15 = vpop.f32.mrf.mxu0  ;;  %14556 = vmatprep.subr.bf16.mxu1 %v18339_v40  ;;  %14680 = vmatprep.subr.bf16.mxu0 %v18339_v40 }
 0x66c   : > { %v18405_v26 = vadd.f32 %v8062_v28, %v7754_v62  ;;  %v8974_v28 = vld [vmem:[#allocation2 + $0x49] sm:$0xff]  ;;  %v8973_v19 = vld [vmem:[#allocation2 + $0x41] sm:$0xff] }
 0x66d   : > { %v7510_v8 = vpop.f32.mrf.mxu1  ;;  %v8067_v4 = vpop.f32.mrf.mxu0  ;;  %14325 = vmatmul.mubr.bf16.gmra.mxu1 %v8467_v25  ;;  %14449 = vmatmul.mubr.bf16.gmra.mxu0 %v9024_v36  ;;  %v8468_v36 = vpack.c.bf16 %v8417_v27, %v8416_v3  ;;  %v15277_v27 = vld [vmem:[#allocation9 + $0x1d0] sm:$0xff]  }
 0x66e   : > { %v7755_v45 = vadd.f32 %v7510_v8, %v18165_v23  ;;  %14328 = vmatprep.mubr.msk.bf16.mxu1 %vm15473_vm0, %v18339_v40  ;;  %14452 = vmatprep.mubr.msk.bf16.mxu0 %vm15473_vm0, %v18339_v40  ;;  %v15275_v8 = vld [vmem:[#allocation9 + $0x1d8] sm:$0xff]  }
 0x66f   : > { %v14090_v54 = vpop.f32.mrf.mxu1  ;;  %v14214_v17 = vpop.f32.mrf.mxu0  ;;  %14557 = vmatpush3.bf16.msra.mxu1 %v15270_v20  ;;  %14681 = vmatpush3.bf16.msra.mxu0 %v15271_v55  ;;  %v9025_v20 = vpack.c.bf16 %v8974_v28, %v8973_v19  ;;  %v15274_v55 = vld [vmem:[#allocation9 + $0x198] sm:$0xff]   ;;  %v8418_v19 = vld [vmem:[#allocation2 + $0x50] sm:$0xff] }
 0x670   : > { %v18412_v0 = vadd.f32 %v8067_v4, %v7755_v45  ;;  %14558 = vmatprep.subr.bf16.mxu1 %v18339_v40  ;;  %14682 = vmatprep.subr.bf16.mxu0 %v18339_v40 }
 0x671   : > { %v7513_v23 = vpop.f32.mrf.mxu1  ;;  %v8070_v62 = vpop.f32.mrf.mxu0 }
 0x672   : > { %v7756_v32 = vadd.f32 %v7513_v23, %v18173_v61  ;;  %v8419_v23 = vld [vmem:[#allocation2 + $0x58] sm:$0xff] }
 0x673   : > { %v14091_v15 = vpop.f32.mrf.mxu1  ;;  %v14215_v25 = vpop.f32.mrf.mxu0  ;;  %14559 = vmatpush3.bf16.msra.mxu1 %v15272_v34  ;;  %14683 = vmatpush3.bf16.msra.mxu0 %v15273_v58  ;;  %v15276_v58 = vld [vmem:[#allocation9 + $0x190] sm:$0xff]  }
 0x674   : > { %v18417_v4 = vadd.f32 %v8070_v62, %v7756_v32  ;;  %14560 = vmatprep.subr.bf16.mxu1 %v18339_v40  ;;  %14684 = vmatprep.subr.bf16.mxu0 %v18339_v40  ;;  %v8976_v62 = vld [vmem:[#allocation2 + $0x59] sm:$0xff]  ;;  %v8975_v15 = vld [vmem:[#allocation2 + $0x51] sm:$0xff] }
 0x675   : > { %v7518_v45 = vpop.f32.mrf.mxu1  ;;  %v8075_v54 = vpop.f32.mrf.mxu0  ;;  %14329 = vmatmul.mubr.bf16.gmra.mxu1 %v8468_v36  ;;  %14453 = vmatmul.mubr.bf16.gmra.mxu0 %v9025_v20  ;;  %v8469_v20 = vpack.c.bf16 %v8419_v23, %v8418_v19 }
 0x676   : > { %v7757_v61 = vadd.f32 %v7518_v45, %v18177_v1  ;;  %14332 = vmatprep.mubr.msk.bf16.mxu1 %vm15473_vm0, %v18339_v40  ;;  %14456 = vmatprep.mubr.msk.bf16.mxu0 %vm15473_vm0, %v18339_v40 }
 0x677   : > { %v14094_v17 = vpop.f32.mrf.mxu1  ;;  %v14218_v34 = vpop.f32.mrf.mxu0  ;;  %14561 = vmatpush3.bf16.msra.mxu1 %v15274_v55  ;;  %14685 = vmatpush3.bf16.msra.mxu0 %v15275_v8  ;;  %v9026_v55 = vpack.c.bf16 %v8976_v62, %v8975_v15 }
 0x678   : > { %v18426_v28 = vadd.f32 %v8075_v54, %v7757_v61  ;;  %14562 = vmatprep.subr.bf16.mxu1 %v18339_v40  ;;  %14686 = vmatprep.subr.bf16.mxu0 %v18339_v40 }
 0x679   : > { %v7521_v1 = vpop.f32.mrf.mxu1  ;;  %v8078_v32 = vpop.f32.mrf.mxu0 }
 0x67a   : > { %v7758_v3 = vadd.f32 %v7521_v1, %v18185_v30 }
 0x67b   : > { %v14095_v25 = vpop.f32.mrf.mxu1  ;;  %v14219_v36 = vpop.f32.mrf.mxu0  ;;  %14563 = vmatpush3.bf16.msra.mxu1 %v15276_v58  ;;  %14687 = vmatpush3.bf16.msra.mxu0 %v15277_v27  ;;  %v8421_v58 = vld [vmem:[#allocation2 + $0x68] sm:$0xff] }
 0x67c   : > { %v18431_v8 = vadd.f32 %v8078_v32, %v7758_v3  ;;  %14564 = vmatprep.subr.bf16.mxu1 %v18339_v40  ;;  %14688 = vmatprep.subr.bf16.mxu0 %v18339_v40  ;;  %v8978_v27 = vld [vmem:[#allocation2 + $0x69] sm:$0xff]  ;;  %v8420_v32 = vld [vmem:[#allocation2 + $0x60] sm:$0xff] }
 0x67d   : > { %v7526_v45 = vpop.f32.mrf.mxu1  ;;  %v8083_v54 = vpop.f32.mrf.mxu0  ;;  %14333 = vmatmul.mubr.bf16.gmra.mxu1 %v8469_v20  ;;  %14457 = vmatmul.mubr.bf16.gmra.mxu0 %v9026_v55  ;;  %v8977_v3 = vld [vmem:[#allocation2 + $0x61] sm:$0xff]  ;;  %v8470_v15 = vpack.c.bf16 %v8421_v58, %v8420_v32  ;;  %v15278_v58 = vld [vmem:[#allocation9 + $0x188] sm:$0xff]  }
 0x67e   : > { %v7759_v30 = vadd.f32 %v7526_v45, %v18189_v10  ;;  %14336 = vmatprep.mubr.msk.bf16.mxu1 %vm15473_vm0, %v18339_v40  ;;  %14460 = vmatprep.mubr.msk.bf16.mxu0 %vm15473_vm0, %v18339_v40  ;;  %v9027_v25 = vpack.c.bf16 %v8978_v27, %v8977_v3  ;;  %v8979_v32 = vld [vmem:[#allocation2 + $0x71] sm:$0xff] }
 0x67f   : > { %v14098_v61 = vpop.f32.mrf.mxu1  ;;  %v14222_v17 = vpop.f32.mrf.mxu0  ;;  %14565 = vmatpush3.bf16.msra.mxu1 %v15278_v58 }
 0x680   : > { %v18440_v34 = vadd.f32 %v8083_v54, %v7759_v30  ;;  %v8423_v61 = vld [vmem:[#allocation2 + $0x78] sm:$0xff]  ;;  %14566 = vmatprep.subr.bf16.mxu1 %v18339_v40 }
 0x681   : > { %v7529_v23 = vpop.f32.mrf.mxu1  ;;  %v8086_v62 = vpop.f32.mrf.mxu0  ;;  %v8980_v17 = vld [vmem:[#allocation2 + $0x79] sm:$0xff] }
 0x682   : > { %v7760_v1 = vadd.f32 %v7529_v23, %v18195_v39 }
 0x683   : > { %v14099_v19 = vpop.f32.mrf.mxu1  ;;  %v14223_v10 = vpop.f32.mrf.mxu0 }
 0x684   : > { %v18443_v36 = vadd.f32 %v8086_v62, %v7760_v1  ;;  %v8422_v1 = vld [vmem:[#allocation2 + $0x70] sm:$0xff]  ;;  %v9028_v10 = vpack.c.bf16 %v8980_v17, %v8979_v32 }
 0x685   : > { %v7534_v20 = vpop.f32.mrf.mxu1  ;;  %v8091_v55 = vpop.f32.mrf.mxu0  ;;  %14337 = vmatmul.mubr.bf16.gmra.mxu1 %v8470_v15  ;;  %14461 = vmatmul.mubr.bf16.gmra.mxu0 %v9027_v25  ;;  %v8471_v19 = vpack.c.bf16 %v8423_v61, %v8422_v1  ;;  %v15279_v25 = vld [vmem:[#allocation9 + $0x1c8] sm:$0xff]   ;;  %v8425_v61 = vld [vmem:[#allocation2 + $0x88] sm:$0xff] }
 0x686   : > { %v7761_v45 = vadd.f32 %v7534_v20, %v18197_v13  ;;  %14340 = vmatprep.mubr.msk.bf16.mxu1 %vm15473_vm0, %v18339_v40  ;;  %14464 = vmatprep.mubr.msk.bf16.mxu0 %vm15473_vm0, %v18339_v40  ;;  %v8982_v17 = vld [vmem:[#allocation2 + $0x89] sm:$0xff] }
 0x687   : > { %v14102_v39 = vpop.f32.mrf.mxu1  ;;  %v14226_v54 = vpop.f32.mrf.mxu0  ;;  %14689 = vmatpush3.bf16.msra.mxu0 %v15279_v25 }
 0x688   : > { %v18450_v30 = vadd.f32 %v8091_v55, %v7761_v45  ;;  %14690 = vmatprep.subr.bf16.mxu0 %v18339_v40 }
 0x689   : > { %v7537_v27 = vpop.f32.mrf.mxu1  ;;  %v8094_v23 = vpop.f32.mrf.mxu0 }
 0x68a   : > { %v7762_v62 = vadd.f32 %v7537_v27, %v18203_v52 }
 0x68b   : > { %v14103_v13 = vpop.f32.mrf.mxu1  ;;  %v14227_v3 = vpop.f32.mrf.mxu0 }
 0x68c   : > { %v18454_v15 = vadd.f32 %v8094_v23, %v7762_v62  ;;  %v8981_v62 = vld [vmem:[#allocation2 + $0x81] sm:$0xff] }
 0x68d   : > { %v7542_v20 = vpop.f32.mrf.mxu1  ;;  %v8099_v55 = vpop.f32.mrf.mxu0  ;;  %14341 = vmatmul.mubr.bf16.gmra.mxu1 %v8471_v19  ;;  %14465 = vmatmul.mubr.bf16.gmra.mxu0 %v9028_v10  ;;  %v9029_v3 = vpack.c.bf16 %v8982_v17, %v8981_v62 }
 0x68e   : > { %v7763_v45 = vadd.f32 %v7542_v20, %v18206_v21  ;;  %14344 = vmatprep.mubr.msk.bf16.mxu1 %vm15473_vm0, %v18339_v40  ;;  %14468 = vmatprep.mubr.msk.bf16.mxu0 %vm15473_vm0, %v18339_v40  ;;  %v8424_v21 = vld [vmem:[#allocation2 + $0x80] sm:$0xff] }
 0x68f   : > { %v14106_v52 = vpop.f32.mrf.mxu1  ;;  %v14230_v39 = vpop.f32.mrf.mxu0  ;;  %v8472_v13 = vpack.c.bf16 %v8425_v61, %v8424_v21 }
 0x690   : > { %v18461_v54 = vadd.f32 %v8099_v55, %v7763_v45  ;;  %v8427_v52 = vld [vmem:[#allocation2 + $0x98] sm:$0xff] }
 0x691   : > { %v7545_v58 = vpop.f32.mrf.mxu1  ;;  %v8102_v27 = vpop.f32.mrf.mxu0  ;;  %v8984_v39 = vld [vmem:[#allocation2 + $0x99] sm:$0xff] }
 0x692   : > { %v7764_v23 = vadd.f32 %v7545_v58, %v18213_v24 }
 0x693   : > { %v14107_v1 = vpop.f32.mrf.mxu1  ;;  %v14231_v32 = vpop.f32.mrf.mxu0 }
 0x694   : > { %v18465_v19 = vadd.f32 %v8102_v27, %v7764_v23  ;;  %v8426_v27 = vld [vmem:[#allocation2 + $0x90] sm:$0xff] }
 0x695   : > { %v7550_v10 = vpop.f32.mrf.mxu1  ;;  %v8107_v25 = vpop.f32.mrf.mxu0  ;;  %14345 = vmatmul.mubr.bf16.gmra.mxu1 %v8472_v13  ;;  %14469 = vmatmul.mubr.bf16.gmra.mxu0 %v9029_v3  ;;  %v8983_v23 = vld [vmem:[#allocation2 + $0x91] sm:$0xff]  ;;  %v8473_v62 = vpack.c.bf16 %v8427_v52, %v8426_v27 }
 0x696   : > { %v7765_v20 = vadd.f32 %v7550_v10, %v18215_v31  ;;  %14348 = vmatprep.mubr.msk.bf16.mxu1 %vm15473_vm0, %v18339_v40  ;;  %14472 = vmatprep.mubr.msk.bf16.mxu0 %vm15473_vm0, %v18339_v40  ;;  %v9030_v1 = vpack.c.bf16 %v8984_v39, %v8983_v23 }
 0x697   : > { %v14110_v24 = vpop.f32.mrf.mxu1  ;;  %v14234_v55 = vpop.f32.mrf.mxu0 }
 0x698   : > { %v18472_v45 = vadd.f32 %v8107_v25, %v7765_v20  ;;  %v8429_v24 = vld [vmem:[#allocation2 + $0xa8] sm:$0xff] }
 0x699   : > { %v7553_v61 = vpop.f32.mrf.mxu1  ;;  %v8110_v17 = vpop.f32.mrf.mxu0  ;;  %v8986_v55 = vld [vmem:[#allocation2 + $0xa9] sm:$0xff] }
 0x69a   : > { %v7766_v58 = vadd.f32 %v7553_v61, %v18221_v6 }
 0x69b   : > { %v14111_v21 = vpop.f32.mrf.mxu1  ;;  %v14235_v31 = vpop.f32.mrf.mxu0 }
 0x69c   : > { %v18475_v32 = vadd.f32 %v8110_v17, %v7766_v58  ;;  %v8428_v17 = vld [vmem:[#allocation2 + $0xa0] sm:$0xff] }
 0x69d   : > { %v7558_v13 = vpop.f32.mrf.mxu1  ;;  %v8115_v3 = vpop.f32.mrf.mxu0  ;;  %14349 = vmatmul.mubr.bf16.gmra.mxu1 %v8473_v62  ;;  %14473 = vmatmul.mubr.bf16.gmra.mxu0 %v9030_v1  ;;  %v8985_v58 = vld [vmem:[#allocation2 + $0xa1] sm:$0xff]  ;;  %v8474_v23 = vpack.c.bf16 %v8429_v24, %v8428_v17  ;;  %v15280_v62 = vld [vmem:[#allocation9 + $0x180] sm:$0xff]   ;;  %v8431_v24 = vld [vmem:[#allocation2 + $0xb8] sm:$0xff] }
 0x69e   : > { %v7767_v10 = vadd.f32 %v7558_v13, %v18223_v44  ;;  %14352 = vmatprep.mubr.msk.bf16.mxu1 %vm15473_vm0, %v18339_v40  ;;  %14476 = vmatprep.mubr.msk.bf16.mxu0 %vm15473_vm0, %v18339_v40  ;;  %v9031_v21 = vpack.c.bf16 %v8986_v55, %v8985_v58  ;;  %v15281_v1 = vld [vmem:[#allocation9 + $0x1c0] sm:$0xff]   ;;  %v8988_v55 = vld [vmem:[#allocation2 + $0xb9] sm:$0xff] }
 0x69f   : > { %v14114_v6 = vpop.f32.mrf.mxu1  ;;  %v14238_v25 = vpop.f32.mrf.mxu0  ;;  %14567 = vmatpush3.bf16.msra.mxu1 %v15280_v62  ;;  %14691 = vmatpush3.bf16.msra.mxu0 %v15281_v1  ;;  %v8987_v17 = vld [vmem:[#allocation2 + $0xb1] sm:$0xff] }
 0x6a0   : > { %v18482_v20 = vadd.f32 %v8115_v3, %v7767_v10  ;;  %14800 = vmatprep.subr.bf16.mxu1 %v18339_v40  ;;  %14924 = vmatprep.subr.bf16.mxu0 %v18339_v40 }
 0x6a1   : > { %v7561_v52 = vpop.f32.mrf.mxu1  ;;  %v8118_v39 = vpop.f32.mrf.mxu0 }
 0x6a2   : > { %v7768_v61 = vadd.f32 %v7561_v52, %v18229_v11 }
 0x6a3   : > { %v14115_v27 = vpop.f32.mrf.mxu1  ;;  %v14239_v44 = vpop.f32.mrf.mxu0 }
 0x6a4   : > { %v18485_v31 = vadd.f32 %v8118_v39, %v7768_v61  ;;  %v8430_v61 = vld [vmem:[#allocation2 + $0xb0] sm:$0xff] }
 0x6a5   : > { %v7566_v13 = vpop.f32.mrf.mxu1  ;;  %v8123_v6 = vpop.f32.mrf.mxu0  ;;  %14353 = vmatmul.mubr.bf16.gmra.mxu1 %v8474_v23  ;;  %14477 = vmatmul.mubr.bf16.gmra.mxu0 %v9031_v21  ;;  %v8475_v44 = vpack.c.bf16 %v8431_v24, %v8430_v61  ;;  %v9032_v23 = vpack.c.bf16 %v8988_v55, %v8987_v17 }
 0x6a6   : > { %v7769_v3 = vadd.f32 %v7566_v13, %v18231_v51  ;;  %14356 = vmatprep.mubr.msk.bf16.mxu1 %vm15473_vm0, %v18339_v40  ;;  %14480 = vmatprep.mubr.msk.bf16.mxu0 %vm15473_vm0, %v18339_v40 }
 0x6a7   : > { %v14118_v11 = vpop.f32.mrf.mxu1  ;;  %v14242_v10 = vpop.f32.mrf.mxu0 }
 0x6a8   : > { %v18492_v25 = vadd.f32 %v8123_v6, %v7769_v3  ;;  %v8433_v11 = vld [vmem:[#allocation2 + $0xc8] sm:$0xff] }
 0x6a9   : > { %v7569_v52 = vpop.f32.mrf.mxu1  ;;  %v8126_v51 = vpop.f32.mrf.mxu0  ;;  %v8990_v10 = vld [vmem:[#allocation2 + $0xc9] sm:$0xff] }
 0x6aa   : > { %v7770_v39 = vadd.f32 %v7569_v52, %v18239_v22 }
 0x6ab   : > { %v14119_v58 = vpop.f32.mrf.mxu1  ;;  %v14243_v27 = vpop.f32.mrf.mxu0 }
 0x6ac   : > { %v18497_v21 = vadd.f32 %v8126_v51, %v7770_v39  ;;  %v8432_v51 = vld [vmem:[#allocation2 + $0xc0] sm:$0xff] }
 0x6ad   : > { %v7574_v62 = vpop.f32.mrf.mxu1  ;;  %v8131_v1 = vpop.f32.mrf.mxu0  ;;  %14357 = vmatmul.mubr.bf16.gmra.mxu1 %v8475_v44  ;;  %14481 = vmatmul.mubr.bf16.gmra.mxu0 %v9032_v23  ;;  %v8989_v39 = vld [vmem:[#allocation2 + $0xc1] sm:$0xff]  ;;  %v8476_v17 = vpack.c.bf16 %v8433_v11, %v8432_v51 }
 0x6ae   : > { %v7771_v13 = vadd.f32 %v7574_v62, %v18241_v16  ;;  %14360 = vmatprep.mubr.msk.bf16.mxu1 %vm15473_vm0, %v18339_v40  ;;  %14484 = vmatprep.mubr.msk.bf16.mxu0 %vm15473_vm0, %v18339_v40  ;;  %v9033_v58 = vpack.c.bf16 %v8990_v10, %v8989_v39 }
 0x6af   : > { %v14122_v22 = vpop.f32.mrf.mxu1  ;;  %v14246_v6 = vpop.f32.mrf.mxu0 }
 0x6b0   : > { %v18504_v3 = vadd.f32 %v8131_v1, %v7771_v13  ;;  %v8435_v22 = vld [vmem:[#allocation2 + $0xd8] sm:$0xff] }
 0x6b1   : > { %v7577_v24 = vpop.f32.mrf.mxu1  ;;  %v8134_v55 = vpop.f32.mrf.mxu0  ;;  %v8992_v6 = vld [vmem:[#allocation2 + $0xd9] sm:$0xff] }
 0x6b2   : > { %v7772_v52 = vadd.f32 %v7577_v24, %v18247_v29 }
 0x6b3   : > { %v14123_v61 = vpop.f32.mrf.mxu1  ;;  %v14247_v16 = vpop.f32.mrf.mxu0 }
 0x6b4   : > { %v18507_v27 = vadd.f32 %v8134_v55, %v7772_v52  ;;  %v8434_v55 = vld [vmem:[#allocation2 + $0xd0] sm:$0xff] }
 0x6b5   : > { %v7582_v44 = vpop.f32.mrf.mxu1  ;;  %v8139_v23 = vpop.f32.mrf.mxu0  ;;  %14361 = vmatmul.mubr.bf16.gmra.mxu1 %v8476_v17  ;;  %14485 = vmatmul.mubr.bf16.gmra.mxu0 %v9033_v58  ;;  %v8991_v52 = vld [vmem:[#allocation2 + $0xd1] sm:$0xff]  ;;  %v8477_v39 = vpack.c.bf16 %v8435_v22, %v8434_v55 }
 0x6b6   : > { %v7773_v62 = vadd.f32 %v7582_v44, %v18249_v37  ;;  %14364 = vmatprep.mubr.msk.bf16.mxu1 %vm15473_vm0, %v18339_v40  ;;  %14488 = vmatprep.mubr.msk.bf16.mxu0 %vm15473_vm0, %v18339_v40  ;;  %v9034_v61 = vpack.c.bf16 %v8992_v6, %v8991_v52 }
 0x6b7   : > { %v14126_v29 = vpop.f32.mrf.mxu1  ;;  %v14250_v1 = vpop.f32.mrf.mxu0 }
 0x6b8   : > { %v18514_v13 = vadd.f32 %v8139_v23, %v7773_v62  ;;  %v8437_v29 = vld [vmem:[#allocation2 + $0xe8] sm:$0xff] }
 0x6b9   : > { %v7585_v11 = vpop.f32.mrf.mxu1  ;;  %v8142_v10 = vpop.f32.mrf.mxu0  ;;  %v8994_v1 = vld [vmem:[#allocation2 + $0xe9] sm:$0xff] }
 0x6ba   : > { %v7774_v24 = vadd.f32 %v7585_v11, %v18255_v48 }
 0x6bb   : > { %v14127_v51 = vpop.f32.mrf.mxu1  ;;  %v14251_v37 = vpop.f32.mrf.mxu0 }
 0x6bc   : > { %v18517_v16 = vadd.f32 %v8142_v10, %v7774_v24  ;;  %v8436_v10 = vld [vmem:[#allocation2 + $0xe0] sm:$0xff] }
 0x6bd   : > { %v7590_v17 = vpop.f32.mrf.mxu1  ;;  %v8147_v58 = vpop.f32.mrf.mxu0  ;;  %14365 = vmatmul.mubr.bf16.gmra.mxu1 %v8477_v39  ;;  %14489 = vmatmul.mubr.bf16.gmra.mxu0 %v9034_v61  ;;  %v8993_v24 = vld [vmem:[#allocation2 + $0xe1] sm:$0xff]  ;;  %v8478_v52 = vpack.c.bf16 %v8437_v29, %v8436_v10 }
 0x6be   : > { %v7775_v44 = vadd.f32 %v7590_v17, %v18257_v57  ;;  %14368 = vmatprep.mubr.msk.bf16.mxu1 %vm15473_vm0, %v18339_v40  ;;  %14492 = vmatprep.mubr.msk.bf16.mxu0 %vm15473_vm0, %v18339_v40  ;;  %v9035_v51 = vpack.c.bf16 %v8994_v1, %v8993_v24 }
 0x6bf   : > { %v14130_v48 = vpop.f32.mrf.mxu1  ;;  %v14254_v23 = vpop.f32.mrf.mxu0 }
 0x6c0   : > { %v18524_v62 = vadd.f32 %v8147_v58, %v7775_v44  ;;  %v8439_v48 = vld [vmem:[#allocation2 + $0xf8] sm:$0xff] }
 0x6c1   : > { %v7593_v22 = vpop.f32.mrf.mxu1  ;;  %v8150_v6 = vpop.f32.mrf.mxu0  ;;  %v8996_v23 = vld [vmem:[#allocation2 + $0xf9] sm:$0xff] }
 0x6c2   : > { %v7776_v11 = vadd.f32 %v7593_v22, %v18263_v59 }
 0x6c3   : > { %v14131_v55 = vpop.f32.mrf.mxu1  ;;  %v14255_v57 = vpop.f32.mrf.mxu0 }
 0x6c4   : > { %v18527_v37 = vadd.f32 %v8150_v6, %v7776_v11  ;;  %v8438_v6 = vld [vmem:[#allocation2 + $0xf0] sm:$0xff] }
 0x6c5   : > { %v7598_v39 = vpop.f32.mrf.mxu1  ;;  %v8155_v61 = vpop.f32.mrf.mxu0  ;;  %14369 = vmatmul.mubr.bf16.gmra.mxu1 %v8478_v52  ;;  %14493 = vmatmul.mubr.bf16.gmra.mxu0 %v9035_v51  ;;  %v8995_v11 = vld [vmem:[#allocation2 + $0xf1] sm:$0xff]  ;;  %v8479_v24 = vpack.c.bf16 %v8439_v48, %v8438_v6 }
 0x6c6   : > { %v7777_v17 = vadd.f32 %v7598_v39, %v18265_v12  ;;  %14372 = vmatprep.mubr.msk.bf16.mxu1 %vm15473_vm0, %v18339_v40  ;;  %14496 = vmatprep.mubr.msk.bf16.mxu0 %vm15473_vm0, %v18339_v40  ;;  %v9036_v55 = vpack.c.bf16 %v8996_v23, %v8995_v11 }
 0x6c7   : > { %v14134_v59 = vpop.f32.mrf.mxu1  ;;  %v14258_v58 = vpop.f32.mrf.mxu0 }
 0x6c8   : > { %v18534_v44 = vadd.f32 %v8155_v61, %v7777_v17  ;;  %v8441_v59 = vld [vmem:[#allocation2 + $0x108] sm:$0xff] }
 0x6c9   : > { %v7601_v29 = vpop.f32.mrf.mxu1  ;;  %v8158_v1 = vpop.f32.mrf.mxu0  ;;  %v8998_v58 = vld [vmem:[#allocation2 + $0x109] sm:$0xff] }
 0x6ca   : > { %v7778_v22 = vadd.f32 %v7601_v29, %v18271_v9 }
 0x6cb   : > { %v14135_v10 = vpop.f32.mrf.mxu1  ;;  %v14259_v12 = vpop.f32.mrf.mxu0 }
 0x6cc   : > { %v18537_v57 = vadd.f32 %v8158_v1, %v7778_v22  ;;  %v8440_v1 = vld [vmem:[#allocation2 + $0x100] sm:$0xff] }
 0x6cd   : > { %v7606_v52 = vpop.f32.mrf.mxu1  ;;  %v8163_v51 = vpop.f32.mrf.mxu0  ;;  %14373 = vmatmul.mubr.bf16.gmra.mxu1 %v8479_v24  ;;  %14497 = vmatmul.mubr.bf16.gmra.mxu0 %v9036_v55  ;;  %v8997_v22 = vld [vmem:[#allocation2 + $0x101] sm:$0xff]  ;;  %v8480_v11 = vpack.c.bf16 %v8441_v59, %v8440_v1 }
 0x6ce   : > { %v7779_v39 = vadd.f32 %v7606_v52, %v18273_v38  ;;  %14376 = vmatprep.mubr.msk.bf16.mxu1 %vm15473_vm0, %v18339_v40  ;;  %14500 = vmatprep.mubr.msk.bf16.mxu0 %vm15473_vm0, %v18339_v40  ;;  %v9037_v10 = vpack.c.bf16 %v8998_v58, %v8997_v22 }
 0x6cf   : > { %v14138_v9 = vpop.f32.mrf.mxu1  ;;  %v14262_v61 = vpop.f32.mrf.mxu0 }
 0x6d0   : > { %v18544_v17 = vadd.f32 %v8163_v51, %v7779_v39  ;;  %v8443_v9 = vld [vmem:[#allocation2 + $0x118] sm:$0xff] }
 0x6d1   : > { %v7609_v48 = vpop.f32.mrf.mxu1  ;;  %v8166_v23 = vpop.f32.mrf.mxu0  ;;  %v9000_v61 = vld [vmem:[#allocation2 + $0x119] sm:$0xff] }
 0x6d2   : > { %v7780_v29 = vadd.f32 %v7609_v48, %v18279_v14 }
 0x6d3   : > { %v14139_v6 = vpop.f32.mrf.mxu1  ;;  %v14263_v38 = vpop.f32.mrf.mxu0 }
 0x6d4   : > { %v18547_v12 = vadd.f32 %v8166_v23, %v7780_v29  ;;  %v8442_v23 = vld [vmem:[#allocation2 + $0x110] sm:$0xff] }
 0x6d5   : > { %v7614_v24 = vpop.f32.mrf.mxu1  ;;  %v8171_v55 = vpop.f32.mrf.mxu0  ;;  %14377 = vmatmul.mubr.bf16.gmra.mxu1 %v8480_v11  ;;  %14501 = vmatmul.mubr.bf16.gmra.mxu0 %v9037_v10  ;;  %v8999_v29 = vld [vmem:[#allocation2 + $0x111] sm:$0xff]  ;;  %v8481_v22 = vpack.c.bf16 %v8443_v9, %v8442_v23 }
 0x6d6   : > { %v7781_v52 = vadd.f32 %v7614_v24, %v18281_v60  ;;  %14380 = vmatprep.mubr.msk.bf16.mxu1 %vm15473_vm0, %v18339_v40  ;;  %14504 = vmatprep.mubr.msk.bf16.mxu0 %vm15473_vm0, %v18339_v40  ;;  %v9038_v6 = vpack.c.bf16 %v9000_v61, %v8999_v29 }
 0x6d7   : > { %v14142_v14 = vpop.f32.mrf.mxu1  ;;  %v14266_v51 = vpop.f32.mrf.mxu0 }
 0x6d8   : > { %v18554_v39 = vadd.f32 %v8171_v55, %v7781_v52  ;;  %v8445_v14 = vld [vmem:[#allocation2 + $0x128] sm:$0xff] }
 0x6d9   : > { %v7617_v59 = vpop.f32.mrf.mxu1  ;;  %v8174_v58 = vpop.f32.mrf.mxu0  ;;  %v9002_v51 = vld [vmem:[#allocation2 + $0x129] sm:$0xff] }
 0x6da   : > { %v7782_v48 = vadd.f32 %v7617_v59, %v18287_v5 }
 0x6db   : > { %v14143_v1 = vpop.f32.mrf.mxu1  ;;  %v14267_v60 = vpop.f32.mrf.mxu0 }
 0x6dc   : > { %v18557_v38 = vadd.f32 %v8174_v58, %v7782_v48  ;;  %v8444_v58 = vld [vmem:[#allocation2 + $0x120] sm:$0xff] }
 0x6dd   : > { %v7622_v11 = vpop.f32.mrf.mxu1  ;;  %v8179_v10 = vpop.f32.mrf.mxu0  ;;  %14381 = vmatmul.mubr.bf16.gmra.mxu1 %v8481_v22  ;;  %14505 = vmatmul.mubr.bf16.gmra.mxu0 %v9038_v6  ;;  %v9001_v48 = vld [vmem:[#allocation2 + $0x121] sm:$0xff]  ;;  %v8482_v29 = vpack.c.bf16 %v8445_v14, %v8444_v58 }
 0x6de   : > { %v7783_v24 = vadd.f32 %v7622_v11, %v18289_v7  ;;  %14384 = vmatprep.mubr.msk.bf16.mxu1 %vm15473_vm0, %v18339_v40  ;;  %14508 = vmatprep.mubr.msk.bf16.mxu0 %vm15473_vm0, %v18339_v40  ;;  %v9039_v1 = vpack.c.bf16 %v9002_v51, %v9001_v48  ;;  %v18570_v11 = vld [vmem:[#allocation2] sm:$0xff] }
 0x6df   : > { %v14146_v5 = vpop.f32.mrf.mxu1  ;;  %v14270_v55 = vpop.f32.mrf.mxu0 }
 0x6e0   : > { %v18564_v52 = vadd.f32 %v8179_v10, %v7783_v24  ;;  %v8447_v5 = vld [vmem:[#allocation2 + $0x138] sm:$0xff] }
 0x6e1   : > { %v7625_v9 = vpop.f32.mrf.mxu1  ;;  %v8182_v61 = vpop.f32.mrf.mxu0  ;;  %v9004_v55 = vld [vmem:[#allocation2 + $0x139] sm:$0xff] }
 0x6e2   : > { %v7784_v59 = vadd.f32 %v7625_v9, %v18295_v33 }
 0x6e3   : > { %v14147_v23 = vpop.f32.mrf.mxu1  ;;  %v14271_v7 = vpop.f32.mrf.mxu0 }
 0x6e4   : > { %v18567_v60 = vadd.f32 %v8182_v61, %v7784_v59  ;;  %v8446_v61 = vld [vmem:[#allocation2 + $0x130] sm:$0xff] }
 0x6e5   : > { %v7630_v22 = vpop.f32.mrf.mxu1  ;;  %v8187_v40 = vpop.f32.mrf.mxu0  ;;  %14385 = vmatmul.mubr.bf16.gmra.mxu1 %v8482_v29  ;;  %14509 = vmatmul.mubr.bf16.gmra.mxu0 %v9039_v1  ;;  %v8483_v48 = vpack.c.bf16 %v8447_v5, %v8446_v61 }
 0x6e6   : > { %v7785_v6 = vadd.f32 %v7630_v22, %v18297_v18  ;;  %14388 = vmatprep.mubr.msk.bf16.mxu1 %vm15473_vm0, %v18570_v11  ;;  %14512 = vmatprep.mubr.msk.bf16.mxu0 %vm15473_vm0, %v18570_v11  ;;  %v9003_v18 = vld [vmem:[#allocation2 + $0x131] sm:$0xff] }
 0x6e7   : > { %v14150_v33 = vpop.f32.mrf.mxu1  ;;  %v14274_v10 = vpop.f32.mrf.mxu0  ;;  %v9040_v23 = vpack.c.bf16 %v9004_v55, %v9003_v18 }
 0x6e8   : > { %v18576_v24 = vadd.f32 %v8187_v40, %v7785_v6  ;;  %v8449_v33 = vld [vmem:[#allocation2 + $0x148] sm:$0xff] }
 0x6e9   : > { %v7633_v14 = vpop.f32.mrf.mxu1  ;;  %v8190_v51 = vpop.f32.mrf.mxu0  ;;  %v9006_v10 = vld [vmem:[#allocation2 + $0x149] sm:$0xff] }
 0x6ea   : > { %v7786_v9 = vadd.f32 %v7633_v14, %v18303_v35 }
 0x6eb   : > { %v14151_v59 = vpop.f32.mrf.mxu1  ;;  %v14275_v58 = vpop.f32.mrf.mxu0 }
 0x6ec   : > { %v18579_v7 = vadd.f32 %v8190_v51, %v7786_v9  ;;  %v8448_v51 = vld [vmem:[#allocation2 + $0x140] sm:$0xff] }
 0x6ed   : > { %v7638_v29 = vpop.f32.mrf.mxu1  ;;  %v8195_v1 = vpop.f32.mrf.mxu0  ;;  %14389 = vmatmul.mubr.bf16.gmra.mxu1 %v8483_v48  ;;  %14513 = vmatmul.mubr.bf16.gmra.mxu0 %v9040_v23  ;;  %v9005_v9 = vld [vmem:[#allocation2 + $0x141] sm:$0xff]  ;;  %v8484_v18 = vpack.c.bf16 %v8449_v33, %v8448_v51 }
 0x6ee   : > { %v7787_v22 = vadd.f32 %v7638_v29, %v18305_v47  ;;  %14392 = vmatprep.mubr.msk.bf16.mxu1 %vm15473_vm0, %v18570_v11  ;;  %14516 = vmatprep.mubr.msk.bf16.mxu0 %vm15473_vm0, %v18570_v11  ;;  %v9041_v59 = vpack.c.bf16 %v9006_v10, %v9005_v9 }
 0x6ef   : > { %v14154_v35 = vpop.f32.mrf.mxu1  ;;  %v14278_v40 = vpop.f32.mrf.mxu0 }
 0x6f0   : > { %v18586_v6 = vadd.f32 %v8195_v1, %v7787_v22  ;;  %v8451_v35 = vld [vmem:[#allocation2 + $0x158] sm:$0xff] }
 0x6f1   : > { %v7641_v5 = vpop.f32.mrf.mxu1  ;;  %v8198_v55 = vpop.f32.mrf.mxu0  ;;  %v9008_v40 = vld [vmem:[#allocation2 + $0x159] sm:$0xff] }
 0x6f2   : > { %v7788_v14 = vadd.f32 %v7641_v5, %v18311_v49 }
 0x6f3   : > { %v14155_v61 = vpop.f32.mrf.mxu1  ;;  %v14279_v47 = vpop.f32.mrf.mxu0 }
 0x6f4   : > { %v18589_v58 = vadd.f32 %v8198_v55, %v7788_v14  ;;  %v8450_v55 = vld [vmem:[#allocation2 + $0x150] sm:$0xff] }
 0x6f5   : > { %v7646_v48 = vpop.f32.mrf.mxu1  ;;  %v8203_v23 = vpop.f32.mrf.mxu0  ;;  %14393 = vmatmul.mubr.bf16.gmra.mxu1 %v8484_v18  ;;  %14517 = vmatmul.mubr.bf16.gmra.mxu0 %v9041_v59  ;;  %v9007_v14 = vld [vmem:[#allocation2 + $0x151] sm:$0xff]  ;;  %v8485_v9 = vpack.c.bf16 %v8451_v35, %v8450_v55 }
 0x6f6   : > { %v7789_v29 = vadd.f32 %v7646_v48, %v18313_v2  ;;  %14396 = vmatprep.mubr.msk.bf16.mxu1 %vm15473_vm0, %v18570_v11  ;;  %14520 = vmatprep.mubr.msk.bf16.mxu0 %vm15473_vm0, %v18570_v11  ;;  %v9042_v61 = vpack.c.bf16 %v9008_v40, %v9007_v14 }
 0x6f7   : > { %v14158_v49 = vpop.f32.mrf.mxu1  ;;  %v14282_v1 = vpop.f32.mrf.mxu0 }
 0x6f8   : > { %v18596_v22 = vadd.f32 %v8203_v23, %v7789_v29  ;;  %v8453_v49 = vld [vmem:[#allocation2 + $0x168] sm:$0xff] }
 0x6f9   : > { %v7649_v33 = vpop.f32.mrf.mxu1  ;;  %v8206_v10 = vpop.f32.mrf.mxu0  ;;  %v9010_v1 = vld [vmem:[#allocation2 + $0x169] sm:$0xff] }
 0x6fa   : > { %v7790_v5 = vadd.f32 %v7649_v33, %v18319_v53 }
 0x6fb   : > { %v14159_v51 = vpop.f32.mrf.mxu1  ;;  %v14283_v2 = vpop.f32.mrf.mxu0 }
 0x6fc   : > { %v18599_v47 = vadd.f32 %v8206_v10, %v7790_v5  ;;  %v8452_v10 = vld [vmem:[#allocation2 + $0x160] sm:$0xff] }
 0x6fd   : > { %v7654_v18 = vpop.f32.mrf.mxu1  ;;  %v8211_v59 = vpop.f32.mrf.mxu0  ;;  %14397 = vmatmul.mubr.bf16.gmra.mxu1 %v8485_v9  ;;  %14521 = vmatmul.mubr.bf16.gmra.mxu0 %v9042_v61  ;;  %v9009_v5 = vld [vmem:[#allocation2 + $0x161] sm:$0xff]  ;;  %v8486_v14 = vpack.c.bf16 %v8453_v49, %v8452_v10  ;;  %v9012_v49 = vld [vmem:[#allocation2 + $0x179] sm:$0xff]  ;;  %v8454_v10 = vld [vmem:[#allocation2 + $0x170] sm:$0xff] }
 0x6fe   : > { %v7791_v48 = vadd.f32 %v7654_v18, %v18321_v50  ;;  %14400 = vmatprep.mubr.msk.bf16.mxu1 %vm15473_vm0, %v18570_v11  ;;  %14524 = vmatprep.mubr.msk.bf16.mxu0 %vm15473_vm0, %v18570_v11  ;;  %v9043_v51 = vpack.c.bf16 %v9010_v1, %v9009_v5  ;;  %v19761_v18 = vld [vmem:[#allocation74_spill] sm:$0xff]  ;;  %v9011_v5 = vld [vmem:[#allocation2 + $0x171] sm:$0xff] }
 0x6ff   : > { %v14162_v53 = vpop.f32.mrf.mxu1  ;;  %v14286_v23 = vpop.f32.mrf.mxu0 }
 0x700   : > { %v18606_v29 = vadd.f32 %v8211_v59, %v7791_v48  ;;  %v8455_v23 = vld [vmem:[#allocation2 + $0x178] sm:$0xff] }
 0x701   : > { %v7657_v35 = vpop.f32.mrf.mxu1  ;;  %v8214_v40 = vpop.f32.mrf.mxu0 }
 0x702   : > { %v7792_v33 = vadd.f32 %v7657_v35, %v18327_v63 }
 0x703   : > { %v14163_v55 = vpop.f32.mrf.mxu1  ;;  %v14287_v50 = vpop.f32.mrf.mxu0 }
 0x704   : > { %v18609_v2 = vadd.f32 %v8214_v40, %v7792_v33  ;;  %v19763_v40 = vld [vmem:[#allocation75_spill] sm:$0xff] }
 0x705   : > { %v7662_v9 = vpop.f32.mrf.mxu1  ;;  %v8219_v61 = vpop.f32.mrf.mxu0  ;;  %14401 = vmatmul.mubr.bf16.gmra.mxu1 %v8486_v14  ;;  %14525 = vmatmul.mubr.bf16.gmra.mxu0 %v9043_v51  ;;  %v8487_v14 = vpack.c.bf16 %v8455_v23, %v8454_v10  ;;  %v9044_v51 = vpack.c.bf16 %v9012_v49, %v9011_v5  ;;  %v8457_v23 = vld [vmem:[#allocation2 + $0x188] sm:$0xff]  ;;  %v8456_v5 = vld [vmem:[#allocation2 + $0x180] sm:$0xff] }
 0x706   : > { %19760 = vst [vmem:[#allocation30_spill] sm:$0xff] %v18609_v2  ;;  %v7793_v59 = vadd.f32 %v7662_v9, %v19761_v18  ;;  %14404 = vmatprep.mubr.msk.bf16.mxu1 %vm15473_vm0, %v18570_v11  ;;  %14528 = vmatprep.mubr.msk.bf16.mxu0 %vm15473_vm0, %v18570_v11  ;;  %v9014_v49 = vld [vmem:[#allocation2 + $0x189] sm:$0xff] }
 0x707   : > { %v14166_v63 = vpop.f32.mrf.mxu1  ;;  %v14290_v48 = vpop.f32.mrf.mxu0 }
 0x708   : > { %v18616_v53 = vadd.f32 %v8219_v61, %v7793_v59  ;;  %v19765_v61 = vld [vmem:[#allocation18_spill] sm:$0xff] }
 0x709   : > { %v7665_v1 = vpop.f32.mrf.mxu1  ;;  %v8222_v35 = vpop.f32.mrf.mxu0 }
 0x70a   : > { %19762 = vst [vmem:[#allocation33_spill] sm:$0xff] %v18616_v53  ;;  %v7794_v33 = vadd.f32 %v7665_v1, %v19763_v40 }
 0x70b   : > { %v14167_v55 = vpop.f32.mrf.mxu1  ;;  %v14291_v50 = vpop.f32.mrf.mxu0 }
 0x70c   : > { %v18619_v9 = vadd.f32 %v8222_v35, %v7794_v33  ;;  %v19767_v33 = vld [vmem:[#allocation76_spill] sm:$0xff]  ;;  %v9013_v55 = vld [vmem:[#allocation2 + $0x181] sm:$0xff] }
 0x70d   : > { %v7670_v18 = vpop.f32.mrf.mxu1  ;;  %v8227_v2 = vpop.f32.mrf.mxu0  ;;  %14405 = vmatmul.mubr.bf16.gmra.mxu1 %v8487_v14  ;;  %14529 = vmatmul.mubr.bf16.gmra.mxu0 %v9044_v51  ;;  %v8488_v51 = vpack.c.bf16 %v8457_v23, %v8456_v5  ;;  %v8459_v23 = vld [vmem:[#allocation2 + $0x198] sm:$0xff] }
 0x70e   : > { %19764 = vst [vmem:[#allocation34_spill] sm:$0xff] %v18619_v9  ;;  %v7795_v59 = vadd.f32 %v7670_v18, %v19765_v61  ;;  %14408 = vmatprep.mubr.msk.bf16.mxu1 %vm15473_vm0, %v18570_v11  ;;  %14532 = vmatprep.mubr.msk.bf16.mxu0 %vm15473_vm0, %v18570_v11  ;;  %v9045_v18 = vpack.c.bf16 %v9014_v49, %v9013_v55  ;;  %v9016_v49 = vld [vmem:[#allocation2 + $0x199] sm:$0xff]  ;;  %v8458_v55 = vld [vmem:[#allocation2 + $0x190] sm:$0xff] }
 0x70f   : > { %v14170_v63 = vpop.f32.mrf.mxu1  ;;  %v14294_v48 = vpop.f32.mrf.mxu0 }
 0x710   : > { %v18626_v1 = vadd.f32 %v8227_v2, %v7795_v59  ;;  %v19769_v2 = vld [vmem:[#allocation21_spill] sm:$0xff] }
 0x711   : > { %v7673_v35 = vpop.f32.mrf.mxu1  ;;  %v8230_v40 = vpop.f32.mrf.mxu0 }
 0x712   : > { %19766 = vst [vmem:[#allocation37_spill] sm:$0xff] %v18626_v1  ;;  %v7796_v10 = vadd.f32 %v7673_v35, %v19767_v33 }
 0x713   : > { %v14171_v50 = vpop.f32.mrf.mxu1  ;;  %v14295_v14 = vpop.f32.mrf.mxu0 }
 0x714   : > { %v18629_v61 = vadd.f32 %v8230_v40, %v7796_v10  ;;  %v19770_v10 = vld [vmem:[#allocation77_spill] sm:$0xff]  ;;  %v9015_v50 = vld [vmem:[#allocation2 + $0x191] sm:$0xff] }
 0x715   : > { %v7678_v9 = vpop.f32.mrf.mxu1  ;;  %v8235_v53 = vpop.f32.mrf.mxu0  ;;  %14409 = vmatmul.mubr.bf16.gmra.mxu1 %v8488_v51  ;;  %14533 = vmatmul.mubr.bf16.gmra.mxu0 %v9045_v18  ;;  %v8489_v51 = vpack.c.bf16 %v8459_v23, %v8458_v55  ;;  %v9046_v18 = vpack.c.bf16 %v9016_v49, %v9015_v50  ;;  %v8461_v23 = vld [vmem:[#allocation2 + $0x1a8] sm:$0xff]  ;;  %v8460_v50 = vld [vmem:[#allocation2 + $0x1a0] sm:$0xff] }
 0x716   : > { %19768 = vst [vmem:[#allocation38_spill] sm:$0xff] %v18629_v61  ;;  %v7797_v59 = vadd.f32 %v7678_v9, %v19769_v2  ;;  %14412 = vmatprep.mubr.msk.bf16.mxu1 %vm15473_vm0, %v18570_v11  ;;  %14536 = vmatprep.mubr.msk.bf16.mxu0 %vm15473_vm0, %v18570_v11  ;;  %v9018_v49 = vld [vmem:[#allocation2 + $0x1a9] sm:$0xff] }
 0x717   : > { %v14174_v63 = vpop.f32.mrf.mxu1  ;;  %v14298_v48 = vpop.f32.mrf.mxu0 }
 0x718   : > { %v18636_v35 = vadd.f32 %v8235_v53, %v7797_v59  ;;  %v19772_v53 = vld [vmem:[#allocation22_spill] sm:$0xff] }
 0x719   : > { %v7681_v40 = vpop.f32.mrf.mxu1  ;;  %v8238_v33 = vpop.f32.mrf.mxu0 }
 0x71a   : > { %v7798_v5 = vadd.f32 %v7681_v40, %v19770_v10 }
 0x71b   : > { %v14175_v14 = vpop.f32.mrf.mxu1  ;;  %v14299_v9 = vpop.f32.mrf.mxu0 }
 0x71c   : > { %v18639_v2 = vadd.f32 %v8238_v33, %v7798_v5  ;;  %v19773_v5 = vld [vmem:[#allocation25_spill] sm:$0xff] }
 0x71d   : > { %v7686_v61 = vpop.f32.mrf.mxu1  ;;  %v8243_v1 = vpop.f32.mrf.mxu0  ;;  %14413 = vmatmul.mubr.bf16.gmra.mxu1 %v8489_v51  ;;  %14537 = vmatmul.mubr.bf16.gmra.mxu0 %v9046_v18  ;;  %v9017_v14 = vld [vmem:[#allocation2 + $0x1a1] sm:$0xff]  ;;  %v8490_v51 = vpack.c.bf16 %v8461_v23, %v8460_v50  ;;  %v8463_v23 = vld [vmem:[#allocation2 + $0x1b8] sm:$0xff]  ;;  %v8462_v50 = vld [vmem:[#allocation2 + $0x1b0] sm:$0xff] }
 0x71e   : > { %19771 = vst [vmem:[#allocation41_spill] sm:$0xff] %v18639_v2  ;;  %v7799_v59 = vadd.f32 %v7686_v61, %v19772_v53  ;;  %14416 = vmatprep.mubr.msk.bf16.mxu1 %vm15473_vm0, %v18570_v11  ;;  %14540 = vmatprep.mubr.msk.bf16.mxu0 %vm15473_vm0, %v18570_v11  ;;  %v9047_v18 = vpack.c.bf16 %v9018_v49, %v9017_v14  ;;  %v9020_v49 = vld [vmem:[#allocation2 + $0x1b9] sm:$0xff]  ;;  %v9019_v14 = vld [vmem:[#allocation2 + $0x1b1] sm:$0xff] }
 0x71f   : > { %v14178_v63 = vpop.f32.mrf.mxu1  ;;  %v14302_v48 = vpop.f32.mrf.mxu0 }
 0x720   : > { %v18646_v40 = vadd.f32 %v8243_v1, %v7799_v59 }
 0x721   : > { %v7689_v33 = vpop.f32.mrf.mxu1  ;;  %v8246_v10 = vpop.f32.mrf.mxu0 }
 0x722   : > { %v7800_v55 = vadd.f32 %v7689_v33, %v19773_v5 }
 0x723   : > { %v14179_v9 = vpop.f32.mrf.mxu1  ;;  %v14303_v61 = vpop.f32.mrf.mxu0 }
 0x724   : > { %v18649_v53 = vadd.f32 %v8246_v10, %v7800_v55  ;;  %v9048_v61 = vpack.c.bf16 %v9020_v49, %v9019_v14  ;;  %v9021_v49 = vld [vmem:[#allocation2 + $0x1c1] sm:$0xff] }
 0x725   : > { %v8592_v2 = vpop.f32.mrf.mxu1  ;;  %14417 = vmatmul.mubr.bf16.gmra.mxu1 %v8490_v51  ;;  %v9149_v63 = vpop.f32.mrf.mxu0  ;;  %14541 = vmatmul.mubr.bf16.gmra.mxu0 %v9047_v18 }
 0x726   : > { %v8861_v1 = vadd.f32 %v8592_v2, %v18368_v56  ;;  %14420 = vmatprep.mubr.msk.bf16.mxu1 %vm15473_vm0, %v18570_v11  ;;  %14544 = vmatprep.mubr.msk.bf16.mxu0 %vm15473_vm0, %v18570_v11  ;;  %v8491_v2 = vpack.c.bf16 %v8463_v23, %v8462_v50  ;;  %v8465_v23 = vld [vmem:[#allocation2 + $0x1c8] sm:$0xff] }
 0x727   : > { %v14322_v59 = vpop.f32.mrf.mxu1  ;;  %v14446_v48 = vpop.f32.mrf.mxu0  ;;  %v19775_v50 = vld [vmem:[#allocation26_spill] sm:$0xff] }
 0x728   : > { %v18656_v33 = vadd.f32 %v9149_v63, %v8861_v1 }
 0x729   : > { %v8595_v10 = vpop.f32.mrf.mxu1  ;;  %v9152_v5 = vpop.f32.mrf.mxu0 }
 0x72a   : > { %v8862_v55 = vadd.f32 %v8595_v10, %v18371_v43  ;;  %v9022_v10 = vld [vmem:[#allocation2 + $0x1c9] sm:$0xff] }
 0x72b   : > { %v14323_v9 = vpop.f32.mrf.mxu1  ;;  %v14447_v56 = vpop.f32.mrf.mxu0 }
 0x72c   : > { %v18659_v51 = vadd.f32 %v9152_v5, %v8862_v55  ;;  %v8464_v9 = vld [vmem:[#allocation2 + $0x1c0] sm:$0xff] }
 0x72d   : > { %v8600_v18 = vpop.f32.mrf.mxu1  ;;  %14421 = vmatmul.mubr.bf16.gmra.mxu1 %v8491_v2  ;;  %v9157_v59 = vpop.f32.mrf.mxu0  ;;  %14545 = vmatmul.mubr.bf16.gmra.mxu0 %v9048_v61  ;;  %v8492_v2 = vpack.c.bf16 %v8465_v23, %v8464_v9  ;;  %v9049_v61 = vpack.c.bf16 %v9022_v10, %v9021_v49  ;;  %v9527_v23 = vld [vmem:[#allocation2 + $0x3f] sm:$0xff] }
 0x72e   : > { %19774 = vst [vmem:[#allocation42_spill] sm:$0xff] %v18659_v51  ;;  %v8863_v63 = vadd.f32 %v8600_v18, %v18378_v41  ;;  %14424 = vmatprep.mubr.msk.bf16.mxu1 %vm15473_vm0, %v18570_v11  ;;  %14548 = vmatprep.mubr.msk.bf16.mxu0 %vm15473_vm0, %v18570_v11  ;;  %v10084_v49 = vld [vmem:[#allocation2 + $0x40] sm:$0xff] }
 0x72f   : > { %v14326_v43 = vpop.f32.mrf.mxu1  ;;  %v14450_v1 = vpop.f32.mrf.mxu0 }
 0x730   : > { %v18666_v48 = vadd.f32 %v9157_v59, %v8863_v63  ;;  %v19777_v59 = vld [vmem:[#allocation29_spill] sm:$0xff] }
 0x731   : > { %v8603_v5 = vpop.f32.mrf.mxu1  ;;  %v9160_v55 = vpop.f32.mrf.mxu0 }
 0x732   : > { %v8864_v14 = vadd.f32 %v8603_v5, %v19775_v50 }
 0x733   : > { %v14327_v56 = vpop.f32.mrf.mxu1  ;;  %v14451_v41 = vpop.f32.mrf.mxu0 }
 0x734   : > { %v18669_v18 = vadd.f32 %v9160_v55, %v8864_v14  ;;  %v9526_v14 = vld [vmem:[#allocation2 + $0x37] sm:$0xff]  ;;  %v15282_v41 = vld [vmem:[#allocation9 + $0x238] sm:$0xff]  }
 0x735   : > { %v8608_v51 = vpop.f32.mrf.mxu1  ;;  %14425 = vmatmul.mubr.bf16.gmra.mxu1 %v8492_v2  ;;  %v9165_v43 = vpop.f32.mrf.mxu0  ;;  %14549 = vmatmul.mubr.bf16.gmra.mxu0 %v9049_v61  ;;  %v10083_v56 = vld [vmem:[#allocation2 + $0x38] sm:$0xff] }
 0x736   : > { %19776 = vst [vmem:[#allocation45_spill] sm:$0xff] %v18669_v18  ;;  %v8865_v63 = vadd.f32 %v8608_v51, %v19777_v59  ;;  %14568 = vmatprep.mubr.msk.bf16.mxu1 %vm15473_vm0, %v18570_v11  ;;  %14692 = vmatprep.mubr.msk.bf16.mxu0 %vm15473_vm0, %v18570_v11  ;;  %v15283_v51 = vld [vmem:[%s19468_s8 + $0x38] sm:$0xff]   ;;  %v9580_v59 = vpack.c.bf16 %v9527_v23, %v9526_v14 }
 0x737   : > { %v14330_v1 = vpop.f32.mrf.mxu1  ;;  %v14454_v5 = vpop.f32.mrf.mxu0 }
 0x738   : > { %v18676_v50 = vadd.f32 %v9165_v43, %v8865_v63  ;;  %v10137_v1 = vpack.c.bf16 %v10084_v49, %v10083_v56  ;;  %v9529_v49 = vld [vmem:[#allocation2 + $0x4f] sm:$0xff] }
 0x739   : > { %v8611_v10 = vpop.f32.mrf.mxu1  ;;  %v9168_v55 = vpop.f32.mrf.mxu0  ;;  %v10085_v56 = vld [vmem:[#allocation2 + $0x48] sm:$0xff] }
 0x73a   : > { %19778 = vst [vmem:[#allocation46_spill] sm:$0xff] %v18676_v50  ;;  %v8866_v9 = vadd.f32 %v8611_v10, %v18391_v46  ;;  %v15284_v46 = vld [vmem:[#allocation9 + $0x230] sm:$0xff]   ;;  %v15285_v10 = vld [vmem:[%s19468_s8 + $0x30] sm:$0xff]  }
 0x73b   : > { %v14331_v2 = vpop.f32.mrf.mxu1  ;;  %v14455_v61 = vpop.f32.mrf.mxu0 }
 0x73c   : > { %v18682_v5 = vadd.f32 %v9168_v55, %v8866_v9  ;;  %v10086_v55 = vld [vmem:[#allocation2 + $0x50] sm:$0xff] }
 0x73d   : > { %v8616_v43 = vpop.f32.mrf.mxu1  ;;  %v9173_v63 = vpop.f32.mrf.mxu0  ;;  %14569 = vmatmul.mubr.bf16.vlgmr.msra.gmra.mxu1 %v9580_v59  ;;  %14693 = vmatmul.mubr.bf16.vlgmr.msra.gmra.mxu0 %v10137_v1  ;;  %v10138_v59 = vpack.c.bf16 %v10086_v55, %v10085_v56  ;;  %v15287_v1 = vld [vmem:[%s19468_s8 + $0x28] sm:$0xff]   ;;  %v15289_v55 = vld [vmem:[%s19468_s8 + $0x20] sm:$0xff]  }
 0x73e   : > { %v8867_v50 = vadd.f32 %v8616_v43, %v18398_v42  ;;  %14801 = vmatpush3.bf16.msra.mxu1 %v15282_v41  ;;  %14925 = vmatpush3.bf16.msra.mxu0 %v15283_v51 }
 0x73f   : > { %v14334_v18 = vpop.f32.mrf.mxu1  ;;  %v14458_v2 = vpop.f32.mrf.mxu0  ;;  %14572 = vmatprep.mubr.msk.bf16.mxu1 %vm15473_vm0, %v18570_v11  ;;  %14696 = vmatprep.mubr.msk.bf16.mxu0 %vm15473_vm0, %v18570_v11 }
 0x740   : > { %v18692_v23 = vadd.f32 %v9173_v63, %v8867_v50  ;;  %14802 = vmatprep.subr.bf16.mxu1 %v18570_v11  ;;  %14926 = vmatprep.subr.bf16.mxu0 %v18570_v11  ;;  %v9528_v18 = vld [vmem:[#allocation2 + $0x47] sm:$0xff]  ;;  %v15286_v50 = vld [vmem:[#allocation9 + $0x228] sm:$0xff]  }
 0x741   : > { %v8619_v42 = vpop.f32.mrf.mxu1  ;;  %v9176_v14 = vpop.f32.mrf.mxu0  ;;  %v9581_v61 = vpack.c.bf16 %v9529_v49, %v9528_v18  ;;  %v15288_v49 = vld [vmem:[#allocation9 + $0x220] sm:$0xff]  }
 0x742   : > { %v8868_v9 = vadd.f32 %v8619_v42, %v18405_v26  ;;  %14803 = vmatpush3.bf16.msra.mxu1 %v15284_v46  ;;  %14927 = vmatpush3.bf16.msra.mxu0 %v15285_v10 }
 0x743   : > { %v14335_v41 = vpop.f32.mrf.mxu1  ;;  %v14459_v51 = vpop.f32.mrf.mxu0  ;;  %14804 = vmatprep.subr.bf16.mxu1 %v18570_v11  ;;  %14928 = vmatprep.subr.bf16.mxu0 %v18570_v11 }
 0x744   : > { %v18702_v43 = vadd.f32 %v9176_v14, %v8868_v9  ;;  %v9531_v14 = vld [vmem:[#allocation2 + $0x5f] sm:$0xff]  ;;  %v9530_v41 = vld [vmem:[#allocation2 + $0x57] sm:$0xff] }
 0x745   : > { %v8624_v26 = vpop.f32.mrf.mxu1  ;;  %v9181_v63 = vpop.f32.mrf.mxu0  ;;  %14573 = vmatmul.mubr.bf16.gmra.mxu1 %v9581_v61  ;;  %14697 = vmatmul.mubr.bf16.gmra.mxu0 %v10138_v59  ;;  %v10088_v9 = vld [vmem:[#allocation2 + $0x60] sm:$0xff]  ;;  %v10087_v51 = vld [vmem:[#allocation2 + $0x58] sm:$0xff] }
 0x746   : > { %v8869_v46 = vadd.f32 %v8624_v26, %v18412_v0  ;;  %14576 = vmatprep.mubr.msk.bf16.mxu1 %vm15473_vm0, %v18570_v11  ;;  %14700 = vmatprep.mubr.msk.bf16.mxu0 %vm15473_vm0, %v18570_v11  ;;  %v15290_v26 = vld [vmem:[#allocation9 + $0x218] sm:$0xff]  }
 0x747   : > { %v14338_v10 = vpop.f32.mrf.mxu1  ;;  %v14462_v2 = vpop.f32.mrf.mxu0  ;;  %14805 = vmatpush3.bf16.msra.mxu1 %v15286_v50  ;;  %14929 = vmatpush3.bf16.msra.mxu0 %v15287_v1  ;;  %v9582_v50 = vpack.c.bf16 %v9531_v14, %v9530_v41  ;;  %v10139_v1 = vpack.c.bf16 %v10088_v9, %v10087_v51  ;;  %v15292_v14 = vld [vmem:[#allocation9 + $0x210] sm:$0xff]   ;;  %v15293_v9 = vld [vmem:[%s19468_s8 + $0x10] sm:$0xff]  }
 0x748   : > { %v18712_v42 = vadd.f32 %v9181_v63, %v8869_v46  ;;  %14806 = vmatprep.subr.bf16.mxu1 %v18570_v11  ;;  %14930 = vmatprep.subr.bf16.mxu0 %v18570_v11  ;;  %v15291_v63 = vld [vmem:[%s19468_s8 + $0x18] sm:$0xff]  }
 0x749   : > { %v8627_v0 = vpop.f32.mrf.mxu1  ;;  %v9184_v18 = vpop.f32.mrf.mxu0 }
 0x74a   : > { %v8870_v56 = vadd.f32 %v8627_v0, %v18417_v4 }
 0x74b   : > { %v14339_v61 = vpop.f32.mrf.mxu1  ;;  %v14463_v59 = vpop.f32.mrf.mxu0  ;;  %14807 = vmatpush3.bf16.msra.mxu1 %v15288_v49  ;;  %14931 = vmatpush3.bf16.msra.mxu0 %v15289_v55 }
 0x74c   : > { %v18720_v46 = vadd.f32 %v9184_v18, %v8870_v56  ;;  %14808 = vmatprep.subr.bf16.mxu1 %v18570_v11  ;;  %14932 = vmatprep.subr.bf16.mxu0 %v18570_v11  ;;  %v9533_v18 = vld [vmem:[#allocation2 + $0x6f] sm:$0xff]  ;;  %v9532_v61 = vld [vmem:[#allocation2 + $0x67] sm:$0xff] }
 0x74d   : > { %v8632_v4 = vpop.f32.mrf.mxu1  ;;  %v9189_v10 = vpop.f32.mrf.mxu0  ;;  %14577 = vmatmul.mubr.bf16.gmra.mxu1 %v9582_v50  ;;  %14701 = vmatmul.mubr.bf16.gmra.mxu0 %v10139_v1  ;;  %v10090_v56 = vld [vmem:[#allocation2 + $0x70] sm:$0xff]  ;;  %v10089_v59 = vld [vmem:[#allocation2 + $0x68] sm:$0xff] }
 0x74e   : > { %v8871_v2 = vadd.f32 %v8632_v4, %v18426_v28  ;;  %14580 = vmatprep.mubr.msk.bf16.mxu1 %vm15473_vm0, %v18570_v11  ;;  %14704 = vmatprep.mubr.msk.bf16.mxu0 %vm15473_vm0, %v18570_v11 }
 0x74f   : > { %v14342_v49 = vpop.f32.mrf.mxu1  ;;  %v14466_v55 = vpop.f32.mrf.mxu0  ;;  %14809 = vmatpush3.bf16.msra.mxu1 %v15290_v26  ;;  %14933 = vmatpush3.bf16.msra.mxu0 %v15291_v63  ;;  %v9583_v26 = vpack.c.bf16 %v9533_v18, %v9532_v61  ;;  %v10140_v63 = vpack.c.bf16 %v10090_v56, %v10089_v59  ;;  %v10092_v18 = vld [vmem:[#allocation2 + $0x80] sm:$0xff]  ;;  %v10091_v61 = vld [vmem:[#allocation2 + $0x78] sm:$0xff] }
 0x750   : > { %v18732_v0 = vadd.f32 %v9189_v10, %v8871_v2  ;;  %14810 = vmatprep.subr.bf16.mxu1 %v18570_v11  ;;  %14934 = vmatprep.subr.bf16.mxu0 %v18570_v11 }
 0x751   : > { %v8635_v28 = vpop.f32.mrf.mxu1  ;;  %v9192_v41 = vpop.f32.mrf.mxu0 }
 0x752   : > { %v8872_v51 = vadd.f32 %v8635_v28, %v18431_v8 }
 0x753   : > { %v14343_v50 = vpop.f32.mrf.mxu1  ;;  %v14467_v1 = vpop.f32.mrf.mxu0  ;;  %14811 = vmatpush3.bf16.msra.mxu1 %v15292_v14  ;;  %14935 = vmatpush3.bf16.msra.mxu0 %v15293_v9  ;;  %v9535_v9 = vld [vmem:[#allocation2 + $0x7f] sm:$0xff] }
 0x754   : > { %v18737_v4 = vadd.f32 %v9192_v41, %v8872_v51  ;;  %14812 = vmatprep.subr.bf16.mxu1 %v18570_v11  ;;  %14936 = vmatprep.subr.bf16.mxu0 %v18570_v11  ;;  %v9534_v51 = vld [vmem:[#allocation2 + $0x77] sm:$0xff]  ;;  %v10141_v1 = vpack.c.bf16 %v10092_v18, %v10091_v61  ;;  %v10093_v61 = vld [vmem:[#allocation2 + $0x88] sm:$0xff] }
 0x755   : > { %v8640_v10 = vpop.f32.mrf.mxu1  ;;  %v9197_v2 = vpop.f32.mrf.mxu0  ;;  %14581 = vmatmul.mubr.bf16.gmra.mxu1 %v9583_v26  ;;  %14705 = vmatmul.mubr.bf16.gmra.mxu0 %v10140_v63  ;;  %v9584_v50 = vpack.c.bf16 %v9535_v9, %v9534_v51  ;;  %v10094_v9 = vld [vmem:[#allocation2 + $0x90] sm:$0xff]  ;;  %v15294_v18 = vld [vmem:[#allocation9 + $0x208] sm:$0xff]   ;;  %v9536_v51 = vld [vmem:[#allocation2 + $0x87] sm:$0xff] }
 0x756   : > { %v8873_v8 = vadd.f32 %v8640_v10, %v18440_v34  ;;  %14584 = vmatprep.mubr.msk.bf16.mxu1 %vm15473_vm0, %v18570_v11  ;;  %14708 = vmatprep.mubr.msk.bf16.mxu0 %vm15473_vm0, %v18570_v11 }
 0x757   : > { %v14346_v49 = vpop.f32.mrf.mxu1  ;;  %v14470_v55 = vpop.f32.mrf.mxu0  ;;  %14813 = vmatpush3.bf16.msra.mxu1 %v15294_v18  ;;  %v10096_v18 = vld [vmem:[#allocation2 + $0xa0] sm:$0xff] }
 0x758   : > { %v18746_v14 = vadd.f32 %v9197_v2, %v8873_v8  ;;  %v9537_v55 = vld [vmem:[#allocation2 + $0x8f] sm:$0xff]  ;;  %14814 = vmatprep.subr.bf16.mxu1 %v18570_v11 }
 0x759   : > { %v8643_v56 = vpop.f32.mrf.mxu1  ;;  %v9200_v28 = vpop.f32.mrf.mxu0 }
 0x75a   : > { %v8874_v41 = vadd.f32 %v8643_v56, %v18443_v36 }
 0x75b   : > { %v14347_v59 = vpop.f32.mrf.mxu1  ;;  %v14471_v34 = vpop.f32.mrf.mxu0 }
 0x75c   : > { %v18749_v26 = vadd.f32 %v9200_v28, %v8874_v41  ;;  %v9585_v34 = vpack.c.bf16 %v9537_v55, %v9536_v51  ;;  %v10095_v51 = vld [vmem:[#allocation2 + $0x98] sm:$0xff] }
 0x75d   : > { %v8648_v63 = vpop.f32.mrf.mxu1  ;;  %v9205_v10 = vpop.f32.mrf.mxu0  ;;  %14585 = vmatmul.mubr.bf16.gmra.mxu1 %v9584_v50  ;;  %14709 = vmatmul.mubr.bf16.gmra.mxu0 %v10141_v1  ;;  %v10142_v50 = vpack.c.bf16 %v10094_v9, %v10093_v61  ;;  %v9539_v9 = vld [vmem:[#allocation2 + $0x9f] sm:$0xff] }
 0x75e   : > { %v8875_v2 = vadd.f32 %v8648_v63, %v18450_v30  ;;  %14588 = vmatprep.mubr.msk.bf16.mxu1 %vm15473_vm0, %v18570_v11  ;;  %14712 = vmatprep.mubr.msk.bf16.mxu0 %vm15473_vm0, %v18570_v11  ;;  %v15295_v63 = vld [vmem:[%s19468_s8 + $0x8] sm:$0xff]  }
 0x75f   : > { %v14350_v36 = vpop.f32.mrf.mxu1  ;;  %v14474_v8 = vpop.f32.mrf.mxu0  ;;  %14937 = vmatpush3.bf16.msra.mxu0 %v15295_v63 }
 0x760   : > { %v18756_v49 = vadd.f32 %v9205_v10, %v8875_v2  ;;  %14938 = vmatprep.subr.bf16.mxu0 %v18570_v11 }
 0x761   : > { %v8651_v56 = vpop.f32.mrf.mxu1  ;;  %v9208_v28 = vpop.f32.mrf.mxu0 }
 0x762   : > { %v8876_v41 = vadd.f32 %v8651_v56, %v18454_v15 }
 0x763   : > { %v14351_v30 = vpop.f32.mrf.mxu1  ;;  %v14475_v59 = vpop.f32.mrf.mxu0 }
 0x764   : > { %v18760_v1 = vadd.f32 %v9208_v28, %v8876_v41 }
 0x765   : > { %v8656_v10 = vpop.f32.mrf.mxu1  ;;  %v9213_v2 = vpop.f32.mrf.mxu0  ;;  %14589 = vmatmul.mubr.bf16.gmra.mxu1 %v9585_v34  ;;  %14713 = vmatmul.mubr.bf16.gmra.mxu0 %v10142_v50  ;;  %v10143_v34 = vpack.c.bf16 %v10096_v18, %v10095_v51 }
 0x766   : > { %v8877_v15 = vadd.f32 %v8656_v10, %v18461_v54  ;;  %14592 = vmatprep.mubr.msk.bf16.mxu1 %vm15473_vm0, %v18570_v11  ;;  %14716 = vmatprep.mubr.msk.bf16.mxu0 %vm15473_vm0, %v18570_v11  ;;  %v9538_v54 = vld [vmem:[#allocation2 + $0x97] sm:$0xff] }
 0x767   : > { %v14354_v36 = vpop.f32.mrf.mxu1  ;;  %v14478_v8 = vpop.f32.mrf.mxu0  ;;  %v9586_v59 = vpack.c.bf16 %v9539_v9, %v9538_v54  ;;  %v10098_v9 = vld [vmem:[#allocation2 + $0xb0] sm:$0xff]  ;;  %v10097_v54 = vld [vmem:[#allocation2 + $0xa8] sm:$0xff] }
 0x768   : > { %v18770_v55 = vadd.f32 %v9213_v2, %v8877_v15  ;;  %v9541_v8 = vld [vmem:[#allocation2 + $0xaf] sm:$0xff] }
 0x769   : > { %v8659_v56 = vpop.f32.mrf.mxu1  ;;  %v9216_v28 = vpop.f32.mrf.mxu0 }
 0x76a   : > { %v8878_v41 = vadd.f32 %v8659_v56, %v18465_v19 }
 0x76b   : > { %v14355_v61 = vpop.f32.mrf.mxu1  ;;  %v14479_v30 = vpop.f32.mrf.mxu0 }
 0x76c   : > { %v18774_v50 = vadd.f32 %v9216_v28, %v8878_v41  ;;  %v9540_v41 = vld [vmem:[#allocation2 + $0xa7] sm:$0xff]  ;;  %v10144_v30 = vpack.c.bf16 %v10098_v9, %v10097_v54 }
 0x76d   : > { %v8664_v10 = vpop.f32.mrf.mxu1  ;;  %v9221_v63 = vpop.f32.mrf.mxu0  ;;  %14593 = vmatmul.mubr.bf16.gmra.mxu1 %v9586_v59  ;;  %14717 = vmatmul.mubr.bf16.gmra.mxu0 %v10143_v34  ;;  %v9587_v61 = vpack.c.bf16 %v9541_v8, %v9540_v41  ;;  %v10100_v8 = vld [vmem:[#allocation2 + $0xc0] sm:$0xff]  ;;  %v10099_v41 = vld [vmem:[#allocation2 + $0xb8] sm:$0xff] }
 0x76e   : > { %v8879_v2 = vadd.f32 %v8664_v10, %v18472_v45  ;;  %14596 = vmatprep.mubr.msk.bf16.mxu1 %vm15473_vm0, %v18570_v11  ;;  %14720 = vmatprep.mubr.msk.bf16.mxu0 %vm15473_vm0, %v18570_v11 }
 0x76f   : > { %v14358_v19 = vpop.f32.mrf.mxu1  ;;  %v14482_v15 = vpop.f32.mrf.mxu0 }
 0x770   : > { %v18781_v36 = vadd.f32 %v9221_v63, %v8879_v2  ;;  %v9543_v15 = vld [vmem:[#allocation2 + $0xbf] sm:$0xff] }
 0x771   : > { %v8667_v18 = vpop.f32.mrf.mxu1  ;;  %v9224_v56 = vpop.f32.mrf.mxu0 }
 0x772   : > { %v8880_v28 = vadd.f32 %v8667_v18, %v18475_v32 }
 0x773   : > { %v14359_v51 = vpop.f32.mrf.mxu1  ;;  %v14483_v45 = vpop.f32.mrf.mxu0 }
 0x774   : > { %v18784_v59 = vadd.f32 %v9224_v56, %v8880_v28  ;;  %v9542_v28 = vld [vmem:[#allocation2 + $0xb7] sm:$0xff]  ;;  %v10145_v45 = vpack.c.bf16 %v10100_v8, %v10099_v41  ;;  %v9545_v8 = vld [vmem:[#allocation2 + $0xcf] sm:$0xff]  ;;  %v9544_v41 = vld [vmem:[#allocation2 + $0xc7] sm:$0xff] }
 0x775   : > { %v8672_v34 = vpop.f32.mrf.mxu1  ;;  %v9229_v10 = vpop.f32.mrf.mxu0  ;;  %14597 = vmatmul.mubr.bf16.gmra.mxu1 %v9587_v61  ;;  %14721 = vmatmul.mubr.bf16.gmra.mxu0 %v10144_v30  ;;  %v9588_v51 = vpack.c.bf16 %v9543_v15, %v9542_v28  ;;  %v15296_v30 = vld [vmem:[#allocation9 + $0x200] sm:$0xff]  }
 0x776   : > { %v8881_v63 = vadd.f32 %v8672_v34, %v18482_v20  ;;  %14600 = vmatprep.mubr.msk.bf16.mxu1 %vm15473_vm0, %v18570_v11  ;;  %14724 = vmatprep.mubr.msk.bf16.mxu0 %vm15473_vm0, %v18570_v11  ;;  %v15297_v34 = vld [vmem:[%s19468_s8] sm:$0xff]  }
 0x777   : > { %v14362_v32 = vpop.f32.mrf.mxu1  ;;  %v14486_v2 = vpop.f32.mrf.mxu0  ;;  %14815 = vmatpush3.bf16.msra.mxu1 %v15296_v30  ;;  %14939 = vmatpush3.bf16.msra.mxu0 %v15297_v34 }
 0x778   : > { %v18791_v19 = vadd.f32 %v9229_v10, %v8881_v63 }
 0x779   : > { %v8675_v9 = vpop.f32.mrf.mxu1  ;;  %v9232_v18 = vpop.f32.mrf.mxu0 }
 0x77a   : > { %v8882_v56 = vadd.f32 %v8675_v9, %v18485_v31  ;;  %v10102_v9 = vld [vmem:[#allocation2 + $0xd0] sm:$0xff] }
 0x77b   : > { %v14363_v54 = vpop.f32.mrf.mxu1  ;;  %v14487_v20 = vpop.f32.mrf.mxu0 }
 0x77c   : > { %v18794_v61 = vadd.f32 %v9232_v18, %v8882_v56 }
 0x77d   : > { %v8680_v10 = vpop.f32.mrf.mxu1  ;;  %v9237_v63 = vpop.f32.mrf.mxu0  ;;  %14601 = vmatmul.mubr.bf16.gmra.mxu1 %v9588_v51  ;;  %14725 = vmatmul.mubr.bf16.gmra.mxu0 %v10145_v45  ;;  %v9589_v51 = vpack.c.bf16 %v9545_v8, %v9544_v41  ;;  %v10104_v8 = vld [vmem:[#allocation2 + $0xe0] sm:$0xff]  ;;  %v10103_v41 = vld [vmem:[#allocation2 + $0xd8] sm:$0xff] }
 0x77e   : > { %v8883_v32 = vadd.f32 %v8680_v10, %v18492_v25  ;;  %14604 = vmatprep.mubr.msk.bf16.mxu1 %vm15473_vm0, %v18570_v11  ;;  %14728 = vmatprep.mubr.msk.bf16.mxu0 %vm15473_vm0, %v18570_v11  ;;  %v10101_v25 = vld [vmem:[#allocation2 + $0xc8] sm:$0xff] }
 0x77f   : > { %v14366_v31 = vpop.f32.mrf.mxu1  ;;  %v14490_v2 = vpop.f32.mrf.mxu0  ;;  %v10146_v45 = vpack.c.bf16 %v10102_v9, %v10101_v25 }
 0x780   : > { %v18804_v15 = vadd.f32 %v9237_v63, %v8883_v32  ;;  %v9547_v32 = vld [vmem:[#allocation2 + $0xdf] sm:$0xff] }
 0x781   : > { %v8683_v18 = vpop.f32.mrf.mxu1  ;;  %v9240_v56 = vpop.f32.mrf.mxu0 }
 0x782   : > { %v8884_v28 = vadd.f32 %v8683_v18, %v18497_v21 }
 0x783   : > { %v14367_v54 = vpop.f32.mrf.mxu1  ;;  %v14491_v20 = vpop.f32.mrf.mxu0 }
 0x784   : > { %v18807_v10 = vadd.f32 %v9240_v56, %v8884_v28  ;;  %v9546_v28 = vld [vmem:[#allocation2 + $0xd7] sm:$0xff]  ;;  %v10147_v20 = vpack.c.bf16 %v10104_v8, %v10103_v41 }
 0x785   : > { %v8688_v31 = vpop.f32.mrf.mxu1  ;;  %v9245_v2 = vpop.f32.mrf.mxu0  ;;  %14605 = vmatmul.mubr.bf16.gmra.mxu1 %v9589_v51  ;;  %14729 = vmatmul.mubr.bf16.gmra.mxu0 %v10146_v45  ;;  %v9590_v54 = vpack.c.bf16 %v9547_v32, %v9546_v28  ;;  %v10106_v32 = vld [vmem:[#allocation2 + $0xf0] sm:$0xff]  ;;  %v10105_v28 = vld [vmem:[#allocation2 + $0xe8] sm:$0xff] }
 0x786   : > { %v8885_v30 = vadd.f32 %v8688_v31, %v18504_v3  ;;  %14608 = vmatprep.mubr.msk.bf16.mxu1 %vm15473_vm0, %v18570_v11  ;;  %14732 = vmatprep.mubr.msk.bf16.mxu0 %vm15473_vm0, %v18570_v11 }
 0x787   : > { %v14370_v21 = vpop.f32.mrf.mxu1  ;;  %v14494_v34 = vpop.f32.mrf.mxu0 }
 0x788   : > { %v18814_v63 = vadd.f32 %v9245_v2, %v8885_v30  ;;  %v9549_v34 = vld [vmem:[#allocation2 + $0xef] sm:$0xff] }
 0x789   : > { %v8691_v9 = vpop.f32.mrf.mxu1  ;;  %v9248_v18 = vpop.f32.mrf.mxu0 }
 0x78a   : > { %v8886_v56 = vadd.f32 %v8691_v9, %v18507_v27 }
 0x78b   : > { %v14371_v25 = vpop.f32.mrf.mxu1  ;;  %v14495_v3 = vpop.f32.mrf.mxu0 }
 0x78c   : > { %v18817_v51 = vadd.f32 %v9248_v18, %v8886_v56  ;;  %v9548_v56 = vld [vmem:[#allocation2 + $0xe7] sm:$0xff]  ;;  %v10148_v3 = vpack.c.bf16 %v10106_v32, %v10105_v28 }
 0x78d   : > { %v8696_v45 = vpop.f32.mrf.mxu1  ;;  %v9253_v31 = vpop.f32.mrf.mxu0  ;;  %14609 = vmatmul.mubr.bf16.gmra.mxu1 %v9590_v54  ;;  %14733 = vmatmul.mubr.bf16.gmra.mxu0 %v10147_v20  ;;  %v9591_v25 = vpack.c.bf16 %v9549_v34, %v9548_v56  ;;  %v10108_v34 = vld [vmem:[#allocation2 + $0x100] sm:$0xff] }
 0x78e   : > { %v8887_v2 = vadd.f32 %v8696_v45, %v18514_v13  ;;  %14612 = vmatprep.mubr.msk.bf16.mxu1 %vm15473_vm0, %v18570_v11  ;;  %14736 = vmatprep.mubr.msk.bf16.mxu0 %vm15473_vm0, %v18570_v11 }
 0x78f   : > { %v14374_v27 = vpop.f32.mrf.mxu1  ;;  %v14498_v30 = vpop.f32.mrf.mxu0 }
 0x790   : > { %v18824_v21 = vadd.f32 %v9253_v31, %v8887_v2  ;;  %v18830_v31 = vld [vmem:[#allocation2] sm:$0xff] }
 0x791   : > { %v8699_v8 = vpop.f32.mrf.mxu1  ;;  %v9256_v9 = vpop.f32.mrf.mxu0  ;;  %v9551_v30 = vld [vmem:[#allocation2 + $0xff] sm:$0xff] }
 0x792   : > { %v8888_v18 = vadd.f32 %v8699_v8, %v18517_v16 }
 0x793   : > { %v14375_v41 = vpop.f32.mrf.mxu1  ;;  %v14499_v13 = vpop.f32.mrf.mxu0 }
 0x794   : > { %v18827_v54 = vadd.f32 %v9256_v9, %v8888_v18  ;;  %v9550_v18 = vld [vmem:[#allocation2 + $0xf7] sm:$0xff] }
 0x795   : > { %v8704_v20 = vpop.f32.mrf.mxu1  ;;  %v9261_v11 = vpop.f32.mrf.mxu0  ;;  %14613 = vmatmul.mubr.bf16.gmra.mxu1 %v9591_v25  ;;  %14737 = vmatmul.mubr.bf16.gmra.mxu0 %v10148_v3  ;;  %v9592_v41 = vpack.c.bf16 %v9551_v30, %v9550_v18  ;;  %v10110_v30 = vld [vmem:[#allocation2 + $0x110] sm:$0xff]  ;;  %v10109_v18 = vld [vmem:[#allocation2 + $0x108] sm:$0xff] }
 0x796   : > { %v8889_v45 = vadd.f32 %v8704_v20, %v18524_v62  ;;  %14616 = vmatprep.mubr.msk.bf16.mxu1 %vm15473_vm0, %v18830_v31  ;;  %14740 = vmatprep.mubr.msk.bf16.mxu0 %vm15473_vm0, %v18830_v31  ;;  %v10107_v62 = vld [vmem:[#allocation2 + $0xf8] sm:$0xff] }
 0x797   : > { %v14378_v16 = vpop.f32.mrf.mxu1  ;;  %v14502_v2 = vpop.f32.mrf.mxu0  ;;  %v10149_v13 = vpack.c.bf16 %v10108_v34, %v10107_v62 }
 0x798   : > { %v18836_v27 = vadd.f32 %v9261_v11, %v8889_v45  ;;  %v9553_v2 = vld [vmem:[#allocation2 + $0x10f] sm:$0xff] }
 0x799   : > { %v8707_v32 = vpop.f32.mrf.mxu1  ;;  %v9264_v8 = vpop.f32.mrf.mxu0 }
 0x79a   : > { %v8890_v9 = vadd.f32 %v8707_v32, %v18527_v37 }
 0x79b   : > { %v14379_v56 = vpop.f32.mrf.mxu1  ;;  %v14503_v28 = vpop.f32.mrf.mxu0 }
 0x79c   : > { %v18839_v25 = vadd.f32 %v9264_v8, %v8890_v9  ;;  %v9552_v9 = vld [vmem:[#allocation2 + $0x107] sm:$0xff]  ;;  %v10150_v28 = vpack.c.bf16 %v10110_v30, %v10109_v18 }
 0x79d   : > { %v8712_v3 = vpop.f32.mrf.mxu1  ;;  %v9269_v20 = vpop.f32.mrf.mxu0  ;;  %14617 = vmatmul.mubr.bf16.gmra.mxu1 %v9592_v41  ;;  %14741 = vmatmul.mubr.bf16.gmra.mxu0 %v10149_v13  ;;  %v9593_v56 = vpack.c.bf16 %v9553_v2, %v9552_v9  ;;  %v10112_v2 = vld [vmem:[#allocation2 + $0x120] sm:$0xff]  ;;  %v10111_v9 = vld [vmem:[#allocation2 + $0x118] sm:$0xff] }
 0x79e   : > { %v8891_v11 = vadd.f32 %v8712_v3, %v18534_v44  ;;  %14620 = vmatprep.mubr.msk.bf16.mxu1 %vm15473_vm0, %v18830_v31  ;;  %14744 = vmatprep.mubr.msk.bf16.mxu0 %vm15473_vm0, %v18830_v31 }
 0x79f   : > { %v14382_v37 = vpop.f32.mrf.mxu1  ;;  %v14506_v45 = vpop.f32.mrf.mxu0 }
 0x7a0   : > { %v18846_v16 = vadd.f32 %v9269_v20, %v8891_v11  ;;  %v9555_v45 = vld [vmem:[#allocation2 + $0x11f] sm:$0xff] }
 0x7a1   : > { %v8715_v34 = vpop.f32.mrf.mxu1  ;;  %v9272_v32 = vpop.f32.mrf.mxu0 }
 0x7a2   : > { %v8892_v8 = vadd.f32 %v8715_v34, %v18537_v57 }
 0x7a3   : > { %v14383_v62 = vpop.f32.mrf.mxu1  ;;  %v14507_v44 = vpop.f32.mrf.mxu0 }
 0x7a4   : > { %v18849_v41 = vadd.f32 %v9272_v32, %v8892_v8  ;;  %v9554_v8 = vld [vmem:[#allocation2 + $0x117] sm:$0xff]  ;;  %v10151_v44 = vpack.c.bf16 %v10112_v2, %v10111_v9 }
 0x7a5   : > { %v8720_v13 = vpop.f32.mrf.mxu1  ;;  %v9277_v3 = vpop.f32.mrf.mxu0  ;;  %14621 = vmatmul.mubr.bf16.gmra.mxu1 %v9593_v56  ;;  %14745 = vmatmul.mubr.bf16.gmra.mxu0 %v10150_v28  ;;  %v9594_v62 = vpack.c.bf16 %v9555_v45, %v9554_v8  ;;  %v10114_v45 = vld [vmem:[#allocation2 + $0x130] sm:$0xff]  ;;  %v10113_v8 = vld [vmem:[#allocation2 + $0x128] sm:$0xff] }
 0x7a6   : > { %v8893_v20 = vadd.f32 %v8720_v13, %v18544_v17  ;;  %14624 = vmatprep.mubr.msk.bf16.mxu1 %vm15473_vm0, %v18830_v31  ;;  %14748 = vmatprep.mubr.msk.bf16.mxu0 %vm15473_vm0, %v18830_v31 }
 0x7a7   : > { %v14386_v57 = vpop.f32.mrf.mxu1  ;;  %v14510_v11 = vpop.f32.mrf.mxu0 }
 0x7a8   : > { %v18856_v37 = vadd.f32 %v9277_v3, %v8893_v20  ;;  %v9557_v11 = vld [vmem:[#allocation2 + $0x12f] sm:$0xff] }
 0x7a9   : > { %v8723_v30 = vpop.f32.mrf.mxu1  ;;  %v9280_v34 = vpop.f32.mrf.mxu0 }
 0x7aa   : > { %v8894_v32 = vadd.f32 %v8723_v30, %v18547_v12 }
 0x7ab   : > { %v14387_v18 = vpop.f32.mrf.mxu1  ;;  %v14511_v17 = vpop.f32.mrf.mxu0 }
 0x7ac   : > { %v18859_v56 = vadd.f32 %v9280_v34, %v8894_v32  ;;  %v9556_v32 = vld [vmem:[#allocation2 + $0x127] sm:$0xff]  ;;  %v10152_v17 = vpack.c.bf16 %v10114_v45, %v10113_v8 }
 0x7ad   : > { %v8728_v28 = vpop.f32.mrf.mxu1  ;;  %v9285_v13 = vpop.f32.mrf.mxu0  ;;  %14625 = vmatmul.mubr.bf16.gmra.mxu1 %v9594_v62  ;;  %14749 = vmatmul.mubr.bf16.gmra.mxu0 %v10151_v44  ;;  %v9595_v18 = vpack.c.bf16 %v9557_v11, %v9556_v32  ;;  %v10116_v11 = vld [vmem:[#allocation2 + $0x140] sm:$0xff]  ;;  %v10115_v32 = vld [vmem:[#allocation2 + $0x138] sm:$0xff] }
 0x7ae   : > { %v8895_v3 = vadd.f32 %v8728_v28, %v18554_v39  ;;  %14628 = vmatprep.mubr.msk.bf16.mxu1 %vm15473_vm0, %v18830_v31  ;;  %14752 = vmatprep.mubr.msk.bf16.mxu0 %vm15473_vm0, %v18830_v31 }
 0x7af   : > { %v14390_v12 = vpop.f32.mrf.mxu1  ;;  %v14514_v20 = vpop.f32.mrf.mxu0 }
 0x7b0   : > { %v18866_v57 = vadd.f32 %v9285_v13, %v8895_v3  ;;  %v9559_v20 = vld [vmem:[#allocation2 + $0x13f] sm:$0xff] }
 0x7b1   : > { %v8731_v2 = vpop.f32.mrf.mxu1  ;;  %v9288_v30 = vpop.f32.mrf.mxu0 }
 0x7b2   : > { %v8896_v34 = vadd.f32 %v8731_v2, %v18557_v38 }
 0x7b3   : > { %v14391_v9 = vpop.f32.mrf.mxu1  ;;  %v14515_v39 = vpop.f32.mrf.mxu0 }
 0x7b4   : > { %v18869_v62 = vadd.f32 %v9288_v30, %v8896_v34  ;;  %v9558_v34 = vld [vmem:[#allocation2 + $0x137] sm:$0xff]  ;;  %v10153_v39 = vpack.c.bf16 %v10116_v11, %v10115_v32 }
 0x7b5   : > { %v8736_v44 = vpop.f32.mrf.mxu1  ;;  %v9293_v28 = vpop.f32.mrf.mxu0  ;;  %14629 = vmatmul.mubr.bf16.gmra.mxu1 %v9595_v18  ;;  %14753 = vmatmul.mubr.bf16.gmra.mxu0 %v10152_v17  ;;  %v9596_v9 = vpack.c.bf16 %v9559_v20, %v9558_v34  ;;  %v10118_v20 = vld [vmem:[#allocation2 + $0x150] sm:$0xff]  ;;  %v10117_v34 = vld [vmem:[#allocation2 + $0x148] sm:$0xff] }
 0x7b6   : > { %v8897_v13 = vadd.f32 %v8736_v44, %v18564_v52  ;;  %14632 = vmatprep.mubr.msk.bf16.mxu1 %vm15473_vm0, %v18830_v31  ;;  %14756 = vmatprep.mubr.msk.bf16.mxu0 %vm15473_vm0, %v18830_v31 }
 0x7b7   : > { %v14394_v38 = vpop.f32.mrf.mxu1  ;;  %v14518_v3 = vpop.f32.mrf.mxu0 }
 0x7b8   : > { %v18876_v12 = vadd.f32 %v9293_v28, %v8897_v13  ;;  %v9561_v3 = vld [vmem:[#allocation2 + $0x14f] sm:$0xff] }
 0x7b9   : > { %v8739_v45 = vpop.f32.mrf.mxu1  ;;  %v9296_v2 = vpop.f32.mrf.mxu0 }
 0x7ba   : > { %v8898_v30 = vadd.f32 %v8739_v45, %v18567_v60 }
 0x7bb   : > { %v14395_v8 = vpop.f32.mrf.mxu1  ;;  %v14519_v52 = vpop.f32.mrf.mxu0 }
 0x7bc   : > { %v18879_v18 = vadd.f32 %v9296_v2, %v8898_v30  ;;  %v9560_v30 = vld [vmem:[#allocation2 + $0x147] sm:$0xff]  ;;  %v10154_v52 = vpack.c.bf16 %v10118_v20, %v10117_v34 }
 0x7bd   : > { %v8744_v17 = vpop.f32.mrf.mxu1  ;;  %v9301_v44 = vpop.f32.mrf.mxu0  ;;  %14633 = vmatmul.mubr.bf16.gmra.mxu1 %v9596_v9  ;;  %14757 = vmatmul.mubr.bf16.gmra.mxu0 %v10153_v39  ;;  %v9597_v8 = vpack.c.bf16 %v9561_v3, %v9560_v30  ;;  %v10120_v3 = vld [vmem:[#allocation2 + $0x160] sm:$0xff]  ;;  %v10119_v30 = vld [vmem:[#allocation2 + $0x158] sm:$0xff] }
 0x7be   : > { %v8899_v28 = vadd.f32 %v8744_v17, %v18576_v24  ;;  %14636 = vmatprep.mubr.msk.bf16.mxu1 %vm15473_vm0, %v18830_v31  ;;  %14760 = vmatprep.mubr.msk.bf16.mxu0 %vm15473_vm0, %v18830_v31 }
 0x7bf   : > { %v14398_v60 = vpop.f32.mrf.mxu1  ;;  %v14522_v13 = vpop.f32.mrf.mxu0 }
 0x7c0   : > { %v18886_v38 = vadd.f32 %v9301_v44, %v8899_v28  ;;  %v9563_v13 = vld [vmem:[#allocation2 + $0x15f] sm:$0xff] }
 0x7c1   : > { %v8747_v11 = vpop.f32.mrf.mxu1  ;;  %v9304_v45 = vpop.f32.mrf.mxu0 }
 0x7c2   : > { %v8900_v2 = vadd.f32 %v8747_v11, %v18579_v7 }
 0x7c3   : > { %v14399_v32 = vpop.f32.mrf.mxu1  ;;  %v14523_v24 = vpop.f32.mrf.mxu0 }
 0x7c4   : > { %v18889_v9 = vadd.f32 %v9304_v45, %v8900_v2  ;;  %v9562_v2 = vld [vmem:[#allocation2 + $0x157] sm:$0xff]  ;;  %v10155_v24 = vpack.c.bf16 %v10120_v3, %v10119_v30 }
 0x7c5   : > { %v8752_v39 = vpop.f32.mrf.mxu1  ;;  %v9309_v17 = vpop.f32.mrf.mxu0  ;;  %14637 = vmatmul.mubr.bf16.gmra.mxu1 %v9597_v8  ;;  %14761 = vmatmul.mubr.bf16.gmra.mxu0 %v10154_v52  ;;  %v9598_v32 = vpack.c.bf16 %v9563_v13, %v9562_v2  ;;  %v10122_v13 = vld [vmem:[#allocation2 + $0x170] sm:$0xff]  ;;  %v10121_v2 = vld [vmem:[#allocation2 + $0x168] sm:$0xff] }
 0x7c6   : > { %v8901_v44 = vadd.f32 %v8752_v39, %v18586_v6  ;;  %14640 = vmatprep.mubr.msk.bf16.mxu1 %vm15473_vm0, %v18830_v31  ;;  %14764 = vmatprep.mubr.msk.bf16.mxu0 %vm15473_vm0, %v18830_v31 }
 0x7c7   : > { %v14402_v7 = vpop.f32.mrf.mxu1  ;;  %v14526_v28 = vpop.f32.mrf.mxu0 }
 0x7c8   : > { %v18896_v60 = vadd.f32 %v9309_v17, %v8901_v44  ;;  %v9565_v28 = vld [vmem:[#allocation2 + $0x16f] sm:$0xff] }
 0x7c9   : > { %v8755_v20 = vpop.f32.mrf.mxu1  ;;  %v9312_v11 = vpop.f32.mrf.mxu0 }
 0x7ca   : > { %v8902_v45 = vadd.f32 %v8755_v20, %v18589_v58 }
 0x7cb   : > { %v14403_v34 = vpop.f32.mrf.mxu1  ;;  %v14527_v6 = vpop.f32.mrf.mxu0 }
 0x7cc   : > { %v18899_v8 = vadd.f32 %v9312_v11, %v8902_v45  ;;  %v9564_v45 = vld [vmem:[#allocation2 + $0x167] sm:$0xff]  ;;  %v10156_v6 = vpack.c.bf16 %v10122_v13, %v10121_v2  ;;  %v10123_v2 = vld [vmem:[#allocation2 + $0x178] sm:$0xff] }
 0x7cd   : > { %v8760_v52 = vpop.f32.mrf.mxu1  ;;  %v9317_v39 = vpop.f32.mrf.mxu0  ;;  %14641 = vmatmul.mubr.bf16.gmra.mxu1 %v9598_v32  ;;  %14765 = vmatmul.mubr.bf16.gmra.mxu0 %v10155_v24  ;;  %v9599_v34 = vpack.c.bf16 %v9565_v28, %v9564_v45  ;;  %v10124_v28 = vld [vmem:[#allocation2 + $0x180] sm:$0xff]  ;;  %v9566_v45 = vld [vmem:[#allocation2 + $0x177] sm:$0xff] }
 0x7ce   : > { %v8903_v17 = vadd.f32 %v8760_v52, %v18596_v22  ;;  %14644 = vmatprep.mubr.msk.bf16.mxu1 %vm15473_vm0, %v18830_v31  ;;  %14768 = vmatprep.mubr.msk.bf16.mxu0 %vm15473_vm0, %v18830_v31 }
 0x7cf   : > { %v14406_v58 = vpop.f32.mrf.mxu1  ;;  %v14530_v44 = vpop.f32.mrf.mxu0 }
 0x7d0   : > { %v18906_v7 = vadd.f32 %v9317_v39, %v8903_v17  ;;  %v9567_v44 = vld [vmem:[#allocation2 + $0x17f] sm:$0xff] }
 0x7d1   : > { %v8763_v3 = vpop.f32.mrf.mxu1  ;;  %v9320_v20 = vpop.f32.mrf.mxu0 }
 0x7d2   : > { %v8904_v11 = vadd.f32 %v8763_v3, %v18599_v47 }
 0x7d3   : > { %v14407_v30 = vpop.f32.mrf.mxu1  ;;  %v14531_v22 = vpop.f32.mrf.mxu0 }
 0x7d4   : > { %v18909_v32 = vadd.f32 %v9320_v20, %v8904_v11  ;;  %v19781_v20 = vld [vmem:[#allocation30_spill] sm:$0xff]  ;;  %v9600_v22 = vpack.c.bf16 %v9567_v44, %v9566_v45 }
 0x7d5   : > { %v8768_v24 = vpop.f32.mrf.mxu1  ;;  %v9325_v52 = vpop.f32.mrf.mxu0  ;;  %14645 = vmatmul.mubr.bf16.gmra.mxu1 %v9599_v34  ;;  %14769 = vmatmul.mubr.bf16.gmra.mxu0 %v10156_v6  ;;  %v10157_v34 = vpack.c.bf16 %v10124_v28, %v10123_v2  ;;  %v9569_v44 = vld [vmem:[#allocation2 + $0x18f] sm:$0xff]  ;;  %v9568_v2 = vld [vmem:[#allocation2 + $0x187] sm:$0xff] }
 0x7d6   : > { %19779 = vst [vmem:[#allocation49_spill] sm:$0xff] %v18909_v32  ;;  %v8905_v39 = vadd.f32 %v8768_v24, %v18606_v29  ;;  %14648 = vmatprep.mubr.msk.bf16.mxu1 %vm15473_vm0, %v18830_v31  ;;  %14772 = vmatprep.mubr.msk.bf16.mxu0 %vm15473_vm0, %v18830_v31  ;;  %v10126_v28 = vld [vmem:[#allocation2 + $0x190] sm:$0xff] }
 0x7d7   : > { %v14410_v47 = vpop.f32.mrf.mxu1  ;;  %v14534_v17 = vpop.f32.mrf.mxu0 }
 0x7d8   : > { %v18916_v58 = vadd.f32 %v9325_v52, %v8905_v39  ;;  %v19783_v52 = vld [vmem:[#allocation33_spill] sm:$0xff] }
 0x7d9   : > { %v8771_v13 = vpop.f32.mrf.mxu1  ;;  %v9328_v3 = vpop.f32.mrf.mxu0 }
 0x7da   : > { %19780 = vst [vmem:[#allocation50_spill] sm:$0xff] %v18916_v58  ;;  %v8906_v11 = vadd.f32 %v8771_v13, %v19781_v20 }
 0x7db   : > { %v14411_v30 = vpop.f32.mrf.mxu1  ;;  %v14535_v29 = vpop.f32.mrf.mxu0 }
 0x7dc   : > { %v18919_v6 = vadd.f32 %v9328_v3, %v8906_v11  ;;  %v19785_v11 = vld [vmem:[#allocation34_spill] sm:$0xff] }
 0x7dd   : > { %v8776_v24 = vpop.f32.mrf.mxu1  ;;  %v9333_v32 = vpop.f32.mrf.mxu0  ;;  %14649 = vmatmul.mubr.bf16.gmra.mxu1 %v9600_v22  ;;  %14773 = vmatmul.mubr.bf16.gmra.mxu0 %v10157_v34  ;;  %v10125_v30 = vld [vmem:[#allocation2 + $0x188] sm:$0xff]  ;;  %v9601_v34 = vpack.c.bf16 %v9569_v44, %v9568_v2  ;;  %v9571_v44 = vld [vmem:[#allocation2 + $0x19f] sm:$0xff] }
 0x7de   : > { %19782 = vst [vmem:[#allocation53_spill] sm:$0xff] %v18919_v6  ;;  %v8907_v39 = vadd.f32 %v8776_v24, %v19783_v52  ;;  %14652 = vmatprep.mubr.msk.bf16.mxu1 %vm15473_vm0, %v18830_v31  ;;  %14776 = vmatprep.mubr.msk.bf16.mxu0 %vm15473_vm0, %v18830_v31  ;;  %v10158_v24 = vpack.c.bf16 %v10126_v28, %v10125_v30  ;;  %v10128_v28 = vld [vmem:[#allocation2 + $0x1a0] sm:$0xff]  ;;  %v9570_v30 = vld [vmem:[#allocation2 + $0x197] sm:$0xff] }
 0x7df   : > { %v14414_v47 = vpop.f32.mrf.mxu1  ;;  %v14538_v17 = vpop.f32.mrf.mxu0 }
 0x7e0   : > { %v18926_v13 = vadd.f32 %v9333_v32, %v8907_v39  ;;  %v19787_v32 = vld [vmem:[#allocation37_spill] sm:$0xff] }
 0x7e1   : > { %v8779_v3 = vpop.f32.mrf.mxu1  ;;  %v9336_v20 = vpop.f32.mrf.mxu0 }
 0x7e2   : > { %19784 = vst [vmem:[#allocation54_spill] sm:$0xff] %v18926_v13  ;;  %v8908_v45 = vadd.f32 %v8779_v3, %v19785_v11 }
 0x7e3   : > { %v14415_v29 = vpop.f32.mrf.mxu1  ;;  %v14539_v22 = vpop.f32.mrf.mxu0 }
 0x7e4   : > { %v18929_v52 = vadd.f32 %v9336_v20, %v8908_v45  ;;  %v19788_v45 = vld [vmem:[#allocation38_spill] sm:$0xff]  ;;  %v10127_v29 = vld [vmem:[#allocation2 + $0x198] sm:$0xff] }
 0x7e5   : > { %v8784_v6 = vpop.f32.mrf.mxu1  ;;  %v9341_v58 = vpop.f32.mrf.mxu0  ;;  %14653 = vmatmul.mubr.bf16.gmra.mxu1 %v9601_v34  ;;  %14777 = vmatmul.mubr.bf16.gmra.mxu0 %v10158_v24  ;;  %v9602_v34 = vpack.c.bf16 %v9571_v44, %v9570_v30  ;;  %v10159_v24 = vpack.c.bf16 %v10128_v28, %v10127_v29  ;;  %v9573_v44 = vld [vmem:[#allocation2 + $0x1af] sm:$0xff]  ;;  %v9572_v30 = vld [vmem:[#allocation2 + $0x1a7] sm:$0xff] }
 0x7e6   : > { %19786 = vst [vmem:[#allocation57_spill] sm:$0xff] %v18929_v52  ;;  %v8909_v39 = vadd.f32 %v8784_v6, %v19787_v32  ;;  %14656 = vmatprep.mubr.msk.bf16.mxu1 %vm15473_vm0, %v18830_v31  ;;  %14780 = vmatprep.mubr.msk.bf16.mxu0 %vm15473_vm0, %v18830_v31  ;;  %v10130_v28 = vld [vmem:[#allocation2 + $0x1b0] sm:$0xff]  ;;  %v10129_v29 = vld [vmem:[#allocation2 + $0x1a8] sm:$0xff] }
 0x7e7   : > { %v14418_v47 = vpop.f32.mrf.mxu1  ;;  %v14542_v17 = vpop.f32.mrf.mxu0 }
 0x7e8   : > { %v18936_v3 = vadd.f32 %v9341_v58, %v8909_v39 }
 0x7e9   : > { %v8787_v20 = vpop.f32.mrf.mxu1  ;;  %v9344_v11 = vpop.f32.mrf.mxu0 }
 0x7ea   : > { %v8910_v2 = vadd.f32 %v8787_v20, %v19788_v45  ;;  %v19790_v45 = vld [vmem:[#allocation41_spill] sm:$0xff] }
 0x7eb   : > { %v14419_v22 = vpop.f32.mrf.mxu1  ;;  %v14543_v6 = vpop.f32.mrf.mxu0 }
 0x7ec   : > { %v18939_v32 = vadd.f32 %v9344_v11, %v8910_v2  ;;  %v10160_v6 = vpack.c.bf16 %v10130_v28, %v10129_v29  ;;  %v10132_v28 = vld [vmem:[#allocation2 + $0x1c0] sm:$0xff] }
 0x7ed   : > { %v8792_v52 = vpop.f32.mrf.mxu1  ;;  %v9349_v13 = vpop.f32.mrf.mxu0  ;;  %14657 = vmatmul.mubr.bf16.gmra.mxu1 %v9602_v34  ;;  %14781 = vmatmul.mubr.bf16.gmra.mxu0 %v10159_v24 }
 0x7ee   : > { %19789 = vst [vmem:[#allocation58_spill] sm:$0xff] %v18939_v32  ;;  %v8911_v58 = vadd.f32 %v8792_v52, %v18636_v35  ;;  %14660 = vmatprep.mubr.msk.bf16.mxu1 %vm15473_vm0, %v18830_v31  ;;  %14784 = vmatprep.mubr.msk.bf16.mxu0 %vm15473_vm0, %v18830_v31  ;;  %v9603_v52 = vpack.c.bf16 %v9573_v44, %v9572_v30  ;;  %v9575_v44 = vld [vmem:[#allocation2 + $0x1bf] sm:$0xff] }
 0x7ef   : > { %v14422_v39 = vpop.f32.mrf.mxu1  ;;  %v14546_v47 = vpop.f32.mrf.mxu0  ;;  %v10131_v30 = vld [vmem:[#allocation2 + $0x1b8] sm:$0xff] }
 0x7f0   : > { %v18946_v17 = vadd.f32 %v9349_v13, %v8911_v58 }
 0x7f1   : > { %v8795_v20 = vpop.f32.mrf.mxu1  ;;  %v9352_v11 = vpop.f32.mrf.mxu0 }
 0x7f2   : > { %v8912_v2 = vadd.f32 %v8795_v20, %v19790_v45 }
 0x7f3   : > { %v14423_v22 = vpop.f32.mrf.mxu1  ;;  %v14547_v35 = vpop.f32.mrf.mxu0 }
 0x7f4   : > { %v18949_v34 = vadd.f32 %v9352_v11, %v8912_v2  ;;  %v9574_v2 = vld [vmem:[#allocation2 + $0x1b7] sm:$0xff]  ;;  %v10161_v35 = vpack.c.bf16 %v10132_v28, %v10131_v30  ;;  %v10133_v28 = vld [vmem:[#allocation2 + $0x1c8] sm:$0xff] }
 0x7f5   : > { %v8800_v24 = vpop.f32.mrf.mxu1  ;;  %v9357_v32 = vpop.f32.mrf.mxu0  ;;  %14661 = vmatmul.mubr.bf16.gmra.mxu1 %v9603_v52  ;;  %14785 = vmatmul.mubr.bf16.gmra.mxu0 %v10160_v6  ;;  %v9604_v22 = vpack.c.bf16 %v9575_v44, %v9574_v2  ;;  %v9577_v44 = vld [vmem:[#allocation2 + $0x1cf] sm:$0xff] }
 0x7f6   : > { %v8913_v13 = vadd.f32 %v8800_v24, %v18646_v40  ;;  %14664 = vmatprep.mubr.msk.bf16.mxu1 %vm15473_vm0, %v18830_v31  ;;  %14788 = vmatprep.mubr.msk.bf16.mxu0 %vm15473_vm0, %v18830_v31 }
 0x7f7   : > { %v14426_v58 = vpop.f32.mrf.mxu1  ;;  %v14550_v39 = vpop.f32.mrf.mxu0 }
 0x7f8   : > { %v18956_v47 = vadd.f32 %v9357_v32, %v8913_v13  ;;  %v9576_v39 = vld [vmem:[#allocation2 + $0x1c7] sm:$0xff] }
 0x7f9   : > { %v8803_v20 = vpop.f32.mrf.mxu1  ;;  %v9360_v11 = vpop.f32.mrf.mxu0 }
 0x7fa   : > { %v8914_v45 = vadd.f32 %v8803_v20, %v18649_v53 }
 0x7fb   : > { %v14427_v29 = vpop.f32.mrf.mxu1  ;;  %v14551_v40 = vpop.f32.mrf.mxu0 }
 0x7fc   : > { %v18959_v52 = vadd.f32 %v9360_v11, %v8914_v45  ;;  %v19791_v45 = vld [vmem:[#allocation42_spill] sm:$0xff]  ;;  %v10162_v40 = vpack.c.bf16 %v18830_v31, %v10133_v28 }
 0x7fd   : > { %v9706_v6 = vpop.f32.mrf.mxu1  ;;  %14665 = vmatmul.mubr.bf16.gmra.mxu1 %v9604_v22  ;;  %v10263_v24 = vpop.f32.mrf.mxu0  ;;  %14789 = vmatmul.mubr.bf16.gmra.mxu0 %v10161_v35 }
 0x7fe   : > { %v9975_v32 = vadd.f32 %v9706_v6, %v18656_v33  ;;  %14668 = vmatprep.mubr.msk.bf16.mxu1 %vm15473_vm0, %v18830_v31  ;;  %14792 = vmatprep.mubr.msk.bf16.mxu0 %vm15473_vm0, %v18830_v31  ;;  %v9605_v33 = vpack.c.bf16 %v9577_v44, %v9576_v39 }
 0x7ff   : > { %v14570_v53 = vpop.f32.mrf.mxu1  ;;  %v14694_v13 = vpop.f32.mrf.mxu0 }
 0x800   : > { %v18966_v58 = vadd.f32 %v10263_v24, %v9975_v32  ;;  %v9578_v32 = vld [vmem:[#allocation2 + $0x1d7] sm:$0xff]  ;;  %v9579_v53 = vld [vmem:[#allocation2 + $0x1df] sm:$0xff] }
 0x801   : > { %v9709_v20 = vpop.f32.mrf.mxu1  ;;  %v10266_v11 = vpop.f32.mrf.mxu0 }
 0x802   : > { %v9976_v2 = vadd.f32 %v9709_v20, %v19791_v45  ;;  %v19794_v45 = vld [vmem:[#allocation45_spill] sm:$0xff] }
 0x803   : > { %v14571_v30 = vpop.f32.mrf.mxu1  ;;  %v14695_v29 = vpop.f32.mrf.mxu0 }
 0x804   : > { %v18970_v22 = vadd.f32 %v10266_v11, %v9976_v2  ;;  %v9606_v11 = vpack.c.bf16 %v9579_v53, %v9578_v32  ;;  %v11197_v32 = vld [vmem:[%s15660_s26] sm:$0xff]  ;;  %v11198_v53 = vld [vmem:[%s15660_s26 + $0x8] sm:$0xff] }
 0x805   : > { %v9714_v35 = vpop.f32.mrf.mxu1  ;;  %14669 = vmatmul.mubr.bf16.gmra.mxu1 %v9605_v33  ;;  %v10271_v6 = vpop.f32.mrf.mxu0  ;;  %14793 = vmatmul.mubr.bf16.gmra.mxu0 %v10162_v40 }
 0x806   : > { %19792 = vst [vmem:[#allocation61_spill] sm:$0xff] %v18970_v22  ;;  %v9977_v24 = vadd.f32 %v9714_v35, %v18666_v48  ;;  %14672 = vmatprep.mubr.msk.bf16.mxu1 %vm15473_vm0, %v18830_v31  ;;  %14796 = vmatprep.mubr.msk.bf16.mxu0 %vm15473_vm0, %v18830_v31  ;;  %v10163_v48 = vpack.c.bf16 %v18830_v31, %v18830_v31 }
 0x807   : > { %v14574_v13 = vpop.f32.mrf.mxu1  ;;  %v14698_v39 = vpop.f32.mrf.mxu0 }
 0x808   : > { %v18977_v44 = vadd.f32 %v10271_v6, %v9977_v24  ;;  %v19796_v6 = vld [vmem:[#allocation46_spill] sm:$0xff] }
 0x809   : > { %v9717_v28 = vpop.f32.mrf.mxu1  ;;  %v10274_v20 = vpop.f32.mrf.mxu0 }
 0x80a   : > { %19793 = vst [vmem:[#allocation62_spill] sm:$0xff] %v18977_v44  ;;  %v9978_v2 = vadd.f32 %v9717_v28, %v19794_v45 }
 0x80b   : > { %v14575_v30 = vpop.f32.mrf.mxu1  ;;  %v14699_v29 = vpop.f32.mrf.mxu0 }
 0x80c   : > { %v18982_v33 = vadd.f32 %v10274_v20, %v9978_v2  ;;  %v10641_v20 = vld [vmem:[#allocation2 + $0x41] sm:$0xff]  ;;  %v10640_v30 = vld [vmem:[#allocation2 + $0x39] sm:$0xff] }
 0x80d   : > { %v9722_v40 = vpop.f32.mrf.mxu1  ;;  %14673 = vmatmul.mubr.bf16.gmra.mxu1 %v9606_v11  ;;  %v10279_v35 = vpop.f32.mrf.mxu0  ;;  %14797 = vmatmul.mubr.bf16.gmra.mxu0 %v10163_v48  ;;  %v11251_v48 = vpack.c.bf16 %v11198_v53, %v11197_v32 }
 0x80e   : > { %19795 = vst [vmem:[#allocation65_spill] sm:$0xff] %v18982_v33  ;;  %v9979_v24 = vadd.f32 %v9722_v40, %v19796_v6  ;;  %14816 = vmatprep.mubr.msk.bf16.mxu1 %vm15473_vm0, %v18830_v31  ;;  %14940 = vmatprep.mubr.msk.bf16.mxu0 %vm15473_vm0, %v18830_v31  ;;  %v10694_v6 = vpack.c.bf16 %v10641_v20, %v10640_v30 }
 0x80f   : > { %v14578_v13 = vpop.f32.mrf.mxu1  ;;  %v14702_v39 = vpop.f32.mrf.mxu0 }
 0x810   : > { %v18991_v28 = vadd.f32 %v10279_v35, %v9979_v24  ;;  %v11199_v24 = vld [vmem:[%s15660_s26 + $0x10] sm:$0xff] }
 0x811   : > { %v9725_v45 = vpop.f32.mrf.mxu1  ;;  %v10282_v11 = vpop.f32.mrf.mxu0  ;;  %v10643_v39 = vld [vmem:[#allocation2 + $0x51] sm:$0xff] }
 0x812   : > { %v9980_v2 = vadd.f32 %v9725_v45, %v18682_v5  ;;  %v11200_v5 = vld [vmem:[%s15660_s26 + $0x18] sm:$0xff] }
 0x813   : > { %v14579_v29 = vpop.f32.mrf.mxu1  ;;  %v14703_v40 = vpop.f32.mrf.mxu0 }
 0x814   : > { %v18994_v33 = vadd.f32 %v10282_v11, %v9980_v2  ;;  %v11252_v11 = vpack.c.bf16 %v11200_v5, %v11199_v24 }
 0x815   : > { %v9730_v44 = vpop.f32.mrf.mxu1  ;;  %v10287_v22 = vpop.f32.mrf.mxu0  ;;  %14817 = vmatmul.mubr.bf16.vlgmr.msra.gmra.mxu1 %v10694_v6  ;;  %14941 = vmatmul.mubr.bf16.vlgmr.msra.gmra.mxu0 %v11251_v48 }
 0x816   : > { %v9981_v35 = vadd.f32 %v9730_v44, %v18692_v23  ;;  %14820 = vmatprep.mubr.msk.bf16.mxu1 %vm15473_vm0, %v18830_v31  ;;  %14944 = vmatprep.mubr.msk.bf16.mxu0 %vm15473_vm0, %v18830_v31  ;;  %v10642_v44 = vld [vmem:[#allocation2 + $0x49] sm:$0xff] }
 0x817   : > { %v14582_v32 = vpop.f32.mrf.mxu1  ;;  %v14706_v53 = vpop.f32.mrf.mxu0  ;;  %v10695_v30 = vpack.c.bf16 %v10643_v39, %v10642_v44 }
 0x818   : > { %v19003_v13 = vadd.f32 %v10287_v22, %v9981_v35  ;;  %v11201_v35 = vld [vmem:[%s15660_s26 + $0x20] sm:$0xff] }
 0x819   : > { %v9733_v20 = vpop.f32.mrf.mxu1  ;;  %v10290_v45 = vpop.f32.mrf.mxu0  ;;  %v10645_v53 = vld [vmem:[#allocation2 + $0x61] sm:$0xff] }
 0x81a   : > { %v9982_v23 = vadd.f32 %v9733_v20, %v18702_v43  ;;  %v11202_v43 = vld [vmem:[%s15660_s26 + $0x28] sm:$0xff] }
 0x81b   : > { %v14583_v48 = vpop.f32.mrf.mxu1  ;;  %v14707_v2 = vpop.f32.mrf.mxu0 }
 0x81c   : > { %v19006_v29 = vadd.f32 %v10290_v45, %v9982_v23  ;;  %v11253_v45 = vpack.c.bf16 %v11202_v43, %v11201_v35 }
 0x81d   : > { %v9738_v40 = vpop.f32.mrf.mxu1  ;;  %v10295_v6 = vpop.f32.mrf.mxu0  ;;  %14821 = vmatmul.mubr.bf16.gmra.mxu1 %v10695_v30  ;;  %14945 = vmatmul.mubr.bf16.gmra.mxu0 %v11252_v11  ;;  %v10644_v11 = vld [vmem:[#allocation2 + $0x59] sm:$0xff] }
 0x81e   : > { %v9983_v22 = vadd.f32 %v9738_v40, %v18712_v42  ;;  %14824 = vmatprep.mubr.msk.bf16.mxu1 %vm15473_vm0, %v18830_v31  ;;  %14948 = vmatprep.mubr.msk.bf16.mxu0 %vm15473_vm0, %v18830_v31  ;;  %v10696_v48 = vpack.c.bf16 %v10645_v53, %v10644_v11 }
 0x81f   : > { %v14586_v24 = vpop.f32.mrf.mxu1  ;;  %v14710_v5 = vpop.f32.mrf.mxu0 }
 0x820   : > { %v19015_v32 = vadd.f32 %v10295_v6, %v9983_v22  ;;  %v11203_v22 = vld [vmem:[%s15660_s26 + $0x30] sm:$0xff] }
 0x821   : > { %v9741_v39 = vpop.f32.mrf.mxu1  ;;  %v10298_v20 = vpop.f32.mrf.mxu0  ;;  %v10647_v5 = vld [vmem:[#allocation2 + $0x71] sm:$0xff] }
 0x822   : > { %v9984_v42 = vadd.f32 %v9741_v39, %v18720_v46  ;;  %v11204_v46 = vld [vmem:[%s15660_s26 + $0x38] sm:$0xff] }
 0x823   : > { %v14587_v23 = vpop.f32.mrf.mxu1  ;;  %v14711_v44 = vpop.f32.mrf.mxu0 }
 0x824   : > { %v19018_v2 = vadd.f32 %v10298_v20, %v9984_v42  ;;  %v11254_v20 = vpack.c.bf16 %v11204_v46, %v11203_v22 }
 0x825   : > { %v9746_v30 = vpop.f32.mrf.mxu1  ;;  %v10303_v40 = vpop.f32.mrf.mxu0  ;;  %14825 = vmatmul.mubr.bf16.gmra.mxu1 %v10696_v48  ;;  %14949 = vmatmul.mubr.bf16.gmra.mxu0 %v11253_v45  ;;  %v10646_v45 = vld [vmem:[#allocation2 + $0x69] sm:$0xff] }
 0x826   : > { %v9985_v6 = vadd.f32 %v9746_v30, %v18732_v0  ;;  %14828 = vmatprep.mubr.msk.bf16.mxu1 %vm15473_vm0, %v18830_v31  ;;  %14952 = vmatprep.mubr.msk.bf16.mxu0 %vm15473_vm0, %v18830_v31  ;;  %v10697_v23 = vpack.c.bf16 %v10647_v5, %v10646_v45 }
 0x827   : > { %v14590_v35 = vpop.f32.mrf.mxu1  ;;  %v14714_v43 = vpop.f32.mrf.mxu0 }
 0x828   : > { %v19027_v24 = vadd.f32 %v10303_v40, %v9985_v6  ;;  %v11205_v6 = vld [vmem:[%s15660_s26 + $0x40] sm:$0xff] }
 0x829   : > { %v9749_v53 = vpop.f32.mrf.mxu1  ;;  %v10306_v39 = vpop.f32.mrf.mxu0  ;;  %v10649_v43 = vld [vmem:[#allocation2 + $0x81] sm:$0xff] }
 0x82a   : > { %v9986_v0 = vadd.f32 %v9749_v53, %v18737_v4  ;;  %v11206_v4 = vld [vmem:[%s15660_s26 + $0x48] sm:$0xff] }
 0x82b   : > { %v14591_v42 = vpop.f32.mrf.mxu1  ;;  %v14715_v11 = vpop.f32.mrf.mxu0 }
 0x82c   : > { %v19030_v44 = vadd.f32 %v10306_v39, %v9986_v0  ;;  %v11255_v39 = vpack.c.bf16 %v11206_v4, %v11205_v6 }
 0x82d   : > { %v9754_v48 = vpop.f32.mrf.mxu1  ;;  %v10311_v30 = vpop.f32.mrf.mxu0  ;;  %14829 = vmatmul.mubr.bf16.gmra.mxu1 %v10697_v23  ;;  %14953 = vmatmul.mubr.bf16.gmra.mxu0 %v11254_v20  ;;  %v10648_v20 = vld [vmem:[#allocation2 + $0x79] sm:$0xff] }
 0x82e   : > { %v9987_v40 = vadd.f32 %v9754_v48, %v18746_v14  ;;  %14832 = vmatprep.mubr.msk.bf16.mxu1 %vm15473_vm0, %v18830_v31  ;;  %14956 = vmatprep.mubr.msk.bf16.mxu0 %vm15473_vm0, %v18830_v31  ;;  %v10698_v42 = vpack.c.bf16 %v10649_v43, %v10648_v20 }
 0x82f   : > { %v14594_v22 = vpop.f32.mrf.mxu1  ;;  %v14718_v46 = vpop.f32.mrf.mxu0 }
 0x830   : > { %v19039_v35 = vadd.f32 %v10311_v30, %v9987_v40  ;;  %v11207_v40 = vld [vmem:[%s15660_s26 + $0x50] sm:$0xff] }
 0x831   : > { %v9757_v5 = vpop.f32.mrf.mxu1  ;;  %v10314_v53 = vpop.f32.mrf.mxu0  ;;  %v10651_v46 = vld [vmem:[#allocation2 + $0x91] sm:$0xff] }
 0x832   : > { %v9988_v14 = vadd.f32 %v9757_v5, %v18749_v26  ;;  %v11208_v26 = vld [vmem:[%s15660_s26 + $0x58] sm:$0xff] }
 0x833   : > { %v14595_v0 = vpop.f32.mrf.mxu1  ;;  %v14719_v45 = vpop.f32.mrf.mxu0 }
 0x834   : > { %v19042_v11 = vadd.f32 %v10314_v53, %v9988_v14  ;;  %v11256_v53 = vpack.c.bf16 %v11208_v26, %v11207_v40 }
 0x835   : > { %v9762_v23 = vpop.f32.mrf.mxu1  ;;  %v10319_v48 = vpop.f32.mrf.mxu0  ;;  %14833 = vmatmul.mubr.bf16.gmra.mxu1 %v10698_v42  ;;  %14957 = vmatmul.mubr.bf16.gmra.mxu0 %v11255_v39  ;;  %v10650_v39 = vld [vmem:[#allocation2 + $0x89] sm:$0xff] }
 0x836   : > { %v9989_v30 = vadd.f32 %v9762_v23, %v18756_v49  ;;  %14836 = vmatprep.mubr.msk.bf16.mxu1 %vm15473_vm0, %v18830_v31  ;;  %14960 = vmatprep.mubr.msk.bf16.mxu0 %vm15473_vm0, %v18830_v31  ;;  %v10699_v0 = vpack.c.bf16 %v10651_v46, %v10650_v39 }
 0x837   : > { %v14598_v6 = vpop.f32.mrf.mxu1  ;;  %v14722_v4 = vpop.f32.mrf.mxu0 }
 0x838   : > { %v19051_v22 = vadd.f32 %v10319_v48, %v9989_v30  ;;  %v11209_v30 = vld [vmem:[%s15660_s26 + $0x60] sm:$0xff] }
 0x839   : > { %v9765_v43 = vpop.f32.mrf.mxu1  ;;  %v10322_v5 = vpop.f32.mrf.mxu0  ;;  %v10653_v4 = vld [vmem:[#allocation2 + $0xa1] sm:$0xff] }
 0x83a   : > { %v9990_v49 = vadd.f32 %v9765_v43, %v18760_v1  ;;  %v11210_v1 = vld [vmem:[%s15660_s26 + $0x68] sm:$0xff] }
 0x83b   : > { %v14599_v14 = vpop.f32.mrf.mxu1  ;;  %v14723_v20 = vpop.f32.mrf.mxu0 }
 0x83c   : > { %v19054_v45 = vadd.f32 %v10322_v5, %v9990_v49  ;;  %v11257_v5 = vpack.c.bf16 %v11210_v1, %v11209_v30 }
 0x83d   : > { %v9770_v42 = vpop.f32.mrf.mxu1  ;;  %v10327_v23 = vpop.f32.mrf.mxu0  ;;  %14837 = vmatmul.mubr.bf16.gmra.mxu1 %v10699_v0  ;;  %14961 = vmatmul.mubr.bf16.gmra.mxu0 %v11256_v53  ;;  %v10652_v53 = vld [vmem:[#allocation2 + $0x99] sm:$0xff] }
 0x83e   : > { %v9991_v48 = vadd.f32 %v9770_v42, %v18770_v55  ;;  %14840 = vmatprep.mubr.msk.bf16.mxu1 %vm15473_vm0, %v18830_v31  ;;  %14964 = vmatprep.mubr.msk.bf16.mxu0 %vm15473_vm0, %v18830_v31  ;;  %v10700_v14 = vpack.c.bf16 %v10653_v4, %v10652_v53 }
 0x83f   : > { %v14602_v40 = vpop.f32.mrf.mxu1  ;;  %v14726_v26 = vpop.f32.mrf.mxu0 }
 0x840   : > { %v19063_v6 = vadd.f32 %v10327_v23, %v9991_v48  ;;  %v11211_v48 = vld [vmem:[%s15660_s26 + $0x70] sm:$0xff] }
 0x841   : > { %v9773_v46 = vpop.f32.mrf.mxu1  ;;  %v10330_v43 = vpop.f32.mrf.mxu0  ;;  %v10655_v26 = vld [vmem:[#allocation2 + $0xb1] sm:$0xff] }
 0x842   : > { %v9992_v55 = vadd.f32 %v9773_v46, %v18774_v50  ;;  %v11212_v50 = vld [vmem:[%s15660_s26 + $0x78] sm:$0xff] }
 0x843   : > { %v14603_v49 = vpop.f32.mrf.mxu1  ;;  %v14727_v39 = vpop.f32.mrf.mxu0 }
 0x844   : > { %v19066_v20 = vadd.f32 %v10330_v43, %v9992_v55  ;;  %v11258_v43 = vpack.c.bf16 %v11212_v50, %v11211_v48 }
 0x845   : > { %v9778_v0 = vpop.f32.mrf.mxu1  ;;  %v10335_v42 = vpop.f32.mrf.mxu0  ;;  %14841 = vmatmul.mubr.bf16.gmra.mxu1 %v10700_v14  ;;  %14965 = vmatmul.mubr.bf16.gmra.mxu0 %v11257_v5  ;;  %v10654_v5 = vld [vmem:[#allocation2 + $0xa9] sm:$0xff] }
 0x846   : > { %v9993_v23 = vadd.f32 %v9778_v0, %v18781_v36  ;;  %14844 = vmatprep.mubr.msk.bf16.mxu1 %vm15473_vm0, %v18830_v31  ;;  %14968 = vmatprep.mubr.msk.bf16.mxu0 %vm15473_vm0, %v18830_v31  ;;  %v10701_v49 = vpack.c.bf16 %v10655_v26, %v10654_v5 }
 0x847   : > { %v14606_v30 = vpop.f32.mrf.mxu1  ;;  %v14730_v1 = vpop.f32.mrf.mxu0 }
 0x848   : > { %v19075_v40 = vadd.f32 %v10335_v42, %v9993_v23  ;;  %v11213_v23 = vld [vmem:[%s15660_s26 + $0x80] sm:$0xff] }
 0x849   : > { %v9781_v4 = vpop.f32.mrf.mxu1  ;;  %v10338_v46 = vpop.f32.mrf.mxu0  ;;  %v10657_v1 = vld [vmem:[#allocation2 + $0xc1] sm:$0xff] }
 0x84a   : > { %v9994_v36 = vadd.f32 %v9781_v4, %v18784_v59  ;;  %v11214_v59 = vld [vmem:[%s15660_s26 + $0x88] sm:$0xff] }
 0x84b   : > { %v14607_v55 = vpop.f32.mrf.mxu1  ;;  %v14731_v53 = vpop.f32.mrf.mxu0 }
 0x84c   : > { %v19078_v39 = vadd.f32 %v10338_v46, %v9994_v36  ;;  %v11259_v46 = vpack.c.bf16 %v11214_v59, %v11213_v23 }
 0x84d   : > { %v9786_v14 = vpop.f32.mrf.mxu1  ;;  %v10343_v0 = vpop.f32.mrf.mxu0  ;;  %14845 = vmatmul.mubr.bf16.gmra.mxu1 %v10701_v49  ;;  %14969 = vmatmul.mubr.bf16.gmra.mxu0 %v11258_v43  ;;  %v10656_v43 = vld [vmem:[#allocation2 + $0xb9] sm:$0xff] }
 0x84e   : > { %v9995_v42 = vadd.f32 %v9786_v14, %v18791_v19  ;;  %14848 = vmatprep.mubr.msk.bf16.mxu1 %vm15473_vm0, %v18830_v31  ;;  %14972 = vmatprep.mubr.msk.bf16.mxu0 %vm15473_vm0, %v18830_v31  ;;  %v10702_v55 = vpack.c.bf16 %v10657_v1, %v10656_v43 }
 0x84f   : > { %v14610_v48 = vpop.f32.mrf.mxu1  ;;  %v14734_v50 = vpop.f32.mrf.mxu0 }
 0x850   : > { %v19087_v30 = vadd.f32 %v10343_v0, %v9995_v42  ;;  %v19093_v0 = vld [vmem:[#allocation2] sm:$0xff]  ;;  %v11216_v42 = vld [vmem:[%s15660_s26 + $0x98] sm:$0xff] }
 0x851   : > { %v9789_v26 = vpop.f32.mrf.mxu1  ;;  %v10346_v4 = vpop.f32.mrf.mxu0  ;;  %v10659_v50 = vld [vmem:[#allocation2 + $0xd1] sm:$0xff] }
 0x852   : > { %v9996_v19 = vadd.f32 %v9789_v26, %v18794_v61  ;;  %v11215_v61 = vld [vmem:[%s15660_s26 + $0x90] sm:$0xff] }
 0x853   : > { %v14611_v36 = vpop.f32.mrf.mxu1  ;;  %v14735_v5 = vpop.f32.mrf.mxu0 }
 0x854   : > { %v19090_v53 = vadd.f32 %v10346_v4, %v9996_v19 }
 0x855   : > { %v9794_v31 = vpop.f32.mrf.mxu1  ;;  %v10351_v49 = vpop.f32.mrf.mxu0  ;;  %14849 = vmatmul.mubr.bf16.gmra.mxu1 %v10702_v55  ;;  %14973 = vmatmul.mubr.bf16.gmra.mxu0 %v11259_v46  ;;  %v10658_v46 = vld [vmem:[#allocation2 + $0xc9] sm:$0xff] }
 0x856   : > { %v9997_v14 = vadd.f32 %v9794_v31, %v18804_v15  ;;  %14852 = vmatprep.mubr.msk.bf16.mxu1 %vm15473_vm0, %v19093_v0  ;;  %14976 = vmatprep.mubr.msk.bf16.mxu0 %vm15473_vm0, %v19093_v0  ;;  %v11260_v15 = vpack.c.bf16 %v11216_v42, %v11215_v61  ;;  %v10703_v36 = vpack.c.bf16 %v10659_v50, %v10658_v46 }
 0x857   : > { %v14614_v23 = vpop.f32.mrf.mxu1  ;;  %v14738_v59 = vpop.f32.mrf.mxu0 }
 0x858   : > { %v19101_v48 = vadd.f32 %v10351_v49, %v9997_v14  ;;  %v11217_v14 = vld [vmem:[%s15660_s26 + $0xa0] sm:$0xff] }
 0x859   : > { %v9797_v1 = vpop.f32.mrf.mxu1  ;;  %v10354_v26 = vpop.f32.mrf.mxu0  ;;  %v10661_v59 = vld [vmem:[#allocation2 + $0xe1] sm:$0xff] }
 0x85a   : > { %v9998_v4 = vadd.f32 %v9797_v1, %v18807_v10  ;;  %v11218_v10 = vld [vmem:[%s15660_s26 + $0xa8] sm:$0xff] }
 0x85b   : > { %v14615_v19 = vpop.f32.mrf.mxu1  ;;  %v14739_v43 = vpop.f32.mrf.mxu0 }
 0x85c   : > { %v19104_v5 = vadd.f32 %v10354_v26, %v9998_v4  ;;  %v11261_v26 = vpack.c.bf16 %v11218_v10, %v11217_v14 }
 0x85d   : > { %v9802_v55 = vpop.f32.mrf.mxu1  ;;  %v10359_v31 = vpop.f32.mrf.mxu0  ;;  %14853 = vmatmul.mubr.bf16.gmra.mxu1 %v10703_v36  ;;  %14977 = vmatmul.mubr.bf16.gmra.mxu0 %v11260_v15  ;;  %v10660_v15 = vld [vmem:[#allocation2 + $0xd9] sm:$0xff] }
 0x85e   : > { %v9999_v49 = vadd.f32 %v9802_v55, %v18814_v63  ;;  %14856 = vmatprep.mubr.msk.bf16.mxu1 %vm15473_vm0, %v19093_v0  ;;  %14980 = vmatprep.mubr.msk.bf16.mxu0 %vm15473_vm0, %v19093_v0  ;;  %v10704_v19 = vpack.c.bf16 %v10661_v59, %v10660_v15 }
 0x85f   : > { %v14618_v61 = vpop.f32.mrf.mxu1  ;;  %v14742_v42 = vpop.f32.mrf.mxu0 }
 0x860   : > { %v19113_v23 = vadd.f32 %v10359_v31, %v9999_v49  ;;  %v11219_v49 = vld [vmem:[%s15660_s26 + $0xb0] sm:$0xff] }
 0x861   : > { %v9805_v50 = vpop.f32.mrf.mxu1  ;;  %v10362_v1 = vpop.f32.mrf.mxu0  ;;  %v10663_v42 = vld [vmem:[#allocation2 + $0xf1] sm:$0xff] }
 0x862   : > { %v10000_v63 = vadd.f32 %v9805_v50, %v18817_v51  ;;  %v11220_v51 = vld [vmem:[%s15660_s26 + $0xb8] sm:$0xff] }
 0x863   : > { %v14619_v4 = vpop.f32.mrf.mxu1  ;;  %v14743_v46 = vpop.f32.mrf.mxu0 }
 0x864   : > { %v19116_v43 = vadd.f32 %v10362_v1, %v10000_v63  ;;  %v11262_v1 = vpack.c.bf16 %v11220_v51, %v11219_v49 }
 0x865   : > { %v9810_v36 = vpop.f32.mrf.mxu1  ;;  %v10367_v55 = vpop.f32.mrf.mxu0  ;;  %14857 = vmatmul.mubr.bf16.gmra.mxu1 %v10704_v19  ;;  %14981 = vmatmul.mubr.bf16.gmra.mxu0 %v11261_v26  ;;  %v10662_v26 = vld [vmem:[#allocation2 + $0xe9] sm:$0xff] }
 0x866   : > { %v10001_v31 = vadd.f32 %v9810_v36, %v18824_v21  ;;  %14860 = vmatprep.mubr.msk.bf16.mxu1 %vm15473_vm0, %v19093_v0  ;;  %14984 = vmatprep.mubr.msk.bf16.mxu0 %vm15473_vm0, %v19093_v0  ;;  %v10705_v4 = vpack.c.bf16 %v10663_v42, %v10662_v26 }
 0x867   : > { %v14622_v14 = vpop.f32.mrf.mxu1  ;;  %v14746_v10 = vpop.f32.mrf.mxu0 }
 0x868   : > { %v19125_v61 = vadd.f32 %v10367_v55, %v10001_v31  ;;  %v11221_v31 = vld [vmem:[%s15660_s26 + $0xc0] sm:$0xff] }
 0x869   : > { %v9813_v59 = vpop.f32.mrf.mxu1  ;;  %v10370_v50 = vpop.f32.mrf.mxu0  ;;  %v10665_v10 = vld [vmem:[#allocation2 + $0x101] sm:$0xff] }
 0x86a   : > { %v10002_v21 = vadd.f32 %v9813_v59, %v18827_v54  ;;  %v11222_v54 = vld [vmem:[%s15660_s26 + $0xc8] sm:$0xff] }
 0x86b   : > { %v14623_v63 = vpop.f32.mrf.mxu1  ;;  %v14747_v15 = vpop.f32.mrf.mxu0 }
 0x86c   : > { %v19128_v46 = vadd.f32 %v10370_v50, %v10002_v21  ;;  %v11263_v50 = vpack.c.bf16 %v11222_v54, %v11221_v31 }
 0x86d   : > { %v9818_v19 = vpop.f32.mrf.mxu1  ;;  %v10375_v36 = vpop.f32.mrf.mxu0  ;;  %14861 = vmatmul.mubr.bf16.gmra.mxu1 %v10705_v4  ;;  %14985 = vmatmul.mubr.bf16.gmra.mxu0 %v11262_v1  ;;  %v10664_v1 = vld [vmem:[#allocation2 + $0xf9] sm:$0xff] }
 0x86e   : > { %v10003_v55 = vadd.f32 %v9818_v19, %v18836_v27  ;;  %14864 = vmatprep.mubr.msk.bf16.mxu1 %vm15473_vm0, %v19093_v0  ;;  %14988 = vmatprep.mubr.msk.bf16.mxu0 %vm15473_vm0, %v19093_v0  ;;  %v10706_v63 = vpack.c.bf16 %v10665_v10, %v10664_v1 }
 0x86f   : > { %v14626_v49 = vpop.f32.mrf.mxu1  ;;  %v14750_v51 = vpop.f32.mrf.mxu0 }
 0x870   : > { %v19137_v14 = vadd.f32 %v10375_v36, %v10003_v55  ;;  %v11223_v55 = vld [vmem:[%s15660_s26 + $0xd0] sm:$0xff] }
 0x871   : > { %v9821_v42 = vpop.f32.mrf.mxu1  ;;  %v10378_v59 = vpop.f32.mrf.mxu0  ;;  %v10667_v51 = vld [vmem:[#allocation2 + $0x111] sm:$0xff] }
 0x872   : > { %v10004_v27 = vadd.f32 %v9821_v42, %v18839_v25  ;;  %v11224_v25 = vld [vmem:[%s15660_s26 + $0xd8] sm:$0xff] }
 0x873   : > { %v14627_v21 = vpop.f32.mrf.mxu1  ;;  %v14751_v26 = vpop.f32.mrf.mxu0 }
 0x874   : > { %v19140_v15 = vadd.f32 %v10378_v59, %v10004_v27  ;;  %v11264_v59 = vpack.c.bf16 %v11224_v25, %v11223_v55 }
 0x875   : > { %v9826_v4 = vpop.f32.mrf.mxu1  ;;  %v10383_v19 = vpop.f32.mrf.mxu0  ;;  %14865 = vmatmul.mubr.bf16.gmra.mxu1 %v10706_v63  ;;  %14989 = vmatmul.mubr.bf16.gmra.mxu0 %v11263_v50  ;;  %v10666_v50 = vld [vmem:[#allocation2 + $0x109] sm:$0xff] }
 0x876   : > { %v10005_v36 = vadd.f32 %v9826_v4, %v18846_v16  ;;  %14868 = vmatprep.mubr.msk.bf16.mxu1 %vm15473_vm0, %v19093_v0  ;;  %14992 = vmatprep.mubr.msk.bf16.mxu0 %vm15473_vm0, %v19093_v0  ;;  %v10707_v21 = vpack.c.bf16 %v10667_v51, %v10666_v50 }
 0x877   : > { %v14630_v31 = vpop.f32.mrf.mxu1  ;;  %v14754_v54 = vpop.f32.mrf.mxu0 }
 0x878   : > { %v19149_v49 = vadd.f32 %v10383_v19, %v10005_v36  ;;  %v11225_v36 = vld [vmem:[%s15660_s26 + $0xe0] sm:$0xff] }
 0x879   : > { %v9829_v10 = vpop.f32.mrf.mxu1  ;;  %v10386_v42 = vpop.f32.mrf.mxu0  ;;  %v10669_v54 = vld [vmem:[#allocation2 + $0x121] sm:$0xff] }
 0x87a   : > { %v10006_v16 = vadd.f32 %v9829_v10, %v18849_v41  ;;  %v11226_v41 = vld [vmem:[%s15660_s26 + $0xe8] sm:$0xff] }
 0x87b   : > { %v14631_v27 = vpop.f32.mrf.mxu1  ;;  %v14755_v1 = vpop.f32.mrf.mxu0 }
 0x87c   : > { %v19152_v26 = vadd.f32 %v10386_v42, %v10006_v16  ;;  %v11265_v42 = vpack.c.bf16 %v11226_v41, %v11225_v36 }
 0x87d   : > { %v9834_v63 = vpop.f32.mrf.mxu1  ;;  %v10391_v4 = vpop.f32.mrf.mxu0  ;;  %14869 = vmatmul.mubr.bf16.gmra.mxu1 %v10707_v21  ;;  %14993 = vmatmul.mubr.bf16.gmra.mxu0 %v11264_v59  ;;  %v10668_v59 = vld [vmem:[#allocation2 + $0x119] sm:$0xff] }
 0x87e   : > { %v10007_v19 = vadd.f32 %v9834_v63, %v18856_v37  ;;  %14872 = vmatprep.mubr.msk.bf16.mxu1 %vm15473_vm0, %v19093_v0  ;;  %14996 = vmatprep.mubr.msk.bf16.mxu0 %vm15473_vm0, %v19093_v0  ;;  %v10708_v27 = vpack.c.bf16 %v10669_v54, %v10668_v59 }
 0x87f   : > { %v14634_v55 = vpop.f32.mrf.mxu1  ;;  %v14758_v25 = vpop.f32.mrf.mxu0 }
 0x880   : > { %v19161_v31 = vadd.f32 %v10391_v4, %v10007_v19  ;;  %v11227_v19 = vld [vmem:[%s15660_s26 + $0xf0] sm:$0xff] }
 0x881   : > { %v9837_v51 = vpop.f32.mrf.mxu1  ;;  %v10394_v10 = vpop.f32.mrf.mxu0  ;;  %v10671_v25 = vld [vmem:[#allocation2 + $0x131] sm:$0xff] }
 0x882   : > { %v10008_v37 = vadd.f32 %v9837_v51, %v18859_v56  ;;  %v11228_v56 = vld [vmem:[%s15660_s26 + $0xf8] sm:$0xff] }
 0x883   : > { %v14635_v16 = vpop.f32.mrf.mxu1  ;;  %v14759_v50 = vpop.f32.mrf.mxu0 }
 0x884   : > { %v19164_v1 = vadd.f32 %v10394_v10, %v10008_v37  ;;  %v11266_v10 = vpack.c.bf16 %v11228_v56, %v11227_v19 }
 0x885   : > { %v9842_v21 = vpop.f32.mrf.mxu1  ;;  %v10399_v63 = vpop.f32.mrf.mxu0  ;;  %14873 = vmatmul.mubr.bf16.gmra.mxu1 %v10708_v27  ;;  %14997 = vmatmul.mubr.bf16.gmra.mxu0 %v11265_v42  ;;  %v10670_v42 = vld [vmem:[#allocation2 + $0x129] sm:$0xff] }
 0x886   : > { %v10009_v4 = vadd.f32 %v9842_v21, %v18866_v57  ;;  %14876 = vmatprep.mubr.msk.bf16.mxu1 %vm15473_vm0, %v19093_v0  ;;  %15000 = vmatprep.mubr.msk.bf16.mxu0 %vm15473_vm0, %v19093_v0  ;;  %v10709_v16 = vpack.c.bf16 %v10671_v25, %v10670_v42 }
 0x887   : > { %v14638_v36 = vpop.f32.mrf.mxu1  ;;  %v14762_v41 = vpop.f32.mrf.mxu0 }
 0x888   : > { %v19173_v55 = vadd.f32 %v10399_v63, %v10009_v4  ;;  %v11229_v4 = vld [vmem:[%s15660_s26 + $0x100] sm:$0xff] }
 0x889   : > { %v9845_v54 = vpop.f32.mrf.mxu1  ;;  %v10402_v51 = vpop.f32.mrf.mxu0  ;;  %v10673_v41 = vld [vmem:[#allocation2 + $0x141] sm:$0xff] }
 0x88a   : > { %v10010_v57 = vadd.f32 %v9845_v54, %v18869_v62  ;;  %v11230_v62 = vld [vmem:[%s15660_s26 + $0x108] sm:$0xff] }
 0x88b   : > { %v14639_v37 = vpop.f32.mrf.mxu1  ;;  %v14763_v59 = vpop.f32.mrf.mxu0 }
 0x88c   : > { %v19176_v50 = vadd.f32 %v10402_v51, %v10010_v57  ;;  %v11267_v51 = vpack.c.bf16 %v11230_v62, %v11229_v4 }
 0x88d   : > { %v9850_v27 = vpop.f32.mrf.mxu1  ;;  %v10407_v21 = vpop.f32.mrf.mxu0  ;;  %14877 = vmatmul.mubr.bf16.gmra.mxu1 %v10709_v16  ;;  %15001 = vmatmul.mubr.bf16.gmra.mxu0 %v11266_v10  ;;  %v10672_v10 = vld [vmem:[#allocation2 + $0x139] sm:$0xff] }
 0x88e   : > { %v10011_v63 = vadd.f32 %v9850_v27, %v18876_v12  ;;  %14880 = vmatprep.mubr.msk.bf16.mxu1 %vm15473_vm0, %v19093_v0  ;;  %15004 = vmatprep.mubr.msk.bf16.mxu0 %vm15473_vm0, %v19093_v0  ;;  %v10710_v37 = vpack.c.bf16 %v10673_v41, %v10672_v10 }
 0x88f   : > { %v14642_v19 = vpop.f32.mrf.mxu1  ;;  %v14766_v56 = vpop.f32.mrf.mxu0 }
 0x890   : > { %v19185_v36 = vadd.f32 %v10407_v21, %v10011_v63  ;;  %v11231_v63 = vld [vmem:[%s15660_s26 + $0x110] sm:$0xff] }
 0x891   : > { %v9853_v25 = vpop.f32.mrf.mxu1  ;;  %v10410_v54 = vpop.f32.mrf.mxu0  ;;  %v10675_v56 = vld [vmem:[#allocation2 + $0x151] sm:$0xff] }
 0x892   : > { %v10012_v12 = vadd.f32 %v9853_v25, %v18879_v18  ;;  %v11232_v18 = vld [vmem:[%s15660_s26 + $0x118] sm:$0xff] }
 0x893   : > { %v14643_v57 = vpop.f32.mrf.mxu1  ;;  %v14767_v42 = vpop.f32.mrf.mxu0 }
 0x894   : > { %v19188_v59 = vadd.f32 %v10410_v54, %v10012_v12  ;;  %v11268_v54 = vpack.c.bf16 %v11232_v18, %v11231_v63 }
 0x895   : > { %v9858_v16 = vpop.f32.mrf.mxu1  ;;  %v10415_v27 = vpop.f32.mrf.mxu0  ;;  %14881 = vmatmul.mubr.bf16.gmra.mxu1 %v10710_v37  ;;  %15005 = vmatmul.mubr.bf16.gmra.mxu0 %v11267_v51  ;;  %v10674_v51 = vld [vmem:[#allocation2 + $0x149] sm:$0xff] }
 0x896   : > { %v10013_v21 = vadd.f32 %v9858_v16, %v18886_v38  ;;  %14884 = vmatprep.mubr.msk.bf16.mxu1 %vm15473_vm0, %v19093_v0  ;;  %15008 = vmatprep.mubr.msk.bf16.mxu0 %vm15473_vm0, %v19093_v0  ;;  %v10711_v57 = vpack.c.bf16 %v10675_v56, %v10674_v51 }
 0x897   : > { %v14646_v4 = vpop.f32.mrf.mxu1  ;;  %v14770_v62 = vpop.f32.mrf.mxu0 }
 0x898   : > { %v19197_v19 = vadd.f32 %v10415_v27, %v10013_v21  ;;  %v11233_v21 = vld [vmem:[%s15660_s26 + $0x120] sm:$0xff] }
 0x899   : > { %v9861_v41 = vpop.f32.mrf.mxu1  ;;  %v10418_v25 = vpop.f32.mrf.mxu0  ;;  %v10677_v62 = vld [vmem:[#allocation2 + $0x161] sm:$0xff] }
 0x89a   : > { %v10014_v38 = vadd.f32 %v9861_v41, %v18889_v9  ;;  %v11234_v9 = vld [vmem:[%s15660_s26 + $0x128] sm:$0xff] }
 0x89b   : > { %v14647_v12 = vpop.f32.mrf.mxu1  ;;  %v14771_v10 = vpop.f32.mrf.mxu0 }
 0x89c   : > { %v19200_v42 = vadd.f32 %v10418_v25, %v10014_v38  ;;  %v11269_v25 = vpack.c.bf16 %v11234_v9, %v11233_v21 }
 0x89d   : > { %v9866_v37 = vpop.f32.mrf.mxu1  ;;  %v10423_v16 = vpop.f32.mrf.mxu0  ;;  %14885 = vmatmul.mubr.bf16.gmra.mxu1 %v10711_v57  ;;  %15009 = vmatmul.mubr.bf16.gmra.mxu0 %v11268_v54  ;;  %v10676_v54 = vld [vmem:[#allocation2 + $0x159] sm:$0xff] }
 0x89e   : > { %v10015_v27 = vadd.f32 %v9866_v37, %v18896_v60  ;;  %14888 = vmatprep.mubr.msk.bf16.mxu1 %vm15473_vm0, %v19093_v0  ;;  %15012 = vmatprep.mubr.msk.bf16.mxu0 %vm15473_vm0, %v19093_v0  ;;  %v10712_v12 = vpack.c.bf16 %v10677_v62, %v10676_v54 }
 0x89f   : > { %v14650_v63 = vpop.f32.mrf.mxu1  ;;  %v14774_v18 = vpop.f32.mrf.mxu0 }
 0x8a0   : > { %v19209_v4 = vadd.f32 %v10423_v16, %v10015_v27  ;;  %v11235_v27 = vld [vmem:[%s15660_s26 + $0x130] sm:$0xff] }
 0x8a1   : > { %v9869_v56 = vpop.f32.mrf.mxu1  ;;  %v10426_v41 = vpop.f32.mrf.mxu0  ;;  %v10679_v18 = vld [vmem:[#allocation2 + $0x171] sm:$0xff] }
 0x8a2   : > { %v10016_v60 = vadd.f32 %v9869_v56, %v18899_v8  ;;  %v11236_v8 = vld [vmem:[%s15660_s26 + $0x138] sm:$0xff] }
 0x8a3   : > { %v14651_v38 = vpop.f32.mrf.mxu1  ;;  %v14775_v51 = vpop.f32.mrf.mxu0 }
 0x8a4   : > { %v19212_v10 = vadd.f32 %v10426_v41, %v10016_v60  ;;  %v11270_v41 = vpack.c.bf16 %v11236_v8, %v11235_v27  ;;  %v10678_v60 = vld [vmem:[#allocation2 + $0x169] sm:$0xff] }
 0x8a5   : > { %v9874_v57 = vpop.f32.mrf.mxu1  ;;  %v10431_v37 = vpop.f32.mrf.mxu0  ;;  %14889 = vmatmul.mubr.bf16.gmra.mxu1 %v10712_v12  ;;  %15013 = vmatmul.mubr.bf16.gmra.mxu0 %v11269_v25  ;;  %v19799_v25 = vld [vmem:[#allocation49_spill] sm:$0xff]  ;;  %v10713_v51 = vpack.c.bf16 %v10679_v18, %v10678_v60  ;;  %v11238_v8 = vld [vmem:[%s15660_s26 + $0x148] sm:$0xff] }
 0x8a6   : > { %19797 = vst [vmem:[#allocation16_spill] sm:$0xff] %v19212_v10  ;;  %v10017_v16 = vadd.f32 %v9874_v57, %v18906_v7  ;;  %14892 = vmatprep.mubr.msk.bf16.mxu1 %vm15473_vm0, %v19093_v0  ;;  %15016 = vmatprep.mubr.msk.bf16.mxu0 %vm15473_vm0, %v19093_v0  ;;  %v11237_v27 = vld [vmem:[%s15660_s26 + $0x140] sm:$0xff] }
 0x8a7   : > { %v14654_v21 = vpop.f32.mrf.mxu1  ;;  %v14778_v9 = vpop.f32.mrf.mxu0  ;;  %v10681_v18 = vld [vmem:[#allocation2 + $0x181] sm:$0xff] }
 0x8a8   : > { %v19221_v63 = vadd.f32 %v10431_v37, %v10017_v16  ;;  %v19801_v37 = vld [vmem:[#allocation50_spill] sm:$0xff] }
 0x8a9   : > { %v9877_v62 = vpop.f32.mrf.mxu1  ;;  %v10434_v56 = vpop.f32.mrf.mxu0 }
 0x8aa   : > { %19798 = vst [vmem:[#allocation17_spill] sm:$0xff] %v19221_v63  ;;  %v10018_v7 = vadd.f32 %v9877_v62, %v19799_v25 }
 0x8ab   : > { %v14655_v54 = vpop.f32.mrf.mxu1  ;;  %v14779_v38 = vpop.f32.mrf.mxu0 }
 0x8ac   : > { %v19224_v12 = vadd.f32 %v10434_v56, %v10018_v7  ;;  %v19803_v7 = vld [vmem:[#allocation53_spill] sm:$0xff] }
 0x8ad   : > { %v9882_v57 = vpop.f32.mrf.mxu1  ;;  %v10439_v10 = vpop.f32.mrf.mxu0  ;;  %14893 = vmatmul.mubr.bf16.gmra.mxu1 %v10713_v51  ;;  %15017 = vmatmul.mubr.bf16.gmra.mxu0 %v11270_v41  ;;  %v11271_v41 = vpack.c.bf16 %v11238_v8, %v11237_v27  ;;  %v10680_v54 = vld [vmem:[#allocation2 + $0x179] sm:$0xff] }
 0x8ae   : > { %19800 = vst [vmem:[#allocation15_spill] sm:$0xff] %v19224_v12  ;;  %v10019_v16 = vadd.f32 %v9882_v57, %v19801_v37  ;;  %14896 = vmatprep.mubr.msk.bf16.mxu1 %vm15473_vm0, %v19093_v0  ;;  %15020 = vmatprep.mubr.msk.bf16.mxu0 %vm15473_vm0, %v19093_v0  ;;  %v10714_v57 = vpack.c.bf16 %v10681_v18, %v10680_v54  ;;  %v11239_v27 = vld [vmem:[%s15660_s26 + $0x150] sm:$0xff]  ;;  %v11240_v8 = vld [vmem:[%s15660_s26 + $0x158] sm:$0xff] }
 0x8af   : > { %v14658_v21 = vpop.f32.mrf.mxu1  ;;  %v14782_v9 = vpop.f32.mrf.mxu0  ;;  %v10683_v18 = vld [vmem:[#allocation2 + $0x191] sm:$0xff]  ;;  %v10682_v54 = vld [vmem:[#allocation2 + $0x189] sm:$0xff] }
 0x8b0   : > { %v19233_v62 = vadd.f32 %v10439_v10, %v10019_v16  ;;  %v19805_v10 = vld [vmem:[#allocation54_spill] sm:$0xff] }
 0x8b1   : > { %v9885_v56 = vpop.f32.mrf.mxu1  ;;  %v10442_v25 = vpop.f32.mrf.mxu0 }
 0x8b2   : > { %19802 = vst [vmem:[#allocation19_spill] sm:$0xff] %v19233_v62  ;;  %v10020_v60 = vadd.f32 %v9885_v56, %v19803_v7 }
 0x8b3   : > { %v14659_v38 = vpop.f32.mrf.mxu1  ;;  %v14783_v51 = vpop.f32.mrf.mxu0 }
 0x8b4   : > { %v19236_v37 = vadd.f32 %v10442_v25, %v10020_v60  ;;  %v19806_v60 = vld [vmem:[#allocation57_spill] sm:$0xff] }
 0x8b5   : > { %v9890_v12 = vpop.f32.mrf.mxu1  ;;  %v10447_v63 = vpop.f32.mrf.mxu0  ;;  %14897 = vmatmul.mubr.bf16.gmra.mxu1 %v10714_v57  ;;  %15021 = vmatmul.mubr.bf16.gmra.mxu0 %v11271_v41  ;;  %v11272_v41 = vpack.c.bf16 %v11240_v8, %v11239_v27  ;;  %v10715_v57 = vpack.c.bf16 %v10683_v18, %v10682_v54  ;;  %v11242_v27 = vld [vmem:[%s15660_s26 + $0x168] sm:$0xff] }
 0x8b6   : > { %19804 = vst [vmem:[#allocation20_spill] sm:$0xff] %v19236_v37  ;;  %v10021_v16 = vadd.f32 %v9890_v12, %v19805_v10  ;;  %14900 = vmatprep.mubr.msk.bf16.mxu1 %vm15473_vm0, %v19093_v0  ;;  %15024 = vmatprep.mubr.msk.bf16.mxu0 %vm15473_vm0, %v19093_v0  ;;  %v10685_v18 = vld [vmem:[#allocation2 + $0x1a1] sm:$0xff] }
 0x8b7   : > { %v14662_v21 = vpop.f32.mrf.mxu1  ;;  %v14786_v9 = vpop.f32.mrf.mxu0 }
 0x8b8   : > { %v19245_v56 = vadd.f32 %v10447_v63, %v10021_v16  ;;  %v11241_v16 = vld [vmem:[%s15660_s26 + $0x160] sm:$0xff] }
 0x8b9   : > { %v9893_v25 = vpop.f32.mrf.mxu1  ;;  %v10450_v7 = vpop.f32.mrf.mxu0 }
 0x8ba   : > { %v10022_v12 = vadd.f32 %v9893_v25, %v19806_v60  ;;  %v19808_v60 = vld [vmem:[#allocation58_spill] sm:$0xff] }
 0x8bb   : > { %v14663_v38 = vpop.f32.mrf.mxu1  ;;  %v14787_v51 = vpop.f32.mrf.mxu0 }
 0x8bc   : > { %v19248_v10 = vadd.f32 %v10450_v7, %v10022_v12 }
 0x8bd   : > { %v9898_v37 = vpop.f32.mrf.mxu1  ;;  %v10455_v62 = vpop.f32.mrf.mxu0  ;;  %14901 = vmatmul.mubr.bf16.gmra.mxu1 %v10715_v57  ;;  %15025 = vmatmul.mubr.bf16.gmra.mxu0 %v11272_v41  ;;  %v11273_v41 = vpack.c.bf16 %v11242_v27, %v11241_v16  ;;  %v11244_v16 = vld [vmem:[%s15660_s26 + $0x178] sm:$0xff] }
 0x8be   : > { %19807 = vst [vmem:[#allocation23_spill] sm:$0xff] %v19248_v10  ;;  %v10023_v63 = vadd.f32 %v9898_v37, %v18936_v3  ;;  %14904 = vmatprep.mubr.msk.bf16.mxu1 %vm15473_vm0, %v19093_v0  ;;  %15028 = vmatprep.mubr.msk.bf16.mxu0 %vm15473_vm0, %v19093_v0  ;;  %v10684_v37 = vld [vmem:[#allocation2 + $0x199] sm:$0xff] }
 0x8bf   : > { %v14666_v8 = vpop.f32.mrf.mxu1  ;;  %v14790_v21 = vpop.f32.mrf.mxu0  ;;  %v10716_v38 = vpack.c.bf16 %v10685_v18, %v10684_v37  ;;  %v10687_v18 = vld [vmem:[#allocation2 + $0x1b1] sm:$0xff] }
 0x8c0   : > { %v19257_v9 = vadd.f32 %v10455_v62, %v10023_v63  ;;  %v11243_v63 = vld [vmem:[%s15660_s26 + $0x170] sm:$0xff] }
 0x8c1   : > { %v9901_v25 = vpop.f32.mrf.mxu1  ;;  %v10458_v7 = vpop.f32.mrf.mxu0 }
 0x8c2   : > { %v10024_v3 = vadd.f32 %v9901_v25, %v19808_v60  ;;  %v10686_v60 = vld [vmem:[#allocation2 + $0x1a9] sm:$0xff] }
 0x8c3   : > { %v14667_v12 = vpop.f32.mrf.mxu1  ;;  %v14791_v54 = vpop.f32.mrf.mxu0 }
 0x8c4   : > { %v19260_v51 = vadd.f32 %v10458_v7, %v10024_v3  ;;  %v10717_v12 = vpack.c.bf16 %v10687_v18, %v10686_v60 }
 0x8c5   : > { %v9906_v57 = vpop.f32.mrf.mxu1  ;;  %v10463_v10 = vpop.f32.mrf.mxu0  ;;  %14905 = vmatmul.mubr.bf16.gmra.mxu1 %v10716_v38  ;;  %15029 = vmatmul.mubr.bf16.gmra.mxu0 %v11273_v41  ;;  %v11274_v41 = vpack.c.bf16 %v11244_v16, %v11243_v63 }
 0x8c6   : > { %v10025_v62 = vadd.f32 %v9906_v57, %v18946_v17  ;;  %14908 = vmatprep.mubr.msk.bf16.mxu1 %vm15473_vm0, %v19093_v0  ;;  %15032 = vmatprep.mubr.msk.bf16.mxu0 %vm15473_vm0, %v19093_v0 }
 0x8c7   : > { %v14670_v27 = vpop.f32.mrf.mxu1  ;;  %v14794_v8 = vpop.f32.mrf.mxu0 }
 0x8c8   : > { %v19269_v21 = vadd.f32 %v10463_v10, %v10025_v62  ;;  %v11245_v62 = vld [vmem:[%s15660_s26 + $0x180] sm:$0xff] }
 0x8c9   : > { %v9909_v25 = vpop.f32.mrf.mxu1  ;;  %v10466_v7 = vpop.f32.mrf.mxu0  ;;  %v10689_v8 = vld [vmem:[#allocation2 + $0x1c1] sm:$0xff] }
 0x8ca   : > { %v10026_v17 = vadd.f32 %v9909_v25, %v18949_v34  ;;  %v11246_v34 = vld [vmem:[%s15660_s26 + $0x188] sm:$0xff] }
 0x8cb   : > { %v14671_v3 = vpop.f32.mrf.mxu1  ;;  %v14795_v37 = vpop.f32.mrf.mxu0 }
 0x8cc   : > { %v19272_v54 = vadd.f32 %v10466_v7, %v10026_v17  ;;  %v11275_v7 = vpack.c.bf16 %v11246_v34, %v11245_v62 }
 0x8cd   : > { %v9914_v38 = vpop.f32.mrf.mxu1  ;;  %v10471_v57 = vpop.f32.mrf.mxu0  ;;  %14909 = vmatmul.mubr.bf16.gmra.mxu1 %v10717_v12  ;;  %15033 = vmatmul.mubr.bf16.gmra.mxu0 %v11274_v41  ;;  %v10688_v41 = vld [vmem:[#allocation2 + $0x1b9] sm:$0xff] }
 0x8ce   : > { %v10027_v10 = vadd.f32 %v9914_v38, %v18956_v47  ;;  %14912 = vmatprep.mubr.msk.bf16.mxu1 %vm15473_vm0, %v19093_v0  ;;  %15036 = vmatprep.mubr.msk.bf16.mxu0 %vm15473_vm0, %v19093_v0  ;;  %v10718_v3 = vpack.c.bf16 %v10689_v8, %v10688_v41  ;;  %v10691_v8 = vld [vmem:[#allocation2 + $0x1d1] sm:$0xff] }
 0x8cf   : > { %v14674_v63 = vpop.f32.mrf.mxu1  ;;  %v14798_v16 = vpop.f32.mrf.mxu0 }
 0x8d0   : > { %v19281_v27 = vadd.f32 %v10471_v57, %v10027_v10  ;;  %v11248_v10 = vld [vmem:[%s15660_s26 + $0x198] sm:$0xff] }
 0x8d1   : > { %v9917_v18 = vpop.f32.mrf.mxu1  ;;  %v10474_v25 = vpop.f32.mrf.mxu0  ;;  %v10690_v16 = vld [vmem:[#allocation2 + $0x1c9] sm:$0xff] }
 0x8d2   : > { %v10028_v47 = vadd.f32 %v9917_v18, %v18959_v52  ;;  %v11247_v52 = vld [vmem:[%s15660_s26 + $0x190] sm:$0xff] }
 0x8d3   : > { %v14675_v17 = vpop.f32.mrf.mxu1  ;;  %v14799_v60 = vpop.f32.mrf.mxu0 }
 0x8d4   : > { %v19284_v37 = vadd.f32 %v10474_v25, %v10028_v47  ;;  %v11276_v47 = vpack.c.bf16 %v11248_v10, %v11247_v52  ;;  %v10719_v60 = vpack.c.bf16 %v10691_v8, %v10690_v16  ;;  %v19810_v52 = vld [vmem:[#allocation62_spill] sm:$0xff] }
 0x8d5   : > { %v10820_v12 = vpop.f32.mrf.mxu1  ;;  %14913 = vmatmul.mubr.bf16.gmra.mxu1 %v10718_v3  ;;  %v11376_v38 = vpop.f32.mrf.mxu0  ;;  %15037 = vmatmul.mubr.bf16.gmra.mxu0 %v11275_v7 }
 0x8d6   : > { %v11089_v57 = vadd.f32 %v10820_v12, %v18966_v58  ;;  %14916 = vmatprep.mubr.msk.bf16.mxu1 %vm15473_vm0, %v19093_v0  ;;  %15040 = vmatprep.mubr.msk.bf16.mxu0 %vm15473_vm0, %v19093_v0  ;;  %v19809_v58 = vld [vmem:[#allocation61_spill] sm:$0xff] }
 0x8d7   : > { %v14818_v62 = vpop.f32.mrf.mxu1  ;;  %v14942_v34 = vpop.f32.mrf.mxu0 }
 0x8d8   : > { %v11645_v63 = vadd.f32 %v11376_v38, %v11089_v57  ;;  %v10692_v57 = vld [vmem:[#allocation2 + $0x1d9] sm:$0xff]  ;;  %v10693_v62 = vld [vmem:[#allocation2 + $0x1e1] sm:$0xff] }
 0x8d9   : > { %v10823_v18 = vpop.f32.mrf.mxu1  ;;  %v11379_v25 = vpop.f32.mrf.mxu0  ;;  %v11249_v34 = vld [vmem:[%s15660_s26 + $0x1a0] sm:$0xff] }
 0x8da   : > { %11699 = vst [vmem:[%s19295_s5] sm:$0xff] %v11645_v63  ;;  %v11090_v7 = vadd.f32 %v10823_v18, %v19809_v58  ;;  %v11250_v63 = vld [vmem:[%s15660_s26 + $0x1a8] sm:$0xff]  ;;  %v10720_v58 = vpack.c.bf16 %v10693_v62, %v10692_v57  ;;  %s11767_s26 = sshll.u32 %s19295_s5, 4  ;;  %s19416_s26 = int_to_ptr.vmem [resolvable:$true] %s11767_s26 }
 0x8db   : > { %v14819_v41 = vpop.f32.mrf.mxu1  ;;  %v14943_v17 = vpop.f32.mrf.mxu0  ;;  %s15394_s15 = scalar_lea.vmem %s19416_s26, 6912  ;;  %p15401_p6 = scmp.lt.s32.totalorder %s19416_s26, %s15399_s24 }
 0x8dc   : > { %v11646_v3 = vadd.f32 %v11379_v25, %v11090_v7  ;;  %v11277_v7 = vpack.c.bf16 %v11250_v63, %v11249_v34  ;;  %v19811_v41 = vld [vmem:[#allocation65_spill] sm:$0xff]  ;;  %p15395_p11 = scmp.ne.s32.totalorder %s19416_s26, %s15394_s15  ;;  %p15402_p12 = scmp.lt.s32.totalorder %s15400_s29, %s15394_s15 }
 0x8dd   : > { %v10828_v12 = vpop.f32.mrf.mxu1  ;;  %14917 = vmatmul.mubr.bf16.gmra.mxu1 %v10719_v60  ;;  %v11384_v38 = vpop.f32.mrf.mxu0  ;;  %15041 = vmatmul.mubr.bf16.gmra.mxu0 %v11276_v47 }
 0x8de   : > { %11700 = vst [vmem:[%s19295_s5 + $0x8] sm:$0xff] %v11646_v3  ;;  %v11091_v10 = vadd.f32 %v10828_v12, %v19810_v52  ;;  %14920 = vmatprep.mubr.msk.bf16.mxu1 %vm15473_vm0, %v19093_v0  ;;  %15044 = vmatprep.mubr.msk.bf16.mxu0 %vm15473_vm0, %v19093_v0  ;;  %p15396_p1 = pnand %p15395_p11, %p19818_p10  ;;  %p15403_p7 = por %p15402_p12, %p15401_p6 }
 0x8df   : > { %v14822_v16 = vpop.f32.mrf.mxu1  ;;  %v14946_v8 = vpop.f32.mrf.mxu0 }
 0x8e0   : > { %v11647_v18 = vadd.f32 %v11384_v38, %v11091_v10  ;;  %p15397_p2 = pneg %p15396_p1 }
 0x8e1   : > { %v10831_v25 = vpop.f32.mrf.mxu1  ;;  %v11387_v47 = vpop.f32.mrf.mxu0 }
 0x8e2   : > { %11701 = vst [vmem:[%s19295_s5 + $0x10] sm:$0xff] %v11647_v18  ;;  %v11092_v17 = vadd.f32 %v10831_v25, %v19811_v41  ;;  %p15404_p9 = pnand %p15403_p7, %p15397_p2 }
 0x8e3   : > { %v14823_v60 = vpop.f32.mrf.mxu1  ;;  %v14947_v3 = vpop.f32.mrf.mxu0 }
 0x8e4   : > { %v11648_v12 = vadd.f32 %v11387_v47, %v11092_v17 }
 0x8e5   : > { %v10836_v52 = vpop.f32.mrf.mxu1  ;;  %14921 = vmatmul.mubr.bf16.gmra.mxu1 %v10720_v58  ;;  %v11392_v0 = vpop.f32.mrf.mxu0  ;;  %15045 = vmatmul.mubr.bf16.gmra.mxu0 %v11277_v7 }
 0x8e6   : > { %11702 = vst [vmem:[%s19295_s5 + $0x18] sm:$0xff] %v11648_v12  ;;  %v11093_v16 = vadd.f32 %v10836_v52, %v18991_v28 }
 0x8e7   : > { %v14826_v38 = vpop.f32.mrf.mxu1  ;;  %v14950_v10 = vpop.f32.mrf.mxu0 }
 0x8e8   : > { %v11649_v8 = vadd.f32 %v11392_v0, %v11093_v16 }
 0x8e9   : > { %v10839_v57 = vpop.f32.mrf.mxu1  ;;  %v11395_v62 = vpop.f32.mrf.mxu0 }
 0x8ea   : > { %11703 = vst [vmem:[%s19295_s5 + $0x20] sm:$0xff] %v11649_v8  ;;  %v11094_v34 = vadd.f32 %v10839_v57, %v18994_v33 }
 0x8eb   : > { %v14827_v63 = vpop.f32.mrf.mxu1  ;;  %v14951_v18 = vpop.f32.mrf.mxu0 }
 0x8ec   : > { %v11650_v25 = vadd.f32 %v11395_v62, %v11094_v34 }
 0x8ed   : > { %v10844_v47 = vpop.f32.mrf.mxu1  ;;  %v11400_v58 = vpop.f32.mrf.mxu0 }
 0x8ee   : > { %11704 = vst [vmem:[%s19295_s5 + $0x28] sm:$0xff] %v11650_v25  ;;  %v11095_v7 = vadd.f32 %v10844_v47, %v19003_v13 }
 0x8ef   : > { %v14830_v41 = vpop.f32.mrf.mxu1  ;;  %v14954_v28 = vpop.f32.mrf.mxu0 }
 0x8f0   : > { %v11651_v17 = vadd.f32 %v11400_v58, %v11095_v7 }
 0x8f1   : > { %v10847_v60 = vpop.f32.mrf.mxu1  ;;  %v11403_v3 = vpop.f32.mrf.mxu0 }
 0x8f2   : > { %11705 = vst [vmem:[%s19295_s5 + $0x30] sm:$0xff] %v11651_v17  ;;  %v11096_v12 = vadd.f32 %v10847_v60, %v19006_v29 }
 0x8f3   : > { %v14831_v52 = vpop.f32.mrf.mxu1  ;;  %v14955_v33 = vpop.f32.mrf.mxu0 }
 0x8f4   : > { %v11652_v0 = vadd.f32 %v11403_v3, %v11096_v12 }
 0x8f5   : > { %v10852_v16 = vpop.f32.mrf.mxu1  ;;  %v11408_v38 = vpop.f32.mrf.mxu0 }
 0x8f6   : > { %11706 = vst [vmem:[%s19295_s5 + $0x38] sm:$0xff] %v11652_v0  ;;  %v11097_v10 = vadd.f32 %v10852_v16, %v19015_v32 }
 0x8f7   : > { %v14834_v8 = vpop.f32.mrf.mxu1  ;;  %v14958_v13 = vpop.f32.mrf.mxu0 }
 0x8f8   : > { %v11653_v57 = vadd.f32 %v11408_v38, %v11097_v10 }
 0x8f9   : > { %v10855_v62 = vpop.f32.mrf.mxu1  ;;  %v11411_v34 = vpop.f32.mrf.mxu0 }
 0x8fa   : > { %11707 = vst [vmem:[%s19295_s5 + $0x40] sm:$0xff] %v11653_v57  ;;  %v11098_v63 = vadd.f32 %v10855_v62, %v19018_v2 }
 0x8fb   : > { %v14835_v18 = vpop.f32.mrf.mxu1  ;;  %v14959_v29 = vpop.f32.mrf.mxu0 }
 0x8fc   : > { %v11654_v25 = vadd.f32 %v11411_v34, %v11098_v63 }
 0x8fd   : > { %v10860_v47 = vpop.f32.mrf.mxu1  ;;  %v11416_v58 = vpop.f32.mrf.mxu0 }
 0x8fe   : > { %11708 = vst [vmem:[%s19295_s5 + $0x48] sm:$0xff] %v11654_v25  ;;  %v11099_v7 = vadd.f32 %v10860_v47, %v19027_v24 }
 0x8ff   : > { %v14838_v41 = vpop.f32.mrf.mxu1  ;;  %v14962_v32 = vpop.f32.mrf.mxu0 }
 0x900   : > { %v11655_v28 = vadd.f32 %v11416_v58, %v11099_v7 }
 0x901   : > { %v10863_v17 = vpop.f32.mrf.mxu1  ;;  %v11419_v60 = vpop.f32.mrf.mxu0 }
 0x902   : > { %11709 = vst [vmem:[%s19295_s5 + $0x50] sm:$0xff] %v11655_v28  ;;  %v11100_v3 = vadd.f32 %v10863_v17, %v19030_v44 }
 0x903   : > { %v14839_v12 = vpop.f32.mrf.mxu1  ;;  %v14963_v2 = vpop.f32.mrf.mxu0 }
 0x904   : > { %v11656_v52 = vadd.f32 %v11419_v60, %v11100_v3 }
 0x905   : > { %v10868_v33 = vpop.f32.mrf.mxu1  ;;  %v11424_v0 = vpop.f32.mrf.mxu0 }
 0x906   : > { %11710 = vst [vmem:[%s19295_s5 + $0x58] sm:$0xff] %v11656_v52  ;;  %v11101_v16 = vadd.f32 %v10868_v33, %v19039_v35 }
 0x907   : > { %v14842_v38 = vpop.f32.mrf.mxu1  ;;  %v14966_v24 = vpop.f32.mrf.mxu0 }
 0x908   : > { %v11657_v10 = vadd.f32 %v11424_v0, %v11101_v16 }
 0x909   : > { %v10871_v8 = vpop.f32.mrf.mxu1  ;;  %v11427_v13 = vpop.f32.mrf.mxu0 }
 0x90a   : > { %11711 = vst [vmem:[%s19295_s5 + $0x60] sm:$0xff] %v11657_v10  ;;  %v11102_v57 = vadd.f32 %v10871_v8, %v19042_v11 }
 0x90b   : > { %v14843_v62 = vpop.f32.mrf.mxu1  ;;  %v14967_v44 = vpop.f32.mrf.mxu0 }
 0x90c   : > { %v11658_v34 = vadd.f32 %v11427_v13, %v11102_v57 }
 0x90d   : > { %v10876_v63 = vpop.f32.mrf.mxu1  ;;  %v11432_v18 = vpop.f32.mrf.mxu0 }
 0x90e   : > { %11712 = vst [vmem:[%s19295_s5 + $0x68] sm:$0xff] %v11658_v34  ;;  %v11103_v29 = vadd.f32 %v10876_v63, %v19051_v22 }
 0x90f   : > { %v14846_v25 = vpop.f32.mrf.mxu1  ;;  %v14970_v35 = vpop.f32.mrf.mxu0 }
 0x910   : > { %v11659_v47 = vadd.f32 %v11432_v18, %v11103_v29 }
 0x911   : > { %v10879_v58 = vpop.f32.mrf.mxu1  ;;  %v11435_v7 = vpop.f32.mrf.mxu0 }
 0x912   : > { %11713 = vst [vmem:[%s19295_s5 + $0x70] sm:$0xff] %v11659_v47  ;;  %v11104_v41 = vadd.f32 %v10879_v58, %v19054_v45 }
 0x913   : > { %v14847_v32 = vpop.f32.mrf.mxu1  ;;  %v14971_v11 = vpop.f32.mrf.mxu0 }
 0x914   : > { %v11660_v28 = vadd.f32 %v11435_v7, %v11104_v41 }
 0x915   : > { %v10884_v17 = vpop.f32.mrf.mxu1  ;;  %v11440_v60 = vpop.f32.mrf.mxu0 }
 0x916   : > { %11714 = vst [vmem:[%s19295_s5 + $0x78] sm:$0xff] %v11660_v28  ;;  %v11105_v3 = vadd.f32 %v10884_v17, %v19063_v6 }
 0x917   : > { %v14850_v12 = vpop.f32.mrf.mxu1  ;;  %v14974_v22 = vpop.f32.mrf.mxu0 }
 0x918   : > { %v11661_v2 = vadd.f32 %v11440_v60, %v11105_v3 }
 0x919   : > { %v10887_v52 = vpop.f32.mrf.mxu1  ;;  %v11443_v33 = vpop.f32.mrf.mxu0 }
 0x91a   : > { %11715 = vst [vmem:[%s19295_s5 + $0x80] sm:$0xff] %v11661_v2  ;;  %v11106_v0 = vadd.f32 %v10887_v52, %v19066_v20 }
 0x91b   : > { %v14851_v16 = vpop.f32.mrf.mxu1  ;;  %v14975_v45 = vpop.f32.mrf.mxu0 }
 0x91c   : > { %v11662_v38 = vadd.f32 %v11443_v33, %v11106_v0 }
 0x91d   : > { %v10892_v24 = vpop.f32.mrf.mxu1  ;;  %v11448_v10 = vpop.f32.mrf.mxu0 }
 0x91e   : > { %11716 = vst [vmem:[%s19295_s5 + $0x88] sm:$0xff] %v11662_v38  ;;  %v11107_v8 = vadd.f32 %v10892_v24, %v19075_v40 }
 0x91f   : > { %v14854_v13 = vpop.f32.mrf.mxu1  ;;  %v14978_v6 = vpop.f32.mrf.mxu0 }
 0x920   : > { %v11663_v57 = vadd.f32 %v11448_v10, %v11107_v8 }
 0x921   : > { %v10895_v62 = vpop.f32.mrf.mxu1  ;;  %v11451_v44 = vpop.f32.mrf.mxu0 }
 0x922   : > { %11717 = vst [vmem:[%s19295_s5 + $0x90] sm:$0xff] %v11663_v57  ;;  %v11108_v34 = vadd.f32 %v10895_v62, %v19078_v39 }
 0x923   : > { %v14855_v63 = vpop.f32.mrf.mxu1  ;;  %v14979_v20 = vpop.f32.mrf.mxu0 }
 0x924   : > { %v11664_v18 = vadd.f32 %v11451_v44, %v11108_v34 }
 0x925   : > { %v10900_v29 = vpop.f32.mrf.mxu1  ;;  %v11456_v25 = vpop.f32.mrf.mxu0 }
 0x926   : > { %11718 = vst [vmem:[%s19295_s5 + $0x98] sm:$0xff] %v11664_v18  ;;  %v11109_v35 = vadd.f32 %v10900_v29, %v19087_v30 }
 0x927   : > { %v14858_v47 = vpop.f32.mrf.mxu1  ;;  %v14982_v40 = vpop.f32.mrf.mxu0 }
 0x928   : > { %v11665_v58 = vadd.f32 %v11456_v25, %v11109_v35 }
 0x929   : > { %v10903_v7 = vpop.f32.mrf.mxu1  ;;  %v11459_v41 = vpop.f32.mrf.mxu0 }
 0x92a   : > { %11719 = vst [vmem:[%s19295_s5 + $0xa0] sm:$0xff] %v11665_v58  ;;  %v11110_v32 = vadd.f32 %v10903_v7, %v19090_v53 }
 0x92b   : > { %v14859_v11 = vpop.f32.mrf.mxu1  ;;  %v14983_v39 = vpop.f32.mrf.mxu0 }
 0x92c   : > { %v11666_v28 = vadd.f32 %v11459_v41, %v11110_v32 }
 0x92d   : > { %v10908_v17 = vpop.f32.mrf.mxu1  ;;  %v11464_v60 = vpop.f32.mrf.mxu0 }
 0x92e   : > { %11720 = vst [vmem:[%s19295_s5 + $0xa8] sm:$0xff] %v11666_v28  ;;  %v11111_v3 = vadd.f32 %v10908_v17, %v19101_v48 }
 0x92f   : > { %v14862_v12 = vpop.f32.mrf.mxu1  ;;  %v14986_v30 = vpop.f32.mrf.mxu0 }
 0x930   : > { %v11667_v22 = vadd.f32 %v11464_v60, %v11111_v3 }
 0x931   : > { %v10911_v2 = vpop.f32.mrf.mxu1  ;;  %v11467_v52 = vpop.f32.mrf.mxu0 }
 0x932   : > { %11721 = vst [vmem:[%s19295_s5 + $0xb0] sm:$0xff] %v11667_v22  ;;  %v11112_v33 = vadd.f32 %v10911_v2, %v19104_v5 }
 0x933   : > { %v14863_v0 = vpop.f32.mrf.mxu1  ;;  %v14987_v53 = vpop.f32.mrf.mxu0 }
 0x934   : > { %v11668_v16 = vadd.f32 %v11467_v52, %v11112_v33 }
 0x935   : > { %v10916_v45 = vpop.f32.mrf.mxu1  ;;  %v11472_v38 = vpop.f32.mrf.mxu0 }
 0x936   : > { %11722 = vst [vmem:[%s19295_s5 + $0xb8] sm:$0xff] %v11668_v16  ;;  %v11113_v24 = vadd.f32 %v10916_v45, %v19113_v23 }
 0x937   : > { %v14866_v10 = vpop.f32.mrf.mxu1  ;;  %v14990_v48 = vpop.f32.mrf.mxu0 }
 0x938   : > { %v11669_v8 = vadd.f32 %v11472_v38, %v11113_v24 }
 0x939   : > { %v10919_v13 = vpop.f32.mrf.mxu1  ;;  %v11475_v6 = vpop.f32.mrf.mxu0 }
 0x93a   : > { %11723 = vst [vmem:[%s19295_s5 + $0xc0] sm:$0xff] %v11669_v8  ;;  %v11114_v57 = vadd.f32 %v10919_v13, %v19116_v43 }
 0x93b   : > { %v14867_v62 = vpop.f32.mrf.mxu1  ;;  %v14991_v5 = vpop.f32.mrf.mxu0 }
 0x93c   : > { %v11670_v44 = vadd.f32 %v11475_v6, %v11114_v57 }
 0x93d   : > { %v10924_v34 = vpop.f32.mrf.mxu1  ;;  %v11480_v63 = vpop.f32.mrf.mxu0 }
 0x93e   : > { %11724 = vst [vmem:[%s19295_s5 + $0xc8] sm:$0xff] %v11670_v44  ;;  %v11115_v20 = vadd.f32 %v10924_v34, %v19125_v61 }
 0x93f   : > { %v14870_v18 = vpop.f32.mrf.mxu1  ;;  %v14994_v23 = vpop.f32.mrf.mxu0 }
 0x940   : > { %v11671_v29 = vadd.f32 %v11480_v63, %v11115_v20 }
 0x941   : > { %v10927_v25 = vpop.f32.mrf.mxu1  ;;  %v11483_v35 = vpop.f32.mrf.mxu0 }
 0x942   : > { %11725 = vst [vmem:[%s19295_s5 + $0xd0] sm:$0xff] %v11671_v29  ;;  %v11116_v47 = vadd.f32 %v10927_v25, %v19128_v46 }
 0x943   : > { %v14871_v40 = vpop.f32.mrf.mxu1  ;;  %v14995_v43 = vpop.f32.mrf.mxu0 }
 0x944   : > { %v11672_v58 = vadd.f32 %v11483_v35, %v11116_v47 }
 0x945   : > { %v10932_v7 = vpop.f32.mrf.mxu1  ;;  %v11488_v41 = vpop.f32.mrf.mxu0 }
 0x946   : > { %11726 = vst [vmem:[%s19295_s5 + $0xd8] sm:$0xff] %v11672_v58  ;;  %v11117_v32 = vadd.f32 %v10932_v7, %v19137_v14 }
 0x947   : > { %v14874_v11 = vpop.f32.mrf.mxu1  ;;  %v14998_v61 = vpop.f32.mrf.mxu0 }
 0x948   : > { %v11673_v39 = vadd.f32 %v11488_v41, %v11117_v32 }
 0x949   : > { %v10935_v28 = vpop.f32.mrf.mxu1  ;;  %v11491_v17 = vpop.f32.mrf.mxu0 }
 0x94a   : > { %11727 = vst [vmem:[%s19295_s5 + $0xe0] sm:$0xff] %v11673_v39  ;;  %v11118_v60 = vadd.f32 %v10935_v28, %v19140_v15 }
 0x94b   : > { %v14875_v3 = vpop.f32.mrf.mxu1  ;;  %v14999_v46 = vpop.f32.mrf.mxu0 }
 0x94c   : > { %v11674_v12 = vadd.f32 %v11491_v17, %v11118_v60 }
 0x94d   : > { %v10940_v30 = vpop.f32.mrf.mxu1  ;;  %v11496_v22 = vpop.f32.mrf.mxu0 }
 0x94e   : > { %11728 = vst [vmem:[%s19295_s5 + $0xe8] sm:$0xff] %v11674_v12  ;;  %v11119_v2 = vadd.f32 %v10940_v30, %v19149_v49 }
 0x94f   : > { %v14878_v52 = vpop.f32.mrf.mxu1  ;;  %v15002_v14 = vpop.f32.mrf.mxu0 }
 0x950   : > { %v11675_v33 = vadd.f32 %v11496_v22, %v11119_v2 }
 0x951   : > { %v10943_v0 = vpop.f32.mrf.mxu1  ;;  %v11499_v53 = vpop.f32.mrf.mxu0 }
 0x952   : > { %11729 = vst [vmem:[%s19295_s5 + $0xf0] sm:$0xff] %v11675_v33  ;;  %v11120_v16 = vadd.f32 %v10943_v0, %v19152_v26 }
 0x953   : > { %v14879_v45 = vpop.f32.mrf.mxu1  ;;  %v15003_v15 = vpop.f32.mrf.mxu0 }
 0x954   : > { %v11676_v38 = vadd.f32 %v11499_v53, %v11120_v16 }
 0x955   : > { %v10948_v24 = vpop.f32.mrf.mxu1  ;;  %v11504_v10 = vpop.f32.mrf.mxu0 }
 0x956   : > { %11730 = vst [vmem:[%s19295_s5 + $0xf8] sm:$0xff] %v11676_v38  ;;  %v11121_v48 = vadd.f32 %v10948_v24, %v19161_v31 }
 0x957   : > { %v14882_v8 = vpop.f32.mrf.mxu1  ;;  %v15006_v49 = vpop.f32.mrf.mxu0 }
 0x958   : > { %v11677_v13 = vadd.f32 %v11504_v10, %v11121_v48  ;;  %v19812_v10 = vld [vmem:[#allocation16_spill] sm:$0xff] }
 0x959   : > { %v10951_v6 = vpop.f32.mrf.mxu1  ;;  %v11507_v57 = vpop.f32.mrf.mxu0 }
 0x95a   : > { %11731 = vst [vmem:[%s19295_s5 + $0x100] sm:$0xff] %v11677_v13  ;;  %v11122_v62 = vadd.f32 %v10951_v6, %v19164_v1 }
 0x95b   : > { %v14883_v5 = vpop.f32.mrf.mxu1  ;;  %v15007_v26 = vpop.f32.mrf.mxu0 }
 0x95c   : > { %v11678_v44 = vadd.f32 %v11507_v57, %v11122_v62  ;;  %v19813_v57 = vld [vmem:[#allocation17_spill] sm:$0xff] }
 0x95d   : > { %v10956_v34 = vpop.f32.mrf.mxu1  ;;  %v11512_v63 = vpop.f32.mrf.mxu0 }
 0x95e   : > { %11732 = vst [vmem:[%s19295_s5 + $0x108] sm:$0xff] %v11678_v44  ;;  %v11123_v20 = vadd.f32 %v10956_v34, %v19173_v55 }
 0x95f   : > { %v14886_v18 = vpop.f32.mrf.mxu1  ;;  %v15010_v31 = vpop.f32.mrf.mxu0 }
 0x960   : > { %v11679_v23 = vadd.f32 %v11512_v63, %v11123_v20  ;;  %v19814_v63 = vld [vmem:[#allocation15_spill] sm:$0xff] }
 0x961   : > { %v10959_v29 = vpop.f32.mrf.mxu1  ;;  %v11515_v25 = vpop.f32.mrf.mxu0 }
 0x962   : > { %11733 = vst [vmem:[%s19295_s5 + $0x110] sm:$0xff] %v11679_v23  ;;  %v11124_v35 = vadd.f32 %v10959_v29, %v19176_v50 }
 0x963   : > { %v14887_v47 = vpop.f32.mrf.mxu1  ;;  %v15011_v1 = vpop.f32.mrf.mxu0 }
 0x964   : > { %v11680_v40 = vadd.f32 %v11515_v25, %v11124_v35  ;;  %v19815_v35 = vld [vmem:[#allocation19_spill] sm:$0xff] }
 0x965   : > { %v10964_v43 = vpop.f32.mrf.mxu1  ;;  %v11520_v58 = vpop.f32.mrf.mxu0 }
 0x966   : > { %11734 = vst [vmem:[%s19295_s5 + $0x118] sm:$0xff] %v11680_v40  ;;  %v11125_v7 = vadd.f32 %v10964_v43, %v19185_v36 }
 0x967   : > { %v14890_v41 = vpop.f32.mrf.mxu1  ;;  %v15014_v55 = vpop.f32.mrf.mxu0 }
 0x968   : > { %v11681_v32 = vadd.f32 %v11520_v58, %v11125_v7  ;;  %v19816_v41 = vld [vmem:[#allocation20_spill] sm:$0xff] }
 0x969   : > { %v10967_v11 = vpop.f32.mrf.mxu1  ;;  %v11523_v61 = vpop.f32.mrf.mxu0 }
 0x96a   : > { %11735 = vst [vmem:[%s19295_s5 + $0x120] sm:$0xff] %v11681_v32  ;;  %v11126_v39 = vadd.f32 %v10967_v11, %v19188_v59 }
 0x96b   : > { %v14891_v28 = vpop.f32.mrf.mxu1  ;;  %v15015_v50 = vpop.f32.mrf.mxu0 }
 0x96c   : > { %v11682_v17 = vadd.f32 %v11523_v61, %v11126_v39 }
 0x96d   : > { %v10972_v60 = vpop.f32.mrf.mxu1  ;;  %v11528_v3 = vpop.f32.mrf.mxu0 }
 0x96e   : > { %11736 = vst [vmem:[%s19295_s5 + $0x128] sm:$0xff] %v11682_v17  ;;  %v11127_v46 = vadd.f32 %v10972_v60, %v19197_v19 }
 0x96f   : > { %v14894_v12 = vpop.f32.mrf.mxu1  ;;  %v15018_v36 = vpop.f32.mrf.mxu0 }
 0x970   : > { %v11683_v30 = vadd.f32 %v11528_v3, %v11127_v46  ;;  %v19817_v36 = vld [vmem:[#allocation23_spill] sm:$0xff] }
 0x971   : > { %v10975_v22 = vpop.f32.mrf.mxu1  ;;  %v11531_v2 = vpop.f32.mrf.mxu0 }
 0x972   : > { %11737 = vst [vmem:[%s19295_s5 + $0x130] sm:$0xff] %v11683_v30  ;;  %v11128_v52 = vadd.f32 %v10975_v22, %v19200_v42 }
 0x973   : > { %v14895_v14 = vpop.f32.mrf.mxu1  ;;  %v15019_v59 = vpop.f32.mrf.mxu0 }
 0x974   : > { %v11684_v33 = vadd.f32 %v11531_v2, %v11128_v52 }
 0x975   : > { %v10980_v0 = vpop.f32.mrf.mxu1  ;;  %v11536_v53 = vpop.f32.mrf.mxu0 }
 0x976   : > { %11738 = vst [vmem:[%s19295_s5 + $0x138] sm:$0xff] %v11684_v33  ;;  %v11129_v16 = vadd.f32 %v10980_v0, %v19209_v4 }
 0x977   : > { %v14898_v45 = vpop.f32.mrf.mxu1  ;;  %v15022_v19 = vpop.f32.mrf.mxu0 }
 0x978   : > { %v11685_v15 = vadd.f32 %v11536_v53, %v11129_v16 }
 0x979   : > { %v10983_v38 = vpop.f32.mrf.mxu1  ;;  %v11539_v24 = vpop.f32.mrf.mxu0 }
 0x97a   : > { %11739 = vst [vmem:[%s19295_s5 + $0x140] sm:$0xff] %v11685_v15  ;;  %v11130_v48 = vadd.f32 %v10983_v38, %v19812_v10 }
 0x97b   : > { %v14899_v8 = vpop.f32.mrf.mxu1  ;;  %v15023_v42 = vpop.f32.mrf.mxu0 }
 0x97c   : > { %v11686_v49 = vadd.f32 %v11539_v24, %v11130_v48 }
 0x97d   : > { %v10988_v13 = vpop.f32.mrf.mxu1  ;;  %v11544_v6 = vpop.f32.mrf.mxu0 }
 0x97e   : > { %11740 = vst [vmem:[%s19295_s5 + $0x148] sm:$0xff] %v11686_v49  ;;  %v11131_v62 = vadd.f32 %v10988_v13, %v19813_v57 }
 0x97f   : > { %v14902_v5 = vpop.f32.mrf.mxu1  ;;  %v15026_v4 = vpop.f32.mrf.mxu0 }
 0x980   : > { %v11687_v26 = vadd.f32 %v11544_v6, %v11131_v62 }
 0x981   : > { %v10991_v44 = vpop.f32.mrf.mxu1  ;;  %v11547_v34 = vpop.f32.mrf.mxu0 }
 0x982   : > { %11741 = vst [vmem:[%s19295_s5 + $0x150] sm:$0xff] %v11687_v26  ;;  %v11132_v20 = vadd.f32 %v10991_v44, %v19814_v63 }
 0x983   : > { %v14903_v18 = vpop.f32.mrf.mxu1  ;;  %v15027_v31 = vpop.f32.mrf.mxu0 }
 0x984   : > { %v11688_v23 = vadd.f32 %v11547_v34, %v11132_v20 }
 0x985   : > { %v10996_v29 = vpop.f32.mrf.mxu1  ;;  %v11552_v25 = vpop.f32.mrf.mxu0 }
 0x986   : > { %11742 = vst [vmem:[%s19295_s5 + $0x158] sm:$0xff] %v11688_v23  ;;  %v11133_v47 = vadd.f32 %v10996_v29, %v19815_v35 }
 0x987   : > { %v14906_v1 = vpop.f32.mrf.mxu1  ;;  %v15030_v40 = vpop.f32.mrf.mxu0 }
 0x988   : > { %v11689_v43 = vadd.f32 %v11552_v25, %v11133_v47 }
 0x989   : > { %v10999_v58 = vpop.f32.mrf.mxu1  ;;  %v11555_v7 = vpop.f32.mrf.mxu0 }
 0x98a   : > { %11743 = vst [vmem:[%s19295_s5 + $0x160] sm:$0xff] %v11689_v43  ;;  %v11134_v55 = vadd.f32 %v10999_v58, %v19816_v41 }
 0x98b   : > { %v14907_v32 = vpop.f32.mrf.mxu1  ;;  %v15031_v11 = vpop.f32.mrf.mxu0 }
 0x98c   : > { %v11690_v61 = vadd.f32 %v11555_v7, %v11134_v55 }
 0x98d   : > { %v11004_v39 = vpop.f32.mrf.mxu1  ;;  %v11560_v28 = vpop.f32.mrf.mxu0 }
 0x98e   : > { %11744 = vst [vmem:[%s19295_s5 + $0x168] sm:$0xff] %v11690_v61  ;;  %v11135_v50 = vadd.f32 %v11004_v39, %v19245_v56 }
 0x98f   : > { %v14910_v17 = vpop.f32.mrf.mxu1  ;;  %v15034_v60 = vpop.f32.mrf.mxu0 }
 0x990   : > { %v11691_v3 = vadd.f32 %v11560_v28, %v11135_v50 }
 0x991   : > { %v11007_v46 = vpop.f32.mrf.mxu1  ;;  %v11563_v12 = vpop.f32.mrf.mxu0 }
 0x992   : > { %11745 = vst [vmem:[%s19295_s5 + $0x170] sm:$0xff] %v11691_v3  ;;  %v11136_v30 = vadd.f32 %v11007_v46, %v19817_v36 }
 0x993   : > { %v14911_v22 = vpop.f32.mrf.mxu1  ;;  %v15035_v2 = vpop.f32.mrf.mxu0 }
 0x994   : > { %v11692_v52 = vadd.f32 %v11563_v12, %v11136_v30 }
 0x995   : > { %v11012_v14 = vpop.f32.mrf.mxu1  ;;  %v11568_v59 = vpop.f32.mrf.mxu0 }
 0x996   : > { %11746 = vst [vmem:[%s19295_s5 + $0x178] sm:$0xff] %v11692_v52  ;;  %v11137_v33 = vadd.f32 %v11012_v14, %v19257_v9 }
 0x997   : > { %v14914_v0 = vpop.f32.mrf.mxu1  ;;  %v15038_v56 = vpop.f32.mrf.mxu0 }
 0x998   : > { %v11693_v53 = vadd.f32 %v11568_v59, %v11137_v33 }
 0x999   : > { %v11015_v16 = vpop.f32.mrf.mxu1  ;;  %v11571_v45 = vpop.f32.mrf.mxu0 }
 0x99a   : > { %11747 = vst [vmem:[%s19295_s5 + $0x180] sm:$0xff] %v11693_v53  ;;  %v11138_v19 = vadd.f32 %v11015_v16, %v19260_v51 }
 0x99b   : > { %v14915_v15 = vpop.f32.mrf.mxu1  ;;  %v15039_v38 = vpop.f32.mrf.mxu0 }
 0x99c   : > { %v11694_v24 = vadd.f32 %v11571_v45, %v11138_v19 }
 0x99d   : > { %v11020_v10 = vpop.f32.mrf.mxu1  ;;  %v11576_v48 = vpop.f32.mrf.mxu0 }
 0x99e   : > { %11748 = vst [vmem:[%s19295_s5 + $0x188] sm:$0xff] %v11694_v24  ;;  %v11139_v8 = vadd.f32 %v11020_v10, %v19269_v21 }
 0x99f   : > { %v14918_v42 = vpop.f32.mrf.mxu1  ;;  %v15042_v9 = vpop.f32.mrf.mxu0 }
 0x9a0   : > { %v11695_v49 = vadd.f32 %v11576_v48, %v11139_v8 }
 0x9a1   : > { %v11023_v13 = vpop.f32.mrf.mxu1  ;;  %v11579_v6 = vpop.f32.mrf.mxu0 }
 0x9a2   : > { %11749 = vst [vmem:[%s19295_s5 + $0x190] sm:$0xff] %v11695_v49  ;;  %v11140_v51 = vadd.f32 %v11023_v13, %v19272_v54 }
 0x9a3   : > { %v14919_v57 = vpop.f32.mrf.mxu1  ;;  %v15043_v62 = vpop.f32.mrf.mxu0 }
 0x9a4   : > { %v11696_v5 = vadd.f32 %v11579_v6, %v11140_v51 }
 0x9a5   : > { %v11028_v4 = vpop.f32.mrf.mxu1  ;;  %v11584_v26 = vpop.f32.mrf.mxu0 }
 0x9a6   : > { %11750 = vst [vmem:[%s19295_s5 + $0x198] sm:$0xff] %v11696_v5  ;;  %v11141_v21 = vadd.f32 %v11028_v4, %v19281_v27 }
 0x9a7   : > { %v14922_v44 = vpop.f32.mrf.mxu1  ;;  %v15046_v34 = vpop.f32.mrf.mxu0 }
 0x9a8   : > { %v11697_v63 = vadd.f32 %v11584_v26, %v11141_v21 }
 0x9a9   : > { %v11031_v20 = vpop.f32.mrf.mxu1  ;;  %v11587_v18 = vpop.f32.mrf.mxu0 }
 0x9aa   : > { %11751 = vst [vmem:[%s19295_s5 + $0x1a0] sm:$0xff] %v11697_v63  ;;  %v11142_v54 = vadd.f32 %v11031_v20, %v19284_v37 }
 0x9ab   : > { %v14923_v31 = vpop.f32.mrf.mxu1  ;;  %v15047_v23 = vpop.f32.mrf.mxu0 }
 0x9ac   : > { %v11698_v27 = vadd.f32 %v11587_v18, %v11142_v54 }
 0x9ae   : > { %11752 = vst [vmem:[%s19295_s5 + $0x1a8] sm:$0xff] %v11698_v27 }
 0x9af   : > { %15407 = shalt.err (!%p15404_p9)
}
 0x9b0   : > { %s15408_s19 = scalar_lea.hbm %s19414_s28, 6912  ;;  %s15412_s14 = scalar_lea.hbm %s19469_s9, 13824 }
 0x9b1   : > { %p15409_p13 = scmp.ne.s32.totalorder %s19414_s28, %s15408_s19  ;;  %p15413_p4 = scmp.lt.s32.totalorder %s19414_s28, %s19469_s9 }
 0x9b2   : > { %p15414_p8 = scmp.lt.s32.totalorder %s15412_s14, %s15408_s19 }
 0x9b3   : > { %p15410_p5 = pnand %p15409_p13, %p19818_p10 }
 0x9b4   : > { %p15415_p3 = por %p15414_p8, %p15413_p4 }
 0x9b5   : > { %p15411_p0 = pneg %p15410_p5 }
 0x9b7   : > { %p15416_p11 = pnand %p15415_p3, %p15411_p0 }
 0x9b9   : > { %15419 = shalt.err (!%p15416_p11)
}
 0x9ba   : > { %s15475_s2 = smov 128   ;;  %s15476_s23 = smov 8  }
 0x9bb   : > { %15078 = dma.vmem_to_hbm [thread:$0]  (%p19818_p10), %s19416_s26, 6912, %s19414_s28, %s11754_s13, %s15475_s2, %s15475_s2, %s15476_s23  }
 0x9bc PF: > { %s11782_s15 = sand.u32 1, %s15450_s30   ;;  %p19819_p1 = scmp.ne.s32.totalorder %s19531_s16, 0 }
 0x9bd   : > { %p19820_p2 = scmp.ge.s32.totalorder %s15462_s12, 2  ;;  %s11783_s17 = scalar_lea.sflag [#allocation6], %s11782_s15 }
 0x9bf   : > { %p15092_p6 = pnand %p19820_p2, %p19819_p1 }
 0x9c1   : > { %p15093_p12 = pneg %p15092_p6 }
 0x9c3   : > { %15445 = dma.done.wait (%p15093_p12), %s11783_s17, 6912  }
 0x9c4   : > { %15447 = vsyncadd (%p15093_p12), %s11783_s17, 4294960384  ;;  %s19821_s24 = sld [smem:[#allocation14_spill]]  ;;  %p23_p7 = scmp.ge.s32.totalorder %s15599_s18, 4  }
 0x9c5   : > { %s19822_s30 = smov %s15454_s10  ;;  %s19823_s10 = smov %s15458_s11 }
 0x9c6   : > { %s19825_s12 = smov %s15599_s18  ;;  %25 = sbr.rel (!%p23_p7) target bundleno = 9 (0x9), region = 125 }
 0x9ca   : > { %s19824_s11 = smov %s19821_s24 }
 0x9cb   :  { %11788 = vsyncpa [#allocation5], 1 }
 0x9cc   :  { %11790 = vsyncpa [#allocation5 + $0x1], 1 }
 0x9cd   :  { %11791 = vsyncpa [#allocation8], 1 }
 0x9ce   :  { %11792 = vsyncpa [#allocation6], 1 }
 0x9cf   :  { %11794 = vsyncpa [#allocation6 + $0x1], 1 }

</bundles_post_ra>
